<compile_context>
chip_gen: v6e
topology: v6e:2x2x1
jax: 0.10.0
libtpu: 0.0.40
codegen_flags: <defaults>
</compile_context>

<pallas_src>
import math

import jax
import jax.numpy as jnp
from jax import lax
from jax.experimental import pallas as pl
from jax.experimental.pallas import tpu as pltpu


def conv2d_size_out(size, kernel_size, stride):
    return (size - (kernel_size - 1) - 1) // stride + 1


# ---------------------------------------------------------------------------
# Fused Pallas kernel: dense conv2 + dense conv3 + linear head + softmax,
# processing Bblk images per grid step.
# ---------------------------------------------------------------------------
def _reinforce_block_kernel(a1_ref, w2_ref, b2_ref, w3_ref, b3_ref,
                            wh_ref, bh_ref, out_ref):
    f32 = jnp.float32
    bf16 = jnp.bfloat16

    # conv2 as a dense matmul on the (r1, c1)-flattened conv1 activation.
    z2 = jnp.dot(a1_ref[...], w2_ref[...], preferred_element_type=f32)
    a2 = jnp.maximum(z2 + b2_ref[...], 0.0).astype(bf16)          # [Bblk, 1152]

    # conv3 as a dense matmul on the (r2, c2)-flattened activation.
    z3 = jnp.dot(a2, w3_ref[...], preferred_element_type=f32)
    a3 = jnp.maximum(z3 + b3_ref[...], 0.0).astype(bf16)          # [Bblk, 128]

    # Linear head: single dot (weight pre-permuted to the kernel flatten order).
    logits = jnp.dot(a3, wh_ref[...], preferred_element_type=f32) + bh_ref[...]

    # Softmax over actions (PyTorch F.softmax default dim=1); exact divide.
    m = jnp.max(logits, axis=-1, keepdims=True)
    e = jnp.exp(logits - m)
    s = jnp.sum(e, axis=-1, keepdims=True)
    out_ref[...] = (e / s).astype(out_ref.dtype)


# ---------------------------------------------------------------------------
# Pack-time construction of the dense conv matrices and permuted head weight.
# ---------------------------------------------------------------------------
def _gather_mats(h_in, w_in, k, stride):
    """One-hot spatial gather per tap: [k*k, h_out*w_out, h_in*w_in] (f32)."""
    h_out = conv2d_size_out(h_in, k, stride)
    w_out = conv2d_size_out(w_in, k, stride)
    ohh, oww = jnp.meshgrid(jnp.arange(h_out), jnp.arange(w_out), indexing="ij")
    cols = jnp.arange(h_in * w_in)[None, :]
    mats = []
    for ki in range(k):
        for kj in range(k):
            rows = ((stride * ohh + ki) * w_in + (stride * oww + kj)).reshape(-1)
            mats.append((rows[:, None] == cols).astype(jnp.float32))
    return jnp.stack(mats, axis=0)


def _dense_conv_matrix(conv_w, h_in, w_in, stride):
    """OIHW conv weight -> dense [h_in*w_in*Cin, h_out*w_out*Cout] matrix on
    (spatial-major, channel-minor) flattened activations."""
    cout, cin, k, _ = conv_w.shape
    g = _gather_mats(h_in, w_in, k, stride)                       # [k*k, n_out, n_in]
    w_taps = jnp.transpose(conv_w, (2, 3, 1, 0)).reshape(k * k, cin, cout)
    # dense[(r_in, c_in), (r_out, c_out)] = sum_t g[t, r_out, r_in] * w_taps[t, c_in, c_out]
    dense = jnp.einsum("tik,tlj->klij", g, w_taps)                # [n_in, cin, n_out, cout]
    n_out, n_in = g.shape[1], g.shape[2]
    return dense.reshape(n_in * cin, n_out * cout)


def pack_params(params, h, w):
    bf16, f32 = jnp.bfloat16, jnp.float32

    oh1, ow1 = conv2d_size_out(h, 8, 4), conv2d_size_out(w, 8, 4)
    oh2, ow2 = conv2d_size_out(oh1, 4, 2), conv2d_size_out(ow1, 4, 2)
    oh3, ow3 = conv2d_size_out(oh2, 4, 2), conv2d_size_out(ow2, 4, 2)

    c1o = params["conv1_w"].shape[0]
    c2o = params["conv2_w"].shape[0]
    c3o = params["conv3_w"].shape[0]
    out_size = params["head_w"].shape[0]

    k2_raw = oh1 * ow1 * c1o                       # 3600
    k2 = ((k2_raw + 127) // 128) * 128             # 128-aligned K -> 3712
    n2 = oh2 * ow2 * c2o                           # 1152 (9 x 128)
    n3 = oh3 * ow3 * c3o                           # 128
    assert params["head_w"].shape == (out_size, n3), "head flatten order changed"

    # conv1 stays in XLA glue: HWIO bf16 weight for lax.conv.
    w1 = jnp.transpose(params["conv1_w"], (2, 3, 1, 0)).astype(bf16)
    b1 = params["conv1_b"].astype(f32)

    # Dense conv2, rows padded 3600 -> 3712 with zeros (padded activation cols
    # therefore contribute nothing regardless of their value).
    w2d = _dense_conv_matrix(params["conv2_w"], oh1, ow1, 2)
    w2d = jnp.pad(w2d, ((0, k2 - k2_raw), (0, 0))).astype(bf16)    # [3712, 1152]
    b2 = jnp.tile(params["conv2_b"], oh2 * ow2).reshape(1, n2).astype(f32)

    # Dense conv3.
    w3d = _dense_conv_matrix(params["conv3_w"], oh2, ow2, 2).astype(bf16)  # [1152, 128]
    b3 = jnp.tile(params["conv3_b"], oh3 * ow3).reshape(1, n3).astype(f32)

    # Head: PyTorch flattens conv3 output in (c, oh, ow) order; kernel rows are
    # (r3 = oh*OW3 + ow, c3). Permute to [r3*C3 + c3, out].
    wh = params["head_w"].reshape(out_size, c3o, oh3 * ow3)
    wh = jnp.transpose(wh, (2, 1, 0)).reshape(n3, out_size).astype(bf16)
    bh = params["head_b"].reshape(1, out_size).astype(f32)

    return {"w1": w1, "b1": b1, "w2d": w2d, "b2": b2,
            "w3d": w3d, "b3": b3, "wh": wh, "bh": bh}


# ---------------------------------------------------------------------------
# Forward wrapper
# ---------------------------------------------------------------------------
def _choose_batch_block(b):
    if b <= 8:
        return b
    half = (b + 1) // 2
    return min(64, ((half + 7) // 8) * 8)     # multiple of 8, >=2 grid steps, cap 64


@jax.jit
def reinforce_forward(packed, x_nchw):
    f32, bf16 = jnp.float32, jnp.bfloat16
    b = x_nchw.shape[0]
    out_size = packed["bh"].shape[-1]
    k2 = packed["w2d"].shape[0]

    # --- conv1 + bias + ReLU in XLA glue (dense form ~88 MB: too big for VMEM).
    # TODO(synk): move the 8x8/stride-4 patch extraction + matmul into the kernel.
    x = jnp.transpose(x_nchw, (0, 2, 3, 1)).astype(bf16)              # NHWC bf16
    a1 = lax.conv_general_dilated(
        x, packed["w1"], window_strides=(4, 4), padding="VALID",
        dimension_numbers=("NHWC", "HWIO", "NHWC"),
        preferred_element_type=f32)
    a1 = jnp.maximum(a1 + packed["b1"], 0.0)                          # [B, 15, 15, 16]
    a1 = a1.reshape(b, -1)                                            # (r1, c1) flatten
    a1 = jnp.pad(a1, ((0, 0), (0, k2 - a1.shape[1]))).astype(bf16)    # pad K to 3712

    # --- batch blocking for the fused kernel ---
    bblk = _choose_batch_block(b)
    bpad = pl.cdiv(b, bblk) * bblk
    if bpad != b:
        a1 = jnp.pad(a1, ((0, bpad - b), (0, 0)))
    grid = (bpad // bblk,)

    def _resident(arr):
        nd = arr.ndim
        return pl.BlockSpec(arr.shape, lambda i: (0,) * nd)           # loaded once

    args = (a1, packed["w2d"], packed["b2"], packed["w3d"], packed["b3"],
            packed["wh"], packed["bh"])
    in_specs = [pl.BlockSpec((bblk, k2), lambda i: (i, 0))]
    in_specs += [_resident(arr) for arr in args[1:]]

    out = pl.pallas_call(
        _reinforce_block_kernel,
        out_shape=jax.ShapeDtypeStruct((bpad, out_size), f32),
        grid_spec=pltpu.PrefetchScalarGridSpec(
            num_scalar_prefetch=0,
            grid=grid,
            in_specs=in_specs,
            out_specs=pl.BlockSpec((bblk, out_size), lambda i: (i, 0)),
        ),
        compiler_params=pltpu.CompilerParams(
            dimension_semantics=("parallel",),          # 2x on v7x dual TensorCore
            vmem_limit_bytes=32 * 1024 * 1024),         # > v5e's 16 MiB default
    )(*args)
    return out[:b]


# ---------------------------------------------------------------------------
# Pure-JAX reference (mirrors the PyTorch module exactly, f32)
# ---------------------------------------------------------------------------
def reference_forward(params, x):
    dn = ("NCHW", "OIHW", "NCHW")
    y = lax.conv_general_dilated(x, params["conv1_w"], (4, 4), "VALID",
                                 dimension_numbers=dn)
    y = jax.nn.relu(y + params["conv1_b"][None, :, None, None])
    y = lax.conv_general_dilated(y, params["conv2_w"], (2, 2), "VALID",
                                 dimension_numbers=dn)
    y = jax.nn.relu(y + params["conv2_b"][None, :, None, None])
    y = lax.conv_general_dilated(y, params["conv3_w"], (2, 2), "VALID",
                                 dimension_numbers=dn)
    y = jax.nn.relu(y + params["conv3_b"][None, :, None, None])
    y = y.reshape(y.shape[0], -1)                      # PyTorch (c, h, w) flatten
    logits = y @ params["head_w"].T + params["head_b"]
    return jax.nn.softmax(logits, axis=-1)


# ---------------------------------------------------------------------------
# Parameter init (PyTorch-like uniform(-1/sqrt(fan_in), 1/sqrt(fan_in)))
# ---------------------------------------------------------------------------
def init_params(key, h, w, output_size):
    keys = jax.random.split(key, 8)

    def uconv(k, shape):
        fan_in = shape[1] * shape[2] * shape[3]
        bound = 1.0 / math.sqrt(fan_in)
        return jax.random.uniform(k, shape, jnp.float32, -bound, bound)

    def ubias(k, shape, fan_in):
        bound = 1.0 / math.sqrt(fan_in)
        return jax.random.uniform(k, shape, jnp.float32, -bound, bound)

    convw = conv2d_size_out(conv2d_size_out(conv2d_size_out(w, 8, 4), 4, 2), 4, 2)
    convh = conv2d_size_out(conv2d_size_out(conv2d_size_out(h, 8, 4), 4, 2), 4, 2)
    linear_input_size = convw * convh * 32

    return {
        "conv1_w": uconv(keys[0], (16, 3, 8, 8)),
        "conv1_b": ubias(keys[1], (16,), 3 * 8 * 8),
        "conv2_w": uconv(keys[2], (32, 16, 4, 4)),
        "conv2_b": ubias(keys[3], (32,), 16 * 4 * 4),
        "conv3_w": uconv(keys[4], (32, 32, 4, 4)),
        "conv3_b": ubias(keys[5], (32,), 32 * 4 * 4),
        "head_w": jax.random.uniform(
            keys[6], (output_size, linear_input_size), jnp.float32,
            -1.0 / math.sqrt(linear_input_size), 1.0 / math.sqrt(linear_input_size)),
        "head_b": ubias(keys[7], (output_size,), linear_input_size),
    }


if __name__ == "__main__":
    H = W = 64
    OUTPUT_SIZE = 4
    BATCH = 2

    key = jax.random.PRNGKey(0)
    key_params, key_x = jax.random.split(key)

    params = init_params(key_params, H, W, OUTPUT_SIZE)
    packed = pack_params(params, H, W)

    x = jax.random.normal(key_x, (BATCH, 3, H, W), dtype=jnp.float32)
    probs = jax.block_until_ready(reinforce_forward(packed, x))

    assert probs.shape == (BATCH, OUTPUT_SIZE)
    assert bool(jnp.all(jnp.isfinite(probs)))
    assert bool(jnp.all(probs >= 0.0))
    assert bool(jnp.allclose(jnp.sum(probs, axis=-1), 1.0, atol=1e-5))

    # Compare against the exact (f32) reference; bf16 weights/activations in the
    # kernel keep the near-uniform probabilities within a few 1e-3.
    ref = jax.block_until_ready(reference_forward(params, x))
    max_diff = float(jnp.max(jnp.abs(probs - ref)))
    assert max_diff < 5e-2, f"max |probs - ref| = {max_diff}"

    # Exercise the multi-step, padded-batch grid path as well.
    x_big = jax.random.normal(jax.random.PRNGKey(1), (81, 3, H, W), dtype=jnp.float32)
    probs_big = jax.block_until_ready(reinforce_forward(packed, x_big))
    assert probs_big.shape == (81, OUTPUT_SIZE)
    assert bool(jnp.allclose(jnp.sum(probs_big, axis=-1), 1.0, atol=1e-5))

    print("KERNEL_OK")
</pallas_src>

<mosaic_0001>
module attributes {stable_mosaic.version = 11 : i64} {
  func.func @_reinforce_block_kernel(%arg0: i32, %arg1: memref<2x3712xbf16, #tpu.memory_space<vmem>>, %arg2: memref<3712x1152xbf16, #tpu.memory_space<vmem>>, %arg3: memref<1x1152xf32, #tpu.memory_space<vmem>>, %arg4: memref<1152x128xbf16, #tpu.memory_space<vmem>>, %arg5: memref<1x128xf32, #tpu.memory_space<vmem>>, %arg6: memref<128x4xbf16, #tpu.memory_space<vmem>>, %arg7: memref<1x4xf32, #tpu.memory_space<vmem>>, %arg8: memref<2x4xf32, #tpu.memory_space<vmem>>) attributes {dimension_semantics = [#tpu.dimension_semantics<parallel>], iteration_bounds = array<i64: 1>, scalar_prefetch = 0 : i64, scratch_operands = 0 : i64, tpu.core_type = #tpu.core_type<tc>, window_params = [{transform_indices = @transform_0, window_bounds = array<i64: 2, 3712>}, {pipeline_mode = #tpu.pipeline_mode<synchronous>, transform_indices = @transform_1, window_bounds = array<i64: 3712, 1152>}, {pipeline_mode = #tpu.pipeline_mode<synchronous>, transform_indices = @transform_2, window_bounds = array<i64: 1, 1152>}, {pipeline_mode = #tpu.pipeline_mode<synchronous>, transform_indices = @transform_3, window_bounds = array<i64: 1152, 128>}, {pipeline_mode = #tpu.pipeline_mode<synchronous>, transform_indices = @transform_4, window_bounds = array<i64: 1, 128>}, {pipeline_mode = #tpu.pipeline_mode<synchronous>, transform_indices = @transform_5, window_bounds = array<i64: 128, 4>}, {pipeline_mode = #tpu.pipeline_mode<synchronous>, transform_indices = @transform_6, window_bounds = array<i64: 1, 4>}, {transform_indices = @transform_7, window_bounds = array<i64: 2, 4>}]} {
    %c0 = arith.constant 0 : index
    %c0_0 = arith.constant 0 : index
    %0 = vector.load %arg1[%c0, %c0_0] : memref<2x3712xbf16, #tpu.memory_space<vmem>>, vector<2x3712xbf16>
    %c0_1 = arith.constant 0 : index
    %c0_2 = arith.constant 0 : index
    %1 = vector.load %arg2[%c0_1, %c0_2] : memref<3712x1152xbf16, #tpu.memory_space<vmem>>, vector<3712x1152xbf16>
    %cst = arith.constant dense<0.000000e+00> : vector<2x1152xf32>
    %2 = tpu.matmul %0, %1, %cst {dimension_numbers = #tpu.dot_dimension_numbers<[1], [0], [0], [1], [0, 0, 1, 1], [], []>} : vector<2x3712xbf16>, vector<3712x1152xbf16>, vector<2x1152xf32> -> vector<2x1152xf32>
    %c0_3 = arith.constant 0 : index
    %c0_4 = arith.constant 0 : index
    %3 = vector.load %arg3[%c0_3, %c0_4] : memref<1x1152xf32, #tpu.memory_space<vmem>>, vector<1x1152xf32>
    %4 = vector.broadcast %3 : vector<1x1152xf32> to vector<2x1152xf32>
    %5 = arith.addf %2, %4 : vector<2x1152xf32>
    %cst_5 = arith.constant 0.000000e+00 : f32
    %6 = vector.broadcast %cst_5 : f32 to vector<2x1152xf32>
    %7 = arith.maximumf %5, %6 : vector<2x1152xf32>
    %8 = arith.truncf %7 : vector<2x1152xf32> to vector<2x1152xbf16>
    %c0_6 = arith.constant 0 : index
    %c0_7 = arith.constant 0 : index
    %9 = vector.load %arg4[%c0_6, %c0_7] : memref<1152x128xbf16, #tpu.memory_space<vmem>>, vector<1152x128xbf16>
    %cst_8 = arith.constant dense<0.000000e+00> : vector<2x128xf32>
    %10 = tpu.matmul %8, %9, %cst_8 {dimension_numbers = #tpu.dot_dimension_numbers<[1], [0], [0], [1], [0, 0, 1, 1], [], []>} : vector<2x1152xbf16>, vector<1152x128xbf16>, vector<2x128xf32> -> vector<2x128xf32>
    %c0_9 = arith.constant 0 : index
    %c0_10 = arith.constant 0 : index
    %11 = vector.load %arg5[%c0_9, %c0_10] : memref<1x128xf32, #tpu.memory_space<vmem>>, vector<1x128xf32>
    %12 = vector.broadcast %11 : vector<1x128xf32> to vector<2x128xf32>
    %13 = arith.addf %10, %12 : vector<2x128xf32>
    %cst_11 = arith.constant 0.000000e+00 : f32
    %14 = vector.broadcast %cst_11 : f32 to vector<2x128xf32>
    %15 = arith.maximumf %13, %14 : vector<2x128xf32>
    %16 = arith.truncf %15 : vector<2x128xf32> to vector<2x128xbf16>
    %c0_12 = arith.constant 0 : index
    %c0_13 = arith.constant 0 : index
    %17 = vector.load %arg6[%c0_12, %c0_13] : memref<128x4xbf16, #tpu.memory_space<vmem>>, vector<128x4xbf16>
    %cst_14 = arith.constant dense<0.000000e+00> : vector<2x4xf32>
    %18 = tpu.matmul %16, %17, %cst_14 {dimension_numbers = #tpu.dot_dimension_numbers<[1], [0], [0], [1], [0, 0, 1, 1], [], []>} : vector<2x128xbf16>, vector<128x4xbf16>, vector<2x4xf32> -> vector<2x4xf32>
    %c0_15 = arith.constant 0 : index
    %c0_16 = arith.constant 0 : index
    %19 = vector.load %arg7[%c0_15, %c0_16] : memref<1x4xf32, #tpu.memory_space<vmem>>, vector<1x4xf32>
    %20 = vector.broadcast %19 : vector<1x4xf32> to vector<2x4xf32>
    %21 = arith.addf %18, %20 : vector<2x4xf32>
    %cst_17 = arith.constant dense<0xFF800000> : vector<2xf32>
    %22 = vector.multi_reduction <maximumf>, %21, %cst_17 [1] : vector<2x4xf32> to vector<2xf32>
    %23 = vector.shape_cast %22 : vector<2xf32> to vector<2x1xf32>
    %24 = vector.broadcast %23 : vector<2x1xf32> to vector<2x4xf32>
    %25 = arith.subf %21, %24 : vector<2x4xf32>
    %26 = math.exp %25 : vector<2x4xf32>
    %cst_18 = arith.constant dense<0.000000e+00> : vector<2xf32>
    %27 = vector.multi_reduction <add>, %26, %cst_18 [1] : vector<2x4xf32> to vector<2xf32>
    %28 = vector.shape_cast %27 : vector<2xf32> to vector<2x1xf32>
    %29 = vector.broadcast %28 : vector<2x1xf32> to vector<2x4xf32>
    %30 = arith.divf %26, %29 : vector<2x4xf32>
    %c0_19 = arith.constant 0 : index
    %c0_20 = arith.constant 0 : index
    %31 = vector.load %arg8[%c0_19, %c0_20] : memref<2x4xf32, #tpu.memory_space<vmem>>, vector<2x4xf32>
    tpu.vector_store %arg8[%c0_19, %c0_20], %30 {strides = array<i32>} : memref<2x4xf32, #tpu.memory_space<vmem>>, vector<2x4xf32>,
    return
  }
  func.func @transform_0(%arg0: i32) -> (i32, i32) {
    %c0_i32 = arith.constant 0 : i32
    %c0_i32_0 = arith.constant 0 : i32
    return %arg0, %c0_i32 : i32, i32
  }
  func.func @transform_1(%arg0: i32) -> (i32, i32) {
    %c0_i32 = arith.constant 0 : i32
    %c0_i32_0 = arith.constant 0 : i32
    %c0_i32_1 = arith.constant 0 : i32
    return %c0_i32, %c0_i32_0 : i32, i32
  }
  func.func @transform_2(%arg0: i32) -> (i32, i32) {
    %c0_i32 = arith.constant 0 : i32
    %c0_i32_0 = arith.constant 0 : i32
    %c0_i32_1 = arith.constant 0 : i32
    return %c0_i32, %c0_i32_0 : i32, i32
  }
  func.func @transform_3(%arg0: i32) -> (i32, i32) {
    %c0_i32 = arith.constant 0 : i32
    %c0_i32_0 = arith.constant 0 : i32
    %c0_i32_1 = arith.constant 0 : i32
    return %c0_i32, %c0_i32_0 : i32, i32
  }
  func.func @transform_4(%arg0: i32) -> (i32, i32) {
    %c0_i32 = arith.constant 0 : i32
    %c0_i32_0 = arith.constant 0 : i32
    %c0_i32_1 = arith.constant 0 : i32
    return %c0_i32, %c0_i32_0 : i32, i32
  }
  func.func @transform_5(%arg0: i32) -> (i32, i32) {
    %c0_i32 = arith.constant 0 : i32
    %c0_i32_0 = arith.constant 0 : i32
    %c0_i32_1 = arith.constant 0 : i32
    return %c0_i32, %c0_i32_0 : i32, i32
  }
  func.func @transform_6(%arg0: i32) -> (i32, i32) {
    %c0_i32 = arith.constant 0 : i32
    %c0_i32_0 = arith.constant 0 : i32
    %c0_i32_1 = arith.constant 0 : i32
    return %c0_i32, %c0_i32_0 : i32, i32
  }
  func.func @transform_7(%arg0: i32) -> (i32, i32) {
    %c0_i32 = arith.constant 0 : i32
    %c0_i32_0 = arith.constant 0 : i32
    return %arg0, %c0_i32 : i32, i32
  }
}

</mosaic_0001>

<bundles_post_ra>
// kernel: reinforce_forward.1
= control target key start
LH: loop header
LB: loop body
LE: loop exit
PB: predicated region body
PF: predicated region fallthrough
CT: control target
= control target key end

     0   :  { %12 = vsyncpa [#allocation3], 0  ;;  %s24067_s0 = inlined_call_operand.vmem [shape: bf16[2,3712], index: 0, kind: input, shape index: {}]   ;;  %s24068_s1 = inlined_call_operand.hbm [shape: bf16[3712,1152], index: 1, kind: input, shape index: {}]   ;;  %s24069_s2 = inlined_call_operand.vmem [shape: f32[1,1152], index: 2, kind: input, shape index: {}]   ;;  %s24070_s3 = inlined_call_operand.vmem [shape: bf16[1152,128], index: 3, kind: input, shape index: {}]   ;;  %s24071_s4 = inlined_call_operand.vmem [shape: f32[1,128], index: 4, kind: input, shape index: {}]   ;;  %s24072_s5 = inlined_call_operand.vmem [shape: bf16[128,4], index: 5, kind: input, shape index: {}]   ;;  %s24073_s6 = inlined_call_operand.vmem [shape: f32[1,4], index: 6, kind: input, shape index: {}]   ;;  %s24074_s7 = inlined_call_operand.hbm [shape: f32[2,4], index: 7, kind: output, shape index: {}]  }
   0x1   :  { %13 = vsyncpa [#allocation4], 0  ;;  %s23121_s24 = smov [#allocation2]  }
   0x2   :  { %s21_s25 = sshll.u32 %s23121_s24, 4  ;;  %s22_s25 = int_to_ptr.vmem [resolvable:$true] %s21_s25 }
   0x3   :  { %s23085_s26 = scalar_lea.vmem %s22_s25, 267264  ;;  %p23090_p1 = scmp.lt.s32.totalorder %s22_s25, %s22_s25 }
   0x4   :  { %p23086_p0 = scmp.ne.s32.totalorder %s22_s25, %s23085_s26  ;;  %p23091_p2 = scmp.lt.s32.totalorder %s23085_s26, %s23085_s26 }
   0x6   :  { %p23092_p3 = por %p23091_p2, %p23090_p1 }
   0x8   :  { %p23093_p4 = pnand %p23092_p3, %p23086_p0 }
   0xa   :  { %23096 = shalt.err (!%p23093_p4)
}
   0xb   :  { %s23122_s27 = smov 576   ;;  %s23123_s28 = smov 36  }
   0xc   :  { %27 = dma.hbm_to_vmem [thread:$0]  %s24068_s1, 267264, %s22_s25, [#allocation3], %s23122_s27, %s23122_s27, %s23123_s28  }
   0xd   :  { %23117 = dma.done.wait [#allocation3], 267264  }
   0xe   :  { %23118 = vsyncadd [#allocation3], 4294700032  ;;  %v19970_v0 = vld [vmem:[#allocation2 + $0x1fc] ss:$36 sps:$4 sm:$0xff]   ;;  %v19976_v4 = vld [vmem:[#allocation2 + $0x1b4] ss:$36 sps:$4 sm:$0xff]   ;;  %v2370_v36 = vlaneseq }
   0xf   :  { %v19972_v1 = vld [vmem:[#allocation2 + $0x67c] ss:$36 sps:$4 sm:$0xff]   ;;  %13306 = vmatprep.subr.bf16.mxu0 %v19970_v0  ;;  %v19978_v5 = vld [vmem:[#allocation2 + $0x634] ss:$36 sps:$4 sm:$0xff]   ;;  %v19982_v8 = vld [vmem:[#allocation2 + $0x16c] ss:$36 sps:$4 sm:$0xff]  }
  0x10   :  { %v19974_v2 = vld [vmem:[#allocation2 + $0x1f8] ss:$36 sps:$4 sm:$0xff]   ;;  %13347 = vmatprep.subr.bf16.mxu1 %v19972_v1  ;;  %v19980_v6 = vld [vmem:[#allocation2 + $0x1b0] ss:$36 sps:$4 sm:$0xff]   ;;  %v19986_v10 = vld [vmem:[#allocation2 + $0x168] ss:$36 sps:$4 sm:$0xff]  }
  0x11   :  { %v19975_v3 = vld [vmem:[#allocation2 + $0x678] ss:$36 sps:$4 sm:$0xff]   ;;  %13307 = vmatpush1.bf16.msra.mxu0 %v19974_v2  ;;  %v19981_v7 = vld [vmem:[#allocation2 + $0x630] ss:$36 sps:$4 sm:$0xff]   ;;  %v19987_v11 = vld [vmem:[#allocation2 + $0x5e8] ss:$36 sps:$4 sm:$0xff]  }
  0x12   :  { %13348 = vmatpush1.bf16.msra.mxu1 %v19975_v3  ;;  %13308 = vmatprep.subr.bf16.mxu0 %v19976_v4  ;;  %v19984_v9 = vld [vmem:[#allocation2 + $0x5ec] ss:$36 sps:$4 sm:$0xff]   ;;  %v19988_v12 = vld [vmem:[#allocation2 + $0x124] ss:$36 sps:$4 sm:$0xff]   ;;  %v19994_v16 = vld [vmem:[#allocation2 + $0xdc] ss:$36 sps:$4 sm:$0xff]  }
  0x13   :  { %13349 = vmatprep.subr.bf16.mxu1 %v19978_v5  ;;  %v19990_v13 = vld [vmem:[#allocation2 + $0x5a4] ss:$36 sps:$4 sm:$0xff]   ;;  %v19996_v17 = vld [vmem:[#allocation2 + $0x55c] ss:$36 sps:$4 sm:$0xff]   ;;  %v20000_v20 = vld [vmem:[#allocation2 + $0x94] ss:$36 sps:$4 sm:$0xff]  }
  0x14   :  { %v19992_v14 = vld [vmem:[#allocation2 + $0x120] ss:$36 sps:$4 sm:$0xff]   ;;  %v19998_v18 = vld [vmem:[#allocation2 + $0xd8] ss:$36 sps:$4 sm:$0xff]   ;;  %v20004_v22 = vld [vmem:[#allocation2 + $0x90] ss:$36 sps:$4 sm:$0xff]  }
  0x15   :  { %13309 = vmatpush1.bf16.msra.mxu0 %v19980_v6  ;;  %v19993_v15 = vld [vmem:[#allocation2 + $0x5a0] ss:$36 sps:$4 sm:$0xff]   ;;  %v19999_v19 = vld [vmem:[#allocation2 + $0x558] ss:$36 sps:$4 sm:$0xff]   ;;  %v20005_v23 = vld [vmem:[#allocation2 + $0x510] ss:$36 sps:$4 sm:$0xff]  }
  0x16   :  { %13350 = vmatpush1.bf16.msra.mxu1 %v19981_v7  ;;  %13310 = vmatprep.subr.bf16.mxu0 %v19982_v8  ;;  %v20002_v21 = vld [vmem:[#allocation2 + $0x514] ss:$36 sps:$4 sm:$0xff]   ;;  %v20006_v24 = vld [vmem:[#allocation2 + $0x4c] ss:$36 sps:$4 sm:$0xff]   ;;  %v20012_v28 = vld [vmem:[#allocation2 + $0x4] ss:$36 sps:$4 sm:$0xff]  }
  0x17   :  { %13351 = vmatprep.subr.bf16.mxu1 %v19984_v9  ;;  %v20008_v25 = vld [vmem:[#allocation2 + $0x4cc] ss:$36 sps:$4 sm:$0xff]   ;;  %v20014_v29 = vld [vmem:[#allocation2 + $0x484] ss:$36 sps:$4 sm:$0xff]   ;;  %v20018_v32 = vld [vmem:[#allocation2 + $0x43c] ss:$36 sps:$4 sm:$0xff]  }
  0x18   :  { %v20010_v26 = vld [vmem:[#allocation2 + $0x48] ss:$36 sps:$4 sm:$0xff]   ;;  %v20016_v30 = vld [vmem:[#allocation2] ss:$36 sps:$4 sm:$0xff]   ;;  %v20022_v34 = vld [vmem:[#allocation2 + $0x438] ss:$36 sps:$4 sm:$0xff]  }
  0x19   :  { %13311 = vmatpush1.bf16.msra.mxu0 %v19986_v10  ;;  %v20011_v27 = vld [vmem:[#allocation2 + $0x4c8] ss:$36 sps:$4 sm:$0xff]   ;;  %v20017_v31 = vld [vmem:[#allocation2 + $0x480] ss:$36 sps:$4 sm:$0xff]   ;;  %v20023_v35 = vld [vmem:[#allocation2 + $0x8b8] ss:$36 sps:$4 sm:$0xff]  }
  0x1a   :  { %13352 = vmatpush1.bf16.msra.mxu1 %v19987_v11  ;;  %13312 = vmatprep.subr.bf16.mxu0 %v19988_v12  ;;  %v20020_v33 = vld [vmem:[#allocation2 + $0x8bc] ss:$36 sps:$4 sm:$0xff]   ;;  %v23124_v37 = vmov 1966171168   ;;  %v20024_v39 = vld [vmem:[#allocation2 + $0x3f4] ss:$36 sps:$4 sm:$0xff]  }
  0x1b   :  { %13353 = vmatprep.subr.bf16.mxu1 %v19990_v13  ;;  %v2421_v38 = vunpack.c.l.s4 %v23124_v37  ;;  %v20026_v40 = vld [vmem:[#allocation2 + $0x874] ss:$36 sps:$4 sm:$0xff]   ;;  %v23172_v42 = vshrl.u32 %v2370_v36, 7  ;;  %v20030_v45 = vld [vmem:[#allocation2 + $0x3ac] ss:$36 sps:$4 sm:$0xff]   ;;  %v42_v52 = vld [vmem:[%s24067_s0] sm:$0xff] }
  0x1c   :  { %v20028_v41 = vld [vmem:[#allocation2 + $0x3f0] ss:$36 sps:$4 sm:$0xff]   ;;  %v20034_v47 = vld [vmem:[#allocation2 + $0x3a8] ss:$36 sps:$4 sm:$0xff]   ;;  %v20040_v53 = vld [vmem:[#allocation2 + $0x360] ss:$36 sps:$4 sm:$0xff]   ;;  %v2419_v1 = vcombine.high %v42_v52, %v42_v52 }
  0x1d   :  { %13313 = vmatpush1.bf16.msra.mxu0 %v19992_v14  ;;  %v2422_v43 = vunpack.c.0.s8 %v2421_v38  ;;  %v20029_v44 = vld [vmem:[#allocation2 + $0x870] ss:$36 sps:$4 sm:$0xff]   ;;  %v20035_v48 = vld [vmem:[#allocation2 + $0x828] ss:$36 sps:$4 sm:$0xff]   ;;  %v20041_v55 = vld [vmem:[#allocation2 + $0x7e0] ss:$36 sps:$4 sm:$0xff]  }
  0x1e   :  { %13354 = vmatpush1.bf16.msra.mxu1 %v19993_v15  ;;  %13314 = vmatprep.subr.bf16.mxu0 %v19994_v16  ;;  %v20032_v46 = vld [vmem:[#allocation2 + $0x82c] ss:$36 sps:$4 sm:$0xff]   ;;  %v20036_v50 = vld [vmem:[#allocation2 + $0x364] ss:$36 sps:$4 sm:$0xff]   ;;  %v20042_v56 = vld [vmem:[#allocation2 + $0x31c] ss:$36 sps:$4 sm:$0xff]  }
  0x1f   :  { %13355 = vmatprep.subr.bf16.mxu1 %v19996_v17  ;;  %v23175_v49 = vsub.s32 %v2422_v43, %v23172_v42  ;;  %v20038_v51 = vld [vmem:[#allocation2 + $0x7e4] ss:$36 sps:$4 sm:$0xff]   ;;  %v20044_v57 = vld [vmem:[#allocation2 + $0x79c] ss:$36 sps:$4 sm:$0xff]   ;;  %v20048_v62 = vld [vmem:[#allocation2 + $0x2d4] ss:$36 sps:$4 sm:$0xff]  }
  0x20   :  { %v20046_v59 = vld [vmem:[#allocation2 + $0x318] ss:$36 sps:$4 sm:$0xff]   ;;  %v20052_v2 = vld [vmem:[#allocation2 + $0x2d0] ss:$36 sps:$4 sm:$0xff]   ;;  %v20058_v7 = vld [vmem:[#allocation2 + $0x288] ss:$36 sps:$4 sm:$0xff]  }
  0x21   :  { %13315 = vmatpush1.bf16.msra.mxu0 %v19998_v18  ;;  %v2426_v54 = vrot.slane %v42_v52, %v23175_v49  ;;  %v20047_v61 = vld [vmem:[#allocation2 + $0x798] ss:$36 sps:$4 sm:$0xff]   ;;  %v20053_v3 = vld [vmem:[#allocation2 + $0x750] ss:$36 sps:$4 sm:$0xff]   ;;  %v23191_v6 = vrot.slane %v2419_v1, %v23175_v49  ;;  %v20059_v8 = vld [vmem:[#allocation2 + $0x708] ss:$36 sps:$4 sm:$0xff]  }
  0x22   :  { %13356 = vmatpush1.bf16.msra.mxu1 %v19999_v19  ;;  %13316 = vmatprep.subr.bf16.mxu0 %v20000_v20  ;;  %v20050_v63 = vld [vmem:[#allocation2 + $0x754] ss:$36 sps:$4 sm:$0xff]   ;;  %v20054_v4 = vld [vmem:[#allocation2 + $0x28c] ss:$36 sps:$4 sm:$0xff]   ;;  %v20060_v9 = vld [vmem:[#allocation2 + $0x244] ss:$36 sps:$4 sm:$0xff]  }
  0x23   :  { %13357 = vmatprep.subr.bf16.mxu1 %v20002_v21  ;;  %v2434_v58 = vcombine.high %v2426_v54, %v2426_v54  ;;  %v20056_v5 = vld [vmem:[#allocation2 + $0x70c] ss:$36 sps:$4 sm:$0xff]   ;;  %v20062_v10 = vld [vmem:[#allocation2 + $0x6c4] ss:$36 sps:$4 sm:$0xff]   ;;  %v2435_v11 = vcombine.high %v23191_v6, %v23191_v6  ;;  %v23196_v13 = vrot.slane %v2426_v54, %v23175_v49  ;;  %v20068_v15 = vld [vmem:[#allocation2 + $0xafc] ss:$36 sps:$4 sm:$0xff]  }
  0x24   :  { %v20064_v12 = vld [vmem:[#allocation2 + $0x240] ss:$36 sps:$4 sm:$0xff]   ;;  %v20066_v18 = vld [vmem:[#allocation2 + $0xaf8] ss:$36 sps:$4 sm:$0xff]   ;;  %v20104_v43 = vld [vmem:[#allocation2 + $0x94c] ss:$36 sps:$4 sm:$0xff]  }
  0x25   :  { %13317 = vmatpush1.bf16.msra.mxu0 %v20004_v22  ;;  %v23182_v60 = vrot.slane %v2434_v58, %v23175_v49  ;;  %v20065_v14 = vld [vmem:[#allocation2 + $0x6c0] ss:$36 sps:$4 sm:$0xff]   ;;  %v23199_v17 = vrot.slane %v2435_v11, %v23175_v49  ;;  %v23203_v19 = vcombine.high %v23196_v13, %v23196_v13  ;;  %v20069_v20 = vld [vmem:[#allocation2 + $0xf78] ss:$36 sps:$4 sm:$0xff]   ;;  %v20120_v58 = vld [vmem:[#allocation2 + $0xcf0] ss:$36 sps:$4 sm:$0xff]  }
  0x26   :  { %13358 = vmatpush1.bf16.msra.mxu1 %v20005_v23  ;;  %13318 = vmatprep.subr.bf16.mxu0 %v20006_v24  ;;  %v20071_v16 = vld [vmem:[#allocation2 + $0xf7c] ss:$36 sps:$4 sm:$0xff]   ;;  %v20074_v21 = vld [vmem:[#allocation2 + $0xab4] ss:$36 sps:$4 sm:$0xff]   ;;  %v20129_v1 = vld [vmem:[#allocation2 + $0x1128] ss:$36 sps:$4 sm:$0xff]  }
  0x27   :  { %13359 = vmatprep.subr.bf16.mxu1 %v20008_v25  ;;  %v23186_v0 = vcombine.high %v23182_v60, %v23182_v60  ;;  %13338 = vmatprep.mubr.bf16.mxu0 %v23182_v60  ;;  %v20077_v22 = vld [vmem:[#allocation2 + $0xf34] ss:$36 sps:$4 sm:$0xff]   ;;  %v23207_v23 = vcombine.high %v23199_v17, %v23199_v17  ;;  %v20116_v52 = vld [vmem:[#allocation2 + $0xd3c] ss:$36 sps:$4 sm:$0xff]   ;;  %vm23127_vm0 = vmmov 0   ;;  %vm17280_vm1 = vcmask 25600  }
  0x28   :  { %v20072_v24 = vld [vmem:[#allocation2 + $0xab0] ss:$36 sps:$4 sm:$0xff]   ;;  %v20090_v36 = vld [vmem:[#allocation2 + $0x9d8] ss:$36 sps:$4 sm:$0xff]  }
  0x29   :  { %13319 = vmatpush1.bf16.msra.mxu0 %v20010_v26  ;;  %13379 = vmatprep.mubr.bf16.mxu1 %v23186_v0  ;;  %v20075_v25 = vld [vmem:[#allocation2 + $0xf30] ss:$36 sps:$4 sm:$0xff]   ;;  %v20093_v37 = vld [vmem:[#allocation2 + $0xe58] ss:$36 sps:$4 sm:$0xff]  }
  0x2a   :  { %13360 = vmatpush1.bf16.msra.mxu1 %v20011_v27  ;;  %13320 = vmatprep.subr.bf16.mxu0 %v20012_v28  ;;  %v20080_v26 = vld [vmem:[#allocation2 + $0xa6c] ss:$36 sps:$4 sm:$0xff]   ;;  %v20098_v38 = vld [vmem:[#allocation2 + $0x994] ss:$36 sps:$4 sm:$0xff]  }
  0x2b   :  { %13361 = vmatprep.subr.bf16.mxu1 %v20014_v29  ;;  %v20083_v27 = vld [vmem:[#allocation2 + $0xeec] ss:$36 sps:$4 sm:$0xff]   ;;  %v20114_v54 = vld [vmem:[#allocation2 + $0xd38] ss:$36 sps:$4 sm:$0xff]  }
  0x2c   :  { %v20078_v28 = vld [vmem:[#allocation2 + $0xa68] ss:$36 sps:$4 sm:$0xff]   ;;  %v20146_v11 = vld [vmem:[#allocation2 + $0xbd4] ss:$36 sps:$4 sm:$0xff]  }
  0x2d   :  { %13321 = vmatpush1.bf16.msra.mxu0 %v20016_v30  ;;  %v20081_v29 = vld [vmem:[#allocation2 + $0xee8] ss:$36 sps:$4 sm:$0xff]  }
  0x2e   :  { %13362 = vmatpush1.bf16.msra.mxu1 %v20017_v31  ;;  %13322 = vmatprep.subr.bf16.mxu0 %v20018_v32  ;;  %v20086_v30 = vld [vmem:[#allocation2 + $0xa24] ss:$36 sps:$4 sm:$0xff]  }
  0x2f   :  { %13363 = vmatprep.subr.bf16.mxu1 %v20020_v33  ;;  %v20089_v31 = vld [vmem:[#allocation2 + $0xea4] ss:$36 sps:$4 sm:$0xff]  }
  0x30   :  { %v20084_v32 = vld [vmem:[#allocation2 + $0xa20] ss:$36 sps:$4 sm:$0xff]  }
  0x31   :  { %13323 = vmatpush2.bf16.msra.mxu0 %v20022_v34  ;;  %v20087_v33 = vld [vmem:[#allocation2 + $0xea0] ss:$36 sps:$4 sm:$0xff]  }
  0x32   :  { %13364 = vmatpush2.bf16.msra.mxu1 %v20023_v35  ;;  %13324 = vmatprep.subr.bf16.mxu0 %v20024_v39  ;;  %v20092_v34 = vld [vmem:[#allocation2 + $0x9dc] ss:$36 sps:$4 sm:$0xff]   ;;  %v20101_v39 = vld [vmem:[#allocation2 + $0xe14] ss:$36 sps:$4 sm:$0xff]  }
  0x33   :  { %13365 = vmatprep.subr.bf16.mxu1 %v20026_v40  ;;  %v20095_v35 = vld [vmem:[#allocation2 + $0xe5c] ss:$36 sps:$4 sm:$0xff]   ;;  %v20096_v40 = vld [vmem:[#allocation2 + $0x990] ss:$36 sps:$4 sm:$0xff]  }
  0x35   :  { %13325 = vmatpush2.bf16.msra.mxu0 %v20028_v41  ;;  %v20099_v41 = vld [vmem:[#allocation2 + $0xe10] ss:$36 sps:$4 sm:$0xff]  }
  0x36   :  { %13366 = vmatpush2.bf16.msra.mxu1 %v20029_v44  ;;  %13326 = vmatprep.subr.bf16.mxu0 %v20030_v45  ;;  %v20107_v44 = vld [vmem:[#allocation2 + $0xdcc] ss:$36 sps:$4 sm:$0xff]  }
  0x37   :  { %13367 = vmatprep.subr.bf16.mxu1 %v20032_v46  ;;  %v20102_v45 = vld [vmem:[#allocation2 + $0x948] ss:$36 sps:$4 sm:$0xff]  }
  0x38   :  { %v20105_v46 = vld [vmem:[#allocation2 + $0xdc8] ss:$36 sps:$4 sm:$0xff]  }
  0x39   :  { %13327 = vmatpush2.bf16.msra.mxu0 %v20034_v47  ;;  %v20110_v47 = vld [vmem:[#allocation2 + $0x904] ss:$36 sps:$4 sm:$0xff]  }
  0x3a   :  { %13368 = vmatpush2.bf16.msra.mxu1 %v20035_v48  ;;  %13328 = vmatprep.subr.bf16.mxu0 %v20036_v50  ;;  %v20113_v48 = vld [vmem:[#allocation2 + $0xd84] ss:$36 sps:$4 sm:$0xff]  }
  0x3b   :  { %13369 = vmatprep.subr.bf16.mxu1 %v20038_v51  ;;  %v20108_v50 = vld [vmem:[#allocation2 + $0x900] ss:$36 sps:$4 sm:$0xff]  }
  0x3c   :  { %v20111_v51 = vld [vmem:[#allocation2 + $0xd80] ss:$36 sps:$4 sm:$0xff]  }
  0x3d   :  { %13329 = vmatpush2.bf16.msra.mxu0 %v20040_v53  ;;  %v20119_v53 = vld [vmem:[#allocation2 + $0x11bc] ss:$36 sps:$4 sm:$0xff]  }
  0x3e   :  { %13370 = vmatpush2.bf16.msra.mxu1 %v20041_v55  ;;  %13330 = vmatprep.subr.bf16.mxu0 %v20042_v56  ;;  %v20117_v55 = vld [vmem:[#allocation2 + $0x11b8] ss:$36 sps:$4 sm:$0xff]  }
  0x3f   :  { %13371 = vmatprep.subr.bf16.mxu1 %v20044_v57  ;;  %v20122_v56 = vld [vmem:[#allocation2 + $0xcf4] ss:$36 sps:$4 sm:$0xff]  }
  0x40   :  { %v20125_v57 = vld [vmem:[#allocation2 + $0x1174] ss:$36 sps:$4 sm:$0xff]  }
  0x41   :  { %13331 = vmatpush2.bf16.msra.mxu0 %v20046_v59  ;;  %v20123_v59 = vld [vmem:[#allocation2 + $0x1170] ss:$36 sps:$4 sm:$0xff]  }
  0x42   :  { %13372 = vmatpush2.bf16.msra.mxu1 %v20047_v61  ;;  %13332 = vmatprep.subr.bf16.mxu0 %v20048_v62  ;;  %v20128_v61 = vld [vmem:[#allocation2 + $0xcac] ss:$36 sps:$4 sm:$0xff]  }
  0x43   :  { %13373 = vmatprep.subr.bf16.mxu1 %v20050_v63  ;;  %v20131_v62 = vld [vmem:[#allocation2 + $0x112c] ss:$36 sps:$4 sm:$0xff]  }
  0x44   :  { %v20126_v63 = vld [vmem:[#allocation2 + $0xca8] ss:$36 sps:$4 sm:$0xff]  }
  0x45   :  { %13333 = vmatpush2.bf16.msra.mxu0 %v20052_v2  ;;  %v20134_v2 = vld [vmem:[#allocation2 + $0xc64] ss:$36 sps:$4 sm:$0xff]  }
  0x46   :  { %13374 = vmatpush2.bf16.msra.mxu1 %v20053_v3  ;;  %13334 = vmatprep.subr.bf16.mxu0 %v20054_v4  ;;  %v20137_v3 = vld [vmem:[#allocation2 + $0x10e4] ss:$36 sps:$4 sm:$0xff]  }
  0x47   :  { %13375 = vmatprep.subr.bf16.mxu1 %v20056_v5  ;;  %v20132_v4 = vld [vmem:[#allocation2 + $0xc60] ss:$36 sps:$4 sm:$0xff]  }
  0x48   :  { %v20135_v5 = vld [vmem:[#allocation2 + $0x10e0] ss:$36 sps:$4 sm:$0xff]  }
  0x49   :  { %13335 = vmatpush2.bf16.msra.mxu0 %v20058_v7  ;;  %v20140_v7 = vld [vmem:[#allocation2 + $0xc1c] ss:$36 sps:$4 sm:$0xff]  }
  0x4a   :  { %13376 = vmatpush2.bf16.msra.mxu1 %v20059_v8  ;;  %13336 = vmatprep.subr.bf16.mxu0 %v20060_v9  ;;  %v20143_v8 = vld [vmem:[#allocation2 + $0x109c] ss:$36 sps:$4 sm:$0xff]  }
  0x4b   :  { %13377 = vmatprep.subr.bf16.mxu1 %v20062_v10  ;;  %v20138_v9 = vld [vmem:[#allocation2 + $0xc18] ss:$36 sps:$4 sm:$0xff]  }
  0x4c   :  { %v20141_v10 = vld [vmem:[#allocation2 + $0x1098] ss:$36 sps:$4 sm:$0xff]  }
  0x4d   :  { %13337 = vmatpush2.bf16.msra.mxu0 %v20064_v12  ;;  %v20149_v12 = vld [vmem:[#allocation2 + $0x1054] ss:$36 sps:$4 sm:$0xff]  }
  0x4e   :  { %13378 = vmatpush2.bf16.msra.mxu1 %v20065_v14  ;;  %13388 = vmatprep.subr.bf16.mxu0 %v20068_v15  ;;  %v20144_v14 = vld [vmem:[#allocation2 + $0xbd0] ss:$36 sps:$4 sm:$0xff]  }
  0x4f   :  { %13429 = vmatprep.subr.bf16.mxu1 %v20071_v16  ;;  %v20147_v15 = vld [vmem:[#allocation2 + $0x1050] ss:$36 sps:$4 sm:$0xff]  }
  0x50   :  { %13339 = vmatmul.mubr.bf16.vlgmr.msra.gmra.mxu0 %v23196_v13  ;;  %v20152_v16 = vld [vmem:[#allocation2 + $0xb8c] ss:$36 sps:$4 sm:$0xff]  }
  0x51   :  { %13380 = vmatmul.mubr.bf16.vlgmr.msra.gmra.mxu1 %v23203_v19  ;;  %13389 = vmatpush1.bf16.msra.mxu0 %v20066_v18  ;;  %v20155_v18 = vld [vmem:[#allocation2 + $0x100c] ss:$36 sps:$4 sm:$0xff]  }
  0x52   :  { %13430 = vmatpush1.bf16.msra.mxu1 %v20069_v20  ;;  %13390 = vmatprep.subr.bf16.mxu0 %v20074_v21  ;;  %v20150_v20 = vld [vmem:[#allocation2 + $0xb88] ss:$36 sps:$4 sm:$0xff]  }
  0x53   :  { %13431 = vmatprep.subr.bf16.mxu1 %v20077_v22  ;;  %13420 = vmatprep.mubr.bf16.mxu0 %v23199_v17  ;;  %v20153_v21 = vld [vmem:[#allocation2 + $0x1008] ss:$36 sps:$4 sm:$0xff]  }
  0x54   :  { %13461 = vmatprep.mubr.bf16.mxu1 %v23207_v23  ;;  %v20158_v22 = vld [vmem:[#allocation2 + $0xb44] ss:$36 sps:$4 sm:$0xff]  }
  0x55   :  { %13391 = vmatpush1.bf16.msra.mxu0 %v20072_v24  ;;  %v20161_v24 = vld [vmem:[#allocation2 + $0xfc4] ss:$36 sps:$4 sm:$0xff]  }
  0x56   :  { %13432 = vmatpush1.bf16.msra.mxu1 %v20075_v25  ;;  %13392 = vmatprep.subr.bf16.mxu0 %v20080_v26  ;;  %v20156_v25 = vld [vmem:[#allocation2 + $0xb40] ss:$36 sps:$4 sm:$0xff]   ;;  %v23215_v26 = vrot.slane %v23191_v6, %v23175_v49  ;;  %v23224_v6 = vld [vmem:[%s24067_s0 + $0x8] sm:$0xff] }
  0x57   :  { %13433 = vmatprep.subr.bf16.mxu1 %v20083_v27  ;;  %v20159_v27 = vld [vmem:[#allocation2 + $0xfc0] ss:$36 sps:$4 sm:$0xff]  }
  0x59   :  { %13393 = vmatpush1.bf16.msra.mxu0 %v20078_v28  ;;  %v20165_v28 = vld [vmem:[#allocation2 + $0x13fc] ss:$36 sps:$4 sm:$0xff]  }
  0x5a   :  { %13434 = vmatpush1.bf16.msra.mxu1 %v20081_v29  ;;  %13394 = vmatprep.subr.bf16.mxu0 %v20086_v30  ;;  %v20168_v29 = vld [vmem:[#allocation2 + $0x187c] ss:$36 sps:$4 sm:$0xff]  }
  0x5b   :  { %13435 = vmatprep.subr.bf16.mxu1 %v20089_v31  ;;  %v20163_v30 = vld [vmem:[#allocation2 + $0x13f8] ss:$36 sps:$4 sm:$0xff]   ;;  %v23219_v31 = vcombine.high %v23215_v26, %v23215_v26 }
  0x5d   :  { %13395 = vmatpush1.bf16.msra.mxu0 %v20084_v32  ;;  %v20166_v32 = vld [vmem:[#allocation2 + $0x1878] ss:$36 sps:$4 sm:$0xff]  }
  0x5e   :  { %13436 = vmatpush1.bf16.msra.mxu1 %v20087_v33  ;;  %13396 = vmatprep.subr.bf16.mxu0 %v20092_v34  ;;  %v20171_v33 = vld [vmem:[#allocation2 + $0x13b4] ss:$36 sps:$4 sm:$0xff]  }
  0x5f   :  { %13437 = vmatprep.subr.bf16.mxu1 %v20095_v35  ;;  %v20174_v34 = vld [vmem:[#allocation2 + $0x1834] ss:$36 sps:$4 sm:$0xff]   ;;  %v23228_v35 = vrot.slane %v23224_v6, %v23175_v49 }
  0x61   :  { %13397 = vmatpush1.bf16.msra.mxu0 %v20090_v36  ;;  %v2483_v36 = vcombine.high %v23228_v35, %v23228_v35 }
  0x62   :  { %13438 = vmatpush1.bf16.msra.mxu1 %v20093_v37  ;;  %13398 = vmatprep.subr.bf16.mxu0 %v20098_v38  ;;  %v20169_v37 = vld [vmem:[#allocation2 + $0x13b0] ss:$36 sps:$4 sm:$0xff]  }
  0x63   :  { %13439 = vmatprep.subr.bf16.mxu1 %v20101_v39  ;;  %v20172_v38 = vld [vmem:[#allocation2 + $0x1830] ss:$36 sps:$4 sm:$0xff]  }
  0x64   :  { %v20177_v39 = vld [vmem:[#allocation2 + $0x136c] ss:$36 sps:$4 sm:$0xff]  }
  0x65   :  { %13399 = vmatpush1.bf16.msra.mxu0 %v20096_v40  ;;  %v20180_v40 = vld [vmem:[#allocation2 + $0x17ec] ss:$36 sps:$4 sm:$0xff]  }
  0x66   :  { %13440 = vmatpush1.bf16.msra.mxu1 %v20099_v41  ;;  %13400 = vmatprep.subr.bf16.mxu0 %v20104_v43  ;;  %v23235_v41 = vrot.slane %v2483_v36, %v23175_v49  ;;  %v20241_v36 = vld [vmem:[#allocation2 + $0x14d0] ss:$36 sps:$4 sm:$0xff]  }
  0x67   :  { %13441 = vmatprep.subr.bf16.mxu1 %v20107_v44  ;;  %v20175_v44 = vld [vmem:[#allocation2 + $0x1368] ss:$36 sps:$4 sm:$0xff]  }
  0x68   :  { %v23240_v43 = vcombine.high %v23235_v41, %v23235_v41 }
  0x69   :  { %13401 = vmatpush1.bf16.msra.mxu0 %v20102_v45  ;;  %v20178_v45 = vld [vmem:[#allocation2 + $0x17e8] ss:$36 sps:$4 sm:$0xff]  }
  0x6a   :  { %13442 = vmatpush1.bf16.msra.mxu1 %v20105_v46  ;;  %13402 = vmatprep.subr.bf16.mxu0 %v20110_v47  ;;  %v20183_v46 = vld [vmem:[#allocation2 + $0x1324] ss:$36 sps:$4 sm:$0xff]  }
  0x6b   :  { %13443 = vmatprep.subr.bf16.mxu1 %v20113_v48  ;;  %v20186_v47 = vld [vmem:[#allocation2 + $0x17a4] ss:$36 sps:$4 sm:$0xff]  }
  0x6c   :  { %v20181_v48 = vld [vmem:[#allocation2 + $0x1320] ss:$36 sps:$4 sm:$0xff]  }
  0x6d   :  { %13403 = vmatpush1.bf16.msra.mxu0 %v20108_v50  ;;  %v20184_v50 = vld [vmem:[#allocation2 + $0x17a0] ss:$36 sps:$4 sm:$0xff]  }
  0x6e   :  { %13444 = vmatpush1.bf16.msra.mxu1 %v20111_v51  ;;  %13404 = vmatprep.subr.bf16.mxu0 %v20116_v52  ;;  %v20189_v51 = vld [vmem:[#allocation2 + $0x12dc] ss:$36 sps:$4 sm:$0xff]  }
  0x6f   :  { %13445 = vmatprep.subr.bf16.mxu1 %v20119_v53  ;;  %v20192_v52 = vld [vmem:[#allocation2 + $0x175c] ss:$36 sps:$4 sm:$0xff]  }
  0x70   :  { %v20187_v53 = vld [vmem:[#allocation2 + $0x12d8] ss:$36 sps:$4 sm:$0xff]  }
  0x71   :  { %13405 = vmatpush2.bf16.msra.mxu0 %v20114_v54  ;;  %v20190_v54 = vld [vmem:[#allocation2 + $0x1758] ss:$36 sps:$4 sm:$0xff]  }
  0x72   :  { %13446 = vmatpush2.bf16.msra.mxu1 %v20117_v55  ;;  %13406 = vmatprep.subr.bf16.mxu0 %v20122_v56  ;;  %v20195_v55 = vld [vmem:[#allocation2 + $0x1294] ss:$36 sps:$4 sm:$0xff]  }
  0x73   :  { %13447 = vmatprep.subr.bf16.mxu1 %v20125_v57  ;;  %v20198_v56 = vld [vmem:[#allocation2 + $0x1714] ss:$36 sps:$4 sm:$0xff]  }
  0x74   :  { %v20193_v57 = vld [vmem:[#allocation2 + $0x1290] ss:$36 sps:$4 sm:$0xff]  }
  0x75   :  { %13407 = vmatpush2.bf16.msra.mxu0 %v20120_v58  ;;  %v20196_v58 = vld [vmem:[#allocation2 + $0x1710] ss:$36 sps:$4 sm:$0xff]  }
  0x76   :  { %13448 = vmatpush2.bf16.msra.mxu1 %v20123_v59  ;;  %13408 = vmatprep.subr.bf16.mxu0 %v20128_v61  ;;  %v20201_v59 = vld [vmem:[#allocation2 + $0x124c] ss:$36 sps:$4 sm:$0xff]  }
  0x77   :  { %13449 = vmatprep.subr.bf16.mxu1 %v20131_v62  ;;  %v20204_v61 = vld [vmem:[#allocation2 + $0x16cc] ss:$36 sps:$4 sm:$0xff]  }
  0x78   :  { %v20199_v62 = vld [vmem:[#allocation2 + $0x1248] ss:$36 sps:$4 sm:$0xff]  }
  0x79   :  { %13409 = vmatpush2.bf16.msra.mxu0 %v20126_v63  ;;  %v20202_v63 = vld [vmem:[#allocation2 + $0x16c8] ss:$36 sps:$4 sm:$0xff]  }
  0x7a   :  { %13450 = vmatpush2.bf16.msra.mxu1 %v20129_v1  ;;  %13410 = vmatprep.subr.bf16.mxu0 %v20134_v2  ;;  %v20207_v1 = vld [vmem:[#allocation2 + $0x1204] ss:$36 sps:$4 sm:$0xff]  }
  0x7b   :  { %13451 = vmatprep.subr.bf16.mxu1 %v20137_v3  ;;  %v20210_v2 = vld [vmem:[#allocation2 + $0x1684] ss:$36 sps:$4 sm:$0xff]  }
  0x7c   :  { %v20205_v3 = vld [vmem:[#allocation2 + $0x1200] ss:$36 sps:$4 sm:$0xff]  }
  0x7d   :  { %13411 = vmatpush2.bf16.msra.mxu0 %v20132_v4  ;;  %v20208_v4 = vld [vmem:[#allocation2 + $0x1680] ss:$36 sps:$4 sm:$0xff]  }
  0x7e   :  { %13452 = vmatpush2.bf16.msra.mxu1 %v20135_v5  ;;  %13412 = vmatprep.subr.bf16.mxu0 %v20140_v7  ;;  %v20213_v5 = vld [vmem:[#allocation2 + $0x163c] ss:$36 sps:$4 sm:$0xff]  }
  0x7f   :  { %13453 = vmatprep.subr.bf16.mxu1 %v20143_v8  ;;  %v20216_v7 = vld [vmem:[#allocation2 + $0x1abc] ss:$36 sps:$4 sm:$0xff]  }
  0x80   :  { %v20211_v8 = vld [vmem:[#allocation2 + $0x1638] ss:$36 sps:$4 sm:$0xff]  }
  0x81   :  { %13413 = vmatpush2.bf16.msra.mxu0 %v20138_v9  ;;  %v20214_v9 = vld [vmem:[#allocation2 + $0x1ab8] ss:$36 sps:$4 sm:$0xff]  }
  0x82   :  { %13454 = vmatpush2.bf16.msra.mxu1 %v20141_v10  ;;  %13414 = vmatprep.subr.bf16.mxu0 %v20146_v11  ;;  %v20219_v10 = vld [vmem:[#allocation2 + $0x15f4] ss:$36 sps:$4 sm:$0xff]  }
  0x83   :  { %13455 = vmatprep.subr.bf16.mxu1 %v20149_v12  ;;  %v20222_v11 = vld [vmem:[#allocation2 + $0x1a74] ss:$36 sps:$4 sm:$0xff]  }
  0x84   :  { %v20217_v12 = vld [vmem:[#allocation2 + $0x15f0] ss:$36 sps:$4 sm:$0xff]  }
  0x85   :  { %13415 = vmatpush2.bf16.msra.mxu0 %v20144_v14  ;;  %v20220_v14 = vld [vmem:[#allocation2 + $0x1a70] ss:$36 sps:$4 sm:$0xff]  }
  0x86   :  { %13456 = vmatpush2.bf16.msra.mxu1 %v20147_v15  ;;  %13416 = vmatprep.subr.bf16.mxu0 %v20152_v16  ;;  %v20225_v15 = vld [vmem:[#allocation2 + $0x15ac] ss:$36 sps:$4 sm:$0xff]  }
  0x87   :  { %13457 = vmatprep.subr.bf16.mxu1 %v20155_v18  ;;  %v20228_v16 = vld [vmem:[#allocation2 + $0x1a2c] ss:$36 sps:$4 sm:$0xff]  }
  0x88   :  { %v20223_v18 = vld [vmem:[#allocation2 + $0x15a8] ss:$36 sps:$4 sm:$0xff]  }
  0x89   :  { %13417 = vmatpush2.bf16.msra.mxu0 %v20150_v20  ;;  %v20226_v20 = vld [vmem:[#allocation2 + $0x1a28] ss:$36 sps:$4 sm:$0xff]  }
  0x8a   :  { %13458 = vmatpush2.bf16.msra.mxu1 %v20153_v21  ;;  %13418 = vmatprep.subr.bf16.mxu0 %v20158_v22  ;;  %v20231_v21 = vld [vmem:[#allocation2 + $0x1564] ss:$36 sps:$4 sm:$0xff]  }
  0x8b   :  { %13459 = vmatprep.subr.bf16.mxu1 %v20161_v24  ;;  %v20234_v22 = vld [vmem:[#allocation2 + $0x19e4] ss:$36 sps:$4 sm:$0xff]  }
  0x8c   :  { %v20229_v24 = vld [vmem:[#allocation2 + $0x1560] ss:$36 sps:$4 sm:$0xff]  }
  0x8d   :  { %13419 = vmatpush2.bf16.msra.mxu0 %v20156_v25  ;;  %v20232_v25 = vld [vmem:[#allocation2 + $0x19e0] ss:$36 sps:$4 sm:$0xff]  }
  0x8e   :  { %13460 = vmatpush2.bf16.msra.mxu1 %v20159_v27  ;;  %13470 = vmatprep.subr.bf16.mxu0 %v20165_v28  ;;  %v20237_v27 = vld [vmem:[#allocation2 + $0x151c] ss:$36 sps:$4 sm:$0xff]  }
  0x8f   :  { %13511 = vmatprep.subr.bf16.mxu1 %v20168_v29  ;;  %v20240_v28 = vld [vmem:[#allocation2 + $0x199c] ss:$36 sps:$4 sm:$0xff]  }
  0x90   :  { %13421 = vmatmul.mubr.bf16.vlgmr.msra.gmra.mxu0 %v23215_v26  ;;  %v20235_v29 = vld [vmem:[#allocation2 + $0x1518] ss:$36 sps:$4 sm:$0xff]  }
  0x91   :  { %13462 = vmatmul.mubr.bf16.vlgmr.msra.gmra.mxu1 %v23219_v31  ;;  %13471 = vmatpush1.bf16.msra.mxu0 %v20163_v30  ;;  %v20238_v30 = vld [vmem:[#allocation2 + $0x1998] ss:$36 sps:$4 sm:$0xff]  }
  0x92   :  { %13512 = vmatpush1.bf16.msra.mxu1 %v20166_v32  ;;  %13472 = vmatprep.subr.bf16.mxu0 %v20171_v33  ;;  %v20243_v32 = vld [vmem:[#allocation2 + $0x14d4] ss:$36 sps:$4 sm:$0xff]  }
  0x93   :  { %13513 = vmatprep.subr.bf16.mxu1 %v20174_v34  ;;  %13502 = vmatprep.mubr.bf16.mxu0 %v23235_v41  ;;  %v20246_v33 = vld [vmem:[#allocation2 + $0x1954] ss:$36 sps:$4 sm:$0xff]   ;;  %v2468_v34 = vcombine.high %v23224_v6, %v23224_v6 }
  0x94   :  { %13543 = vmatprep.mubr.bf16.mxu1 %v23240_v43 }
  0x95   :  { %13473 = vmatpush1.bf16.msra.mxu0 %v20169_v37  ;;  %v20244_v37 = vld [vmem:[#allocation2 + $0x1950] ss:$36 sps:$4 sm:$0xff]  }
  0x96   :  { %13514 = vmatpush1.bf16.msra.mxu1 %v20172_v38  ;;  %13474 = vmatprep.subr.bf16.mxu0 %v20177_v39  ;;  %v20249_v38 = vld [vmem:[#allocation2 + $0x148c] ss:$36 sps:$4 sm:$0xff]  }
  0x97   :  { %13515 = vmatprep.subr.bf16.mxu1 %v20180_v40  ;;  %v20252_v39 = vld [vmem:[#allocation2 + $0x190c] ss:$36 sps:$4 sm:$0xff]   ;;  %v23246_v40 = vrot.slane %v2468_v34, %v23175_v49  ;;  %v20310_v34 = vld [vmem:[#allocation2 + $0x23b8] ss:$36 sps:$4 sm:$0xff]  }
  0x99   :  { %13475 = vmatpush1.bf16.msra.mxu0 %v20175_v44  ;;  %v20247_v44 = vld [vmem:[#allocation2 + $0x1488] ss:$36 sps:$4 sm:$0xff]   ;;  %v2484_v6 = vcombine.high %v23246_v40, %v23246_v40 }
  0x9a   :  { %13516 = vmatpush1.bf16.msra.mxu1 %v20178_v45  ;;  %13476 = vmatprep.subr.bf16.mxu0 %v20183_v46  ;;  %v20250_v45 = vld [vmem:[#allocation2 + $0x1908] ss:$36 sps:$4 sm:$0xff]  }
  0x9b   :  { %13517 = vmatprep.subr.bf16.mxu1 %v20186_v47  ;;  %v20255_v46 = vld [vmem:[#allocation2 + $0x1444] ss:$36 sps:$4 sm:$0xff]  }
  0x9c   :  { %v20258_v47 = vld [vmem:[#allocation2 + $0x18c4] ss:$36 sps:$4 sm:$0xff]  }
  0x9d   :  { %13477 = vmatpush1.bf16.msra.mxu0 %v20181_v48  ;;  %v20253_v48 = vld [vmem:[#allocation2 + $0x1440] ss:$36 sps:$4 sm:$0xff]  }
  0x9e   :  { %13518 = vmatpush1.bf16.msra.mxu1 %v20184_v50  ;;  %13478 = vmatprep.subr.bf16.mxu0 %v20189_v51  ;;  %v23252_v50 = vrot.slane %v23228_v35, %v23175_v49  ;;  %v20256_v51 = vld [vmem:[#allocation2 + $0x18c0] ss:$36 sps:$4 sm:$0xff]   ;;  %v20267_v35 = vld [vmem:[#allocation2 + $0x1cb4] ss:$36 sps:$4 sm:$0xff]  }
  0x9f   :  { %13519 = vmatprep.subr.bf16.mxu1 %v20192_v52  ;;  %v20261_v52 = vld [vmem:[#allocation2 + $0x1cfc] ss:$36 sps:$4 sm:$0xff]  }
  0xa1   :  { %13479 = vmatpush1.bf16.msra.mxu0 %v20187_v53  ;;  %v20264_v53 = vld [vmem:[#allocation2 + $0x217c] ss:$36 sps:$4 sm:$0xff]  }
  0xa2   :  { %13520 = vmatpush1.bf16.msra.mxu1 %v20190_v54  ;;  %13480 = vmatprep.subr.bf16.mxu0 %v20195_v55  ;;  %v23255_v54 = vrot.slane %v2484_v6, %v23175_v49  ;;  %v20259_v55 = vld [vmem:[#allocation2 + $0x1cf8] ss:$36 sps:$4 sm:$0xff]   ;;  %v20327_v6 = vld [vmem:[#allocation2 + $0x1e64] ss:$36 sps:$4 sm:$0xff]  }
  0xa3   :  { %13521 = vmatprep.subr.bf16.mxu1 %v20198_v56  ;;  %v23259_v56 = vcombine.high %v23252_v50, %v23252_v50 }
  0xa5   :  { %13481 = vmatpush1.bf16.msra.mxu0 %v20193_v57  ;;  %v20262_v57 = vld [vmem:[#allocation2 + $0x2178] ss:$36 sps:$4 sm:$0xff]  }
  0xa6   :  { %13522 = vmatpush1.bf16.msra.mxu1 %v20196_v58  ;;  %13482 = vmatprep.subr.bf16.mxu0 %v20201_v59  ;;  %v20270_v58 = vld [vmem:[#allocation2 + $0x2134] ss:$36 sps:$4 sm:$0xff]   ;;  %v23263_v59 = vcombine.high %v23255_v54, %v23255_v54 }
  0xa7   :  { %13523 = vmatprep.subr.bf16.mxu1 %v20204_v61  ;;  %v20265_v61 = vld [vmem:[#allocation2 + $0x1cb0] ss:$36 sps:$4 sm:$0xff]  }
  0xa9   :  { %13483 = vmatpush1.bf16.msra.mxu0 %v20199_v62  ;;  %v20268_v62 = vld [vmem:[#allocation2 + $0x2130] ss:$36 sps:$4 sm:$0xff]  }
  0xaa   :  { %13524 = vmatpush1.bf16.msra.mxu1 %v20202_v63  ;;  %13484 = vmatprep.subr.bf16.mxu0 %v20207_v1  ;;  %v20273_v63 = vld [vmem:[#allocation2 + $0x1c6c] ss:$36 sps:$4 sm:$0xff]  }
  0xab   :  { %13525 = vmatprep.subr.bf16.mxu1 %v20210_v2  ;;  %v20276_v1 = vld [vmem:[#allocation2 + $0x20ec] ss:$36 sps:$4 sm:$0xff]  }
  0xac   :  { %v20271_v2 = vld [vmem:[#allocation2 + $0x1c68] ss:$36 sps:$4 sm:$0xff]  }
  0xad   :  { %13485 = vmatpush1.bf16.msra.mxu0 %v20205_v3  ;;  %v20274_v3 = vld [vmem:[#allocation2 + $0x20e8] ss:$36 sps:$4 sm:$0xff]  }
  0xae   :  { %13526 = vmatpush1.bf16.msra.mxu1 %v20208_v4  ;;  %13486 = vmatprep.subr.bf16.mxu0 %v20213_v5  ;;  %v20279_v4 = vld [vmem:[#allocation2 + $0x1c24] ss:$36 sps:$4 sm:$0xff]  }
  0xaf   :  { %13527 = vmatprep.subr.bf16.mxu1 %v20216_v7  ;;  %v20282_v5 = vld [vmem:[#allocation2 + $0x20a4] ss:$36 sps:$4 sm:$0xff]  }
  0xb0   :  { %v20277_v7 = vld [vmem:[#allocation2 + $0x1c20] ss:$36 sps:$4 sm:$0xff]  }
  0xb1   :  { %13487 = vmatpush2.bf16.msra.mxu0 %v20211_v8  ;;  %v20280_v8 = vld [vmem:[#allocation2 + $0x20a0] ss:$36 sps:$4 sm:$0xff]  }
  0xb2   :  { %13528 = vmatpush2.bf16.msra.mxu1 %v20214_v9  ;;  %13488 = vmatprep.subr.bf16.mxu0 %v20219_v10  ;;  %v20285_v9 = vld [vmem:[#allocation2 + $0x1bdc] ss:$36 sps:$4 sm:$0xff]  }
  0xb3   :  { %13529 = vmatprep.subr.bf16.mxu1 %v20222_v11  ;;  %v20288_v10 = vld [vmem:[#allocation2 + $0x205c] ss:$36 sps:$4 sm:$0xff]  }
  0xb4   :  { %v20283_v11 = vld [vmem:[#allocation2 + $0x1bd8] ss:$36 sps:$4 sm:$0xff]  }
  0xb5   :  { %13489 = vmatpush2.bf16.msra.mxu0 %v20217_v12  ;;  %v20286_v12 = vld [vmem:[#allocation2 + $0x2058] ss:$36 sps:$4 sm:$0xff]  }
  0xb6   :  { %13530 = vmatpush2.bf16.msra.mxu1 %v20220_v14  ;;  %13490 = vmatprep.subr.bf16.mxu0 %v20225_v15  ;;  %v20291_v14 = vld [vmem:[#allocation2 + $0x1b94] ss:$36 sps:$4 sm:$0xff]  }
  0xb7   :  { %13531 = vmatprep.subr.bf16.mxu1 %v20228_v16  ;;  %v20294_v15 = vld [vmem:[#allocation2 + $0x2014] ss:$36 sps:$4 sm:$0xff]  }
  0xb8   :  { %v20289_v16 = vld [vmem:[#allocation2 + $0x1b90] ss:$36 sps:$4 sm:$0xff]  }
  0xb9   :  { %13491 = vmatpush2.bf16.msra.mxu0 %v20223_v18  ;;  %v20292_v18 = vld [vmem:[#allocation2 + $0x2010] ss:$36 sps:$4 sm:$0xff]  }
  0xba   :  { %13532 = vmatpush2.bf16.msra.mxu1 %v20226_v20  ;;  %13492 = vmatprep.subr.bf16.mxu0 %v20231_v21  ;;  %v20297_v20 = vld [vmem:[#allocation2 + $0x1b4c] ss:$36 sps:$4 sm:$0xff]  }
  0xbb   :  { %13533 = vmatprep.subr.bf16.mxu1 %v20234_v22  ;;  %v20300_v21 = vld [vmem:[#allocation2 + $0x1fcc] ss:$36 sps:$4 sm:$0xff]  }
  0xbc   :  { %v20295_v22 = vld [vmem:[#allocation2 + $0x1b48] ss:$36 sps:$4 sm:$0xff]  }
  0xbd   :  { %13493 = vmatpush2.bf16.msra.mxu0 %v20229_v24  ;;  %v20298_v24 = vld [vmem:[#allocation2 + $0x1fc8] ss:$36 sps:$4 sm:$0xff]  }
  0xbe   :  { %13534 = vmatpush2.bf16.msra.mxu1 %v20232_v25  ;;  %13494 = vmatprep.subr.bf16.mxu0 %v20237_v27  ;;  %v20303_v25 = vld [vmem:[#allocation2 + $0x1b04] ss:$36 sps:$4 sm:$0xff]  }
  0xbf   :  { %13535 = vmatprep.subr.bf16.mxu1 %v20240_v28  ;;  %v20306_v27 = vld [vmem:[#allocation2 + $0x1f84] ss:$36 sps:$4 sm:$0xff]  }
  0xc0   :  { %v20301_v28 = vld [vmem:[#allocation2 + $0x1b00] ss:$36 sps:$4 sm:$0xff]  }
  0xc1   :  { %13495 = vmatpush2.bf16.msra.mxu0 %v20235_v29  ;;  %v20304_v29 = vld [vmem:[#allocation2 + $0x1f80] ss:$36 sps:$4 sm:$0xff]  }
  0xc2   :  { %13536 = vmatpush2.bf16.msra.mxu1 %v20238_v30  ;;  %13496 = vmatprep.subr.bf16.mxu0 %v20243_v32  ;;  %v20309_v30 = vld [vmem:[#allocation2 + $0x1f3c] ss:$36 sps:$4 sm:$0xff]  }
  0xc3   :  { %13537 = vmatprep.subr.bf16.mxu1 %v20246_v33  ;;  %v20312_v32 = vld [vmem:[#allocation2 + $0x23bc] ss:$36 sps:$4 sm:$0xff]  }
  0xc4   :  { %v20307_v33 = vld [vmem:[#allocation2 + $0x1f38] ss:$36 sps:$4 sm:$0xff]  }
  0xc5   :  { %13497 = vmatpush2.bf16.msra.mxu0 %v20241_v36  ;;  %v20315_v36 = vld [vmem:[#allocation2 + $0x1ef4] ss:$36 sps:$4 sm:$0xff]  }
  0xc6   :  { %13538 = vmatpush2.bf16.msra.mxu1 %v20244_v37  ;;  %13498 = vmatprep.subr.bf16.mxu0 %v20249_v38  ;;  %v20318_v37 = vld [vmem:[#allocation2 + $0x2374] ss:$36 sps:$4 sm:$0xff]  }
  0xc7   :  { %13539 = vmatprep.subr.bf16.mxu1 %v20252_v39  ;;  %v20313_v38 = vld [vmem:[#allocation2 + $0x1ef0] ss:$36 sps:$4 sm:$0xff]  }
  0xc8   :  { %v20316_v39 = vld [vmem:[#allocation2 + $0x2370] ss:$36 sps:$4 sm:$0xff]  }
  0xc9   :  { %13499 = vmatpush2.bf16.msra.mxu0 %v20247_v44  ;;  %v20321_v44 = vld [vmem:[#allocation2 + $0x1eac] ss:$36 sps:$4 sm:$0xff]  }
  0xca   :  { %13540 = vmatpush2.bf16.msra.mxu1 %v20250_v45  ;;  %13500 = vmatprep.subr.bf16.mxu0 %v20255_v46  ;;  %v20324_v45 = vld [vmem:[#allocation2 + $0x232c] ss:$36 sps:$4 sm:$0xff]  }
  0xcb   :  { %13541 = vmatprep.subr.bf16.mxu1 %v20258_v47  ;;  %v20319_v46 = vld [vmem:[#allocation2 + $0x1ea8] ss:$36 sps:$4 sm:$0xff]  }
  0xcc   :  { %v20322_v47 = vld [vmem:[#allocation2 + $0x2328] ss:$36 sps:$4 sm:$0xff]  }
  0xcd   :  { %13501 = vmatpush2.bf16.msra.mxu0 %v20253_v48  ;;  %v20330_v48 = vld [vmem:[#allocation2 + $0x22e4] ss:$36 sps:$4 sm:$0xff]  }
  0xce   :  { %13542 = vmatpush2.bf16.msra.mxu1 %v20256_v51  ;;  %13552 = vmatprep.subr.bf16.mxu0 %v20261_v52  ;;  %v20325_v51 = vld [vmem:[#allocation2 + $0x1e60] ss:$36 sps:$4 sm:$0xff]  }
  0xcf   :  { %13593 = vmatprep.subr.bf16.mxu1 %v20264_v53  ;;  %v20328_v52 = vld [vmem:[#allocation2 + $0x22e0] ss:$36 sps:$4 sm:$0xff]  }
  0xd0   :  { %13503 = vmatmul.mubr.bf16.vlgmr.msra.gmra.mxu0 %v23252_v50  ;;  %v20333_v53 = vld [vmem:[#allocation2 + $0x1e1c] ss:$36 sps:$4 sm:$0xff]  }
  0xd1   :  { %13544 = vmatmul.mubr.bf16.vlgmr.msra.gmra.mxu1 %v23259_v56  ;;  %13553 = vmatpush1.bf16.msra.mxu0 %v20259_v55  ;;  %v20336_v55 = vld [vmem:[#allocation2 + $0x229c] ss:$36 sps:$4 sm:$0xff]  }
  0xd2   :  { %13594 = vmatpush1.bf16.msra.mxu1 %v20262_v57  ;;  %13554 = vmatprep.subr.bf16.mxu0 %v20267_v35  ;;  %v20331_v57 = vld [vmem:[#allocation2 + $0x1e18] ss:$36 sps:$4 sm:$0xff]  }
  0xd3   :  { %13595 = vmatprep.subr.bf16.mxu1 %v20270_v58  ;;  %13584 = vmatprep.mubr.bf16.mxu0 %v23255_v54  ;;  %v20334_v35 = vld [vmem:[#allocation2 + $0x2298] ss:$36 sps:$4 sm:$0xff]  }
  0xd4   :  { %13625 = vmatprep.mubr.bf16.mxu1 %v23263_v59  ;;  %v20339_v58 = vld [vmem:[#allocation2 + $0x1dd4] ss:$36 sps:$4 sm:$0xff]  }
  0xd5   :  { %13555 = vmatpush1.bf16.msra.mxu0 %v20265_v61  ;;  %v20342_v61 = vld [vmem:[#allocation2 + $0x2254] ss:$36 sps:$4 sm:$0xff]  }
  0xd6   :  { %13596 = vmatpush1.bf16.msra.mxu1 %v20268_v62  ;;  %13556 = vmatprep.subr.bf16.mxu0 %v20273_v63  ;;  %v20337_v62 = vld [vmem:[#allocation2 + $0x1dd0] ss:$36 sps:$4 sm:$0xff]  }
  0xd7   :  { %13597 = vmatprep.subr.bf16.mxu1 %v20276_v1  ;;  %v20340_v63 = vld [vmem:[#allocation2 + $0x2250] ss:$36 sps:$4 sm:$0xff]  }
  0xd8   :  { %v23272_v1 = vld [vmem:[%s24067_s0 + $0x10] sm:$0xff] }
  0xd9   :  { %13557 = vmatpush1.bf16.msra.mxu0 %v20271_v2  ;;  %v20345_v2 = vld [vmem:[#allocation2 + $0x1d8c] ss:$36 sps:$4 sm:$0xff]  }
  0xda   :  { %13598 = vmatpush1.bf16.msra.mxu1 %v20274_v3  ;;  %13558 = vmatprep.subr.bf16.mxu0 %v20279_v4  ;;  %v20348_v3 = vld [vmem:[#allocation2 + $0x220c] ss:$36 sps:$4 sm:$0xff]   ;;  %v23276_v4 = vrot.slane %v23272_v1, %v23175_v49 }
  0xdb   :  { %13599 = vmatprep.subr.bf16.mxu1 %v20282_v5  ;;  %v20343_v5 = vld [vmem:[#allocation2 + $0x1d88] ss:$36 sps:$4 sm:$0xff]  }
  0xdd   :  { %13559 = vmatpush1.bf16.msra.mxu0 %v20277_v7  ;;  %v20346_v7 = vld [vmem:[#allocation2 + $0x2208] ss:$36 sps:$4 sm:$0xff]  }
  0xde   :  { %13600 = vmatpush1.bf16.msra.mxu1 %v20280_v8  ;;  %13560 = vmatprep.subr.bf16.mxu0 %v20285_v9  ;;  %v20351_v8 = vld [vmem:[#allocation2 + $0x1d44] ss:$36 sps:$4 sm:$0xff]  }
  0xdf   :  { %13601 = vmatprep.subr.bf16.mxu1 %v20288_v10  ;;  %v20354_v9 = vld [vmem:[#allocation2 + $0x21c4] ss:$36 sps:$4 sm:$0xff]  }
  0xe0   :  { %v20349_v10 = vld [vmem:[#allocation2 + $0x1d40] ss:$36 sps:$4 sm:$0xff]  }
  0xe1   :  { %13561 = vmatpush1.bf16.msra.mxu0 %v20283_v11  ;;  %v2532_v11 = vcombine.high %v23276_v4, %v23276_v4 }
  0xe2   :  { %13602 = vmatpush1.bf16.msra.mxu1 %v20286_v12  ;;  %13562 = vmatprep.subr.bf16.mxu0 %v20291_v14  ;;  %v20352_v12 = vld [vmem:[#allocation2 + $0x21c0] ss:$36 sps:$4 sm:$0xff]  }
  0xe3   :  { %13603 = vmatprep.subr.bf16.mxu1 %v20294_v15  ;;  %v2366_v14 = vld [vmem:[%s24069_s2] sm:$0xff]  ;;  %v23285_v15 = vrot.slane %v23246_v40, %v23175_v49 }
  0xe5   :  { %13563 = vmatpush1.bf16.msra.mxu0 %v20289_v16  ;;  %v2372_v16 = vsub.s32 0, %v23172_v42 }
  0xe6   :  { %13604 = vmatpush1.bf16.msra.mxu1 %v20292_v18  ;;  %13564 = vmatprep.subr.bf16.mxu0 %v20297_v20  ;;  %v20358_v18 = vld [vmem:[#allocation2 + $0x25fc] ss:$36 sps:$4 sm:$0xff]  }
  0xe7   :  { %13605 = vmatprep.subr.bf16.mxu1 %v20300_v21  ;;  %v20361_v20 = vld [vmem:[#allocation2 + $0x2a7c] ss:$36 sps:$4 sm:$0xff]   ;;  %v2376_v21 = vsub.s32 1, %v23172_v42  ;;  %v2373_v40 = vrot.slane %v2366_v14, %v2372_v16  ;;  %v20392_v16 = vld [vmem:[#allocation2 + $0x2448] ss:$36 sps:$4 sm:$0xff]  }
  0xe9   :  { %13565 = vmatpush1.bf16.msra.mxu0 %v20295_v22  ;;  %v23290_v22 = vrot.slane %v2532_v11, %v23175_v49  ;;  %v20389_v11 = vld [vmem:[#allocation2 + $0x2910] ss:$36 sps:$4 sm:$0xff]  }
  0xea   :  { %13606 = vmatpush1.bf16.msra.mxu1 %v20298_v24  ;;  %13566 = vmatprep.subr.bf16.mxu0 %v20303_v25  ;;  %v20356_v24 = vld [vmem:[#allocation2 + $0x25f8] ss:$36 sps:$4 sm:$0xff]  }
  0xeb   :  { %13607 = vmatprep.subr.bf16.mxu1 %v20306_v27  ;;  %v20359_v25 = vld [vmem:[#allocation2 + $0x2a78] ss:$36 sps:$4 sm:$0xff]   ;;  %v23294_v27 = vcombine.high %v23285_v15, %v23285_v15 }
  0xed   :  { %13567 = vmatpush1.bf16.msra.mxu0 %v20301_v28  ;;  %v20364_v28 = vld [vmem:[#allocation2 + $0x25b4] ss:$36 sps:$4 sm:$0xff]  }
  0xee   :  { %13608 = vmatpush1.bf16.msra.mxu1 %v20304_v29  ;;  %13568 = vmatprep.subr.bf16.mxu0 %v20309_v30  ;;  %v20367_v29 = vld [vmem:[#allocation2 + $0x2a34] ss:$36 sps:$4 sm:$0xff]   ;;  %v2377_v30 = vrot.slane %v2366_v14, %v2376_v21  ;;  %v20397_v14 = vld [vmem:[#allocation2 + $0x28cc] ss:$36 sps:$4 sm:$0xff]   ;;  %v20403_v21 = vld [vmem:[#allocation2 + $0x2884] ss:$36 sps:$4 sm:$0xff]  }
  0xef   :  { %13609 = vmatprep.subr.bf16.mxu1 %v20312_v32  ;;  %v23298_v32 = vcombine.high %v23290_v22, %v23290_v22 }
  0xf1   :  { %13569 = vmatpush2.bf16.msra.mxu0 %v20307_v33 }
  0xf2   :  { %13610 = vmatpush2.bf16.msra.mxu1 %v20310_v34  ;;  %13570 = vmatprep.subr.bf16.mxu0 %v20315_v36  ;;  %v20362_v36 = vld [vmem:[#allocation2 + $0x25b0] ss:$36 sps:$4 sm:$0xff]  }
  0xf3   :  { %13611 = vmatprep.subr.bf16.mxu1 %v20318_v37  ;;  %v20365_v37 = vld [vmem:[#allocation2 + $0x2a30] ss:$36 sps:$4 sm:$0xff]  }
  0xf5   :  { %13571 = vmatpush2.bf16.msra.mxu0 %v20313_v38 }
  0xf6   :  { %13612 = vmatpush2.bf16.msra.mxu1 %v20316_v39  ;;  %13572 = vmatprep.subr.bf16.mxu0 %v20321_v44 }
  0xf7   :  { %13613 = vmatprep.subr.bf16.mxu1 %v20324_v45  ;;  %v20370_v45 = vld [vmem:[#allocation2 + $0x256c] ss:$36 sps:$4 sm:$0xff]  }
  0xf9   :  { %13573 = vmatpush2.bf16.msra.mxu0 %v20319_v46  ;;  %v20373_v46 = vld [vmem:[#allocation2 + $0x29ec] ss:$36 sps:$4 sm:$0xff]  }
  0xfa   :  { %13614 = vmatpush2.bf16.msra.mxu1 %v20322_v47  ;;  %13574 = vmatprep.subr.bf16.mxu0 %v20327_v6 }
  0xfb   :  { %13615 = vmatprep.subr.bf16.mxu1 %v20330_v48  ;;  %v20368_v48 = vld [vmem:[#allocation2 + $0x2568] ss:$36 sps:$4 sm:$0xff]  }
  0xfd   :  { %13575 = vmatpush2.bf16.msra.mxu0 %v20325_v51  ;;  %v20371_v51 = vld [vmem:[#allocation2 + $0x29e8] ss:$36 sps:$4 sm:$0xff]  }
  0xfe   :  { %13616 = vmatpush2.bf16.msra.mxu1 %v20328_v52  ;;  %13576 = vmatprep.subr.bf16.mxu0 %v20333_v53 }
  0xff   :  { %13617 = vmatprep.subr.bf16.mxu1 %v20336_v55 }
 0x101   :  { %13577 = vmatpush2.bf16.msra.mxu0 %v20331_v57 }
 0x102   :  { %13618 = vmatpush2.bf16.msra.mxu1 %v20334_v35  ;;  %13578 = vmatprep.subr.bf16.mxu0 %v20339_v58  ;;  %v20376_v35 = vld [vmem:[#allocation2 + $0x2524] ss:$36 sps:$4 sm:$0xff]  }
 0x103   :  { %13619 = vmatprep.subr.bf16.mxu1 %v20342_v61  ;;  %v20379_v58 = vld [vmem:[#allocation2 + $0x29a4] ss:$36 sps:$4 sm:$0xff]  }
 0x105   :  { %13579 = vmatpush2.bf16.msra.mxu0 %v20337_v62  ;;  %v20374_v62 = vld [vmem:[#allocation2 + $0x2520] ss:$36 sps:$4 sm:$0xff]  }
 0x106   :  { %13620 = vmatpush2.bf16.msra.mxu1 %v20340_v63  ;;  %13580 = vmatprep.subr.bf16.mxu0 %v20345_v2  ;;  %v20377_v63 = vld [vmem:[#allocation2 + $0x29a0] ss:$36 sps:$4 sm:$0xff]  }
 0x107   :  { %13621 = vmatprep.subr.bf16.mxu1 %v20348_v3  ;;  %v20382_v2 = vld [vmem:[#allocation2 + $0x24dc] ss:$36 sps:$4 sm:$0xff]  }
 0x108   :  { %v20385_v3 = vld [vmem:[#allocation2 + $0x295c] ss:$36 sps:$4 sm:$0xff]  }
 0x109   :  { %13581 = vmatpush2.bf16.msra.mxu0 %v20343_v5  ;;  %v20380_v5 = vld [vmem:[#allocation2 + $0x24d8] ss:$36 sps:$4 sm:$0xff]  }
 0x10a   :  { %13622 = vmatpush2.bf16.msra.mxu1 %v20346_v7  ;;  %13582 = vmatprep.subr.bf16.mxu0 %v20351_v8  ;;  %v20383_v7 = vld [vmem:[#allocation2 + $0x2958] ss:$36 sps:$4 sm:$0xff]  }
 0x10b   :  { %13623 = vmatprep.subr.bf16.mxu1 %v20354_v9  ;;  %v20388_v8 = vld [vmem:[#allocation2 + $0x2494] ss:$36 sps:$4 sm:$0xff]  }
 0x10c   :  { %v20391_v9 = vld [vmem:[#allocation2 + $0x2914] ss:$36 sps:$4 sm:$0xff]  }
 0x10d   :  { %13583 = vmatpush2.bf16.msra.mxu0 %v20349_v10  ;;  %v20386_v10 = vld [vmem:[#allocation2 + $0x2490] ss:$36 sps:$4 sm:$0xff]  }
 0x10e   :  { %13624 = vmatpush2.bf16.msra.mxu1 %v20352_v12  ;;  %13634 = vmatprep.subr.bf16.mxu0 %v20358_v18  ;;  %v20394_v12 = vld [vmem:[#allocation2 + $0x244c] ss:$36 sps:$4 sm:$0xff]  }
 0x10f   :  { %13675 = vmatprep.subr.bf16.mxu1 %v20361_v20  ;;  %v20395_v18 = vld [vmem:[#allocation2 + $0x28c8] ss:$36 sps:$4 sm:$0xff]  }
 0x110   :  { %v13340_v33 = vpop.f32.mrf.mxu0  ;;  %13585 = vmatmul.mubr.bf16.vlgmr.msra.gmra.mxu0 %v23285_v15  ;;  %v20400_v20 = vld [vmem:[#allocation2 + $0x2404] ss:$36 sps:$4 sm:$0xff]  }
 0x111   :  { %13626 = vmatmul.mubr.bf16.vlgmr.msra.gmra.mxu1 %v23294_v27  ;;  %v13381_v34 = vpop.f32.mrf.mxu1  ;;  %v13341_v38 = vadd.f32 %v13340_v33, %v2373_v40  ;;  %13635 = vmatpush1.bf16.msra.mxu0 %v20356_v24  ;;  %v20398_v24 = vld [vmem:[#allocation2 + $0x2400] ss:$36 sps:$4 sm:$0xff]   ;;  %v20412_v33 = vld [vmem:[#allocation2 + $0x27f4] ss:$36 sps:$4 sm:$0xff]  }
 0x112   :  { %13676 = vmatpush1.bf16.msra.mxu1 %v20359_v25  ;;  %v13342_v39 = vpop.f32.mrf.mxu0  ;;  %13636 = vmatprep.subr.bf16.mxu0 %v20364_v28  ;;  %v20401_v25 = vld [vmem:[#allocation2 + $0x2880] ss:$36 sps:$4 sm:$0xff]  }
 0x113   :  { %v13383_v44 = vpop.f32.mrf.mxu1  ;;  %13677 = vmatprep.subr.bf16.mxu1 %v20367_v29  ;;  %v13343_v47 = vadd.f32 %v13342_v39, %v2377_v30  ;;  %v23302_v6 = vadd.f32 %v13381_v34, %v13341_v38  ;;  %13666 = vmatprep.mubr.bf16.mxu0 %v23290_v22  ;;  %v20406_v40 = vld [vmem:[#allocation2 + $0x283c] ss:$36 sps:$4 sm:$0xff]   ;;  %v20415_v34 = vld [vmem:[#allocation2 + $0x2c74] ss:$36 sps:$4 sm:$0xff]   ;;  %v20418_v38 = vld [vmem:[#allocation2 + $0x27ac] ss:$36 sps:$4 sm:$0xff]  }
 0x114   :  { %13707 = vmatprep.mubr.bf16.mxu1 %v23298_v32  ;;  %v13344_v52 = vpop.f32.mrf.mxu0  ;;  %v20409_v28 = vld [vmem:[#allocation2 + $0x2cbc] ss:$36 sps:$4 sm:$0xff]   ;;  %v20421_v39 = vld [vmem:[#allocation2 + $0x2c2c] ss:$36 sps:$4 sm:$0xff]  }
 0x115   :  { %v13385_v53 = vpop.f32.mrf.mxu1  ;;  %v23306_v55 = vadd.f32 %v13383_v44, %v13343_v47  ;;  %13637 = vmatpush1.bf16.msra.mxu0 %v20362_v36  ;;  %v20404_v29 = vld [vmem:[#allocation2 + $0x2838] ss:$36 sps:$4 sm:$0xff]   ;;  %v20410_v36 = vld [vmem:[#allocation2 + $0x27f0] ss:$36 sps:$4 sm:$0xff]   ;;  %v20416_v44 = vld [vmem:[#allocation2 + $0x27a8] ss:$36 sps:$4 sm:$0xff]  }
 0x116   :  { %13678 = vmatpush1.bf16.msra.mxu1 %v20365_v37  ;;  %v13345_v57 = vpop.f32.mrf.mxu0  ;;  %13638 = vmatprep.subr.bf16.mxu0 %v20370_v45  ;;  %v20407_v30 = vld [vmem:[#allocation2 + $0x2cb8] ss:$36 sps:$4 sm:$0xff]   ;;  %v20413_v37 = vld [vmem:[#allocation2 + $0x2c70] ss:$36 sps:$4 sm:$0xff]   ;;  %v20419_v45 = vld [vmem:[#allocation2 + $0x2c28] ss:$36 sps:$4 sm:$0xff]  }
 0x117   :  { %13679 = vmatprep.subr.bf16.mxu1 %v20373_v46  ;;  %v13386_v61 = vpop.f32.mrf.mxu1  ;;  %v20424_v46 = vld [vmem:[#allocation2 + $0x2764] ss:$36 sps:$4 sm:$0xff]   ;;  %v20430_v52 = vld [vmem:[#allocation2 + $0x271c] ss:$36 sps:$4 sm:$0xff]  }
 0x118   :  { %v20427_v47 = vld [vmem:[#allocation2 + $0x2be4] ss:$36 sps:$4 sm:$0xff]   ;;  %v20433_v53 = vld [vmem:[#allocation2 + $0x2b9c] ss:$36 sps:$4 sm:$0xff]   ;;  %v20439_v61 = vld [vmem:[#allocation2 + $0x2b54] ss:$36 sps:$4 sm:$0xff]  }
 0x119   :  { %13639 = vmatpush1.bf16.msra.mxu0 %v20368_v48  ;;  %v20422_v48 = vld [vmem:[#allocation2 + $0x2760] ss:$36 sps:$4 sm:$0xff]   ;;  %v20428_v57 = vld [vmem:[#allocation2 + $0x2718] ss:$36 sps:$4 sm:$0xff]  }
 0x11a   :  { %13680 = vmatpush1.bf16.msra.mxu1 %v20371_v51  ;;  %13640 = vmatprep.subr.bf16.mxu0 %v20376_v35  ;;  %v20425_v51 = vld [vmem:[#allocation2 + $0x2be0] ss:$36 sps:$4 sm:$0xff]   ;;  %v20431_v35 = vld [vmem:[#allocation2 + $0x2b98] ss:$36 sps:$4 sm:$0xff]  }
 0x11b   :  { %13681 = vmatprep.subr.bf16.mxu1 %v20379_v58  ;;  %v20436_v58 = vld [vmem:[#allocation2 + $0x26d4] ss:$36 sps:$4 sm:$0xff]  }
 0x11d   :  { %13641 = vmatpush1.bf16.msra.mxu0 %v20374_v62  ;;  %v2517_v62 = vcombine.high %v23272_v1, %v23272_v1 }
 0x11e   :  { %13682 = vmatpush1.bf16.msra.mxu1 %v20377_v63  ;;  %13642 = vmatprep.subr.bf16.mxu0 %v20382_v2  ;;  %v20434_v63 = vld [vmem:[#allocation2 + $0x26d0] ss:$36 sps:$4 sm:$0xff]  }
 0x11f   :  { %13683 = vmatprep.subr.bf16.mxu1 %v20385_v3  ;;  %v20437_v2 = vld [vmem:[#allocation2 + $0x2b50] ss:$36 sps:$4 sm:$0xff]  }
 0x120   :  { %v20442_v3 = vld [vmem:[#allocation2 + $0x268c] ss:$36 sps:$4 sm:$0xff]  }
 0x121   :  { %13643 = vmatpush1.bf16.msra.mxu0 %v20380_v5  ;;  %v20445_v5 = vld [vmem:[#allocation2 + $0x2b0c] ss:$36 sps:$4 sm:$0xff]  }
 0x122   :  { %13684 = vmatpush1.bf16.msra.mxu1 %v20383_v7  ;;  %13644 = vmatprep.subr.bf16.mxu0 %v20388_v8  ;;  %v23311_v7 = vrot.slane %v2517_v62, %v23175_v49  ;;  %v20440_v8 = vld [vmem:[#allocation2 + $0x2688] ss:$36 sps:$4 sm:$0xff]   ;;  %v20473_v62 = vld [vmem:[#allocation2 + $0x32a0] ss:$36 sps:$4 sm:$0xff]  }
 0x123   :  { %13685 = vmatprep.subr.bf16.mxu1 %v20391_v9  ;;  %v20443_v9 = vld [vmem:[#allocation2 + $0x2b08] ss:$36 sps:$4 sm:$0xff]  }
 0x124   :  { %v2533_v1 = vcombine.high %v23311_v7, %v23311_v7 }
 0x125   :  { %13645 = vmatpush1.bf16.msra.mxu0 %v20386_v10  ;;  %v20448_v10 = vld [vmem:[#allocation2 + $0x2644] ss:$36 sps:$4 sm:$0xff]  }
 0x126   :  { %13686 = vmatpush1.bf16.msra.mxu1 %v20389_v11  ;;  %13646 = vmatprep.subr.bf16.mxu0 %v20394_v12  ;;  %v20451_v11 = vld [vmem:[#allocation2 + $0x2ac4] ss:$36 sps:$4 sm:$0xff]   ;;  %v23317_v12 = vrot.slane %v23276_v4, %v23175_v49  ;;  %v20460_v4 = vld [vmem:[#allocation2 + $0x2eb4] ss:$36 sps:$4 sm:$0xff]  }
 0x127   :  { %13687 = vmatprep.subr.bf16.mxu1 %v20397_v14  ;;  %v20446_v14 = vld [vmem:[#allocation2 + $0x2640] ss:$36 sps:$4 sm:$0xff]  }
 0x129   :  { %13647 = vmatpush1.bf16.msra.mxu0 %v20392_v16  ;;  %v20449_v16 = vld [vmem:[#allocation2 + $0x2ac0] ss:$36 sps:$4 sm:$0xff]  }
 0x12a   :  { %13688 = vmatpush1.bf16.msra.mxu1 %v20395_v18  ;;  %13648 = vmatprep.subr.bf16.mxu0 %v20400_v20  ;;  %v20454_v18 = vld [vmem:[#allocation2 + $0x2efc] ss:$36 sps:$4 sm:$0xff]  }
 0x12b   :  { %13689 = vmatprep.subr.bf16.mxu1 %v20403_v21  ;;  %v20457_v20 = vld [vmem:[#allocation2 + $0x337c] ss:$36 sps:$4 sm:$0xff]  }
 0x12c   :  { %v20452_v21 = vld [vmem:[#allocation2 + $0x2ef8] ss:$36 sps:$4 sm:$0xff]  }
 0x12d   :  { %13649 = vmatpush1.bf16.msra.mxu0 %v20398_v24  ;;  %v20455_v24 = vld [vmem:[#allocation2 + $0x3378] ss:$36 sps:$4 sm:$0xff]  }
 0x12e   :  { %13690 = vmatpush1.bf16.msra.mxu1 %v20401_v25  ;;  %13650 = vmatprep.subr.bf16.mxu0 %v20406_v40  ;;  %v23320_v25 = vrot.slane %v2533_v1, %v23175_v49  ;;  %v23324_v40 = vcombine.high %v23317_v12, %v23317_v12  ;;  %v20490_v1 = vld [vmem:[#allocation2 + $0x2d4c] ss:$36 sps:$4 sm:$0xff]  }
 0x12f   :  { %13691 = vmatprep.subr.bf16.mxu1 %v20409_v28  ;;  %v20463_v28 = vld [vmem:[#allocation2 + $0x3334] ss:$36 sps:$4 sm:$0xff]  }
 0x131   :  { %13651 = vmatpush2.bf16.msra.mxu0 %v20404_v29  ;;  %v20458_v29 = vld [vmem:[#allocation2 + $0x2eb0] ss:$36 sps:$4 sm:$0xff]  }
 0x132   :  { %13692 = vmatpush2.bf16.msra.mxu1 %v20407_v30  ;;  %13652 = vmatprep.subr.bf16.mxu0 %v20412_v33  ;;  %v20461_v30 = vld [vmem:[#allocation2 + $0x3330] ss:$36 sps:$4 sm:$0xff]   ;;  %v23328_v33 = vcombine.high %v23320_v25, %v23320_v25 }
 0x133   :  { %13693 = vmatprep.subr.bf16.mxu1 %v20415_v34 }
 0x135   :  { %13653 = vmatpush2.bf16.msra.mxu0 %v20410_v36 }
 0x136   :  { %13694 = vmatpush2.bf16.msra.mxu1 %v20413_v37  ;;  %13654 = vmatprep.subr.bf16.mxu0 %v20418_v38 }
 0x137   :  { %13695 = vmatprep.subr.bf16.mxu1 %v20421_v39 }
 0x139   :  { %13655 = vmatpush2.bf16.msra.mxu0 %v20416_v44  ;;  %v20466_v44 = vld [vmem:[#allocation2 + $0x2e6c] ss:$36 sps:$4 sm:$0xff]  }
 0x13a   :  { %13696 = vmatpush2.bf16.msra.mxu1 %v20419_v45  ;;  %13656 = vmatprep.subr.bf16.mxu0 %v20424_v46  ;;  %v20469_v45 = vld [vmem:[#allocation2 + $0x32ec] ss:$36 sps:$4 sm:$0xff]  }
 0x13b   :  { %13697 = vmatprep.subr.bf16.mxu1 %v20427_v47 }
 0x13d   :  { %13657 = vmatpush2.bf16.msra.mxu0 %v20422_v48  ;;  %v20464_v48 = vld [vmem:[#allocation2 + $0x2e68] ss:$36 sps:$4 sm:$0xff]  }
 0x13e   :  { %13698 = vmatpush2.bf16.msra.mxu1 %v20425_v51  ;;  %13658 = vmatprep.subr.bf16.mxu0 %v20430_v52  ;;  %v20467_v51 = vld [vmem:[#allocation2 + $0x32e8] ss:$36 sps:$4 sm:$0xff]  }
 0x13f   :  { %13699 = vmatprep.subr.bf16.mxu1 %v20433_v53 }
 0x141   :  { %13659 = vmatpush2.bf16.msra.mxu0 %v20428_v57 }
 0x142   :  { %13700 = vmatpush2.bf16.msra.mxu1 %v20431_v35  ;;  %13660 = vmatprep.subr.bf16.mxu0 %v20436_v58  ;;  %v20472_v35 = vld [vmem:[#allocation2 + $0x2e24] ss:$36 sps:$4 sm:$0xff]  }
 0x143   :  { %13701 = vmatprep.subr.bf16.mxu1 %v20439_v61  ;;  %v20475_v58 = vld [vmem:[#allocation2 + $0x32a4] ss:$36 sps:$4 sm:$0xff]  }
 0x144   :  { %v20470_v61 = vld [vmem:[#allocation2 + $0x2e20] ss:$36 sps:$4 sm:$0xff]  }
 0x145   :  { %13661 = vmatpush2.bf16.msra.mxu0 %v20434_v63  ;;  %v20478_v63 = vld [vmem:[#allocation2 + $0x2ddc] ss:$36 sps:$4 sm:$0xff]  }
 0x146   :  { %13702 = vmatpush2.bf16.msra.mxu1 %v20437_v2  ;;  %13662 = vmatprep.subr.bf16.mxu0 %v20442_v3  ;;  %v20481_v2 = vld [vmem:[#allocation2 + $0x325c] ss:$36 sps:$4 sm:$0xff]  }
 0x147   :  { %13703 = vmatprep.subr.bf16.mxu1 %v20445_v5  ;;  %v20476_v3 = vld [vmem:[#allocation2 + $0x2dd8] ss:$36 sps:$4 sm:$0xff]  }
 0x148   :  { %v20479_v5 = vld [vmem:[#allocation2 + $0x3258] ss:$36 sps:$4 sm:$0xff]  }
 0x149   :  { %13663 = vmatpush2.bf16.msra.mxu0 %v20440_v8  ;;  %v20484_v8 = vld [vmem:[#allocation2 + $0x2d94] ss:$36 sps:$4 sm:$0xff]  }
 0x14a   :  { %13704 = vmatpush2.bf16.msra.mxu1 %v20443_v9  ;;  %13664 = vmatprep.subr.bf16.mxu0 %v20448_v10  ;;  %v20487_v9 = vld [vmem:[#allocation2 + $0x3214] ss:$36 sps:$4 sm:$0xff]  }
 0x14b   :  { %13705 = vmatprep.subr.bf16.mxu1 %v20451_v11  ;;  %v20482_v10 = vld [vmem:[#allocation2 + $0x2d90] ss:$36 sps:$4 sm:$0xff]  }
 0x14c   :  { %v20485_v11 = vld [vmem:[#allocation2 + $0x3210] ss:$36 sps:$4 sm:$0xff]  }
 0x14d   :  { %13665 = vmatpush2.bf16.msra.mxu0 %v20446_v14  ;;  %v20493_v14 = vld [vmem:[#allocation2 + $0x31cc] ss:$36 sps:$4 sm:$0xff]  }
 0x14e   :  { %13706 = vmatpush2.bf16.msra.mxu1 %v20449_v16  ;;  %13716 = vmatprep.subr.bf16.mxu0 %v20454_v18  ;;  %v20488_v16 = vld [vmem:[#allocation2 + $0x2d48] ss:$36 sps:$4 sm:$0xff]  }
 0x14f   :  { %13757 = vmatprep.subr.bf16.mxu1 %v20457_v20  ;;  %v20491_v18 = vld [vmem:[#allocation2 + $0x31c8] ss:$36 sps:$4 sm:$0xff]  }
 0x150   :  { %v13422_v34 = vpop.f32.mrf.mxu0  ;;  %13667 = vmatmul.mubr.bf16.vlgmr.msra.gmra.mxu0 %v23317_v12  ;;  %v20496_v20 = vld [vmem:[#allocation2 + $0x2d04] ss:$36 sps:$4 sm:$0xff]  }
 0x151   :  { %13708 = vmatmul.mubr.bf16.vlgmr.msra.gmra.mxu1 %v23324_v40  ;;  %v13463_v36 = vpop.f32.mrf.mxu1  ;;  %v13423_v37 = vadd.f32 %v13422_v34, %v23302_v6  ;;  %13717 = vmatpush1.bf16.msra.mxu0 %v20452_v21  ;;  %v20499_v21 = vld [vmem:[#allocation2 + $0x3184] ss:$36 sps:$4 sm:$0xff]   ;;  %v20503_v34 = vld [vmem:[#allocation2 + $0x35b8] ss:$36 sps:$4 sm:$0xff]  }
 0x152   :  { %13758 = vmatpush1.bf16.msra.mxu1 %v20455_v24  ;;  %v13424_v38 = vpop.f32.mrf.mxu0  ;;  %13718 = vmatprep.subr.bf16.mxu0 %v20460_v4  ;;  %v20494_v24 = vld [vmem:[#allocation2 + $0x2d00] ss:$36 sps:$4 sm:$0xff]  }
 0x153   :  { %v13465_v39 = vpop.f32.mrf.mxu1  ;;  %13759 = vmatprep.subr.bf16.mxu1 %v20463_v28  ;;  %v13425_v46 = vadd.f32 %v13424_v38, %v23306_v55  ;;  %v23334_v47 = vadd.f32 %v13463_v36, %v13423_v37  ;;  %13748 = vmatprep.mubr.bf16.mxu0 %v23320_v25  ;;  %v20497_v4 = vld [vmem:[#allocation2 + $0x3180] ss:$36 sps:$4 sm:$0xff]   ;;  %v20508_v36 = vld [vmem:[#allocation2 + $0x30f4] ss:$36 sps:$4 sm:$0xff]  }
 0x154   :  { %13789 = vmatprep.mubr.bf16.mxu1 %v23328_v33  ;;  %v13426_v52 = vpop.f32.mrf.mxu0  ;;  %v20502_v28 = vld [vmem:[#allocation2 + $0x313c] ss:$36 sps:$4 sm:$0xff]   ;;  %v20511_v37 = vld [vmem:[#allocation2 + $0x3574] ss:$36 sps:$4 sm:$0xff]  }
 0x155   :  { %v13467_v6 = vpop.f32.mrf.mxu1  ;;  %v23338_v53 = vadd.f32 %v13465_v39, %v13425_v46  ;;  %13719 = vmatpush1.bf16.msra.mxu0 %v20458_v29  ;;  %v20505_v29 = vld [vmem:[#allocation2 + $0x35bc] ss:$36 sps:$4 sm:$0xff]   ;;  %v20506_v38 = vld [vmem:[#allocation2 + $0x30f0] ss:$36 sps:$4 sm:$0xff]   ;;  %v20512_v46 = vld [vmem:[#allocation2 + $0x30a8] ss:$36 sps:$4 sm:$0xff]  }
 0x156   :  { %13760 = vmatpush1.bf16.msra.mxu1 %v20461_v30  ;;  %v13427_v57 = vpop.f32.mrf.mxu0  ;;  %13720 = vmatprep.subr.bf16.mxu0 %v20466_v44  ;;  %v20500_v30 = vld [vmem:[#allocation2 + $0x3138] ss:$36 sps:$4 sm:$0xff]   ;;  %v20509_v39 = vld [vmem:[#allocation2 + $0x3570] ss:$36 sps:$4 sm:$0xff]   ;;  %v20523_v52 = vld [vmem:[#allocation2 + $0x34e4] ss:$36 sps:$4 sm:$0xff]  }
 0x157   :  { %13761 = vmatprep.subr.bf16.mxu1 %v20469_v45  ;;  %v13468_v55 = vpop.f32.mrf.mxu1  ;;  %v20514_v44 = vld [vmem:[#allocation2 + $0x30ac] ss:$36 sps:$4 sm:$0xff]   ;;  %v20518_v6 = vld [vmem:[#allocation2 + $0x3060] ss:$36 sps:$4 sm:$0xff]  }
 0x158   :  { %v20517_v45 = vld [vmem:[#allocation2 + $0x352c] ss:$36 sps:$4 sm:$0xff]   ;;  %v20521_v57 = vld [vmem:[#allocation2 + $0x34e0] ss:$36 sps:$4 sm:$0xff]   ;;  %v20524_v55 = vld [vmem:[#allocation2 + $0x3018] ss:$36 sps:$4 sm:$0xff]  }
 0x159   :  { %13721 = vmatpush1.bf16.msra.mxu0 %v20464_v48  ;;  %v20515_v48 = vld [vmem:[#allocation2 + $0x3528] ss:$36 sps:$4 sm:$0xff]  }
 0x15a   :  { %13762 = vmatpush1.bf16.msra.mxu1 %v20467_v51  ;;  %13722 = vmatprep.subr.bf16.mxu0 %v20472_v35  ;;  %v20520_v51 = vld [vmem:[#allocation2 + $0x3064] ss:$36 sps:$4 sm:$0xff]   ;;  %v20526_v35 = vld [vmem:[#allocation2 + $0x301c] ss:$36 sps:$4 sm:$0xff]  }
 0x15b   :  { %13763 = vmatprep.subr.bf16.mxu1 %v20475_v58  ;;  %v20529_v58 = vld [vmem:[#allocation2 + $0x349c] ss:$36 sps:$4 sm:$0xff]  }
 0x15d   :  { %13723 = vmatpush1.bf16.msra.mxu0 %v20470_v61  ;;  %v20527_v61 = vld [vmem:[#allocation2 + $0x3498] ss:$36 sps:$4 sm:$0xff]  }
 0x15e   :  { %13764 = vmatpush1.bf16.msra.mxu1 %v20473_v62  ;;  %13724 = vmatprep.subr.bf16.mxu0 %v20478_v63  ;;  %v20532_v62 = vld [vmem:[#allocation2 + $0x2fd4] ss:$36 sps:$4 sm:$0xff]  }
 0x15f   :  { %13765 = vmatprep.subr.bf16.mxu1 %v20481_v2  ;;  %v20535_v63 = vld [vmem:[#allocation2 + $0x3454] ss:$36 sps:$4 sm:$0xff]  }
 0x160   :  { %v23343_v2 = vld [vmem:[%s24067_s0 + $0x18] sm:$0x1f] }
 0x161   :  { %13725 = vmatpush1.bf16.msra.mxu0 %v20476_v3  ;;  %v20530_v3 = vld [vmem:[#allocation2 + $0x2fd0] ss:$36 sps:$4 sm:$0xff]  }
 0x162   :  { %13766 = vmatpush1.bf16.msra.mxu1 %v20479_v5  ;;  %13726 = vmatprep.subr.bf16.mxu0 %v20484_v8  ;;  %v20533_v5 = vld [vmem:[#allocation2 + $0x3450] ss:$36 sps:$4 sm:$0xff]  }
 0x163   :  { %13767 = vmatprep.subr.bf16.mxu1 %v20487_v9  ;;  %v20538_v8 = vld [vmem:[#allocation2 + $0x2f8c] ss:$36 sps:$4 sm:$0xff]  }
 0x164   :  { %v20541_v9 = vld [vmem:[#allocation2 + $0x340c] ss:$36 sps:$4 sm:$0xff]  }
 0x165   :  { %13727 = vmatpush1.bf16.msra.mxu0 %v20482_v10  ;;  %v23347_v10 = vrot.slane %v23343_v2, %v23175_v49 }
 0x166   :  { %13768 = vmatpush1.bf16.msra.mxu1 %v20485_v11  ;;  %13728 = vmatprep.subr.bf16.mxu0 %v20490_v1  ;;  %v20536_v11 = vld [vmem:[#allocation2 + $0x2f88] ss:$36 sps:$4 sm:$0xff]  }
 0x167   :  { %13769 = vmatprep.subr.bf16.mxu1 %v20493_v14  ;;  %v20539_v1 = vld [vmem:[#allocation2 + $0x3408] ss:$36 sps:$4 sm:$0xff]  }
 0x168   :  { %v20544_v14 = vld [vmem:[#allocation2 + $0x2f44] ss:$36 sps:$4 sm:$0xff]  }
 0x169   :  { %13729 = vmatpush1.bf16.msra.mxu0 %v20488_v16  ;;  %v20547_v16 = vld [vmem:[#allocation2 + $0x33c4] ss:$36 sps:$4 sm:$0xff]  }
 0x16a   :  { %13770 = vmatpush1.bf16.msra.mxu1 %v20491_v18  ;;  %13730 = vmatprep.subr.bf16.mxu0 %v20496_v20  ;;  %v2581_v18 = vcombine.high %v23347_v10, %v23347_v10  ;;  %v23353_v20 = vrot.slane %v23311_v7, %v23175_v49  ;;  %v20557_v7 = vld [vmem:[#allocation2 + $0x37b4] ss:$36 sps:$4 sm:$0xff]  }
 0x16b   :  { %13771 = vmatprep.subr.bf16.mxu1 %v20499_v21  ;;  %v20542_v21 = vld [vmem:[#allocation2 + $0x2f40] ss:$36 sps:$4 sm:$0xff]  }
 0x16d   :  { %13731 = vmatpush1.bf16.msra.mxu0 %v20494_v24  ;;  %v20545_v24 = vld [vmem:[#allocation2 + $0x33c0] ss:$36 sps:$4 sm:$0xff]  }
 0x16e   :  { %13772 = vmatpush1.bf16.msra.mxu1 %v20497_v4  ;;  %13732 = vmatprep.subr.bf16.mxu0 %v20502_v28  ;;  %v20551_v4 = vld [vmem:[#allocation2 + $0x37fc] ss:$36 sps:$4 sm:$0xff]  }
 0x16f   :  { %13773 = vmatprep.subr.bf16.mxu1 %v20505_v29  ;;  %v20554_v28 = vld [vmem:[#allocation2 + $0x3c7c] ss:$36 sps:$4 sm:$0xff]  }
 0x170   :  { %v20549_v29 = vld [vmem:[#allocation2 + $0x37f8] ss:$36 sps:$4 sm:$0xff]  }
 0x171   :  { %13733 = vmatpush2.bf16.msra.mxu0 %v20500_v30  ;;  %v20552_v30 = vld [vmem:[#allocation2 + $0x3c78] ss:$36 sps:$4 sm:$0xff]  }
 0x172   :  { %13774 = vmatpush2.bf16.msra.mxu1 %v20503_v34  ;;  %13734 = vmatprep.subr.bf16.mxu0 %v20508_v36  ;;  %v23356_v34 = vrot.slane %v2581_v18, %v23175_v49  ;;  %v23360_v36 = vcombine.high %v23353_v20, %v23353_v20  ;;  %v20576_v18 = vld [vmem:[#allocation2 + $0x3b58] ss:$36 sps:$4 sm:$0xff]  }
 0x173   :  { %13775 = vmatprep.subr.bf16.mxu1 %v20511_v37  ;;  %v20560_v37 = vld [vmem:[#allocation2 + $0x3c34] ss:$36 sps:$4 sm:$0xff]  }
 0x175   :  { %13735 = vmatpush2.bf16.msra.mxu0 %v20506_v38  ;;  %v20555_v38 = vld [vmem:[#allocation2 + $0x37b0] ss:$36 sps:$4 sm:$0xff]  }
 0x176   :  { %13776 = vmatpush2.bf16.msra.mxu1 %v20509_v39  ;;  %13736 = vmatprep.subr.bf16.mxu0 %v20514_v44  ;;  %v20558_v39 = vld [vmem:[#allocation2 + $0x3c30] ss:$36 sps:$4 sm:$0xff]   ;;  %v23364_v44 = vcombine.high %v23356_v34, %v23356_v34 }
 0x177   :  { %13777 = vmatprep.subr.bf16.mxu1 %v20517_v45 }
 0x179   :  { %13737 = vmatpush2.bf16.msra.mxu0 %v20512_v46 }
 0x17a   :  { %13778 = vmatpush2.bf16.msra.mxu1 %v20515_v48  ;;  %13738 = vmatprep.subr.bf16.mxu0 %v20520_v51 }
 0x17b   :  { %13779 = vmatprep.subr.bf16.mxu1 %v20523_v52 }
 0x17d   :  { %13739 = vmatpush2.bf16.msra.mxu0 %v20518_v6  ;;  %v20563_v6 = vld [vmem:[#allocation2 + $0x376c] ss:$36 sps:$4 sm:$0xff]  }
 0x17e   :  { %13780 = vmatpush2.bf16.msra.mxu1 %v20521_v57  ;;  %13740 = vmatprep.subr.bf16.mxu0 %v20526_v35  ;;  %v20566_v57 = vld [vmem:[#allocation2 + $0x3bec] ss:$36 sps:$4 sm:$0xff]  }
 0x17f   :  { %13781 = vmatprep.subr.bf16.mxu1 %v20529_v58 }
 0x181   :  { %13741 = vmatpush2.bf16.msra.mxu0 %v20524_v55  ;;  %v20561_v55 = vld [vmem:[#allocation2 + $0x3768] ss:$36 sps:$4 sm:$0xff]  }
 0x182   :  { %13782 = vmatpush2.bf16.msra.mxu1 %v20527_v61  ;;  %13742 = vmatprep.subr.bf16.mxu0 %v20532_v62  ;;  %v20564_v61 = vld [vmem:[#allocation2 + $0x3be8] ss:$36 sps:$4 sm:$0xff]  }
 0x183   :  { %13783 = vmatprep.subr.bf16.mxu1 %v20535_v63 }
 0x185   :  { %13743 = vmatpush2.bf16.msra.mxu0 %v20530_v3 }
 0x186   :  { %13784 = vmatpush2.bf16.msra.mxu1 %v20533_v5  ;;  %13744 = vmatprep.subr.bf16.mxu0 %v20538_v8  ;;  %v20569_v5 = vld [vmem:[#allocation2 + $0x3724] ss:$36 sps:$4 sm:$0xff]  }
 0x187   :  { %13785 = vmatprep.subr.bf16.mxu1 %v20541_v9  ;;  %v20572_v8 = vld [vmem:[#allocation2 + $0x3ba4] ss:$36 sps:$4 sm:$0xff]  }
 0x188   :  { %v20567_v9 = vld [vmem:[#allocation2 + $0x3720] ss:$36 sps:$4 sm:$0xff]  }
 0x189   :  { %13745 = vmatpush2.bf16.msra.mxu0 %v20536_v11  ;;  %v20570_v11 = vld [vmem:[#allocation2 + $0x3ba0] ss:$36 sps:$4 sm:$0xff]  }
 0x18a   :  { %13786 = vmatpush2.bf16.msra.mxu1 %v20539_v1  ;;  %13746 = vmatprep.subr.bf16.mxu0 %v20544_v14  ;;  %v20575_v1 = vld [vmem:[#allocation2 + $0x36dc] ss:$36 sps:$4 sm:$0xff]  }
 0x18b   :  { %13787 = vmatprep.subr.bf16.mxu1 %v20547_v16  ;;  %v20578_v14 = vld [vmem:[#allocation2 + $0x3b5c] ss:$36 sps:$4 sm:$0xff]  }
 0x18c   :  { %v20573_v16 = vld [vmem:[#allocation2 + $0x36d8] ss:$36 sps:$4 sm:$0xff]  }
 0x18d   :  { %13747 = vmatpush2.bf16.msra.mxu0 %v20542_v21  ;;  %v20581_v21 = vld [vmem:[#allocation2 + $0x3694] ss:$36 sps:$4 sm:$0xff]  }
 0x18e   :  { %13788 = vmatpush2.bf16.msra.mxu1 %v20545_v24  ;;  %13798 = vmatprep.subr.bf16.mxu0 %v20551_v4  ;;  %v20584_v24 = vld [vmem:[#allocation2 + $0x3b14] ss:$36 sps:$4 sm:$0xff]  }
 0x18f   :  { %13839 = vmatprep.subr.bf16.mxu1 %v20554_v28  ;;  %v20579_v4 = vld [vmem:[#allocation2 + $0x3690] ss:$36 sps:$4 sm:$0xff]  }
 0x190   :  { %v13504_v45 = vpop.f32.mrf.mxu0  ;;  %13749 = vmatmul.mubr.bf16.vlgmr.msra.gmra.mxu0 %v23353_v20  ;;  %v20582_v28 = vld [vmem:[#allocation2 + $0x3b10] ss:$36 sps:$4 sm:$0xff]  }
 0x191   :  { %13790 = vmatmul.mubr.bf16.vlgmr.msra.gmra.mxu1 %v23360_v36  ;;  %v13545_v46 = vpop.f32.mrf.mxu1  ;;  %v13505_v48 = vadd.f32 %v13504_v45, %v23334_v47  ;;  %13799 = vmatpush1.bf16.msra.mxu0 %v20549_v29  ;;  %v20587_v29 = vld [vmem:[#allocation2 + $0x364c] ss:$36 sps:$4 sm:$0xff]   ;;  %v20591_v45 = vld [vmem:[#allocation2 + $0x3600] ss:$36 sps:$4 sm:$0xff]  }
 0x192   :  { %13840 = vmatpush1.bf16.msra.mxu1 %v20552_v30  ;;  %v13506_v51 = vpop.f32.mrf.mxu0  ;;  %13800 = vmatprep.subr.bf16.mxu0 %v20557_v7  ;;  %v20590_v30 = vld [vmem:[#allocation2 + $0x3acc] ss:$36 sps:$4 sm:$0xff]  }
 0x193   :  { %v13547_v52 = vpop.f32.mrf.mxu1  ;;  %13841 = vmatprep.subr.bf16.mxu1 %v20560_v37  ;;  %v13507_v35 = vadd.f32 %v13506_v51, %v23338_v53  ;;  %v23370_v58 = vadd.f32 %v13545_v46, %v13505_v48  ;;  %13830 = vmatprep.mubr.bf16.mxu0 %v23356_v34  ;;  %v20585_v7 = vld [vmem:[#allocation2 + $0x3648] ss:$36 sps:$4 sm:$0xff]   ;;  %v20594_v46 = vld [vmem:[#allocation2 + $0x3a80] ss:$36 sps:$4 sm:$0xff]  }
 0x194   :  { %13871 = vmatprep.mubr.bf16.mxu1 %v23364_v44  ;;  %v13508_v62 = vpop.f32.mrf.mxu0  ;;  %v20588_v37 = vld [vmem:[#allocation2 + $0x3ac8] ss:$36 sps:$4 sm:$0xff]   ;;  %v20599_v48 = vld [vmem:[#allocation2 + $0x3a3c] ss:$36 sps:$4 sm:$0xff]  }
 0x195   :  { %v13549_v47 = vpop.f32.mrf.mxu1  ;;  %v23374_v63 = vadd.f32 %v13547_v52, %v13507_v35  ;;  %13801 = vmatpush1.bf16.msra.mxu0 %v20555_v38  ;;  %v20593_v38 = vld [vmem:[#allocation2 + $0x3604] ss:$36 sps:$4 sm:$0xff]   ;;  %v20602_v51 = vld [vmem:[#allocation2 + $0x3ebc] ss:$36 sps:$4 sm:$0xff]   ;;  %v20608_v35 = vld [vmem:[#allocation2 + $0x3e74] ss:$36 sps:$4 sm:$0xff]  }
 0x196   :  { %13842 = vmatpush1.bf16.msra.mxu1 %v20558_v39  ;;  %v13509_v3 = vpop.f32.mrf.mxu0  ;;  %13802 = vmatprep.subr.bf16.mxu0 %v20563_v6  ;;  %v20596_v39 = vld [vmem:[#allocation2 + $0x3a84] ss:$36 sps:$4 sm:$0xff]   ;;  %v20597_v52 = vld [vmem:[#allocation2 + $0x3a38] ss:$36 sps:$4 sm:$0xff]   ;;  %v20611_v62 = vld [vmem:[#allocation2 + $0x39ac] ss:$36 sps:$4 sm:$0xff]  }
 0x197   :  { %13843 = vmatprep.subr.bf16.mxu1 %v20566_v57  ;;  %v13550_v53 = vpop.f32.mrf.mxu1  ;;  %v20600_v6 = vld [vmem:[#allocation2 + $0x3eb8] ss:$36 sps:$4 sm:$0xff]   ;;  %v20614_v47 = vld [vmem:[#allocation2 + $0x3e2c] ss:$36 sps:$4 sm:$0xff]  }
 0x198   :  { %v20605_v57 = vld [vmem:[#allocation2 + $0x39f4] ss:$36 sps:$4 sm:$0xff]   ;;  %v20609_v3 = vld [vmem:[#allocation2 + $0x39a8] ss:$36 sps:$4 sm:$0xff]  }
 0x199   :  { %13803 = vmatpush1.bf16.msra.mxu0 %v20561_v55  ;;  %v20603_v55 = vld [vmem:[#allocation2 + $0x39f0] ss:$36 sps:$4 sm:$0xff]   ;;  %v20620_v53 = vld [vmem:[#allocation2 + $0x3de4] ss:$36 sps:$4 sm:$0xff]  }
 0x19a   :  { %13844 = vmatpush1.bf16.msra.mxu1 %v20564_v61  ;;  %13804 = vmatprep.subr.bf16.mxu0 %v20569_v5  ;;  %v20606_v61 = vld [vmem:[#allocation2 + $0x3e70] ss:$36 sps:$4 sm:$0xff]   ;;  %v20612_v5 = vld [vmem:[#allocation2 + $0x3e28] ss:$36 sps:$4 sm:$0xff]  }
 0x19b   :  { %13845 = vmatprep.subr.bf16.mxu1 %v20572_v8  ;;  %v20617_v8 = vld [vmem:[#allocation2 + $0x3964] ss:$36 sps:$4 sm:$0xff]  }
 0x19d   :  { %13805 = vmatpush1.bf16.msra.mxu0 %v20567_v9  ;;  %v20615_v9 = vld [vmem:[#allocation2 + $0x3960] ss:$36 sps:$4 sm:$0xff]  }
 0x19e   :  { %13846 = vmatpush1.bf16.msra.mxu1 %v20570_v11  ;;  %13806 = vmatprep.subr.bf16.mxu0 %v20575_v1  ;;  %v20618_v11 = vld [vmem:[#allocation2 + $0x3de0] ss:$36 sps:$4 sm:$0xff]  }
 0x19f   :  { %13847 = vmatprep.subr.bf16.mxu1 %v20578_v14  ;;  %v20623_v1 = vld [vmem:[#allocation2 + $0x391c] ss:$36 sps:$4 sm:$0xff]  }
 0x1a0   :  { %v20626_v14 = vld [vmem:[#allocation2 + $0x3d9c] ss:$36 sps:$4 sm:$0xff]  }
 0x1a1   :  { %13807 = vmatpush1.bf16.msra.mxu0 %v20573_v16  ;;  %v20621_v16 = vld [vmem:[#allocation2 + $0x3918] ss:$36 sps:$4 sm:$0xff]  }
 0x1a2   :  { %13848 = vmatpush1.bf16.msra.mxu1 %v20576_v18  ;;  %13808 = vmatprep.subr.bf16.mxu0 %v20581_v21  ;;  %v20624_v18 = vld [vmem:[#allocation2 + $0x3d98] ss:$36 sps:$4 sm:$0xff]  }
 0x1a3   :  { %13849 = vmatprep.subr.bf16.mxu1 %v20584_v24  ;;  %v20629_v21 = vld [vmem:[#allocation2 + $0x38d4] ss:$36 sps:$4 sm:$0xff]  }
 0x1a4   :  { %v20632_v24 = vld [vmem:[#allocation2 + $0x3d54] ss:$36 sps:$4 sm:$0xff]  }
 0x1a5   :  { %13809 = vmatpush1.bf16.msra.mxu0 %v20579_v4  ;;  %v20627_v4 = vld [vmem:[#allocation2 + $0x38d0] ss:$36 sps:$4 sm:$0xff]  }
 0x1a6   :  { %13850 = vmatpush1.bf16.msra.mxu1 %v20582_v28  ;;  %13810 = vmatprep.subr.bf16.mxu0 %v20587_v29  ;;  %v20630_v28 = vld [vmem:[#allocation2 + $0x3d50] ss:$36 sps:$4 sm:$0xff]  }
 0x1a7   :  { %13851 = vmatprep.subr.bf16.mxu1 %v20590_v30  ;;  %v20635_v29 = vld [vmem:[#allocation2 + $0x388c] ss:$36 sps:$4 sm:$0xff]  }
 0x1a8   :  { %v20638_v30 = vld [vmem:[#allocation2 + $0x3d0c] ss:$36 sps:$4 sm:$0xff]  }
 0x1a9   :  { %13811 = vmatpush1.bf16.msra.mxu0 %v20585_v7  ;;  %v20633_v7 = vld [vmem:[#allocation2 + $0x3888] ss:$36 sps:$4 sm:$0xff]  }
 0x1aa   :  { %13852 = vmatpush1.bf16.msra.mxu1 %v20588_v37  ;;  %13812 = vmatprep.subr.bf16.mxu0 %v20593_v38  ;;  %v20636_v37 = vld [vmem:[#allocation2 + $0x3d08] ss:$36 sps:$4 sm:$0xff]  }
 0x1ab   :  { %13853 = vmatprep.subr.bf16.mxu1 %v20596_v39  ;;  %v20641_v38 = vld [vmem:[#allocation2 + $0x3844] ss:$36 sps:$4 sm:$0xff]  }
 0x1ac   :  { %v20644_v39 = vld [vmem:[#allocation2 + $0x3cc4] ss:$36 sps:$4 sm:$0xff]  }
 0x1ad   :  { %13813 = vmatpush1.bf16.msra.mxu0 %v20591_v45  ;;  %v23378_v45 = vrot.slane %v23347_v10, %v23175_v49  ;;  %v20653_v10 = vld [vmem:[#allocation2 + $0x40b4] ss:$36 sps:$4 sm:$0xff]  }
 0x1ae   :  { %13854 = vmatpush1.bf16.msra.mxu1 %v20594_v46  ;;  %13814 = vmatprep.subr.bf16.mxu0 %v20599_v48  ;;  %v20639_v46 = vld [vmem:[#allocation2 + $0x3840] ss:$36 sps:$4 sm:$0xff]  }
 0x1af   :  { %13855 = vmatprep.subr.bf16.mxu1 %v20602_v51  ;;  %v20642_v48 = vld [vmem:[#allocation2 + $0x3cc0] ss:$36 sps:$4 sm:$0xff]  }
 0x1b0   :  { %v20647_v51 = vld [vmem:[#allocation2 + $0x40fc] ss:$36 sps:$4 sm:$0xff]  }
 0x1b1   :  { %13815 = vmatpush2.bf16.msra.mxu0 %v20597_v52  ;;  %v20650_v52 = vld [vmem:[#allocation2 + $0x204] ss:$36 sps:$4 sm:$0xff]  }
 0x1b2   :  { %13856 = vmatpush2.bf16.msra.mxu1 %v20600_v6  ;;  %13816 = vmatprep.subr.bf16.mxu0 %v20605_v57  ;;  %v20645_v6 = vld [vmem:[#allocation2 + $0x40f8] ss:$36 sps:$4 sm:$0xff]   ;;  %v20648_v57 = vld [vmem:[#allocation2 + $0x200] ss:$36 sps:$4 sm:$0xff]  }
 0x1b3   :  { %13857 = vmatprep.subr.bf16.mxu1 %v20608_v35  ;;  %v23382_v35 = vcombine.high %v23378_v45, %v23378_v45 }
 0x1b5   :  { %13817 = vmatpush2.bf16.msra.mxu0 %v20603_v55  ;;  %v20656_v55 = vld [vmem:[#allocation2 + $0x1bc] ss:$36 sps:$4 sm:$0xff]  }
 0x1b6   :  { %13858 = vmatpush2.bf16.msra.mxu1 %v20606_v61  ;;  %13818 = vmatprep.subr.bf16.mxu0 %v20611_v62  ;;  %v20651_v61 = vld [vmem:[#allocation2 + $0x40b0] ss:$36 sps:$4 sm:$0xff]   ;;  %v20654_v62 = vld [vmem:[#allocation2 + $0x1b8] ss:$36 sps:$4 sm:$0xff]  }
 0x1b7   :  { %13859 = vmatprep.subr.bf16.mxu1 %v20614_v47 }
 0x1b9   :  { %13819 = vmatpush2.bf16.msra.mxu0 %v20609_v3 }
 0x1ba   :  { %13860 = vmatpush2.bf16.msra.mxu1 %v20612_v5  ;;  %13820 = vmatprep.subr.bf16.mxu0 %v20617_v8 }
 0x1bb   :  { %13861 = vmatprep.subr.bf16.mxu1 %v20620_v53 }
 0x1bd   :  { %13821 = vmatpush2.bf16.msra.mxu0 %v20615_v9  ;;  %v20659_v9 = vld [vmem:[#allocation2 + $0x406c] ss:$36 sps:$4 sm:$0xff]  }
 0x1be   :  { %13862 = vmatpush2.bf16.msra.mxu1 %v20618_v11  ;;  %13822 = vmatprep.subr.bf16.mxu0 %v20623_v1  ;;  %v20662_v11 = vld [vmem:[#allocation2 + $0x174] ss:$36 sps:$4 sm:$0xff]  }
 0x1bf   :  { %13863 = vmatprep.subr.bf16.mxu1 %v20626_v14 }
 0x1c1   :  { %13823 = vmatpush2.bf16.msra.mxu0 %v20621_v16  ;;  %v20657_v16 = vld [vmem:[#allocation2 + $0x4068] ss:$36 sps:$4 sm:$0xff]  }
 0x1c2   :  { %13864 = vmatpush2.bf16.msra.mxu1 %v20624_v18  ;;  %13824 = vmatprep.subr.bf16.mxu0 %v20629_v21  ;;  %v20660_v18 = vld [vmem:[#allocation2 + $0x170] ss:$36 sps:$4 sm:$0xff]   ;;  %v23125_v21 = vmov 0  }
 0x1c3   :  { %13865 = vmatprep.subr.bf16.mxu1 %v20632_v24 }
 0x1c5   :  { %13825 = vmatpush2.bf16.msra.mxu0 %v20627_v4 }
 0x1c6   :  { %13866 = vmatpush2.bf16.msra.mxu1 %v20630_v28  ;;  %13826 = vmatprep.subr.bf16.mxu0 %v20635_v29  ;;  %v20665_v29 = vld [vmem:[#allocation2 + $0x4024] ss:$36 sps:$4 sm:$0xff]  }
 0x1c7   :  { %13867 = vmatprep.subr.bf16.mxu1 %v20638_v30 }
 0x1c9   :  { %13827 = vmatpush2.bf16.msra.mxu0 %v20633_v7  ;;  %v20663_v7 = vld [vmem:[#allocation2 + $0x4020] ss:$36 sps:$4 sm:$0xff]  }
 0x1ca   :  { %13868 = vmatpush2.bf16.msra.mxu1 %v20636_v37  ;;  %13828 = vmatprep.subr.bf16.mxu0 %v20641_v38  ;;  %v20666_v37 = vld [vmem:[#allocation2 + $0x128] ss:$36 sps:$4 sm:$0xff]   ;;  %v20671_v38 = vld [vmem:[#allocation2 + $0x3fdc] ss:$36 sps:$4 sm:$0xff]  }
 0x1cb   :  { %13869 = vmatprep.subr.bf16.mxu1 %v20644_v39  ;;  %v20674_v39 = vld [vmem:[#allocation2 + $0xe4] ss:$36 sps:$4 sm:$0xff]  }
 0x1cd   :  { %13829 = vmatpush2.bf16.msra.mxu0 %v20639_v46  ;;  %v20669_v46 = vld [vmem:[#allocation2 + $0x3fd8] ss:$36 sps:$4 sm:$0xff]  }
 0x1ce   :  { %13870 = vmatpush2.bf16.msra.mxu1 %v20642_v48  ;;  %13880 = vmatprep.subr.bf16.mxu0 %v20647_v51  ;;  %v20672_v48 = vld [vmem:[#allocation2 + $0xe0] ss:$36 sps:$4 sm:$0xff]   ;;  %v20677_v51 = vld [vmem:[#allocation2 + $0x3f94] ss:$36 sps:$4 sm:$0xff]  }
 0x1cf   :  { %13921 = vmatprep.subr.bf16.mxu1 %v20650_v52  ;;  %v20680_v52 = vld [vmem:[#allocation2 + $0x9c] ss:$36 sps:$4 sm:$0xff]  }
 0x1d0   :  { %v13586_v47 = vpop.f32.mrf.mxu0  ;;  %13831 = vmatmul.mubr.bf16.vlgmr.msra.gmra.mxu0 %v23378_v45 }
 0x1d1   :  { %13872 = vmatmul.mubr.bf16.vlgmr.msra.gmra.mxu1 %v23382_v35  ;;  %v13627_v3 = vpop.f32.mrf.mxu1  ;;  %v13587_v5 = vadd.f32 %v13586_v47, %v23370_v58  ;;  %13881 = vmatpush1.bf16.msra.mxu0 %v20645_v6  ;;  %v20675_v6 = vld [vmem:[#allocation2 + $0x3f90] ss:$36 sps:$4 sm:$0xff]  }
 0x1d2   :  { %13922 = vmatpush1.bf16.msra.mxu1 %v20648_v57  ;;  %v13588_v8 = vpop.f32.mrf.mxu0  ;;  %13882 = vmatprep.subr.bf16.mxu0 %v20653_v10  ;;  %v20678_v57 = vld [vmem:[#allocation2 + $0x98] ss:$36 sps:$4 sm:$0xff]   ;;  %v20683_v10 = vld [vmem:[#allocation2 + $0x3f4c] ss:$36 sps:$4 sm:$0xff]  }
 0x1d3   :  { %v13629_v53 = vpop.f32.mrf.mxu1  ;;  %13923 = vmatprep.subr.bf16.mxu1 %v20656_v55  ;;  %v13589_v1 = vadd.f32 %v13588_v8, %v23374_v63  ;;  %v23388_v14 = vadd.f32 %v13627_v3, %v13587_v5  ;;  %13912 = vmatprep.mubr.bf16.mxu0 %v23125_v21  ;;  %v20668_v63 = vld [vmem:[#allocation2 + $0x12c] ss:$36 sps:$4 sm:$0xff]   ;;  %v20686_v55 = vld [vmem:[#allocation2 + $0x54] ss:$36 sps:$4 sm:$0xff]   ;;  %v20689_v3 = vld [vmem:[#allocation2 + $0x3f04] ss:$36 sps:$4 sm:$0xff]  }
 0x1d4   :  { %13953 = vmatprep.mubr.bf16.mxu1 %v23182_v60  ;;  %v13590_v58 = vpop.f32.mrf.mxu0  ;;  %v20684_v47 = vld [vmem:[#allocation2 + $0x50] ss:$36 sps:$4 sm:$0xff]  }
 0x1d5   :  { %v13631_v24 = vpop.f32.mrf.mxu1  ;;  %v23392_v4 = vadd.f32 %v13629_v53, %v13589_v1  ;;  %13883 = vmatpush1.bf16.msra.mxu0 %v20651_v61  ;;  %v2566_v61 = vcombine.high %v23343_v2, %v23343_v2  ;;  %v20692_v5 = vld [vmem:[#allocation2 + $0xc] ss:$36 sps:$4 sm:$0xff]   ;;  %v20687_v53 = vld [vmem:[#allocation2 + $0x3f00] ss:$36 sps:$4 sm:$0xff]  }
 0x1d6   :  { %13924 = vmatpush1.bf16.msra.mxu1 %v20654_v62  ;;  %v13591_v28 = vpop.f32.mrf.mxu0  ;;  %13884 = vmatprep.subr.bf16.mxu0 %v20659_v9  ;;  %v20681_v62 = vld [vmem:[#allocation2 + $0x3f48] ss:$36 sps:$4 sm:$0xff]   ;;  %v20697_v2 = vld [vmem:[#allocation2 + $0x680] ss:$36 sps:$4 sm:$0xff]  }
 0x1d7   :  { %13925 = vmatprep.subr.bf16.mxu1 %v20662_v11  ;;  %v13632_v30 = vpop.f32.mrf.mxu1  ;;  %v2580_v8 = vrot.slane %v2566_v61, %v23175_v49  ;;  %v20690_v9 = vld [vmem:[#allocation2 + $0x8] ss:$36 sps:$4 sm:$0xff]   ;;  %v20702_v58 = vld [vmem:[#allocation2 + $0x3fc] ss:$36 sps:$4 sm:$0xff]  }
 0x1d8   :  { %v20696_v11 = vld [vmem:[#allocation2 + $0x444] ss:$36 sps:$4 sm:$0xff]   ;;  %v20705_v24 = vld [vmem:[#allocation2 + $0x63c] ss:$36 sps:$4 sm:$0xff]   ;;  %v20711_v30 = vld [vmem:[#allocation2 + $0x5f4] ss:$36 sps:$4 sm:$0xff]  }
 0x1d9   :  { %13885 = vmatpush1.bf16.msra.mxu0 %v20657_v16  ;;  %v20699_v1 = vld [vmem:[#allocation2 + $0x684] ss:$36 sps:$4 sm:$0xff]   ;;  %v20700_v28 = vld [vmem:[#allocation2 + $0x3f8] ss:$36 sps:$4 sm:$0xff]  }
 0x1da   :  { %13926 = vmatpush1.bf16.msra.mxu1 %v20660_v18  ;;  %13886 = vmatprep.subr.bf16.mxu0 %v20665_v29  ;;  %v20694_v16 = vld [vmem:[#allocation2 + $0x440] ss:$36 sps:$4 sm:$0xff]   ;;  %v23398_v18 = vrot.slane %v2580_v8, %v23175_v49  ;;  %v20703_v29 = vld [vmem:[#allocation2 + $0x638] ss:$36 sps:$4 sm:$0xff]   ;;  %v20706_v49 = vld [vmem:[#allocation2 + $0x3b0] ss:$36 sps:$4 sm:$0xff]  }
 0x1db   :  { %13927 = vmatprep.subr.bf16.mxu1 %v20668_v63  ;;  %v20708_v63 = vld [vmem:[#allocation2 + $0x3b4] ss:$36 sps:$4 sm:$0xff]   ;;  %v20738_v8 = vld [vmem:[#allocation2 + $0x24c] ss:$36 sps:$4 sm:$0xff]  }
 0x1dc   :  { %v20727_v61 = vld [vmem:[#allocation2 + $0x518] ss:$36 sps:$4 sm:$0xff]  }
 0x1dd   :  { %13887 = vmatpush1.bf16.msra.mxu0 %v20663_v7  ;;  %v20709_v7 = vld [vmem:[#allocation2 + $0x5f0] ss:$36 sps:$4 sm:$0xff]  }
 0x1de   :  { %13928 = vmatpush1.bf16.msra.mxu1 %v20666_v37  ;;  %13888 = vmatprep.subr.bf16.mxu0 %v20671_v38  ;;  %v20714_v37 = vld [vmem:[#allocation2 + $0x36c] ss:$36 sps:$4 sm:$0xff]  }
 0x1df   :  { %13929 = vmatprep.subr.bf16.mxu1 %v20674_v39  ;;  %v20717_v38 = vld [vmem:[#allocation2 + $0x5ac] ss:$36 sps:$4 sm:$0xff]  }
 0x1e0   :  { %v20712_v39 = vld [vmem:[#allocation2 + $0x368] ss:$36 sps:$4 sm:$0xff]  }
 0x1e1   :  { %13889 = vmatpush1.bf16.msra.mxu0 %v20669_v46  ;;  %v20715_v46 = vld [vmem:[#allocation2 + $0x5a8] ss:$36 sps:$4 sm:$0xff]  }
 0x1e2   :  { %13930 = vmatpush1.bf16.msra.mxu1 %v20672_v48  ;;  %13890 = vmatprep.subr.bf16.mxu0 %v20677_v51  ;;  %v20720_v48 = vld [vmem:[#allocation2 + $0x324] ss:$36 sps:$4 sm:$0xff]  }
 0x1e3   :  { %13931 = vmatprep.subr.bf16.mxu1 %v20680_v52  ;;  %v20723_v51 = vld [vmem:[#allocation2 + $0x564] ss:$36 sps:$4 sm:$0xff]  }
 0x1e4   :  { %v20718_v52 = vld [vmem:[#allocation2 + $0x320] ss:$36 sps:$4 sm:$0xff]  }
 0x1e5   :  { %13891 = vmatpush1.bf16.msra.mxu0 %v20675_v6  ;;  %v20721_v6 = vld [vmem:[#allocation2 + $0x560] ss:$36 sps:$4 sm:$0xff]  }
 0x1e6   :  { %13932 = vmatpush1.bf16.msra.mxu1 %v20678_v57  ;;  %13892 = vmatprep.subr.bf16.mxu0 %v20683_v10  ;;  %v20726_v57 = vld [vmem:[#allocation2 + $0x2dc] ss:$36 sps:$4 sm:$0xff]  }
 0x1e7   :  { %13933 = vmatprep.subr.bf16.mxu1 %v20686_v55  ;;  %v20729_v10 = vld [vmem:[#allocation2 + $0x51c] ss:$36 sps:$4 sm:$0xff]  }
 0x1e8   :  { %v20724_v55 = vld [vmem:[#allocation2 + $0x2d8] ss:$36 sps:$4 sm:$0xff]  }
 0x1e9   :  { %13893 = vmatpush1.bf16.msra.mxu0 %v20681_v62  ;;  %v20732_v62 = vld [vmem:[#allocation2 + $0x294] ss:$36 sps:$4 sm:$0xff]  }
 0x1ea   :  { %13934 = vmatpush1.bf16.msra.mxu1 %v20684_v47  ;;  %13894 = vmatprep.subr.bf16.mxu0 %v20689_v3  ;;  %v20735_v47 = vld [vmem:[#allocation2 + $0x4d4] ss:$36 sps:$4 sm:$0xff]  }
 0x1eb   :  { %13935 = vmatprep.subr.bf16.mxu1 %v20692_v5  ;;  %v20730_v3 = vld [vmem:[#allocation2 + $0x290] ss:$36 sps:$4 sm:$0xff]  }
 0x1ec   :  { %v20733_v5 = vld [vmem:[#allocation2 + $0x4d0] ss:$36 sps:$4 sm:$0xff]  }
 0x1ed   :  { %13895 = vmatpush1.bf16.msra.mxu0 %v20687_v53  ;;  %v20741_v53 = vld [vmem:[#allocation2 + $0x48c] ss:$36 sps:$4 sm:$0xff]  }
 0x1ee   :  { %13936 = vmatpush1.bf16.msra.mxu1 %v20690_v9  ;;  %13962 = vmatprep.subr.bf16.mxu0 %v20699_v1  ;;  %v20736_v9 = vld [vmem:[#allocation2 + $0x248] ss:$36 sps:$4 sm:$0xff]  }
 0x1ef   :  { %13937 = vmatprep.subr.bf16.mxu1 %v20696_v11  ;;  %v20739_v11 = vld [vmem:[#allocation2 + $0x488] ss:$36 sps:$4 sm:$0xff]  }
 0x1f0   :  { %13913 = vmatmul.mubr.bf16.vlgmr.msra.gmra.mxu0 %v23398_v18  ;;  %v20744_v1 = vld [vmem:[#allocation2 + $0x8c4] ss:$36 sps:$4 sm:$0xff]  }
 0x1f1   :  { %13963 = vmatpush1.bf16.msra.mxu0 %v20697_v2  ;;  %13994 = vmatprep.mubr.bf16.mxu0 %v23186_v0  ;;  %v20742_v2 = vld [vmem:[#allocation2 + $0x8c0] ss:$36 sps:$4 sm:$0xff]  }
 0x1f2   :  { %13938 = vmatpush2.bf16.msra.mxu1 %v20694_v16  ;;  %13964 = vmatprep.subr.bf16.mxu0 %v20705_v24  ;;  %v20747_v16 = vld [vmem:[#allocation2 + $0xb04] ss:$36 sps:$4 sm:$0xff]   ;;  %v20750_v24 = vld [vmem:[#allocation2 + $0x87c] ss:$36 sps:$4 sm:$0xff]  }
 0x1f3   :  { %13939 = vmatprep.subr.bf16.mxu1 %v20702_v58  ;;  %v20745_v58 = vld [vmem:[#allocation2 + $0xb00] ss:$36 sps:$4 sm:$0xff]  }
 0x1f5   :  { %13965 = vmatpush1.bf16.msra.mxu0 %v20703_v29  ;;  %v20748_v29 = vld [vmem:[#allocation2 + $0x878] ss:$36 sps:$4 sm:$0xff]  }
 0x1f6   :  { %13940 = vmatpush2.bf16.msra.mxu1 %v20700_v28  ;;  %13966 = vmatprep.subr.bf16.mxu0 %v20711_v30  ;;  %v20753_v28 = vld [vmem:[#allocation2 + $0xabc] ss:$36 sps:$4 sm:$0xff]  }
 0x1f7   :  { %13941 = vmatprep.subr.bf16.mxu1 %v20708_v63  ;;  %v20751_v63 = vld [vmem:[#allocation2 + $0xab8] ss:$36 sps:$4 sm:$0xff]  }
 0x1f9   :  { %13967 = vmatpush1.bf16.msra.mxu0 %v20709_v7 }
 0x1fa   :  { %13942 = vmatpush2.bf16.msra.mxu1 %v20706_v49  ;;  %13968 = vmatprep.subr.bf16.mxu0 %v20717_v38 }
 0x1fb   :  { %13943 = vmatprep.subr.bf16.mxu1 %v20714_v37 }
 0x1fd   :  { %13969 = vmatpush1.bf16.msra.mxu0 %v20715_v46  ;;  %v20759_v46 = vld [vmem:[#allocation2 + $0xa74] ss:$36 sps:$4 sm:$0xff]  }
 0x1fe   :  { %13944 = vmatpush2.bf16.msra.mxu1 %v20712_v39  ;;  %13970 = vmatprep.subr.bf16.mxu0 %v20723_v51  ;;  %v20756_v39 = vld [vmem:[#allocation2 + $0x834] ss:$36 sps:$4 sm:$0xff]  }
 0x1ff   :  { %13945 = vmatprep.subr.bf16.mxu1 %v20720_v48 }
 0x201   :  { %13971 = vmatpush1.bf16.msra.mxu0 %v20721_v6  ;;  %v20757_v6 = vld [vmem:[#allocation2 + $0xa70] ss:$36 sps:$4 sm:$0xff]  }
 0x202   :  { %13946 = vmatpush2.bf16.msra.mxu1 %v20718_v52  ;;  %13972 = vmatprep.subr.bf16.mxu0 %v20729_v10  ;;  %v20754_v52 = vld [vmem:[#allocation2 + $0x830] ss:$36 sps:$4 sm:$0xff]  }
 0x203   :  { %13947 = vmatprep.subr.bf16.mxu1 %v20726_v57 }
 0x205   :  { %13973 = vmatpush1.bf16.msra.mxu0 %v20727_v61  ;;  %v20762_v61 = vld [vmem:[#allocation2 + $0x7ec] ss:$36 sps:$4 sm:$0xff]  }
 0x206   :  { %13948 = vmatpush2.bf16.msra.mxu1 %v20724_v55  ;;  %13974 = vmatprep.subr.bf16.mxu0 %v20735_v47 }
 0x207   :  { %13949 = vmatprep.subr.bf16.mxu1 %v20732_v62  ;;  %v20765_v62 = vld [vmem:[#allocation2 + $0xa2c] ss:$36 sps:$4 sm:$0xff]  }
 0x209   :  { %13975 = vmatpush1.bf16.msra.mxu0 %v20733_v5  ;;  %v20768_v5 = vld [vmem:[#allocation2 + $0x7a4] ss:$36 sps:$4 sm:$0xff]  }
 0x20a   :  { %13950 = vmatpush2.bf16.msra.mxu1 %v20730_v3  ;;  %13976 = vmatprep.subr.bf16.mxu0 %v20741_v53  ;;  %v20763_v3 = vld [vmem:[#allocation2 + $0xa28] ss:$36 sps:$4 sm:$0xff]   ;;  %v20766_v53 = vld [vmem:[#allocation2 + $0x7a0] ss:$36 sps:$4 sm:$0xff]  }
 0x20b   :  { %13951 = vmatprep.subr.bf16.mxu1 %v20738_v8  ;;  %v20771_v8 = vld [vmem:[#allocation2 + $0x9e4] ss:$36 sps:$4 sm:$0xff]  }
 0x20d   :  { %13977 = vmatpush1.bf16.msra.mxu0 %v20739_v11  ;;  %v20774_v11 = vld [vmem:[#allocation2 + $0x75c] ss:$36 sps:$4 sm:$0xff]  }
 0x20e   :  { %13952 = vmatpush2.bf16.msra.mxu1 %v20736_v9  ;;  %13978 = vmatprep.subr.bf16.mxu0 %v20744_v1  ;;  %v20769_v9 = vld [vmem:[#allocation2 + $0x9e0] ss:$36 sps:$4 sm:$0xff]  }
 0x20f   :  { %14003 = vmatprep.subr.bf16.mxu1 %v20747_v16  ;;  %v20777_v1 = vld [vmem:[#allocation2 + $0x99c] ss:$36 sps:$4 sm:$0xff]  }
 0x210   :  { %v13668_v30 = vpop.f32.mrf.mxu0  ;;  %v20772_v16 = vld [vmem:[#allocation2 + $0x758] ss:$36 sps:$4 sm:$0xff]  }
 0x211   :  { %13954 = vmatmul.mubr.bf16.vlgmr.msra.gmra.mxu1 %v23196_v13  ;;  %v13709_v49 = vpop.f32.mrf.mxu1  ;;  %v13669_v7 = vadd.f32 %v13668_v30, %v23388_v14  ;;  %13979 = vmatpush2.bf16.msra.mxu0 %v20742_v2  ;;  %v20775_v2 = vld [vmem:[#allocation2 + $0x998] ss:$36 sps:$4 sm:$0xff]   ;;  %v20789_v30 = vld [vmem:[#allocation2 + $0x90c] ss:$36 sps:$4 sm:$0xff]  }
 0x212   :  { %14004 = vmatpush1.bf16.msra.mxu1 %v20745_v58  ;;  %v13670_v37 = vpop.f32.mrf.mxu0  ;;  %13980 = vmatprep.subr.bf16.mxu0 %v20750_v24  ;;  %v20780_v58 = vld [vmem:[#allocation2 + $0x714] ss:$36 sps:$4 sm:$0xff]  }
 0x213   :  { %v13711_v38 = vpop.f32.mrf.mxu1  ;;  %14005 = vmatprep.subr.bf16.mxu1 %v20753_v28  ;;  %v13671_v48 = vadd.f32 %v13670_v37, %v23392_v4  ;;  %v23405_v51 = vadd.f32 %v13709_v49, %v13669_v7  ;;  %14035 = vmatprep.mubr.bf16.mxu1 %v23199_v17  ;;  %v20760_v4 = vld [vmem:[#allocation2 + $0x7e8] ss:$36 sps:$4 sm:$0xff]   ;;  %v20783_v24 = vld [vmem:[#allocation2 + $0x954] ss:$36 sps:$4 sm:$0xff]  }
 0x214   :  { %v13672_v57 = vpop.f32.mrf.mxu0  ;;  %v20778_v28 = vld [vmem:[#allocation2 + $0x710] ss:$36 sps:$4 sm:$0xff]   ;;  %v20784_v49 = vld [vmem:[#allocation2 + $0x6c8] ss:$36 sps:$4 sm:$0xff]  }
 0x215   :  { %v13713_v10 = vpop.f32.mrf.mxu1  ;;  %v23408_v55 = vadd.f32 %v13711_v38, %v13671_v48  ;;  %13981 = vmatpush2.bf16.msra.mxu0 %v20748_v29  ;;  %v20781_v29 = vld [vmem:[#allocation2 + $0x950] ss:$36 sps:$4 sm:$0xff]   ;;  %v20787_v7 = vld [vmem:[#allocation2 + $0x908] ss:$36 sps:$4 sm:$0xff]   ;;  %v20798_v48 = vld [vmem:[#allocation2 + $0xcfc] ss:$36 sps:$4 sm:$0xff]  }
 0x216   :  { %14006 = vmatpush1.bf16.msra.mxu1 %v20751_v63  ;;  %v13673_v14 = vpop.f32.mrf.mxu0  ;;  %13982 = vmatprep.subr.bf16.mxu0 %v20756_v39  ;;  %v20786_v63 = vld [vmem:[#allocation2 + $0x6cc] ss:$36 sps:$4 sm:$0xff]   ;;  %v20792_v37 = vld [vmem:[#allocation2 + $0xd44] ss:$36 sps:$4 sm:$0xff]   ;;  %v20799_v57 = vld [vmem:[#allocation2 + $0xf38] ss:$36 sps:$4 sm:$0xff]  }
 0x217   :  { %14007 = vmatprep.subr.bf16.mxu1 %v20759_v46  ;;  %v13714_v47 = vpop.f32.mrf.mxu1  ;;  %v20795_v38 = vld [vmem:[#allocation2 + $0xf84] ss:$36 sps:$4 sm:$0xff]   ;;  %v20804_v10 = vld [vmem:[#allocation2 + $0xcb4] ss:$36 sps:$4 sm:$0xff]  }
 0x218   :  { %v20790_v39 = vld [vmem:[#allocation2 + $0xd40] ss:$36 sps:$4 sm:$0xff]   ;;  %v20807_v14 = vld [vmem:[#allocation2 + $0xef4] ss:$36 sps:$4 sm:$0xff]   ;;  %v20810_v47 = vld [vmem:[#allocation2 + $0xc6c] ss:$36 sps:$4 sm:$0xff]  }
 0x219   :  { %13983 = vmatpush2.bf16.msra.mxu0 %v20754_v52  ;;  %v20793_v46 = vld [vmem:[#allocation2 + $0xf80] ss:$36 sps:$4 sm:$0xff]  }
 0x21a   :  { %14008 = vmatpush1.bf16.msra.mxu1 %v20757_v6  ;;  %13984 = vmatprep.subr.bf16.mxu0 %v20762_v61  ;;  %v20801_v52 = vld [vmem:[#allocation2 + $0xf3c] ss:$36 sps:$4 sm:$0xff]   ;;  %v20802_v61 = vld [vmem:[#allocation2 + $0xcb0] ss:$36 sps:$4 sm:$0xff]  }
 0x21b   :  { %14009 = vmatprep.subr.bf16.mxu1 %v20765_v62  ;;  %v20796_v6 = vld [vmem:[#allocation2 + $0xcf8] ss:$36 sps:$4 sm:$0xff]   ;;  %v20805_v62 = vld [vmem:[#allocation2 + $0xef0] ss:$36 sps:$4 sm:$0xff]  }
 0x21d   :  { %13985 = vmatpush2.bf16.msra.mxu0 %v20760_v4  ;;  %v20813_v4 = vld [vmem:[#allocation2 + $0xeac] ss:$36 sps:$4 sm:$0xff]  }
 0x21e   :  { %14010 = vmatpush1.bf16.msra.mxu1 %v20763_v3  ;;  %13986 = vmatprep.subr.bf16.mxu0 %v20768_v5  ;;  %v20808_v3 = vld [vmem:[#allocation2 + $0xc68] ss:$36 sps:$4 sm:$0xff]  }
 0x21f   :  { %14011 = vmatprep.subr.bf16.mxu1 %v20771_v8  ;;  %v20811_v5 = vld [vmem:[#allocation2 + $0xea8] ss:$36 sps:$4 sm:$0xff]  }
 0x220   :  { %v20816_v8 = vld [vmem:[#allocation2 + $0xc24] ss:$36 sps:$4 sm:$0xff]  }
 0x221   :  { %13987 = vmatpush2.bf16.msra.mxu0 %v20766_v53  ;;  %v20819_v53 = vld [vmem:[#allocation2 + $0xe64] ss:$36 sps:$4 sm:$0xff]  }
 0x222   :  { %14012 = vmatpush1.bf16.msra.mxu1 %v20769_v9  ;;  %13988 = vmatprep.subr.bf16.mxu0 %v20774_v11  ;;  %v20814_v9 = vld [vmem:[#allocation2 + $0xc20] ss:$36 sps:$4 sm:$0xff]  }
 0x223   :  { %14013 = vmatprep.subr.bf16.mxu1 %v20777_v1  ;;  %v20817_v11 = vld [vmem:[#allocation2 + $0xe60] ss:$36 sps:$4 sm:$0xff]  }
 0x224   :  { %v20822_v1 = vld [vmem:[#allocation2 + $0xbdc] ss:$36 sps:$4 sm:$0xff]  }
 0x225   :  { %13989 = vmatpush2.bf16.msra.mxu0 %v20772_v16  ;;  %v20825_v16 = vld [vmem:[#allocation2 + $0xe1c] ss:$36 sps:$4 sm:$0xff]  }
 0x226   :  { %14014 = vmatpush1.bf16.msra.mxu1 %v20775_v2  ;;  %13990 = vmatprep.subr.bf16.mxu0 %v20780_v58  ;;  %v20820_v2 = vld [vmem:[#allocation2 + $0xbd8] ss:$36 sps:$4 sm:$0xff]  }
 0x227   :  { %14015 = vmatprep.subr.bf16.mxu1 %v20783_v24  ;;  %v20823_v58 = vld [vmem:[#allocation2 + $0xe18] ss:$36 sps:$4 sm:$0xff]  }
 0x228   :  { %v20828_v24 = vld [vmem:[#allocation2 + $0xb94] ss:$36 sps:$4 sm:$0xff]  }
 0x229   :  { %13991 = vmatpush2.bf16.msra.mxu0 %v20778_v28  ;;  %v20831_v28 = vld [vmem:[#allocation2 + $0xdd4] ss:$36 sps:$4 sm:$0xff]  }
 0x22a   :  { %14016 = vmatpush1.bf16.msra.mxu1 %v20781_v29  ;;  %13992 = vmatprep.subr.bf16.mxu0 %v20786_v63  ;;  %v20826_v29 = vld [vmem:[#allocation2 + $0xb90] ss:$36 sps:$4 sm:$0xff]  }
 0x22b   :  { %14017 = vmatprep.subr.bf16.mxu1 %v20789_v30  ;;  %v20829_v63 = vld [vmem:[#allocation2 + $0xdd0] ss:$36 sps:$4 sm:$0xff]  }
 0x22c   :  { %v20834_v30 = vld [vmem:[#allocation2 + $0xb4c] ss:$36 sps:$4 sm:$0xff]  }
 0x22d   :  { %13993 = vmatpush2.bf16.msra.mxu0 %v20784_v49  ;;  %v20837_v49 = vld [vmem:[#allocation2 + $0xd8c] ss:$36 sps:$4 sm:$0xff]  }
 0x22e   :  { %14018 = vmatpush1.bf16.msra.mxu1 %v20787_v7  ;;  %14044 = vmatprep.subr.bf16.mxu0 %v20795_v38  ;;  %v20832_v7 = vld [vmem:[#allocation2 + $0xb48] ss:$36 sps:$4 sm:$0xff]  }
 0x22f   :  { %14019 = vmatprep.subr.bf16.mxu1 %v20792_v37  ;;  %v20835_v37 = vld [vmem:[#allocation2 + $0xd88] ss:$36 sps:$4 sm:$0xff]  }
 0x230   :  { %13995 = vmatmul.mubr.bf16.vlgmr.msra.gmra.mxu0 %v23203_v19  ;;  %v20840_v38 = vld [vmem:[#allocation2 + $0x11c4] ss:$36 sps:$4 sm:$0xff]  }
 0x231   :  { %14045 = vmatpush1.bf16.msra.mxu0 %v20793_v46  ;;  %14076 = vmatprep.mubr.bf16.mxu0 %v23207_v23  ;;  %v20838_v46 = vld [vmem:[#allocation2 + $0x11c0] ss:$36 sps:$4 sm:$0xff]  }
 0x232   :  { %14020 = vmatpush2.bf16.msra.mxu1 %v20790_v39  ;;  %14046 = vmatprep.subr.bf16.mxu0 %v20801_v52  ;;  %v20843_v39 = vld [vmem:[#allocation2 + $0x1404] ss:$36 sps:$4 sm:$0xff]   ;;  %v20846_v52 = vld [vmem:[#allocation2 + $0x117c] ss:$36 sps:$4 sm:$0xff]  }
 0x233   :  { %14021 = vmatprep.subr.bf16.mxu1 %v20798_v48  ;;  %v20841_v48 = vld [vmem:[#allocation2 + $0x1400] ss:$36 sps:$4 sm:$0xff]  }
 0x235   :  { %14047 = vmatpush1.bf16.msra.mxu0 %v20799_v57 }
 0x236   :  { %14022 = vmatpush2.bf16.msra.mxu1 %v20796_v6  ;;  %14048 = vmatprep.subr.bf16.mxu0 %v20807_v14  ;;  %v20849_v6 = vld [vmem:[#allocation2 + $0x13bc] ss:$36 sps:$4 sm:$0xff]  }
 0x237   :  { %14023 = vmatprep.subr.bf16.mxu1 %v20804_v10 }
 0x239   :  { %14049 = vmatpush1.bf16.msra.mxu0 %v20805_v62  ;;  %v20847_v62 = vld [vmem:[#allocation2 + $0x13b8] ss:$36 sps:$4 sm:$0xff]  }
 0x23a   :  { %14024 = vmatpush2.bf16.msra.mxu1 %v20802_v61  ;;  %14050 = vmatprep.subr.bf16.mxu0 %v20813_v4  ;;  %v20844_v61 = vld [vmem:[#allocation2 + $0x1178] ss:$36 sps:$4 sm:$0xff]  }
 0x23b   :  { %14025 = vmatprep.subr.bf16.mxu1 %v20810_v47 }
 0x23d   :  { %14051 = vmatpush1.bf16.msra.mxu0 %v20811_v5  ;;  %v20855_v5 = vld [vmem:[#allocation2 + $0x1374] ss:$36 sps:$4 sm:$0xff]  }
 0x23e   :  { %14026 = vmatpush2.bf16.msra.mxu1 %v20808_v3  ;;  %14052 = vmatprep.subr.bf16.mxu0 %v20819_v53  ;;  %v20852_v3 = vld [vmem:[#allocation2 + $0x1134] ss:$36 sps:$4 sm:$0xff]  }
 0x23f   :  { %14027 = vmatprep.subr.bf16.mxu1 %v20816_v8 }
 0x241   :  { %14053 = vmatpush1.bf16.msra.mxu0 %v20817_v11 }
 0x242   :  { %14028 = vmatpush2.bf16.msra.mxu1 %v20814_v9  ;;  %14054 = vmatprep.subr.bf16.mxu0 %v20825_v16  ;;  %v20853_v16 = vld [vmem:[#allocation2 + $0x1370] ss:$36 sps:$4 sm:$0xff]  }
 0x243   :  { %14029 = vmatprep.subr.bf16.mxu1 %v20822_v1 }
 0x245   :  { %14055 = vmatpush1.bf16.msra.mxu0 %v20823_v58  ;;  %v20858_v58 = vld [vmem:[#allocation2 + $0x10ec] ss:$36 sps:$4 sm:$0xff]  }
 0x246   :  { %14030 = vmatpush2.bf16.msra.mxu1 %v20820_v2  ;;  %14056 = vmatprep.subr.bf16.mxu0 %v20831_v28 }
 0x247   :  { %14031 = vmatprep.subr.bf16.mxu1 %v20828_v24  ;;  %v20861_v24 = vld [vmem:[#allocation2 + $0x132c] ss:$36 sps:$4 sm:$0xff]  }
 0x249   :  { %14057 = vmatpush1.bf16.msra.mxu0 %v20829_v63  ;;  %v20864_v63 = vld [vmem:[#allocation2 + $0x10a4] ss:$36 sps:$4 sm:$0xff]  }
 0x24a   :  { %14032 = vmatpush2.bf16.msra.mxu1 %v20826_v29  ;;  %14058 = vmatprep.subr.bf16.mxu0 %v20837_v49  ;;  %v20859_v29 = vld [vmem:[#allocation2 + $0x1328] ss:$36 sps:$4 sm:$0xff]   ;;  %v20862_v49 = vld [vmem:[#allocation2 + $0x10a0] ss:$36 sps:$4 sm:$0xff]  }
 0x24b   :  { %14033 = vmatprep.subr.bf16.mxu1 %v20834_v30  ;;  %v20867_v30 = vld [vmem:[#allocation2 + $0x12e4] ss:$36 sps:$4 sm:$0xff]  }
 0x24d   :  { %14059 = vmatpush1.bf16.msra.mxu0 %v20835_v37  ;;  %v20870_v37 = vld [vmem:[#allocation2 + $0x105c] ss:$36 sps:$4 sm:$0xff]  }
 0x24e   :  { %14034 = vmatpush2.bf16.msra.mxu1 %v20832_v7  ;;  %14060 = vmatprep.subr.bf16.mxu0 %v20840_v38  ;;  %v20865_v7 = vld [vmem:[#allocation2 + $0x12e0] ss:$36 sps:$4 sm:$0xff]  }
 0x24f   :  { %14085 = vmatprep.subr.bf16.mxu1 %v20843_v39  ;;  %v20873_v38 = vld [vmem:[#allocation2 + $0x129c] ss:$36 sps:$4 sm:$0xff]  }
 0x250   :  { %v13750_v57 = vpop.f32.mrf.mxu0  ;;  %v20868_v39 = vld [vmem:[#allocation2 + $0x1058] ss:$36 sps:$4 sm:$0xff]  }
 0x251   :  { %14036 = vmatmul.mubr.bf16.vlgmr.msra.gmra.mxu1 %v23215_v26  ;;  %v13791_v10 = vpop.f32.mrf.mxu1  ;;  %v13751_v14 = vadd.f32 %v13750_v57, %v23405_v51  ;;  %14061 = vmatpush2.bf16.msra.mxu0 %v20838_v46  ;;  %v20850_v51 = vld [vmem:[#allocation2 + $0x1130] ss:$36 sps:$4 sm:$0xff]   ;;  %v20871_v46 = vld [vmem:[#allocation2 + $0x1298] ss:$36 sps:$4 sm:$0xff]  }
 0x252   :  { %14086 = vmatpush1.bf16.msra.mxu1 %v20841_v48  ;;  %v13752_v47 = vpop.f32.mrf.mxu0  ;;  %14062 = vmatprep.subr.bf16.mxu0 %v20846_v52  ;;  %v20876_v48 = vld [vmem:[#allocation2 + $0x1014] ss:$36 sps:$4 sm:$0xff]  }
 0x253   :  { %v13793_v4 = vpop.f32.mrf.mxu1  ;;  %14087 = vmatprep.subr.bf16.mxu1 %v20849_v6  ;;  %v13753_v8 = vadd.f32 %v13752_v47, %v23408_v55  ;;  %v23415_v53 = vadd.f32 %v13791_v10, %v13751_v14  ;;  %14117 = vmatprep.mubr.bf16.mxu1 %v23235_v41  ;;  %v20856_v55 = vld [vmem:[#allocation2 + $0x10e8] ss:$36 sps:$4 sm:$0xff]   ;;  %v20879_v52 = vld [vmem:[#allocation2 + $0x1254] ss:$36 sps:$4 sm:$0xff]  }
 0x254   :  { %v13754_v9 = vpop.f32.mrf.mxu0  ;;  %v20874_v6 = vld [vmem:[#allocation2 + $0x1010] ss:$36 sps:$4 sm:$0xff]   ;;  %v20888_v47 = vld [vmem:[#allocation2 + $0x1644] ss:$36 sps:$4 sm:$0xff]  }
 0x255   :  { %v13795_v11 = vpop.f32.mrf.mxu1  ;;  %v23418_v1 = vadd.f32 %v13793_v4, %v13753_v8  ;;  %14063 = vmatpush2.bf16.msra.mxu0 %v20844_v61  ;;  %v20877_v57 = vld [vmem:[#allocation2 + $0x1250] ss:$36 sps:$4 sm:$0xff]   ;;  %v20880_v61 = vld [vmem:[#allocation2 + $0xfc8] ss:$36 sps:$4 sm:$0xff]   ;;  %v20894_v8 = vld [vmem:[#allocation2 + $0x15fc] ss:$36 sps:$4 sm:$0xff]  }
 0x256   :  { %14088 = vmatpush1.bf16.msra.mxu1 %v20847_v62  ;;  %v13755_v2 = vpop.f32.mrf.mxu0  ;;  %14064 = vmatprep.subr.bf16.mxu0 %v20852_v3  ;;  %v20882_v10 = vld [vmem:[#allocation2 + $0xfcc] ss:$36 sps:$4 sm:$0xff]   ;;  %v20891_v4 = vld [vmem:[#allocation2 + $0x1884] ss:$36 sps:$4 sm:$0xff]   ;;  %v20897_v9 = vld [vmem:[#allocation2 + $0x183c] ss:$36 sps:$4 sm:$0xff]  }
 0x257   :  { %14089 = vmatprep.subr.bf16.mxu1 %v20855_v5  ;;  %v13796_v28 = vpop.f32.mrf.mxu1  ;;  %v20885_v14 = vld [vmem:[#allocation2 + $0x120c] ss:$36 sps:$4 sm:$0xff]   ;;  %v20886_v3 = vld [vmem:[#allocation2 + $0x1640] ss:$36 sps:$4 sm:$0xff]   ;;  %v20892_v11 = vld [vmem:[#allocation2 + $0x15f8] ss:$36 sps:$4 sm:$0xff]  }
 0x258   :  { %v20883_v62 = vld [vmem:[#allocation2 + $0x1208] ss:$36 sps:$4 sm:$0xff]   ;;  %v20889_v5 = vld [vmem:[#allocation2 + $0x1880] ss:$36 sps:$4 sm:$0xff]   ;;  %v20903_v2 = vld [vmem:[#allocation2 + $0x17f4] ss:$36 sps:$4 sm:$0xff]  }
 0x259   :  { %14065 = vmatpush2.bf16.msra.mxu0 %v20850_v51  ;;  %v20895_v51 = vld [vmem:[#allocation2 + $0x1838] ss:$36 sps:$4 sm:$0xff]   ;;  %v20906_v28 = vld [vmem:[#allocation2 + $0x156c] ss:$36 sps:$4 sm:$0xff]  }
 0x25a   :  { %14090 = vmatpush1.bf16.msra.mxu1 %v20853_v16  ;;  %14066 = vmatprep.subr.bf16.mxu0 %v20858_v58  ;;  %v20900_v16 = vld [vmem:[#allocation2 + $0x15b4] ss:$36 sps:$4 sm:$0xff]  }
 0x25b   :  { %14091 = vmatprep.subr.bf16.mxu1 %v20861_v24  ;;  %v20898_v58 = vld [vmem:[#allocation2 + $0x15b0] ss:$36 sps:$4 sm:$0xff]  }
 0x25c   :  { %v20901_v24 = vld [vmem:[#allocation2 + $0x17f0] ss:$36 sps:$4 sm:$0xff]  }
 0x25d   :  { %14067 = vmatpush2.bf16.msra.mxu0 %v20856_v55  ;;  %v20909_v55 = vld [vmem:[#allocation2 + $0x17ac] ss:$36 sps:$4 sm:$0xff]  }
 0x25e   :  { %14092 = vmatpush1.bf16.msra.mxu1 %v20859_v29  ;;  %14068 = vmatprep.subr.bf16.mxu0 %v20864_v63  ;;  %v20904_v29 = vld [vmem:[#allocation2 + $0x1568] ss:$36 sps:$4 sm:$0xff]  }
 0x25f   :  { %14093 = vmatprep.subr.bf16.mxu1 %v20867_v30  ;;  %v20907_v63 = vld [vmem:[#allocation2 + $0x17a8] ss:$36 sps:$4 sm:$0xff]  }
 0x260   :  { %v20912_v30 = vld [vmem:[#allocation2 + $0x1524] ss:$36 sps:$4 sm:$0xff]  }
 0x261   :  { %14069 = vmatpush2.bf16.msra.mxu0 %v20862_v49  ;;  %v20915_v49 = vld [vmem:[#allocation2 + $0x1764] ss:$36 sps:$4 sm:$0xff]  }
 0x262   :  { %14094 = vmatpush1.bf16.msra.mxu1 %v20865_v7  ;;  %14070 = vmatprep.subr.bf16.mxu0 %v20870_v37  ;;  %v20910_v7 = vld [vmem:[#allocation2 + $0x1520] ss:$36 sps:$4 sm:$0xff]  }
 0x263   :  { %14095 = vmatprep.subr.bf16.mxu1 %v20873_v38  ;;  %v20913_v37 = vld [vmem:[#allocation2 + $0x1760] ss:$36 sps:$4 sm:$0xff]  }
 0x264   :  { %v20918_v38 = vld [vmem:[#allocation2 + $0x14dc] ss:$36 sps:$4 sm:$0xff]  }
 0x265   :  { %14071 = vmatpush2.bf16.msra.mxu0 %v20868_v39  ;;  %v20921_v39 = vld [vmem:[#allocation2 + $0x171c] ss:$36 sps:$4 sm:$0xff]  }
 0x266   :  { %14096 = vmatpush1.bf16.msra.mxu1 %v20871_v46  ;;  %14072 = vmatprep.subr.bf16.mxu0 %v20876_v48  ;;  %v20916_v46 = vld [vmem:[#allocation2 + $0x14d8] ss:$36 sps:$4 sm:$0xff]  }
 0x267   :  { %14097 = vmatprep.subr.bf16.mxu1 %v20879_v52  ;;  %v20919_v48 = vld [vmem:[#allocation2 + $0x1718] ss:$36 sps:$4 sm:$0xff]  }
 0x268   :  { %v20924_v52 = vld [vmem:[#allocation2 + $0x1494] ss:$36 sps:$4 sm:$0xff]  }
 0x269   :  { %14073 = vmatpush2.bf16.msra.mxu0 %v20874_v6  ;;  %v20927_v6 = vld [vmem:[#allocation2 + $0x16d4] ss:$36 sps:$4 sm:$0xff]  }
 0x26a   :  { %14098 = vmatpush1.bf16.msra.mxu1 %v20877_v57  ;;  %14074 = vmatprep.subr.bf16.mxu0 %v20882_v10  ;;  %v20922_v57 = vld [vmem:[#allocation2 + $0x1490] ss:$36 sps:$4 sm:$0xff]  }
 0x26b   :  { %14099 = vmatprep.subr.bf16.mxu1 %v20885_v14  ;;  %v20925_v10 = vld [vmem:[#allocation2 + $0x16d0] ss:$36 sps:$4 sm:$0xff]  }
 0x26c   :  { %v20930_v14 = vld [vmem:[#allocation2 + $0x144c] ss:$36 sps:$4 sm:$0xff]  }
 0x26d   :  { %14075 = vmatpush2.bf16.msra.mxu0 %v20880_v61  ;;  %v20933_v61 = vld [vmem:[#allocation2 + $0x168c] ss:$36 sps:$4 sm:$0xff]  }
 0x26e   :  { %14100 = vmatpush1.bf16.msra.mxu1 %v20883_v62  ;;  %14126 = vmatprep.subr.bf16.mxu0 %v20891_v4  ;;  %v20928_v62 = vld [vmem:[#allocation2 + $0x1448] ss:$36 sps:$4 sm:$0xff]  }
 0x26f   :  { %14101 = vmatprep.subr.bf16.mxu1 %v20888_v47  ;;  %v20931_v47 = vld [vmem:[#allocation2 + $0x1688] ss:$36 sps:$4 sm:$0xff]  }
 0x270   :  { %14077 = vmatmul.mubr.bf16.vlgmr.msra.gmra.mxu0 %v23219_v31  ;;  %v20936_v4 = vld [vmem:[#allocation2 + $0x1ac4] ss:$36 sps:$4 sm:$0xff]  }
 0x271   :  { %14127 = vmatpush1.bf16.msra.mxu0 %v20889_v5  ;;  %14158 = vmatprep.mubr.bf16.mxu0 %v23240_v43  ;;  %v20934_v5 = vld [vmem:[#allocation2 + $0x1ac0] ss:$36 sps:$4 sm:$0xff]  }
 0x272   :  { %14102 = vmatpush2.bf16.msra.mxu1 %v20886_v3  ;;  %14128 = vmatprep.subr.bf16.mxu0 %v20897_v9  ;;  %v20939_v3 = vld [vmem:[#allocation2 + $0x1d04] ss:$36 sps:$4 sm:$0xff]   ;;  %v20942_v9 = vld [vmem:[#allocation2 + $0x1a7c] ss:$36 sps:$4 sm:$0xff]  }
 0x273   :  { %14103 = vmatprep.subr.bf16.mxu1 %v20894_v8  ;;  %v20937_v8 = vld [vmem:[#allocation2 + $0x1d00] ss:$36 sps:$4 sm:$0xff]  }
 0x275   :  { %14129 = vmatpush1.bf16.msra.mxu0 %v20895_v51  ;;  %v20940_v51 = vld [vmem:[#allocation2 + $0x1a78] ss:$36 sps:$4 sm:$0xff]  }
 0x276   :  { %14104 = vmatpush2.bf16.msra.mxu1 %v20892_v11  ;;  %14130 = vmatprep.subr.bf16.mxu0 %v20903_v2  ;;  %v20945_v11 = vld [vmem:[#allocation2 + $0x1cbc] ss:$36 sps:$4 sm:$0xff]  }
 0x277   :  { %14105 = vmatprep.subr.bf16.mxu1 %v20900_v16  ;;  %v20943_v16 = vld [vmem:[#allocation2 + $0x1cb8] ss:$36 sps:$4 sm:$0xff]  }
 0x279   :  { %14131 = vmatpush1.bf16.msra.mxu0 %v20901_v24 }
 0x27a   :  { %14106 = vmatpush2.bf16.msra.mxu1 %v20898_v58  ;;  %14132 = vmatprep.subr.bf16.mxu0 %v20909_v55 }
 0x27b   :  { %14107 = vmatprep.subr.bf16.mxu1 %v20906_v28 }
 0x27d   :  { %14133 = vmatpush1.bf16.msra.mxu0 %v20907_v63  ;;  %v20951_v63 = vld [vmem:[#allocation2 + $0x1c74] ss:$36 sps:$4 sm:$0xff]  }
 0x27e   :  { %14108 = vmatpush2.bf16.msra.mxu1 %v20904_v29  ;;  %14134 = vmatprep.subr.bf16.mxu0 %v20915_v49  ;;  %v20948_v29 = vld [vmem:[#allocation2 + $0x1a34] ss:$36 sps:$4 sm:$0xff]  }
 0x27f   :  { %14109 = vmatprep.subr.bf16.mxu1 %v20912_v30 }
 0x281   :  { %14135 = vmatpush1.bf16.msra.mxu0 %v20913_v37 }
 0x282   :  { %14110 = vmatpush2.bf16.msra.mxu1 %v20910_v7  ;;  %14136 = vmatprep.subr.bf16.mxu0 %v20921_v39  ;;  %v20949_v39 = vld [vmem:[#allocation2 + $0x1c70] ss:$36 sps:$4 sm:$0xff]  }
 0x283   :  { %14111 = vmatprep.subr.bf16.mxu1 %v20918_v38 }
 0x285   :  { %14137 = vmatpush1.bf16.msra.mxu0 %v20919_v48  ;;  %v20954_v48 = vld [vmem:[#allocation2 + $0x19ec] ss:$36 sps:$4 sm:$0xff]  }
 0x286   :  { %14112 = vmatpush2.bf16.msra.mxu1 %v20916_v46  ;;  %14138 = vmatprep.subr.bf16.mxu0 %v20927_v6 }
 0x287   :  { %14113 = vmatprep.subr.bf16.mxu1 %v20924_v52  ;;  %v20957_v52 = vld [vmem:[#allocation2 + $0x1c2c] ss:$36 sps:$4 sm:$0xff]  }
 0x289   :  { %14139 = vmatpush1.bf16.msra.mxu0 %v20925_v10  ;;  %v20960_v10 = vld [vmem:[#allocation2 + $0x19a4] ss:$36 sps:$4 sm:$0xff]  }
 0x28a   :  { %14114 = vmatpush2.bf16.msra.mxu1 %v20922_v57  ;;  %14140 = vmatprep.subr.bf16.mxu0 %v20933_v61  ;;  %v20955_v57 = vld [vmem:[#allocation2 + $0x1c28] ss:$36 sps:$4 sm:$0xff]   ;;  %v20958_v61 = vld [vmem:[#allocation2 + $0x19a0] ss:$36 sps:$4 sm:$0xff]  }
 0x28b   :  { %14115 = vmatprep.subr.bf16.mxu1 %v20930_v14  ;;  %v20963_v14 = vld [vmem:[#allocation2 + $0x1be4] ss:$36 sps:$4 sm:$0xff]  }
 0x28d   :  { %14141 = vmatpush1.bf16.msra.mxu0 %v20931_v47  ;;  %v20966_v47 = vld [vmem:[#allocation2 + $0x195c] ss:$36 sps:$4 sm:$0xff]  }
 0x28e   :  { %14116 = vmatpush2.bf16.msra.mxu1 %v20928_v62  ;;  %14142 = vmatprep.subr.bf16.mxu0 %v20936_v4  ;;  %v20961_v62 = vld [vmem:[#allocation2 + $0x1be0] ss:$36 sps:$4 sm:$0xff]  }
 0x28f   :  { %14167 = vmatprep.subr.bf16.mxu1 %v20939_v3  ;;  %v20969_v4 = vld [vmem:[#allocation2 + $0x1b9c] ss:$36 sps:$4 sm:$0xff]  }
 0x290   :  { %v13832_v2 = vpop.f32.mrf.mxu0  ;;  %v20964_v3 = vld [vmem:[#allocation2 + $0x1958] ss:$36 sps:$4 sm:$0xff]  }
 0x291   :  { %14118 = vmatmul.mubr.bf16.vlgmr.msra.gmra.mxu1 %v23252_v50  ;;  %v13873_v58 = vpop.f32.mrf.mxu1  ;;  %v13833_v24 = vadd.f32 %v13832_v2, %v23415_v53  ;;  %14143 = vmatpush2.bf16.msra.mxu0 %v20934_v5  ;;  %v20946_v53 = vld [vmem:[#allocation2 + $0x1a30] ss:$36 sps:$4 sm:$0xff]   ;;  %v20967_v5 = vld [vmem:[#allocation2 + $0x1b98] ss:$36 sps:$4 sm:$0xff]  }
 0x292   :  { %14168 = vmatpush1.bf16.msra.mxu1 %v20937_v8  ;;  %v13834_v28 = vpop.f32.mrf.mxu0  ;;  %14144 = vmatprep.subr.bf16.mxu0 %v20942_v9  ;;  %v20972_v8 = vld [vmem:[#allocation2 + $0x1914] ss:$36 sps:$4 sm:$0xff]   ;;  %v20981_v2 = vld [vmem:[#allocation2 + $0x1b0c] ss:$36 sps:$4 sm:$0xff]  }
 0x293   :  { %v13875_v55 = vpop.f32.mrf.mxu1  ;;  %14169 = vmatprep.subr.bf16.mxu1 %v20945_v11  ;;  %v13835_v30 = vadd.f32 %v13834_v28, %v23418_v1  ;;  %v23425_v49 = vadd.f32 %v13873_v58, %v13833_v24  ;;  %14199 = vmatprep.mubr.bf16.mxu1 %v23255_v54  ;;  %v20952_v1 = vld [vmem:[#allocation2 + $0x19e8] ss:$36 sps:$4 sm:$0xff]   ;;  %v20975_v9 = vld [vmem:[#allocation2 + $0x1b54] ss:$36 sps:$4 sm:$0xff]  }
 0x294   :  { %v13836_v7 = vpop.f32.mrf.mxu0  ;;  %v20970_v11 = vld [vmem:[#allocation2 + $0x1910] ss:$36 sps:$4 sm:$0xff]   ;;  %v20976_v58 = vld [vmem:[#allocation2 + $0x18c8] ss:$36 sps:$4 sm:$0xff]  }
 0x295   :  { %v13877_v37 = vpop.f32.mrf.mxu1  ;;  %v23428_v38 = vadd.f32 %v13875_v55, %v13835_v30  ;;  %14145 = vmatpush2.bf16.msra.mxu0 %v20940_v51  ;;  %v20973_v51 = vld [vmem:[#allocation2 + $0x1b50] ss:$36 sps:$4 sm:$0xff]   ;;  %v20979_v24 = vld [vmem:[#allocation2 + $0x1b08] ss:$36 sps:$4 sm:$0xff]   ;;  %v20990_v30 = vld [vmem:[#allocation2 + $0x1efc] ss:$36 sps:$4 sm:$0xff]  }
 0x296   :  { %14170 = vmatpush1.bf16.msra.mxu1 %v20943_v16  ;;  %v13837_v46 = vpop.f32.mrf.mxu0  ;;  %14146 = vmatprep.subr.bf16.mxu0 %v20948_v29  ;;  %v20978_v16 = vld [vmem:[#allocation2 + $0x18cc] ss:$36 sps:$4 sm:$0xff]   ;;  %v20984_v28 = vld [vmem:[#allocation2 + $0x1f44] ss:$36 sps:$4 sm:$0xff]   ;;  %v20993_v7 = vld [vmem:[#allocation2 + $0x213c] ss:$36 sps:$4 sm:$0xff]  }
 0x297   :  { %14171 = vmatprep.subr.bf16.mxu1 %v20951_v63  ;;  %v13878_v6 = vpop.f32.mrf.mxu1  ;;  %v20987_v55 = vld [vmem:[#allocation2 + $0x2184] ss:$36 sps:$4 sm:$0xff]   ;;  %v20988_v37 = vld [vmem:[#allocation2 + $0x1ef8] ss:$36 sps:$4 sm:$0xff]  }
 0x298   :  { %v20982_v29 = vld [vmem:[#allocation2 + $0x1f40] ss:$36 sps:$4 sm:$0xff]   ;;  %v20999_v6 = vld [vmem:[#allocation2 + $0x20f4] ss:$36 sps:$4 sm:$0xff]  }
 0x299   :  { %14147 = vmatpush2.bf16.msra.mxu0 %v20946_v53  ;;  %v20985_v63 = vld [vmem:[#allocation2 + $0x2180] ss:$36 sps:$4 sm:$0xff]   ;;  %v20991_v53 = vld [vmem:[#allocation2 + $0x2138] ss:$36 sps:$4 sm:$0xff]  }
 0x29a   :  { %14172 = vmatpush1.bf16.msra.mxu1 %v20949_v39  ;;  %14148 = vmatprep.subr.bf16.mxu0 %v20954_v48 }
 0x29b   :  { %14173 = vmatprep.subr.bf16.mxu1 %v20957_v52  ;;  %v20996_v52 = vld [vmem:[#allocation2 + $0x1eb4] ss:$36 sps:$4 sm:$0xff]  }
 0x29d   :  { %14149 = vmatpush2.bf16.msra.mxu0 %v20952_v1 }
 0x29e   :  { %14174 = vmatpush1.bf16.msra.mxu1 %v20955_v57  ;;  %14150 = vmatprep.subr.bf16.mxu0 %v20960_v10  ;;  %v20994_v57 = vld [vmem:[#allocation2 + $0x1eb0] ss:$36 sps:$4 sm:$0xff]  }
 0x29f   :  { %14175 = vmatprep.subr.bf16.mxu1 %v20963_v14  ;;  %v20997_v10 = vld [vmem:[#allocation2 + $0x20f0] ss:$36 sps:$4 sm:$0xff]  }
 0x2a1   :  { %14151 = vmatpush2.bf16.msra.mxu0 %v20958_v61 }
 0x2a2   :  { %14176 = vmatpush1.bf16.msra.mxu1 %v20961_v62  ;;  %14152 = vmatprep.subr.bf16.mxu0 %v20966_v47  ;;  %v21005_v62 = vld [vmem:[#allocation2 + $0x20ac] ss:$36 sps:$4 sm:$0xff]  }
 0x2a3   :  { %14177 = vmatprep.subr.bf16.mxu1 %v20969_v4  ;;  %v21000_v47 = vld [vmem:[#allocation2 + $0x1e68] ss:$36 sps:$4 sm:$0xff]  }
 0x2a4   :  { %v21003_v4 = vld [vmem:[#allocation2 + $0x20a8] ss:$36 sps:$4 sm:$0xff]  }
 0x2a5   :  { %14153 = vmatpush2.bf16.msra.mxu0 %v20964_v3  ;;  %v21011_v3 = vld [vmem:[#allocation2 + $0x2064] ss:$36 sps:$4 sm:$0xff]  }
 0x2a6   :  { %14178 = vmatpush1.bf16.msra.mxu1 %v20967_v5  ;;  %14154 = vmatprep.subr.bf16.mxu0 %v20972_v8  ;;  %v21006_v5 = vld [vmem:[#allocation2 + $0x1e20] ss:$36 sps:$4 sm:$0xff]  }
 0x2a7   :  { %14179 = vmatprep.subr.bf16.mxu1 %v20975_v9  ;;  %v21009_v8 = vld [vmem:[#allocation2 + $0x2060] ss:$36 sps:$4 sm:$0xff]  }
 0x2a8   :  { %v21014_v9 = vld [vmem:[#allocation2 + $0x1ddc] ss:$36 sps:$4 sm:$0xff]  }
 0x2a9   :  { %14155 = vmatpush2.bf16.msra.mxu0 %v20970_v11  ;;  %v21017_v11 = vld [vmem:[#allocation2 + $0x201c] ss:$36 sps:$4 sm:$0xff]  }
 0x2aa   :  { %14180 = vmatpush1.bf16.msra.mxu1 %v20973_v51  ;;  %14156 = vmatprep.subr.bf16.mxu0 %v20978_v16  ;;  %v21012_v51 = vld [vmem:[#allocation2 + $0x1dd8] ss:$36 sps:$4 sm:$0xff]  }
 0x2ab   :  { %14181 = vmatprep.subr.bf16.mxu1 %v20981_v2  ;;  %v21015_v16 = vld [vmem:[#allocation2 + $0x2018] ss:$36 sps:$4 sm:$0xff]  }
 0x2ac   :  { %v21020_v2 = vld [vmem:[#allocation2 + $0x1d94] ss:$36 sps:$4 sm:$0xff]  }
 0x2ad   :  { %14157 = vmatpush2.bf16.msra.mxu0 %v20976_v58  ;;  %v21023_v58 = vld [vmem:[#allocation2 + $0x1fd4] ss:$36 sps:$4 sm:$0xff]  }
 0x2ae   :  { %14182 = vmatpush1.bf16.msra.mxu1 %v20979_v24  ;;  %14208 = vmatprep.subr.bf16.mxu0 %v20987_v55  ;;  %v21018_v24 = vld [vmem:[#allocation2 + $0x1d90] ss:$36 sps:$4 sm:$0xff]  }
 0x2af   :  { %14183 = vmatprep.subr.bf16.mxu1 %v20984_v28  ;;  %v21021_v28 = vld [vmem:[#allocation2 + $0x1fd0] ss:$36 sps:$4 sm:$0xff]  }
 0x2b0   :  { %v13914_v39 = vpop.f32.mrf.mxu0  ;;  %14159 = vmatmul.mubr.bf16.vlgmr.msra.gmra.mxu0 %v23259_v56  ;;  %v21026_v55 = vld [vmem:[#allocation2 + $0x1d4c] ss:$36 sps:$4 sm:$0xff]  }
 0x2b1   :  { %v23432_v46 = vadd.f32 %v13914_v39, %v23425_v49  ;;  %14209 = vmatpush1.bf16.msra.mxu0 %v20985_v63  ;;  %14240 = vmatprep.mubr.bf16.mxu0 %v23263_v59  ;;  %v21002_v49 = vld [vmem:[#allocation2 + $0x1e6c] ss:$36 sps:$4 sm:$0xff]   ;;  %v21033_v39 = vld [vmem:[#allocation2 + $0x2600] ss:$36 sps:$4 sm:$0xff]  }
 0x2b2   :  { %14184 = vmatpush2.bf16.msra.mxu1 %v20982_v29  ;;  %v13916_v48 = vpop.f32.mrf.mxu0  ;;  %14210 = vmatprep.subr.bf16.mxu0 %v20993_v7  ;;  %v21029_v29 = vld [vmem:[#allocation2 + $0x1f8c] ss:$36 sps:$4 sm:$0xff]   ;;  %v21032_v7 = vld [vmem:[#allocation2 + $0x23c4] ss:$36 sps:$4 sm:$0xff]  }
 0x2b3   :  { %14185 = vmatprep.subr.bf16.mxu1 %v20990_v30  ;;  %v23435_v1 = vadd.f32 %v13916_v48, %v23428_v38  ;;  %v21008_v38 = vld [vmem:[#allocation2 + $0x1e24] ss:$36 sps:$4 sm:$0xff]   ;;  %v21038_v48 = vld [vmem:[#allocation2 + $0x237c] ss:$36 sps:$4 sm:$0xff]  }
 0x2b4   :  { %v13918_v14 = vpop.f32.mrf.mxu0  ;;  %v21024_v63 = vld [vmem:[#allocation2 + $0x1d48] ss:$36 sps:$4 sm:$0xff]  }
 0x2b5   :  { %14211 = vmatpush1.bf16.msra.mxu0 %v20991_v53  ;;  %v21027_v30 = vld [vmem:[#allocation2 + $0x1f88] ss:$36 sps:$4 sm:$0xff]   ;;  %v21030_v53 = vld [vmem:[#allocation2 + $0x23c0] ss:$36 sps:$4 sm:$0xff]   ;;  %v21044_v14 = vld [vmem:[#allocation2 + $0x2334] ss:$36 sps:$4 sm:$0xff]  }
 0x2b6   :  { %14186 = vmatpush2.bf16.msra.mxu1 %v20988_v37  ;;  %v13919_v61 = vpop.f32.mrf.mxu0  ;;  %14212 = vmatprep.subr.bf16.mxu0 %v20999_v6  ;;  %v21035_v37 = vld [vmem:[#allocation2 + $0x2604] ss:$36 sps:$4 sm:$0xff]   ;;  %v21036_v6 = vld [vmem:[#allocation2 + $0x2378] ss:$36 sps:$4 sm:$0xff]  }
 0x2b7   :  { %14187 = vmatprep.subr.bf16.mxu1 %v20996_v52  ;;  %v21041_v52 = vld [vmem:[#allocation2 + $0x25bc] ss:$36 sps:$4 sm:$0xff]   ;;  %v21047_v61 = vld [vmem:[#allocation2 + $0x2574] ss:$36 sps:$4 sm:$0xff]  }
 0x2b9   :  { %14213 = vmatpush1.bf16.msra.mxu0 %v20997_v10 }
 0x2ba   :  { %14188 = vmatpush2.bf16.msra.mxu1 %v20994_v57  ;;  %14214 = vmatprep.subr.bf16.mxu0 %v21005_v62  ;;  %v21039_v57 = vld [vmem:[#allocation2 + $0x25b8] ss:$36 sps:$4 sm:$0xff]  }
 0x2bb   :  { %14189 = vmatprep.subr.bf16.mxu1 %v21002_v49 }
 0x2bd   :  { %14215 = vmatpush1.bf16.msra.mxu0 %v21003_v4  ;;  %v21045_v4 = vld [vmem:[#allocation2 + $0x2570] ss:$36 sps:$4 sm:$0xff]  }
 0x2be   :  { %14190 = vmatpush2.bf16.msra.mxu1 %v21000_v47  ;;  %14216 = vmatprep.subr.bf16.mxu0 %v21011_v3  ;;  %v21042_v47 = vld [vmem:[#allocation2 + $0x2330] ss:$36 sps:$4 sm:$0xff]  }
 0x2bf   :  { %14191 = vmatprep.subr.bf16.mxu1 %v21008_v38  ;;  %v21050_v38 = vld [vmem:[#allocation2 + $0x22ec] ss:$36 sps:$4 sm:$0xff]  }
 0x2c0   :  { %v21053_v3 = vld [vmem:[#allocation2 + $0x252c] ss:$36 sps:$4 sm:$0xff]  }
 0x2c1   :  { %14217 = vmatpush1.bf16.msra.mxu0 %v21009_v8  ;;  %v21048_v8 = vld [vmem:[#allocation2 + $0x22e8] ss:$36 sps:$4 sm:$0xff]  }
 0x2c2   :  { %14192 = vmatpush2.bf16.msra.mxu1 %v21006_v5  ;;  %14218 = vmatprep.subr.bf16.mxu0 %v21017_v11  ;;  %v21056_v11 = vld [vmem:[#allocation2 + $0x22a4] ss:$36 sps:$4 sm:$0xff]  }
 0x2c3   :  { %14193 = vmatprep.subr.bf16.mxu1 %v21014_v9  ;;  %v21051_v9 = vld [vmem:[#allocation2 + $0x2528] ss:$36 sps:$4 sm:$0xff]  }
 0x2c5   :  { %14219 = vmatpush1.bf16.msra.mxu0 %v21015_v16  ;;  %v21054_v16 = vld [vmem:[#allocation2 + $0x22a0] ss:$36 sps:$4 sm:$0xff]  }
 0x2c6   :  { %14194 = vmatpush2.bf16.msra.mxu1 %v21012_v51  ;;  %14220 = vmatprep.subr.bf16.mxu0 %v21023_v58  ;;  %v21059_v51 = vld [vmem:[#allocation2 + $0x24e4] ss:$36 sps:$4 sm:$0xff]   ;;  %v21062_v58 = vld [vmem:[#allocation2 + $0x225c] ss:$36 sps:$4 sm:$0xff]  }
 0x2c7   :  { %14195 = vmatprep.subr.bf16.mxu1 %v21020_v2  ;;  %v21057_v2 = vld [vmem:[#allocation2 + $0x24e0] ss:$36 sps:$4 sm:$0xff]  }
 0x2c9   :  { %14221 = vmatpush1.bf16.msra.mxu0 %v21021_v28  ;;  %v21060_v28 = vld [vmem:[#allocation2 + $0x2258] ss:$36 sps:$4 sm:$0xff]  }
 0x2ca   :  { %14196 = vmatpush2.bf16.msra.mxu1 %v21018_v24  ;;  %14222 = vmatprep.subr.bf16.mxu0 %v21029_v29  ;;  %v21065_v24 = vld [vmem:[#allocation2 + $0x249c] ss:$36 sps:$4 sm:$0xff]   ;;  %v21068_v29 = vld [vmem:[#allocation2 + $0x2214] ss:$36 sps:$4 sm:$0xff]  }
 0x2cb   :  { %14197 = vmatprep.subr.bf16.mxu1 %v21026_v55  ;;  %v21063_v55 = vld [vmem:[#allocation2 + $0x2498] ss:$36 sps:$4 sm:$0xff]  }
 0x2cd   :  { %14223 = vmatpush1.bf16.msra.mxu0 %v21027_v30  ;;  %v21066_v30 = vld [vmem:[#allocation2 + $0x2210] ss:$36 sps:$4 sm:$0xff]  }
 0x2ce   :  { %14198 = vmatpush2.bf16.msra.mxu1 %v21024_v63  ;;  %14224 = vmatprep.subr.bf16.mxu0 %v21032_v7  ;;  %v21071_v63 = vld [vmem:[#allocation2 + $0x2454] ss:$36 sps:$4 sm:$0xff]  }
 0x2cf   :  { %14249 = vmatprep.subr.bf16.mxu1 %v21035_v37  ;;  %v21069_v7 = vld [vmem:[#allocation2 + $0x2450] ss:$36 sps:$4 sm:$0xff]  }
 0x2d0   :  { %v21074_v37 = vld [vmem:[#allocation2 + $0x21cc] ss:$36 sps:$4 sm:$0xff]  }
 0x2d1   :  { %14200 = vmatmul.mubr.bf16.vlgmr.msra.gmra.mxu1 %v23285_v15  ;;  %v23439_v10 = vpop.f32.mrf.mxu1  ;;  %14225 = vmatpush2.bf16.msra.mxu0 %v21030_v53  ;;  %v21077_v53 = vld [vmem:[#allocation2 + $0x240c] ss:$36 sps:$4 sm:$0xff]  }
 0x2d2   :  { %14250 = vmatpush1.bf16.msra.mxu1 %v21033_v39  ;;  %14226 = vmatprep.subr.bf16.mxu0 %v21038_v48  ;;  %v2380_v39 = vsub.s32 2, %v23172_v42  ;;  %v2384_v48 = vsub.s32 3, %v23172_v42 }
 0x2d3   :  { %14251 = vmatprep.subr.bf16.mxu1 %v21041_v52  ;;  %v23441_v49 = vpop.f32.mrf.mxu1  ;;  %14281 = vmatprep.mubr.bf16.mxu1 %v23290_v22  ;;  %v21072_v52 = vld [vmem:[#allocation2 + $0x21c8] ss:$36 sps:$4 sm:$0xff]  }
 0x2d5   :  { %v13959_v62 = vpop.f32.mrf.mxu1  ;;  %14227 = vmatpush2.bf16.msra.mxu0 %v21036_v6  ;;  %v21075_v6 = vld [vmem:[#allocation2 + $0x2408] ss:$36 sps:$4 sm:$0xff]  }
 0x2d6   :  { %14252 = vmatpush1.bf16.msra.mxu1 %v21039_v57  ;;  %14228 = vmatprep.subr.bf16.mxu0 %v21044_v14  ;;  %v21080_v57 = vld [vmem:[#allocation2 + $0x2844] ss:$36 sps:$4 sm:$0xff]  }
 0x2d7   :  { %14253 = vmatprep.subr.bf16.mxu1 %v21047_v61  ;;  %v13960_v5 = vpop.f32.mrf.mxu1  ;;  %v21083_v14 = vld [vmem:[#allocation2 + $0x2a84] ss:$36 sps:$4 sm:$0xff]  }
 0x2d8   :  { %v23074_v61 = vld [vmem:[%s24069_s2] sm:$0xff] }
 0x2d9   :  { %14229 = vmatpush2.bf16.msra.mxu0 %v21042_v47  ;;  %v2381_v62 = vrot.slane %v23074_v61, %v2380_v39  ;;  %v21078_v47 = vld [vmem:[#allocation2 + $0x2840] ss:$36 sps:$4 sm:$0xff]  }
 0x2da   :  { %14254 = vmatpush1.bf16.msra.mxu1 %v21045_v4  ;;  %14230 = vmatprep.subr.bf16.mxu0 %v21050_v38  ;;  %v21081_v4 = vld [vmem:[#allocation2 + $0x2a80] ss:$36 sps:$4 sm:$0xff]   ;;  %v2385_v38 = vrot.slane %v23074_v61, %v2384_v48  ;;  %v21108_v61 = vld [vmem:[#allocation2 + $0x26d8] ss:$36 sps:$4 sm:$0xff]  }
 0x2db   :  { %14255 = vmatprep.subr.bf16.mxu1 %v21053_v3  ;;  %v21086_v3 = vld [vmem:[#allocation2 + $0x27fc] ss:$36 sps:$4 sm:$0xff]   ;;  %v21104_v39 = vld [vmem:[#allocation2 + $0x2724] ss:$36 sps:$4 sm:$0xff]  }
 0x2dc   :  { %v21089_v5 = vld [vmem:[#allocation2 + $0x2a3c] ss:$36 sps:$4 sm:$0xff]   ;;  %v21107_v48 = vld [vmem:[#allocation2 + $0x2964] ss:$36 sps:$4 sm:$0xff]  }
 0x2dd   :  { %14231 = vmatpush2.bf16.msra.mxu0 %v21048_v8  ;;  %v13956_v8 = vadd.f32 %v23439_v10, %v2381_v62  ;;  %v21093_v10 = vld [vmem:[#allocation2 + $0x29f0] ss:$36 sps:$4 sm:$0xff]   ;;  %v21111_v62 = vld [vmem:[#allocation2 + $0x2918] ss:$36 sps:$4 sm:$0xff]  }
 0x2de   :  { %14256 = vmatpush1.bf16.msra.mxu1 %v21051_v9  ;;  %14232 = vmatprep.subr.bf16.mxu0 %v21056_v11  ;;  %v21084_v9 = vld [vmem:[#allocation2 + $0x27f8] ss:$36 sps:$4 sm:$0xff]  }
 0x2df   :  { %14257 = vmatprep.subr.bf16.mxu1 %v21059_v51  ;;  %v21087_v11 = vld [vmem:[#allocation2 + $0x2a38] ss:$36 sps:$4 sm:$0xff]  }
 0x2e1   :  { %14233 = vmatpush2.bf16.msra.mxu0 %v21054_v16  ;;  %v13958_v16 = vadd.f32 %v23441_v49, %v2385_v38  ;;  %v21098_v49 = vld [vmem:[#allocation2 + $0x276c] ss:$36 sps:$4 sm:$0xff]  }
 0x2e2   :  { %14258 = vmatpush1.bf16.msra.mxu1 %v21057_v2  ;;  %14234 = vmatprep.subr.bf16.mxu0 %v21062_v58  ;;  %v21114_v38 = vld [vmem:[#allocation2 + $0x2690] ss:$36 sps:$4 sm:$0xff]  }
 0x2e3   :  { %14259 = vmatprep.subr.bf16.mxu1 %v21065_v24  ;;  %v21092_v24 = vld [vmem:[#allocation2 + $0x27b4] ss:$36 sps:$4 sm:$0xff]  }
 0x2e5   :  { %14235 = vmatpush2.bf16.msra.mxu0 %v21060_v28  ;;  %v21095_v28 = vld [vmem:[#allocation2 + $0x29f4] ss:$36 sps:$4 sm:$0xff]  }
 0x2e6   :  { %14260 = vmatpush1.bf16.msra.mxu1 %v21063_v55  ;;  %14236 = vmatprep.subr.bf16.mxu0 %v21068_v29  ;;  %v21090_v29 = vld [vmem:[#allocation2 + $0x27b0] ss:$36 sps:$4 sm:$0xff]  }
 0x2e7   :  { %14261 = vmatprep.subr.bf16.mxu1 %v21071_v63 }
 0x2e9   :  { %14237 = vmatpush2.bf16.msra.mxu0 %v21066_v30 }
 0x2ea   :  { %14262 = vmatpush1.bf16.msra.mxu1 %v21069_v7  ;;  %14238 = vmatprep.subr.bf16.mxu0 %v21074_v37  ;;  %v21101_v7 = vld [vmem:[#allocation2 + $0x29ac] ss:$36 sps:$4 sm:$0xff]  }
 0x2eb   :  { %14263 = vmatprep.subr.bf16.mxu1 %v21077_v53  ;;  %v21096_v37 = vld [vmem:[#allocation2 + $0x2768] ss:$36 sps:$4 sm:$0xff]  }
 0x2ec   :  { %v21099_v53 = vld [vmem:[#allocation2 + $0x29a8] ss:$36 sps:$4 sm:$0xff]  }
 0x2ed   :  { %14239 = vmatpush2.bf16.msra.mxu0 %v21072_v52  ;;  %v21102_v52 = vld [vmem:[#allocation2 + $0x2720] ss:$36 sps:$4 sm:$0xff]  }
 0x2ee   :  { %14264 = vmatpush1.bf16.msra.mxu1 %v21075_v6  ;;  %14290 = vmatprep.subr.bf16.mxu0 %v21083_v14  ;;  %v21105_v6 = vld [vmem:[#allocation2 + $0x2960] ss:$36 sps:$4 sm:$0xff]  }
 0x2ef   :  { %14265 = vmatprep.subr.bf16.mxu1 %v21080_v57  ;;  %v21110_v57 = vld [vmem:[#allocation2 + $0x26dc] ss:$36 sps:$4 sm:$0xff]  }
 0x2f0   :  { %v13996_v51 = vpop.f32.mrf.mxu0  ;;  %14241 = vmatmul.mubr.bf16.vlgmr.msra.gmra.mxu0 %v23294_v27  ;;  %v21113_v14 = vld [vmem:[#allocation2 + $0x291c] ss:$36 sps:$4 sm:$0xff]  }
 0x2f1   :  { %v23452_v2 = vadd.f32 %v13996_v51, %v13956_v8  ;;  %14291 = vmatpush1.bf16.msra.mxu0 %v21081_v4  ;;  %14322 = vmatprep.mubr.bf16.mxu0 %v23298_v32  ;;  %v21119_v4 = vld [vmem:[#allocation2 + $0x28d4] ss:$36 sps:$4 sm:$0xff]   ;;  %v21125_v8 = vld [vmem:[#allocation2 + $0x288c] ss:$36 sps:$4 sm:$0xff]   ;;  %v21128_v51 = vld [vmem:[#allocation2 + $0x2cc4] ss:$36 sps:$4 sm:$0xff]  }
 0x2f2   :  { %14266 = vmatpush2.bf16.msra.mxu1 %v21078_v47  ;;  %v13998_v58 = vpop.f32.mrf.mxu0  ;;  %14292 = vmatprep.subr.bf16.mxu0 %v21089_v5  ;;  %v21116_v47 = vld [vmem:[#allocation2 + $0x2694] ss:$36 sps:$4 sm:$0xff]   ;;  %v21122_v5 = vld [vmem:[#allocation2 + $0x264c] ss:$36 sps:$4 sm:$0xff]  }
 0x2f3   :  { %14267 = vmatprep.subr.bf16.mxu1 %v21086_v3  ;;  %v23454_v55 = vadd.f32 %v13998_v58, %v13958_v16  ;;  %v21117_v3 = vld [vmem:[#allocation2 + $0x28d0] ss:$36 sps:$4 sm:$0xff]   ;;  %v21131_v16 = vld [vmem:[#allocation2 + $0x2f04] ss:$36 sps:$4 sm:$0xff]  }
 0x2f4   :  { %v14000_v63 = vpop.f32.mrf.mxu0  ;;  %v21126_v58 = vld [vmem:[#allocation2 + $0x2cc0] ss:$36 sps:$4 sm:$0xff]  }
 0x2f5   :  { %14293 = vmatpush1.bf16.msra.mxu0 %v21087_v11  ;;  %v21123_v11 = vld [vmem:[#allocation2 + $0x2888] ss:$36 sps:$4 sm:$0xff]   ;;  %v21135_v63 = vld [vmem:[#allocation2 + $0x2eb8] ss:$36 sps:$4 sm:$0xff]  }
 0x2f6   :  { %14268 = vmatpush2.bf16.msra.mxu1 %v21084_v9  ;;  %v14001_v30 = vpop.f32.mrf.mxu0  ;;  %14294 = vmatprep.subr.bf16.mxu0 %v21095_v28  ;;  %v21120_v9 = vld [vmem:[#allocation2 + $0x2648] ss:$36 sps:$4 sm:$0xff]   ;;  %v21134_v28 = vld [vmem:[#allocation2 + $0x2c7c] ss:$36 sps:$4 sm:$0xff]  }
 0x2f7   :  { %14269 = vmatprep.subr.bf16.mxu1 %v21092_v24  ;;  %v21129_v24 = vld [vmem:[#allocation2 + $0x2f00] ss:$36 sps:$4 sm:$0xff]  }
 0x2f9   :  { %14295 = vmatpush1.bf16.msra.mxu0 %v21093_v10  ;;  %v21132_v10 = vld [vmem:[#allocation2 + $0x2c78] ss:$36 sps:$4 sm:$0xff]  }
 0x2fa   :  { %14270 = vmatpush2.bf16.msra.mxu1 %v21090_v29  ;;  %14296 = vmatprep.subr.bf16.mxu0 %v21101_v7  ;;  %v21137_v29 = vld [vmem:[#allocation2 + $0x2ebc] ss:$36 sps:$4 sm:$0xff]  }
 0x2fb   :  { %14271 = vmatprep.subr.bf16.mxu1 %v21098_v49 }
 0x2fd   :  { %14297 = vmatpush1.bf16.msra.mxu0 %v21099_v53  ;;  %v21143_v53 = vld [vmem:[#allocation2 + $0x2e74] ss:$36 sps:$4 sm:$0xff]  }
 0x2fe   :  { %14272 = vmatpush2.bf16.msra.mxu1 %v21096_v37  ;;  %14298 = vmatprep.subr.bf16.mxu0 %v21107_v48  ;;  %v21140_v37 = vld [vmem:[#allocation2 + $0x2c34] ss:$36 sps:$4 sm:$0xff]  }
 0x2ff   :  { %14273 = vmatprep.subr.bf16.mxu1 %v21104_v39 }
 0x301   :  { %14299 = vmatpush1.bf16.msra.mxu0 %v21105_v6  ;;  %v21141_v6 = vld [vmem:[#allocation2 + $0x2e70] ss:$36 sps:$4 sm:$0xff]  }
 0x302   :  { %14274 = vmatpush2.bf16.msra.mxu1 %v21102_v52  ;;  %14300 = vmatprep.subr.bf16.mxu0 %v21113_v14  ;;  %v21138_v52 = vld [vmem:[#allocation2 + $0x2c30] ss:$36 sps:$4 sm:$0xff]  }
 0x303   :  { %14275 = vmatprep.subr.bf16.mxu1 %v21110_v57  ;;  %v21149_v57 = vld [vmem:[#allocation2 + $0x2e2c] ss:$36 sps:$4 sm:$0xff]  }
 0x305   :  { %14301 = vmatpush1.bf16.msra.mxu0 %v21111_v62  ;;  %v21147_v62 = vld [vmem:[#allocation2 + $0x2e28] ss:$36 sps:$4 sm:$0xff]  }
 0x306   :  { %14276 = vmatpush2.bf16.msra.mxu1 %v21108_v61  ;;  %14302 = vmatprep.subr.bf16.mxu0 %v21119_v4  ;;  %v21144_v61 = vld [vmem:[#allocation2 + $0x2be8] ss:$36 sps:$4 sm:$0xff]   ;;  %v21150_v4 = vld [vmem:[#allocation2 + $0x2ba0] ss:$36 sps:$4 sm:$0xff]  }
 0x307   :  { %14277 = vmatprep.subr.bf16.mxu1 %v21116_v47  ;;  %v21155_v47 = vld [vmem:[#allocation2 + $0x2de4] ss:$36 sps:$4 sm:$0xff]  }
 0x309   :  { %14303 = vmatpush1.bf16.msra.mxu0 %v21117_v3  ;;  %v21158_v3 = vld [vmem:[#allocation2 + $0x2b5c] ss:$36 sps:$4 sm:$0xff]  }
 0x30a   :  { %14278 = vmatpush2.bf16.msra.mxu1 %v21114_v38  ;;  %14304 = vmatprep.subr.bf16.mxu0 %v21125_v8  ;;  %v21153_v38 = vld [vmem:[#allocation2 + $0x2de0] ss:$36 sps:$4 sm:$0xff]   ;;  %v21156_v8 = vld [vmem:[#allocation2 + $0x2b58] ss:$36 sps:$4 sm:$0xff]  }
 0x30b   :  { %14279 = vmatprep.subr.bf16.mxu1 %v21122_v5  ;;  %v21161_v5 = vld [vmem:[#allocation2 + $0x2d9c] ss:$36 sps:$4 sm:$0xff]  }
 0x30d   :  { %14305 = vmatpush1.bf16.msra.mxu0 %v21123_v11  ;;  %v21164_v11 = vld [vmem:[#allocation2 + $0x2b14] ss:$36 sps:$4 sm:$0xff]  }
 0x30e   :  { %14280 = vmatpush2.bf16.msra.mxu1 %v21120_v9  ;;  %14306 = vmatprep.subr.bf16.mxu0 %v21128_v51  ;;  %v21159_v9 = vld [vmem:[#allocation2 + $0x2d98] ss:$36 sps:$4 sm:$0xff]  }
 0x30f   :  { %14331 = vmatprep.subr.bf16.mxu1 %v21131_v16  ;;  %v21167_v51 = vld [vmem:[#allocation2 + $0x2d54] ss:$36 sps:$4 sm:$0xff]  }
 0x310   :  { %v21162_v16 = vld [vmem:[#allocation2 + $0x2b10] ss:$36 sps:$4 sm:$0xff]  }
 0x311   :  { %v14037_v30 = vpop.f32.mrf.mxu1  ;;  %14282 = vmatmul.mubr.bf16.vlgmr.msra.gmra.mxu1 %v23317_v12  ;;  %14307 = vmatpush2.bf16.msra.mxu0 %v21126_v58  ;;  %v21165_v58 = vld [vmem:[#allocation2 + $0x2d50] ss:$36 sps:$4 sm:$0xff]  }
 0x312   :  { %v23459_v49 = vadd.f32 %v14037_v30, %v23452_v2  ;;  %14332 = vmatpush1.bf16.msra.mxu1 %v21129_v24  ;;  %14308 = vmatprep.subr.bf16.mxu0 %v21134_v28  ;;  %v21146_v2 = vld [vmem:[#allocation2 + $0x2bec] ss:$36 sps:$4 sm:$0xff]   ;;  %v21179_v30 = vld [vmem:[#allocation2 + $0x3384] ss:$36 sps:$4 sm:$0xff]  }
 0x313   :  { %v14039_v7 = vpop.f32.mrf.mxu1  ;;  %14333 = vmatprep.subr.bf16.mxu1 %v21137_v29  ;;  %14363 = vmatprep.mubr.bf16.mxu1 %v23320_v25  ;;  %v21170_v24 = vld [vmem:[#allocation2 + $0x2acc] ss:$36 sps:$4 sm:$0xff]  }
 0x314   :  { %v23462_v39 = vadd.f32 %v14039_v7, %v23454_v55  ;;  %v21152_v55 = vld [vmem:[#allocation2 + $0x2ba4] ss:$36 sps:$4 sm:$0xff]   ;;  %v21173_v28 = vld [vmem:[#allocation2 + $0x2d0c] ss:$36 sps:$4 sm:$0xff]  }
 0x315   :  { %v14041_v48 = vpop.f32.mrf.mxu1  ;;  %14309 = vmatpush2.bf16.msra.mxu0 %v21132_v10  ;;  %v21168_v29 = vld [vmem:[#allocation2 + $0x2ac8] ss:$36 sps:$4 sm:$0xff]   ;;  %v21174_v7 = vld [vmem:[#allocation2 + $0x3140] ss:$36 sps:$4 sm:$0xff]  }
 0x316   :  { %14334 = vmatpush1.bf16.msra.mxu1 %v21135_v63  ;;  %14310 = vmatprep.subr.bf16.mxu0 %v21140_v37  ;;  %v21171_v10 = vld [vmem:[#allocation2 + $0x2d08] ss:$36 sps:$4 sm:$0xff]   ;;  %v21177_v37 = vld [vmem:[#allocation2 + $0x3380] ss:$36 sps:$4 sm:$0xff]  }
 0x317   :  { %14335 = vmatprep.subr.bf16.mxu1 %v21143_v53  ;;  %v14042_v14 = vpop.f32.mrf.mxu1  ;;  %v21176_v63 = vld [vmem:[#allocation2 + $0x3144] ss:$36 sps:$4 sm:$0xff]   ;;  %v21182_v53 = vld [vmem:[#allocation2 + $0x30fc] ss:$36 sps:$4 sm:$0xff]  }
 0x318   :  { %v21185_v48 = vld [vmem:[#allocation2 + $0x333c] ss:$36 sps:$4 sm:$0xff]  }
 0x319   :  { %14311 = vmatpush2.bf16.msra.mxu0 %v21138_v52  ;;  %v21180_v52 = vld [vmem:[#allocation2 + $0x30f8] ss:$36 sps:$4 sm:$0xff]  }
 0x31a   :  { %14336 = vmatpush1.bf16.msra.mxu1 %v21141_v6  ;;  %14312 = vmatprep.subr.bf16.mxu0 %v21146_v2  ;;  %v21183_v6 = vld [vmem:[#allocation2 + $0x3338] ss:$36 sps:$4 sm:$0xff]  }
 0x31b   :  { %14337 = vmatprep.subr.bf16.mxu1 %v21149_v57 }
 0x31d   :  { %14313 = vmatpush2.bf16.msra.mxu0 %v21144_v61  ;;  %v21188_v61 = vld [vmem:[#allocation2 + $0x30b4] ss:$36 sps:$4 sm:$0xff]  }
 0x31e   :  { %14338 = vmatpush1.bf16.msra.mxu1 %v21147_v62  ;;  %14314 = vmatprep.subr.bf16.mxu0 %v21152_v55  ;;  %v21191_v62 = vld [vmem:[#allocation2 + $0x32f4] ss:$36 sps:$4 sm:$0xff]  }
 0x31f   :  { %14339 = vmatprep.subr.bf16.mxu1 %v21155_v47  ;;  %v21186_v47 = vld [vmem:[#allocation2 + $0x30b0] ss:$36 sps:$4 sm:$0xff]  }
 0x321   :  { %14315 = vmatpush2.bf16.msra.mxu0 %v21150_v4  ;;  %v21189_v4 = vld [vmem:[#allocation2 + $0x32f0] ss:$36 sps:$4 sm:$0xff]  }
 0x322   :  { %14340 = vmatpush1.bf16.msra.mxu1 %v21153_v38  ;;  %14316 = vmatprep.subr.bf16.mxu0 %v21158_v3 }
 0x323   :  { %14341 = vmatprep.subr.bf16.mxu1 %v21161_v5  ;;  %v21197_v5 = vld [vmem:[#allocation2 + $0x32ac] ss:$36 sps:$4 sm:$0xff]  }
 0x325   :  { %14317 = vmatpush2.bf16.msra.mxu0 %v21156_v8  ;;  %v21192_v8 = vld [vmem:[#allocation2 + $0x3068] ss:$36 sps:$4 sm:$0xff]  }
 0x326   :  { %14342 = vmatpush1.bf16.msra.mxu1 %v21159_v9  ;;  %14318 = vmatprep.subr.bf16.mxu0 %v21164_v11  ;;  %v21195_v9 = vld [vmem:[#allocation2 + $0x32a8] ss:$36 sps:$4 sm:$0xff]  }
 0x327   :  { %14343 = vmatprep.subr.bf16.mxu1 %v21167_v51  ;;  %v21203_v11 = vld [vmem:[#allocation2 + $0x3264] ss:$36 sps:$4 sm:$0xff]  }
 0x328   :  { %v21198_v51 = vld [vmem:[#allocation2 + $0x3020] ss:$36 sps:$4 sm:$0xff]  }
 0x329   :  { %14319 = vmatpush2.bf16.msra.mxu0 %v21162_v16  ;;  %v21201_v16 = vld [vmem:[#allocation2 + $0x3260] ss:$36 sps:$4 sm:$0xff]  }
 0x32a   :  { %14344 = vmatpush1.bf16.msra.mxu1 %v21165_v58  ;;  %14320 = vmatprep.subr.bf16.mxu0 %v21170_v24  ;;  %v21206_v58 = vld [vmem:[#allocation2 + $0x2fdc] ss:$36 sps:$4 sm:$0xff]  }
 0x32b   :  { %14345 = vmatprep.subr.bf16.mxu1 %v21173_v28  ;;  %v21209_v24 = vld [vmem:[#allocation2 + $0x321c] ss:$36 sps:$4 sm:$0xff]  }
 0x32c   :  { %v21204_v28 = vld [vmem:[#allocation2 + $0x2fd8] ss:$36 sps:$4 sm:$0xff]  }
 0x32d   :  { %14321 = vmatpush2.bf16.msra.mxu0 %v21168_v29  ;;  %v21207_v29 = vld [vmem:[#allocation2 + $0x3218] ss:$36 sps:$4 sm:$0xff]  }
 0x32e   :  { %14346 = vmatpush1.bf16.msra.mxu1 %v21171_v10  ;;  %14372 = vmatprep.subr.bf16.mxu0 %v21179_v30  ;;  %v21212_v10 = vld [vmem:[#allocation2 + $0x2f94] ss:$36 sps:$4 sm:$0xff]  }
 0x32f   :  { %14347 = vmatprep.subr.bf16.mxu1 %v21176_v63  ;;  %v21215_v63 = vld [vmem:[#allocation2 + $0x31d4] ss:$36 sps:$4 sm:$0xff]  }
 0x330   :  { %v14078_v2 = vpop.f32.mrf.mxu0  ;;  %14323 = vmatmul.mubr.bf16.vlgmr.msra.gmra.mxu0 %v23324_v40  ;;  %v21210_v30 = vld [vmem:[#allocation2 + $0x2f90] ss:$36 sps:$4 sm:$0xff]  }
 0x331   :  { %v23467_v57 = vadd.f32 %v14078_v2, %v23459_v49  ;;  %14373 = vmatpush1.bf16.msra.mxu0 %v21177_v37  ;;  %14404 = vmatprep.mubr.bf16.mxu0 %v23328_v33  ;;  %v21194_v49 = vld [vmem:[#allocation2 + $0x306c] ss:$36 sps:$4 sm:$0xff]   ;;  %v21227_v2 = vld [vmem:[#allocation2 + $0x3804] ss:$36 sps:$4 sm:$0xff]  }
 0x332   :  { %14348 = vmatpush2.bf16.msra.mxu1 %v21174_v7  ;;  %v14080_v14 = vpop.f32.mrf.mxu0  ;;  %14374 = vmatprep.subr.bf16.mxu0 %v21185_v48  ;;  %v21213_v7 = vld [vmem:[#allocation2 + $0x31d0] ss:$36 sps:$4 sm:$0xff]   ;;  %v21216_v48 = vld [vmem:[#allocation2 + $0x2f48] ss:$36 sps:$4 sm:$0xff]  }
 0x333   :  { %14349 = vmatprep.subr.bf16.mxu1 %v21182_v53  ;;  %v23470_v55 = vadd.f32 %v14080_v14, %v23462_v39  ;;  %v21200_v39 = vld [vmem:[#allocation2 + $0x3024] ss:$36 sps:$4 sm:$0xff]   ;;  %v21218_v37 = vld [vmem:[#allocation2 + $0x2f4c] ss:$36 sps:$4 sm:$0xff]  }
 0x334   :  { %v14082_v38 = vpop.f32.mrf.mxu0  ;;  %v21221_v53 = vld [vmem:[#allocation2 + $0x318c] ss:$36 sps:$4 sm:$0xff]   ;;  %v21222_v14 = vld [vmem:[#allocation2 + $0x35c0] ss:$36 sps:$4 sm:$0xff]  }
 0x335   :  { %14375 = vmatpush1.bf16.msra.mxu0 %v21183_v6  ;;  %v21224_v6 = vld [vmem:[#allocation2 + $0x35c4] ss:$36 sps:$4 sm:$0xff]   ;;  %v21231_v38 = vld [vmem:[#allocation2 + $0x37b8] ss:$36 sps:$4 sm:$0xff]  }
 0x336   :  { %14350 = vmatpush2.bf16.msra.mxu1 %v21180_v52  ;;  %v14083_v3 = vpop.f32.mrf.mxu0  ;;  %14376 = vmatprep.subr.bf16.mxu0 %v21191_v62  ;;  %v21219_v52 = vld [vmem:[#allocation2 + $0x3188] ss:$36 sps:$4 sm:$0xff]   ;;  %v21230_v62 = vld [vmem:[#allocation2 + $0x357c] ss:$36 sps:$4 sm:$0xff]  }
 0x337   :  { %14351 = vmatprep.subr.bf16.mxu1 %v21188_v61  ;;  %v21225_v61 = vld [vmem:[#allocation2 + $0x3800] ss:$36 sps:$4 sm:$0xff]  }
 0x339   :  { %14377 = vmatpush1.bf16.msra.mxu0 %v21189_v4  ;;  %v21228_v4 = vld [vmem:[#allocation2 + $0x3578] ss:$36 sps:$4 sm:$0xff]  }
 0x33a   :  { %14352 = vmatpush2.bf16.msra.mxu1 %v21186_v47  ;;  %14378 = vmatprep.subr.bf16.mxu0 %v21197_v5  ;;  %v21233_v47 = vld [vmem:[#allocation2 + $0x37bc] ss:$36 sps:$4 sm:$0xff]  }
 0x33b   :  { %14353 = vmatprep.subr.bf16.mxu1 %v21194_v49 }
 0x33d   :  { %14379 = vmatpush1.bf16.msra.mxu0 %v21195_v9  ;;  %v21239_v9 = vld [vmem:[#allocation2 + $0x3774] ss:$36 sps:$4 sm:$0xff]  }
 0x33e   :  { %14354 = vmatpush2.bf16.msra.mxu1 %v21192_v8  ;;  %14380 = vmatprep.subr.bf16.mxu0 %v21203_v11  ;;  %v21236_v8 = vld [vmem:[#allocation2 + $0x3534] ss:$36 sps:$4 sm:$0xff]  }
 0x33f   :  { %14355 = vmatprep.subr.bf16.mxu1 %v21200_v39 }
 0x341   :  { %14381 = vmatpush1.bf16.msra.mxu0 %v21201_v16  ;;  %v21237_v16 = vld [vmem:[#allocation2 + $0x3770] ss:$36 sps:$4 sm:$0xff]  }
 0x342   :  { %14356 = vmatpush2.bf16.msra.mxu1 %v21198_v51  ;;  %14382 = vmatprep.subr.bf16.mxu0 %v21209_v24  ;;  %v21234_v51 = vld [vmem:[#allocation2 + $0x3530] ss:$36 sps:$4 sm:$0xff]  }
 0x343   :  { %14357 = vmatprep.subr.bf16.mxu1 %v21206_v58  ;;  %v21245_v58 = vld [vmem:[#allocation2 + $0x372c] ss:$36 sps:$4 sm:$0xff]  }
 0x345   :  { %14383 = vmatpush1.bf16.msra.mxu0 %v21207_v29  ;;  %v21243_v29 = vld [vmem:[#allocation2 + $0x3728] ss:$36 sps:$4 sm:$0xff]  }
 0x346   :  { %14358 = vmatpush2.bf16.msra.mxu1 %v21204_v28  ;;  %14384 = vmatprep.subr.bf16.mxu0 %v21215_v63  ;;  %v21240_v28 = vld [vmem:[#allocation2 + $0x34e8] ss:$36 sps:$4 sm:$0xff]   ;;  %v21246_v63 = vld [vmem:[#allocation2 + $0x34a0] ss:$36 sps:$4 sm:$0xff]  }
 0x347   :  { %14359 = vmatprep.subr.bf16.mxu1 %v21212_v10  ;;  %v21251_v10 = vld [vmem:[#allocation2 + $0x36e4] ss:$36 sps:$4 sm:$0xff]  }
 0x349   :  { %14385 = vmatpush1.bf16.msra.mxu0 %v21213_v7  ;;  %v21254_v7 = vld [vmem:[#allocation2 + $0x345c] ss:$36 sps:$4 sm:$0xff]  }
 0x34a   :  { %14360 = vmatpush2.bf16.msra.mxu1 %v21210_v30  ;;  %14386 = vmatprep.subr.bf16.mxu0 %v21221_v53  ;;  %v21249_v30 = vld [vmem:[#allocation2 + $0x36e0] ss:$36 sps:$4 sm:$0xff]   ;;  %v21252_v53 = vld [vmem:[#allocation2 + $0x3458] ss:$36 sps:$4 sm:$0xff]  }
 0x34b   :  { %14361 = vmatprep.subr.bf16.mxu1 %v21218_v37  ;;  %v21257_v37 = vld [vmem:[#allocation2 + $0x369c] ss:$36 sps:$4 sm:$0xff]  }
 0x34d   :  { %14387 = vmatpush1.bf16.msra.mxu0 %v21219_v52  ;;  %v21260_v52 = vld [vmem:[#allocation2 + $0x3414] ss:$36 sps:$4 sm:$0xff]  }
 0x34e   :  { %14362 = vmatpush2.bf16.msra.mxu1 %v21216_v48  ;;  %14388 = vmatprep.subr.bf16.mxu0 %v21224_v6  ;;  %v21255_v48 = vld [vmem:[#allocation2 + $0x3698] ss:$36 sps:$4 sm:$0xff]  }
 0x34f   :  { %14413 = vmatprep.subr.bf16.mxu1 %v21227_v2  ;;  %v21263_v6 = vld [vmem:[#allocation2 + $0x3654] ss:$36 sps:$4 sm:$0xff]  }
 0x350   :  { %v21258_v2 = vld [vmem:[#allocation2 + $0x3410] ss:$36 sps:$4 sm:$0xff]  }
 0x351   :  { %v14119_v3 = vpop.f32.mrf.mxu1  ;;  %14364 = vmatmul.mubr.bf16.vlgmr.msra.gmra.mxu1 %v23353_v20  ;;  %14389 = vmatpush2.bf16.msra.mxu0 %v21222_v14  ;;  %v21261_v14 = vld [vmem:[#allocation2 + $0x3650] ss:$36 sps:$4 sm:$0xff]  }
 0x352   :  { %v23475_v49 = vadd.f32 %v14119_v3, %v23467_v57  ;;  %14414 = vmatpush1.bf16.msra.mxu1 %v21225_v61  ;;  %14390 = vmatprep.subr.bf16.mxu0 %v21230_v62  ;;  %v21242_v57 = vld [vmem:[#allocation2 + $0x34ec] ss:$36 sps:$4 sm:$0xff]   ;;  %v21275_v3 = vld [vmem:[#allocation2 + $0x3c84] ss:$36 sps:$4 sm:$0xff]  }
 0x353   :  { %v14121_v5 = vpop.f32.mrf.mxu1  ;;  %14415 = vmatprep.subr.bf16.mxu1 %v21233_v47  ;;  %14445 = vmatprep.mubr.bf16.mxu1 %v23356_v34  ;;  %v21266_v61 = vld [vmem:[#allocation2 + $0x33cc] ss:$36 sps:$4 sm:$0xff]  }
 0x354   :  { %v23478_v39 = vadd.f32 %v14121_v5, %v23470_v55  ;;  %v21248_v55 = vld [vmem:[#allocation2 + $0x34a4] ss:$36 sps:$4 sm:$0xff]   ;;  %v21269_v62 = vld [vmem:[#allocation2 + $0x360c] ss:$36 sps:$4 sm:$0xff]  }
 0x355   :  { %v14123_v11 = vpop.f32.mrf.mxu1  ;;  %14391 = vmatpush2.bf16.msra.mxu0 %v21228_v4  ;;  %v21264_v47 = vld [vmem:[#allocation2 + $0x33c8] ss:$36 sps:$4 sm:$0xff]   ;;  %v21270_v5 = vld [vmem:[#allocation2 + $0x3a40] ss:$36 sps:$4 sm:$0xff]  }
 0x356   :  { %14416 = vmatpush1.bf16.msra.mxu1 %v21231_v38  ;;  %14392 = vmatprep.subr.bf16.mxu0 %v21236_v8  ;;  %v21267_v4 = vld [vmem:[#allocation2 + $0x3608] ss:$36 sps:$4 sm:$0xff]   ;;  %v21273_v8 = vld [vmem:[#allocation2 + $0x3c80] ss:$36 sps:$4 sm:$0xff]  }
 0x357   :  { %14417 = vmatprep.subr.bf16.mxu1 %v21239_v9  ;;  %v14124_v24 = vpop.f32.mrf.mxu1  ;;  %v21272_v38 = vld [vmem:[#allocation2 + $0x3a44] ss:$36 sps:$4 sm:$0xff]   ;;  %v21278_v9 = vld [vmem:[#allocation2 + $0x39fc] ss:$36 sps:$4 sm:$0xff]  }
 0x358   :  { %v21281_v11 = vld [vmem:[#allocation2 + $0x3c3c] ss:$36 sps:$4 sm:$0xff]  }
 0x359   :  { %14393 = vmatpush2.bf16.msra.mxu0 %v21234_v51  ;;  %v21276_v51 = vld [vmem:[#allocation2 + $0x39f8] ss:$36 sps:$4 sm:$0xff]  }
 0x35a   :  { %14418 = vmatpush1.bf16.msra.mxu1 %v21237_v16  ;;  %14394 = vmatprep.subr.bf16.mxu0 %v21242_v57  ;;  %v21279_v16 = vld [vmem:[#allocation2 + $0x3c38] ss:$36 sps:$4 sm:$0xff]  }
 0x35b   :  { %14419 = vmatprep.subr.bf16.mxu1 %v21245_v58 }
 0x35d   :  { %14395 = vmatpush2.bf16.msra.mxu0 %v21240_v28  ;;  %v21284_v28 = vld [vmem:[#allocation2 + $0x39b4] ss:$36 sps:$4 sm:$0xff]  }
 0x35e   :  { %14420 = vmatpush1.bf16.msra.mxu1 %v21243_v29  ;;  %14396 = vmatprep.subr.bf16.mxu0 %v21248_v55  ;;  %v21287_v29 = vld [vmem:[#allocation2 + $0x3bf4] ss:$36 sps:$4 sm:$0xff]  }
 0x35f   :  { %14421 = vmatprep.subr.bf16.mxu1 %v21251_v10  ;;  %v21282_v10 = vld [vmem:[#allocation2 + $0x39b0] ss:$36 sps:$4 sm:$0xff]  }
 0x361   :  { %14397 = vmatpush2.bf16.msra.mxu0 %v21246_v63  ;;  %v21285_v63 = vld [vmem:[#allocation2 + $0x3bf0] ss:$36 sps:$4 sm:$0xff]  }
 0x362   :  { %14422 = vmatpush1.bf16.msra.mxu1 %v21249_v30  ;;  %14398 = vmatprep.subr.bf16.mxu0 %v21254_v7 }
 0x363   :  { %14423 = vmatprep.subr.bf16.mxu1 %v21257_v37  ;;  %v21293_v37 = vld [vmem:[#allocation2 + $0x3bac] ss:$36 sps:$4 sm:$0xff]  }
 0x365   :  { %14399 = vmatpush2.bf16.msra.mxu0 %v21252_v53  ;;  %v21288_v53 = vld [vmem:[#allocation2 + $0x3968] ss:$36 sps:$4 sm:$0xff]  }
 0x366   :  { %14424 = vmatpush1.bf16.msra.mxu1 %v21255_v48  ;;  %14400 = vmatprep.subr.bf16.mxu0 %v21260_v52  ;;  %v21291_v48 = vld [vmem:[#allocation2 + $0x3ba8] ss:$36 sps:$4 sm:$0xff]  }
 0x367   :  { %14425 = vmatprep.subr.bf16.mxu1 %v21263_v6  ;;  %v21299_v52 = vld [vmem:[#allocation2 + $0x3b64] ss:$36 sps:$4 sm:$0xff]  }
 0x368   :  { %v21294_v6 = vld [vmem:[#allocation2 + $0x3920] ss:$36 sps:$4 sm:$0xff]  }
 0x369   :  { %14401 = vmatpush2.bf16.msra.mxu0 %v21258_v2  ;;  %v21297_v2 = vld [vmem:[#allocation2 + $0x3b60] ss:$36 sps:$4 sm:$0xff]  }
 0x36a   :  { %14426 = vmatpush1.bf16.msra.mxu1 %v21261_v14  ;;  %14402 = vmatprep.subr.bf16.mxu0 %v21266_v61  ;;  %v21302_v14 = vld [vmem:[#allocation2 + $0x38dc] ss:$36 sps:$4 sm:$0xff]  }
 0x36b   :  { %14427 = vmatprep.subr.bf16.mxu1 %v21269_v62  ;;  %v21305_v61 = vld [vmem:[#allocation2 + $0x3b1c] ss:$36 sps:$4 sm:$0xff]  }
 0x36c   :  { %v21300_v62 = vld [vmem:[#allocation2 + $0x38d8] ss:$36 sps:$4 sm:$0xff]  }
 0x36d   :  { %14403 = vmatpush2.bf16.msra.mxu0 %v21264_v47  ;;  %v21303_v47 = vld [vmem:[#allocation2 + $0x3b18] ss:$36 sps:$4 sm:$0xff]  }
 0x36e   :  { %14428 = vmatpush1.bf16.msra.mxu1 %v21267_v4  ;;  %14454 = vmatprep.subr.bf16.mxu0 %v21275_v3  ;;  %v21308_v4 = vld [vmem:[#allocation2 + $0x3894] ss:$36 sps:$4 sm:$0xff]  }
 0x36f   :  { %14429 = vmatprep.subr.bf16.mxu1 %v21272_v38  ;;  %v21311_v38 = vld [vmem:[#allocation2 + $0x3ad4] ss:$36 sps:$4 sm:$0xff]  }
 0x370   :  { %v14160_v57 = vpop.f32.mrf.mxu0  ;;  %14405 = vmatmul.mubr.bf16.vlgmr.msra.gmra.mxu0 %v23360_v36  ;;  %v21306_v3 = vld [vmem:[#allocation2 + $0x3890] ss:$36 sps:$4 sm:$0xff]  }
 0x371   :  { %v23483_v58 = vadd.f32 %v14160_v57, %v23475_v49  ;;  %14455 = vmatpush1.bf16.msra.mxu0 %v21273_v8  ;;  %14486 = vmatprep.mubr.bf16.mxu0 %v23364_v44  ;;  %v21290_v49 = vld [vmem:[#allocation2 + $0x396c] ss:$36 sps:$4 sm:$0xff]   ;;  %v21323_v57 = vld [vmem:[#allocation2 + $0x4104] ss:$36 sps:$4 sm:$0xff]  }
 0x372   :  { %14430 = vmatpush2.bf16.msra.mxu1 %v21270_v5  ;;  %v14162_v24 = vpop.f32.mrf.mxu0  ;;  %14456 = vmatprep.subr.bf16.mxu0 %v21281_v11  ;;  %v21309_v5 = vld [vmem:[#allocation2 + $0x3ad0] ss:$36 sps:$4 sm:$0xff]   ;;  %v21312_v11 = vld [vmem:[#allocation2 + $0x3848] ss:$36 sps:$4 sm:$0xff]  }
 0x373   :  { %14431 = vmatprep.subr.bf16.mxu1 %v21278_v9  ;;  %v23486_v55 = vadd.f32 %v14162_v24, %v23478_v39  ;;  %v21296_v39 = vld [vmem:[#allocation2 + $0x3924] ss:$36 sps:$4 sm:$0xff]   ;;  %v21314_v8 = vld [vmem:[#allocation2 + $0x384c] ss:$36 sps:$4 sm:$0xff]  }
 0x374   :  { %v14164_v30 = vpop.f32.mrf.mxu0  ;;  %v21317_v9 = vld [vmem:[#allocation2 + $0x3a8c] ss:$36 sps:$4 sm:$0xff]   ;;  %v21318_v24 = vld [vmem:[#allocation2 + $0x3ec0] ss:$36 sps:$4 sm:$0xff]  }
 0x375   :  { %14457 = vmatpush1.bf16.msra.mxu0 %v21279_v16  ;;  %v21320_v16 = vld [vmem:[#allocation2 + $0x3ec4] ss:$36 sps:$4 sm:$0xff]   ;;  %v21327_v30 = vld [vmem:[#allocation2 + $0x40b8] ss:$36 sps:$4 sm:$0xff]  }
 0x376   :  { %14432 = vmatpush2.bf16.msra.mxu1 %v21276_v51  ;;  %v14165_v7 = vpop.f32.mrf.mxu0  ;;  %14458 = vmatprep.subr.bf16.mxu0 %v21287_v29  ;;  %v21315_v51 = vld [vmem:[#allocation2 + $0x3a88] ss:$36 sps:$4 sm:$0xff]   ;;  %v21326_v29 = vld [vmem:[#allocation2 + $0x3e7c] ss:$36 sps:$4 sm:$0xff]  }
 0x377   :  { %14433 = vmatprep.subr.bf16.mxu1 %v21284_v28  ;;  %v21321_v28 = vld [vmem:[#allocation2 + $0x4100] ss:$36 sps:$4 sm:$0xff]  }
 0x379   :  { %14459 = vmatpush1.bf16.msra.mxu0 %v21285_v63  ;;  %v21324_v63 = vld [vmem:[#allocation2 + $0x3e78] ss:$36 sps:$4 sm:$0xff]  }
 0x37a   :  { %14434 = vmatpush2.bf16.msra.mxu1 %v21282_v10  ;;  %14460 = vmatprep.subr.bf16.mxu0 %v21293_v37  ;;  %v21329_v10 = vld [vmem:[#allocation2 + $0x40bc] ss:$36 sps:$4 sm:$0xff]  }
 0x37b   :  { %14435 = vmatprep.subr.bf16.mxu1 %v21290_v49 }
 0x37d   :  { %14461 = vmatpush1.bf16.msra.mxu0 %v21291_v48  ;;  %v21335_v48 = vld [vmem:[#allocation2 + $0x4074] ss:$36 sps:$4 sm:$0xff]  }
 0x37e   :  { %14436 = vmatpush2.bf16.msra.mxu1 %v21288_v53  ;;  %14462 = vmatprep.subr.bf16.mxu0 %v21299_v52  ;;  %v21332_v53 = vld [vmem:[#allocation2 + $0x3e34] ss:$36 sps:$4 sm:$0xff]  }
 0x37f   :  { %14437 = vmatprep.subr.bf16.mxu1 %v21296_v39 }
 0x381   :  { %14463 = vmatpush1.bf16.msra.mxu0 %v21297_v2  ;;  %v21333_v2 = vld [vmem:[#allocation2 + $0x4070] ss:$36 sps:$4 sm:$0xff]  }
 0x382   :  { %14438 = vmatpush2.bf16.msra.mxu1 %v21294_v6  ;;  %14464 = vmatprep.subr.bf16.mxu0 %v21305_v61  ;;  %v21330_v6 = vld [vmem:[#allocation2 + $0x3e30] ss:$36 sps:$4 sm:$0xff]  }
 0x383   :  { %14439 = vmatprep.subr.bf16.mxu1 %v21302_v14  ;;  %v21341_v14 = vld [vmem:[#allocation2 + $0x402c] ss:$36 sps:$4 sm:$0xff]  }
 0x385   :  { %14465 = vmatpush1.bf16.msra.mxu0 %v21303_v47  ;;  %v21339_v47 = vld [vmem:[#allocation2 + $0x4028] ss:$36 sps:$4 sm:$0xff]  }
 0x386   :  { %14440 = vmatpush2.bf16.msra.mxu1 %v21300_v62  ;;  %14466 = vmatprep.subr.bf16.mxu0 %v21311_v38  ;;  %v21336_v62 = vld [vmem:[#allocation2 + $0x3de8] ss:$36 sps:$4 sm:$0xff]   ;;  %v21342_v38 = vld [vmem:[#allocation2 + $0x3da0] ss:$36 sps:$4 sm:$0xff]  }
 0x387   :  { %14441 = vmatprep.subr.bf16.mxu1 %v21308_v4  ;;  %v21347_v4 = vld [vmem:[#allocation2 + $0x3fe4] ss:$36 sps:$4 sm:$0xff]  }
 0x389   :  { %14467 = vmatpush1.bf16.msra.mxu0 %v21309_v5  ;;  %v21350_v5 = vld [vmem:[#allocation2 + $0x3d5c] ss:$36 sps:$4 sm:$0xff]  }
 0x38a   :  { %14442 = vmatpush2.bf16.msra.mxu1 %v21306_v3  ;;  %14468 = vmatprep.subr.bf16.mxu0 %v21317_v9  ;;  %v21345_v3 = vld [vmem:[#allocation2 + $0x3fe0] ss:$36 sps:$4 sm:$0xff]   ;;  %v21348_v9 = vld [vmem:[#allocation2 + $0x3d58] ss:$36 sps:$4 sm:$0xff]  }
 0x38b   :  { %14443 = vmatprep.subr.bf16.mxu1 %v21314_v8  ;;  %v21353_v8 = vld [vmem:[#allocation2 + $0x3f9c] ss:$36 sps:$4 sm:$0xff]  }
 0x38d   :  { %14469 = vmatpush1.bf16.msra.mxu0 %v21315_v51  ;;  %v21356_v51 = vld [vmem:[#allocation2 + $0x3d14] ss:$36 sps:$4 sm:$0xff]  }
 0x38e   :  { %14444 = vmatpush2.bf16.msra.mxu1 %v21312_v11  ;;  %14470 = vmatprep.subr.bf16.mxu0 %v21320_v16  ;;  %v21351_v11 = vld [vmem:[#allocation2 + $0x3f98] ss:$36 sps:$4 sm:$0xff]  }
 0x38f   :  { %14495 = vmatprep.subr.bf16.mxu1 %v21323_v57  ;;  %v21359_v16 = vld [vmem:[#allocation2 + $0x3f54] ss:$36 sps:$4 sm:$0xff]  }
 0x390   :  { %v21354_v57 = vld [vmem:[#allocation2 + $0x3d10] ss:$36 sps:$4 sm:$0xff]  }
 0x391   :  { %v14201_v7 = vpop.f32.mrf.mxu1  ;;  %14446 = vmatmul.mubr.bf16.vlgmr.msra.gmra.mxu1 %v23378_v45  ;;  %14471 = vmatpush2.bf16.msra.mxu0 %v21318_v24  ;;  %v21357_v24 = vld [vmem:[#allocation2 + $0x3f50] ss:$36 sps:$4 sm:$0xff]  }
 0x392   :  { %v23491_v49 = vadd.f32 %v14201_v7, %v23483_v58  ;;  %14496 = vmatpush1.bf16.msra.mxu1 %v21321_v28  ;;  %14472 = vmatprep.subr.bf16.mxu0 %v21326_v29  ;;  %v21338_v58 = vld [vmem:[#allocation2 + $0x3dec] ss:$36 sps:$4 sm:$0xff]  }
 0x393   :  { %v14203_v37 = vpop.f32.mrf.mxu1  ;;  %14497 = vmatprep.subr.bf16.mxu1 %v21329_v10  ;;  %14527 = vmatprep.mubr.bf16.mxu1 %v23125_v21  ;;  %v21362_v28 = vld [vmem:[#allocation2 + $0x3ccc] ss:$36 sps:$4 sm:$0xff]  }
 0x394   :  { %v23494_v39 = vadd.f32 %v14203_v37, %v23486_v55  ;;  %v21344_v55 = vld [vmem:[#allocation2 + $0x3da4] ss:$36 sps:$4 sm:$0xff]   ;;  %v21365_v29 = vld [vmem:[#allocation2 + $0x3f0c] ss:$36 sps:$4 sm:$0xff]  }
 0x395   :  { %v14205_v52 = vpop.f32.mrf.mxu1  ;;  %14473 = vmatpush2.bf16.msra.mxu0 %v21324_v63  ;;  %v21360_v10 = vld [vmem:[#allocation2 + $0x3cc8] ss:$36 sps:$4 sm:$0xff]  }
 0x396   :  { %14498 = vmatpush1.bf16.msra.mxu1 %v21327_v30  ;;  %14474 = vmatprep.subr.bf16.mxu0 %v21332_v53  ;;  %v21363_v63 = vld [vmem:[#allocation2 + $0x3f08] ss:$36 sps:$4 sm:$0xff]  }
 0x397   :  { %14499 = vmatprep.subr.bf16.mxu1 %v21335_v48  ;;  %v14206_v61 = vpop.f32.mrf.mxu1  ;;  %v21368_v30 = vld [vmem:[#allocation2 + $0x20c] ss:$36 sps:$4 sm:$0xff]   ;;  %v21374_v48 = vld [vmem:[#allocation2 + $0x1c4] ss:$36 sps:$4 sm:$0xff]  }
 0x398   :  { %v21371_v7 = vld [vmem:[#allocation2 + $0x68c] ss:$36 sps:$4 sm:$0xff]   ;;  %v21377_v52 = vld [vmem:[#allocation2 + $0x644] ss:$36 sps:$4 sm:$0xff]  }
 0x399   :  { %14475 = vmatpush2.bf16.msra.mxu0 %v21330_v6  ;;  %v21366_v37 = vld [vmem:[#allocation2 + $0x208] ss:$36 sps:$4 sm:$0xff]   ;;  %v21372_v6 = vld [vmem:[#allocation2 + $0x1c0] ss:$36 sps:$4 sm:$0xff]  }
 0x39a   :  { %14500 = vmatpush1.bf16.msra.mxu1 %v21333_v2  ;;  %14476 = vmatprep.subr.bf16.mxu0 %v21338_v58  ;;  %v21369_v53 = vld [vmem:[#allocation2 + $0x688] ss:$36 sps:$4 sm:$0xff]   ;;  %v21375_v2 = vld [vmem:[#allocation2 + $0x640] ss:$36 sps:$4 sm:$0xff]  }
 0x39b   :  { %14501 = vmatprep.subr.bf16.mxu1 %v21341_v14 }
 0x39d   :  { %14477 = vmatpush2.bf16.msra.mxu0 %v21336_v62  ;;  %v21380_v62 = vld [vmem:[#allocation2 + $0x17c] ss:$36 sps:$4 sm:$0xff]  }
 0x39e   :  { %14502 = vmatpush1.bf16.msra.mxu1 %v21339_v47  ;;  %14478 = vmatprep.subr.bf16.mxu0 %v21344_v55  ;;  %v21383_v47 = vld [vmem:[#allocation2 + $0x5fc] ss:$36 sps:$4 sm:$0xff]  }
 0x39f   :  { %14503 = vmatprep.subr.bf16.mxu1 %v21347_v4  ;;  %v21378_v4 = vld [vmem:[#allocation2 + $0x178] ss:$36 sps:$4 sm:$0xff]  }
 0x3a1   :  { %14479 = vmatpush2.bf16.msra.mxu0 %v21342_v38  ;;  %v21381_v38 = vld [vmem:[#allocation2 + $0x5f8] ss:$36 sps:$4 sm:$0xff]  }
 0x3a2   :  { %14504 = vmatpush1.bf16.msra.mxu1 %v21345_v3  ;;  %14480 = vmatprep.subr.bf16.mxu0 %v21350_v5  ;;  %v21386_v5 = vld [vmem:[#allocation2 + $0x134] ss:$36 sps:$4 sm:$0xff]  }
 0x3a3   :  { %14505 = vmatprep.subr.bf16.mxu1 %v21353_v8  ;;  %v21389_v8 = vld [vmem:[#allocation2 + $0x5b4] ss:$36 sps:$4 sm:$0xff]  }
 0x3a5   :  { %14481 = vmatpush2.bf16.msra.mxu0 %v21348_v9  ;;  %v21384_v9 = vld [vmem:[#allocation2 + $0x130] ss:$36 sps:$4 sm:$0xff]  }
 0x3a6   :  { %14506 = vmatpush1.bf16.msra.mxu1 %v21351_v11  ;;  %14482 = vmatprep.subr.bf16.mxu0 %v21356_v51  ;;  %v21387_v11 = vld [vmem:[#allocation2 + $0x5b0] ss:$36 sps:$4 sm:$0xff]  }
 0x3a7   :  { %14507 = vmatprep.subr.bf16.mxu1 %v21359_v16  ;;  %v21395_v51 = vld [vmem:[#allocation2 + $0x56c] ss:$36 sps:$4 sm:$0xff]  }
 0x3a8   :  { %v21390_v16 = vld [vmem:[#allocation2 + $0xe8] ss:$36 sps:$4 sm:$0xff]  }
 0x3a9   :  { %14483 = vmatpush2.bf16.msra.mxu0 %v21354_v57  ;;  %v21393_v57 = vld [vmem:[#allocation2 + $0x568] ss:$36 sps:$4 sm:$0xff]  }
 0x3aa   :  { %14508 = vmatpush1.bf16.msra.mxu1 %v21357_v24  ;;  %14484 = vmatprep.subr.bf16.mxu0 %v21362_v28  ;;  %v21398_v24 = vld [vmem:[#allocation2 + $0xa4] ss:$36 sps:$4 sm:$0xff]  }
 0x3ab   :  { %14509 = vmatprep.subr.bf16.mxu1 %v21365_v29  ;;  %v21401_v28 = vld [vmem:[#allocation2 + $0x524] ss:$36 sps:$4 sm:$0xff]  }
 0x3ac   :  { %v21396_v29 = vld [vmem:[#allocation2 + $0xa0] ss:$36 sps:$4 sm:$0xff]  }
 0x3ad   :  { %14485 = vmatpush2.bf16.msra.mxu0 %v21360_v10  ;;  %v21399_v10 = vld [vmem:[#allocation2 + $0x520] ss:$36 sps:$4 sm:$0xff]  }
 0x3ae   :  { %14510 = vmatpush1.bf16.msra.mxu1 %v21363_v63  ;;  %14536 = vmatprep.subr.bf16.mxu0 %v21368_v30  ;;  %v21404_v63 = vld [vmem:[#allocation2 + $0x5c] ss:$36 sps:$4 sm:$0xff]  }
 0x3af   :  { %14577 = vmatprep.subr.bf16.mxu1 %v21371_v7  ;;  %v21407_v30 = vld [vmem:[#allocation2 + $0x4dc] ss:$36 sps:$4 sm:$0xff]  }
 0x3b0   :  { %v14242_v58 = vpop.f32.mrf.mxu0  ;;  %14487 = vmatmul.mubr.bf16.vlgmr.msra.gmra.mxu0 %v23382_v35  ;;  %v21402_v7 = vld [vmem:[#allocation2 + $0x58] ss:$36 sps:$4 sm:$0xff]  }
 0x3b1   :  { %14528 = vmatmul.mubr.bf16.vlgmr.msra.gmra.mxu1 %v23398_v18  ;;  %v23500_v14 = vadd.f32 %v14242_v58, %v23491_v49  ;;  %14537 = vmatpush1.bf16.msra.mxu0 %v21366_v37  ;;  %v21405_v37 = vld [vmem:[#allocation2 + $0x4d8] ss:$36 sps:$4 sm:$0xff]   ;;  %v21419_v58 = vld [vmem:[#allocation2 + $0x8cc] ss:$36 sps:$4 sm:$0xff]  }
 0x3b2   :  { %14578 = vmatpush1.bf16.msra.mxu1 %v21369_v53  ;;  %v14244_v61 = vpop.f32.mrf.mxu0  ;;  %14538 = vmatprep.subr.bf16.mxu0 %v21374_v48  ;;  %v21410_v53 = vld [vmem:[#allocation2 + $0x14] ss:$36 sps:$4 sm:$0xff]  }
 0x3b3   :  { %14579 = vmatprep.subr.bf16.mxu1 %v21377_v52  ;;  %v23503_v55 = vadd.f32 %v14244_v61, %v23494_v39  ;;  %14568 = vmatprep.mubr.bf16.mxu0 %v23182_v60  ;;  %v21392_v39 = vld [vmem:[#allocation2 + $0xec] ss:$36 sps:$4 sm:$0xff]   ;;  %v21413_v48 = vld [vmem:[#allocation2 + $0x494] ss:$36 sps:$4 sm:$0xff]  }
 0x3b4   :  { %14609 = vmatprep.mubr.bf16.mxu1 %v23186_v0  ;;  %v14246_v3 = vpop.f32.mrf.mxu0  ;;  %v21408_v52 = vld [vmem:[#allocation2 + $0x10] ss:$36 sps:$4 sm:$0xff]   ;;  %v21414_v61 = vld [vmem:[#allocation2 + $0x448] ss:$36 sps:$4 sm:$0xff]  }
 0x3b5   :  { %14539 = vmatpush1.bf16.msra.mxu0 %v21372_v6  ;;  %v21411_v6 = vld [vmem:[#allocation2 + $0x490] ss:$36 sps:$4 sm:$0xff]   ;;  %v21423_v3 = vld [vmem:[#allocation2 + $0x880] ss:$36 sps:$4 sm:$0xff]  }
 0x3b6   :  { %14580 = vmatpush1.bf16.msra.mxu1 %v21375_v2  ;;  %v14247_v49 = vpop.f32.mrf.mxu0  ;;  %14540 = vmatprep.subr.bf16.mxu0 %v21380_v62  ;;  %v21416_v2 = vld [vmem:[#allocation2 + $0x44c] ss:$36 sps:$4 sm:$0xff]  }
 0x3b7   :  { %14581 = vmatprep.subr.bf16.mxu1 %v21383_v47  ;;  %v21417_v62 = vld [vmem:[#allocation2 + $0x8c8] ss:$36 sps:$4 sm:$0xff]  }
 0x3b8   :  { %v21422_v47 = vld [vmem:[#allocation2 + $0x404] ss:$36 sps:$4 sm:$0xff]  }
 0x3b9   :  { %14541 = vmatpush1.bf16.msra.mxu0 %v21378_v4  ;;  %v21425_v4 = vld [vmem:[#allocation2 + $0x884] ss:$36 sps:$4 sm:$0xff]  }
 0x3ba   :  { %14582 = vmatpush1.bf16.msra.mxu1 %v21381_v38  ;;  %14542 = vmatprep.subr.bf16.mxu0 %v21386_v5  ;;  %v21420_v38 = vld [vmem:[#allocation2 + $0x400] ss:$36 sps:$4 sm:$0xff]  }
 0x3bb   :  { %14583 = vmatprep.subr.bf16.mxu1 %v21389_v8 }
 0x3bd   :  { %14543 = vmatpush1.bf16.msra.mxu0 %v21384_v9  ;;  %v21428_v9 = vld [vmem:[#allocation2 + $0x3bc] ss:$36 sps:$4 sm:$0xff]  }
 0x3be   :  { %14584 = vmatpush1.bf16.msra.mxu1 %v21387_v11  ;;  %14544 = vmatprep.subr.bf16.mxu0 %v21392_v39  ;;  %v21431_v11 = vld [vmem:[#allocation2 + $0x83c] ss:$36 sps:$4 sm:$0xff]  }
 0x3bf   :  { %14585 = vmatprep.subr.bf16.mxu1 %v21395_v51 }
 0x3c1   :  { %14545 = vmatpush1.bf16.msra.mxu0 %v21390_v16  ;;  %v21426_v16 = vld [vmem:[#allocation2 + $0x3b8] ss:$36 sps:$4 sm:$0xff]  }
 0x3c2   :  { %14586 = vmatpush1.bf16.msra.mxu1 %v21393_v57  ;;  %14546 = vmatprep.subr.bf16.mxu0 %v21398_v24  ;;  %v21429_v57 = vld [vmem:[#allocation2 + $0x838] ss:$36 sps:$4 sm:$0xff]  }
 0x3c3   :  { %14587 = vmatprep.subr.bf16.mxu1 %v21401_v28  ;;  %v21434_v24 = vld [vmem:[#allocation2 + $0x374] ss:$36 sps:$4 sm:$0xff]  }
 0x3c5   :  { %14547 = vmatpush1.bf16.msra.mxu0 %v21396_v29  ;;  %v21432_v29 = vld [vmem:[#allocation2 + $0x370] ss:$36 sps:$4 sm:$0xff]  }
 0x3c6   :  { %14588 = vmatpush1.bf16.msra.mxu1 %v21399_v10  ;;  %14548 = vmatprep.subr.bf16.mxu0 %v21404_v63  ;;  %v21435_v10 = vld [vmem:[#allocation2 + $0x7f0] ss:$36 sps:$4 sm:$0xff]  }
 0x3c7   :  { %14589 = vmatprep.subr.bf16.mxu1 %v21407_v30  ;;  %v21440_v63 = vld [vmem:[#allocation2 + $0x32c] ss:$36 sps:$4 sm:$0xff]  }
 0x3c8   :  { %v21443_v30 = vld [vmem:[#allocation2 + $0x7ac] ss:$36 sps:$4 sm:$0xff]  }
 0x3c9   :  { %14549 = vmatpush1.bf16.msra.mxu0 %v21402_v7  ;;  %v21441_v7 = vld [vmem:[#allocation2 + $0x7a8] ss:$36 sps:$4 sm:$0xff]  }
 0x3ca   :  { %14590 = vmatpush1.bf16.msra.mxu1 %v21405_v37  ;;  %14550 = vmatprep.subr.bf16.mxu0 %v21410_v53  ;;  %v21446_v37 = vld [vmem:[#allocation2 + $0x2e4] ss:$36 sps:$4 sm:$0xff]  }
 0x3cb   :  { %14591 = vmatprep.subr.bf16.mxu1 %v21413_v48  ;;  %v21449_v53 = vld [vmem:[#allocation2 + $0x764] ss:$36 sps:$4 sm:$0xff]  }
 0x3cc   :  { %v21444_v48 = vld [vmem:[#allocation2 + $0x2e0] ss:$36 sps:$4 sm:$0xff]  }
 0x3cd   :  { %14551 = vmatpush1.bf16.msra.mxu0 %v21408_v52  ;;  %v21447_v52 = vld [vmem:[#allocation2 + $0x760] ss:$36 sps:$4 sm:$0xff]  }
 0x3ce   :  { %14592 = vmatpush1.bf16.msra.mxu1 %v21411_v6  ;;  %14552 = vmatprep.subr.bf16.mxu0 %v21416_v2  ;;  %v21452_v6 = vld [vmem:[#allocation2 + $0x29c] ss:$36 sps:$4 sm:$0xff]  }
 0x3cf   :  { %14593 = vmatprep.subr.bf16.mxu1 %v21419_v58  ;;  %v21455_v2 = vld [vmem:[#allocation2 + $0x71c] ss:$36 sps:$4 sm:$0xff]  }
 0x3d0   :  { %v21450_v58 = vld [vmem:[#allocation2 + $0x298] ss:$36 sps:$4 sm:$0xff]  }
 0x3d1   :  { %v14283_v49 = vpop.f32.mrf.mxu1  ;;  %14553 = vmatpush2.bf16.msra.mxu0 %v21414_v61  ;;  %v21453_v61 = vld [vmem:[#allocation2 + $0x718] ss:$36 sps:$4 sm:$0xff]  }
 0x3d2   :  { %v23508_v5 = vadd.f32 %v14283_v49, %v23500_v14  ;;  %14594 = vmatpush2.bf16.msra.mxu1 %v21417_v62  ;;  %14554 = vmatprep.subr.bf16.mxu0 %v21422_v47  ;;  %v21437_v14 = vld [vmem:[#allocation2 + $0x7f4] ss:$36 sps:$4 sm:$0xff]   ;;  %v21467_v49 = vld [vmem:[#allocation2 + $0xf8c] ss:$36 sps:$4 sm:$0xff]  }
 0x3d3   :  { %v14285_v8 = vpop.f32.mrf.mxu1  ;;  %14595 = vmatprep.subr.bf16.mxu1 %v21425_v4  ;;  %v21458_v62 = vld [vmem:[#allocation2 + $0x254] ss:$36 sps:$4 sm:$0xff]  }
 0x3d4   :  { %v23511_v39 = vadd.f32 %v14285_v8, %v23503_v55  ;;  %v21438_v55 = vld [vmem:[#allocation2 + $0x328] ss:$36 sps:$4 sm:$0xff]   ;;  %v21461_v47 = vld [vmem:[#allocation2 + $0x6d4] ss:$36 sps:$4 sm:$0xff]  }
 0x3d5   :  { %v14287_v51 = vpop.f32.mrf.mxu1  ;;  %14555 = vmatpush2.bf16.msra.mxu0 %v21420_v38  ;;  %v21456_v4 = vld [vmem:[#allocation2 + $0x250] ss:$36 sps:$4 sm:$0xff]   ;;  %v21462_v8 = vld [vmem:[#allocation2 + $0xb08] ss:$36 sps:$4 sm:$0xff]  }
 0x3d6   :  { %14596 = vmatpush2.bf16.msra.mxu1 %v21423_v3  ;;  %14556 = vmatprep.subr.bf16.mxu0 %v21428_v9  ;;  %v21459_v38 = vld [vmem:[#allocation2 + $0x6d0] ss:$36 sps:$4 sm:$0xff]   ;;  %v21465_v9 = vld [vmem:[#allocation2 + $0xf88] ss:$36 sps:$4 sm:$0xff]  }
 0x3d7   :  { %14597 = vmatprep.subr.bf16.mxu1 %v21431_v11  ;;  %v14288_v28 = vpop.f32.mrf.mxu1  ;;  %v21464_v3 = vld [vmem:[#allocation2 + $0xb0c] ss:$36 sps:$4 sm:$0xff]   ;;  %v21470_v11 = vld [vmem:[#allocation2 + $0xac4] ss:$36 sps:$4 sm:$0xff]  }
 0x3d8   :  { %v21473_v51 = vld [vmem:[#allocation2 + $0xf44] ss:$36 sps:$4 sm:$0xff]  }
 0x3d9   :  { %14557 = vmatpush2.bf16.msra.mxu0 %v21426_v16  ;;  %v21468_v16 = vld [vmem:[#allocation2 + $0xac0] ss:$36 sps:$4 sm:$0xff]  }
 0x3da   :  { %14598 = vmatpush2.bf16.msra.mxu1 %v21429_v57  ;;  %14558 = vmatprep.subr.bf16.mxu0 %v21434_v24  ;;  %v21471_v57 = vld [vmem:[#allocation2 + $0xf40] ss:$36 sps:$4 sm:$0xff]  }
 0x3db   :  { %14599 = vmatprep.subr.bf16.mxu1 %v21437_v14 }
 0x3dd   :  { %14559 = vmatpush2.bf16.msra.mxu0 %v21432_v29  ;;  %v21476_v29 = vld [vmem:[#allocation2 + $0xa7c] ss:$36 sps:$4 sm:$0xff]  }
 0x3de   :  { %14600 = vmatpush2.bf16.msra.mxu1 %v21435_v10  ;;  %14560 = vmatprep.subr.bf16.mxu0 %v21440_v63  ;;  %v21479_v10 = vld [vmem:[#allocation2 + $0xefc] ss:$36 sps:$4 sm:$0xff]  }
 0x3df   :  { %14601 = vmatprep.subr.bf16.mxu1 %v21443_v30  ;;  %v21474_v30 = vld [vmem:[#allocation2 + $0xa78] ss:$36 sps:$4 sm:$0xff]  }
 0x3e1   :  { %14561 = vmatpush2.bf16.msra.mxu0 %v21438_v55  ;;  %v21477_v55 = vld [vmem:[#allocation2 + $0xef8] ss:$36 sps:$4 sm:$0xff]  }
 0x3e2   :  { %14602 = vmatpush2.bf16.msra.mxu1 %v21441_v7  ;;  %14562 = vmatprep.subr.bf16.mxu0 %v21446_v37  ;;  %v21482_v37 = vld [vmem:[#allocation2 + $0xa34] ss:$36 sps:$4 sm:$0xff]  }
 0x3e3   :  { %14603 = vmatprep.subr.bf16.mxu1 %v21449_v53  ;;  %v21485_v53 = vld [vmem:[#allocation2 + $0xeb4] ss:$36 sps:$4 sm:$0xff]  }
 0x3e5   :  { %14563 = vmatpush2.bf16.msra.mxu0 %v21444_v48  ;;  %v21480_v48 = vld [vmem:[#allocation2 + $0xa30] ss:$36 sps:$4 sm:$0xff]  }
 0x3e6   :  { %14604 = vmatpush2.bf16.msra.mxu1 %v21447_v52  ;;  %14564 = vmatprep.subr.bf16.mxu0 %v21452_v6  ;;  %v21483_v52 = vld [vmem:[#allocation2 + $0xeb0] ss:$36 sps:$4 sm:$0xff]  }
 0x3e7   :  { %14605 = vmatprep.subr.bf16.mxu1 %v21455_v2  ;;  %v21491_v6 = vld [vmem:[#allocation2 + $0xe6c] ss:$36 sps:$4 sm:$0xff]  }
 0x3e8   :  { %v21486_v2 = vld [vmem:[#allocation2 + $0x9e8] ss:$36 sps:$4 sm:$0xff]  }
 0x3e9   :  { %14565 = vmatpush2.bf16.msra.mxu0 %v21450_v58  ;;  %v21489_v58 = vld [vmem:[#allocation2 + $0xe68] ss:$36 sps:$4 sm:$0xff]  }
 0x3ea   :  { %14606 = vmatpush2.bf16.msra.mxu1 %v21453_v61  ;;  %14566 = vmatprep.subr.bf16.mxu0 %v21458_v62  ;;  %v21494_v61 = vld [vmem:[#allocation2 + $0x9a4] ss:$36 sps:$4 sm:$0xff]  }
 0x3eb   :  { %14607 = vmatprep.subr.bf16.mxu1 %v21461_v47  ;;  %v21497_v62 = vld [vmem:[#allocation2 + $0xe24] ss:$36 sps:$4 sm:$0xff]  }
 0x3ec   :  { %v21492_v47 = vld [vmem:[#allocation2 + $0x9a0] ss:$36 sps:$4 sm:$0xff]  }
 0x3ed   :  { %14567 = vmatpush2.bf16.msra.mxu0 %v21456_v4  ;;  %v21495_v4 = vld [vmem:[#allocation2 + $0xe20] ss:$36 sps:$4 sm:$0xff]  }
 0x3ee   :  { %14608 = vmatpush2.bf16.msra.mxu1 %v21459_v38  ;;  %14618 = vmatprep.subr.bf16.mxu0 %v21464_v3  ;;  %v21500_v38 = vld [vmem:[#allocation2 + $0x95c] ss:$36 sps:$4 sm:$0xff]  }
 0x3ef   :  { %14659 = vmatprep.subr.bf16.mxu1 %v21467_v49  ;;  %v21503_v3 = vld [vmem:[#allocation2 + $0xddc] ss:$36 sps:$4 sm:$0xff]  }
 0x3f0   :  { %v14324_v24 = vpop.f32.mrf.mxu0  ;;  %14569 = vmatmul.mubr.bf16.vlgmr.msra.gmra.mxu0 %v23196_v13  ;;  %v21498_v49 = vld [vmem:[#allocation2 + $0x958] ss:$36 sps:$4 sm:$0xff]  }
 0x3f1   :  { %14610 = vmatmul.mubr.bf16.vlgmr.msra.gmra.mxu1 %v23203_v19  ;;  %v23516_v14 = vadd.f32 %v14324_v24, %v23508_v5  ;;  %14619 = vmatpush1.bf16.msra.mxu0 %v21462_v8  ;;  %v21501_v8 = vld [vmem:[#allocation2 + $0xdd8] ss:$36 sps:$4 sm:$0xff]   ;;  %v21515_v24 = vld [vmem:[#allocation2 + $0x11cc] ss:$36 sps:$4 sm:$0xff]  }
 0x3f2   :  { %14660 = vmatpush1.bf16.msra.mxu1 %v21465_v9  ;;  %v14326_v28 = vpop.f32.mrf.mxu0  ;;  %14620 = vmatprep.subr.bf16.mxu0 %v21470_v11  ;;  %v21506_v9 = vld [vmem:[#allocation2 + $0x914] ss:$36 sps:$4 sm:$0xff]  }
 0x3f3   :  { %14661 = vmatprep.subr.bf16.mxu1 %v21473_v51  ;;  %v23519_v63 = vadd.f32 %v14326_v28, %v23511_v39  ;;  %14650 = vmatprep.mubr.bf16.mxu0 %v23199_v17  ;;  %v21488_v39 = vld [vmem:[#allocation2 + $0x9ec] ss:$36 sps:$4 sm:$0xff]   ;;  %v21509_v11 = vld [vmem:[#allocation2 + $0xd94] ss:$36 sps:$4 sm:$0xff]  }
 0x3f4   :  { %14691 = vmatprep.mubr.bf16.mxu1 %v23207_v23  ;;  %v14328_v7 = vpop.f32.mrf.mxu0  ;;  %v21504_v51 = vld [vmem:[#allocation2 + $0x910] ss:$36 sps:$4 sm:$0xff]   ;;  %v21510_v28 = vld [vmem:[#allocation2 + $0xd48] ss:$36 sps:$4 sm:$0xff]  }
 0x3f5   :  { %14621 = vmatpush1.bf16.msra.mxu0 %v21468_v16  ;;  %v21507_v16 = vld [vmem:[#allocation2 + $0xd90] ss:$36 sps:$4 sm:$0xff]  }
 0x3f6   :  { %14662 = vmatpush1.bf16.msra.mxu1 %v21471_v57  ;;  %v14329_v5 = vpop.f32.mrf.mxu0  ;;  %14622 = vmatprep.subr.bf16.mxu0 %v21476_v29  ;;  %v21512_v57 = vld [vmem:[#allocation2 + $0xd4c] ss:$36 sps:$4 sm:$0xff]  }
 0x3f7   :  { %14663 = vmatprep.subr.bf16.mxu1 %v21479_v10  ;;  %v21513_v29 = vld [vmem:[#allocation2 + $0x11c8] ss:$36 sps:$4 sm:$0xff]   ;;  %v21516_v5 = vld [vmem:[#allocation2 + $0xd00] ss:$36 sps:$4 sm:$0xff]  }
 0x3f8   :  { %v21518_v10 = vld [vmem:[#allocation2 + $0xd04] ss:$36 sps:$4 sm:$0xff]  }
 0x3f9   :  { %14623 = vmatpush1.bf16.msra.mxu0 %v21474_v30  ;;  %v21521_v30 = vld [vmem:[#allocation2 + $0x1184] ss:$36 sps:$4 sm:$0xff]  }
 0x3fa   :  { %14664 = vmatpush1.bf16.msra.mxu1 %v21477_v55  ;;  %14624 = vmatprep.subr.bf16.mxu0 %v21482_v37  ;;  %v21519_v37 = vld [vmem:[#allocation2 + $0x1180] ss:$36 sps:$4 sm:$0xff]  }
 0x3fb   :  { %14665 = vmatprep.subr.bf16.mxu1 %v21485_v53 }
 0x3fd   :  { %14625 = vmatpush1.bf16.msra.mxu0 %v21480_v48  ;;  %v21524_v48 = vld [vmem:[#allocation2 + $0xcbc] ss:$36 sps:$4 sm:$0xff]  }
 0x3fe   :  { %14666 = vmatpush1.bf16.msra.mxu1 %v21483_v52  ;;  %14626 = vmatprep.subr.bf16.mxu0 %v21488_v39  ;;  %v21527_v52 = vld [vmem:[#allocation2 + $0x113c] ss:$36 sps:$4 sm:$0xff]  }
 0x3ff   :  { %14667 = vmatprep.subr.bf16.mxu1 %v21491_v6 }
 0x401   :  { %14627 = vmatpush1.bf16.msra.mxu0 %v21486_v2  ;;  %v21522_v2 = vld [vmem:[#allocation2 + $0xcb8] ss:$36 sps:$4 sm:$0xff]  }
 0x402   :  { %14668 = vmatpush1.bf16.msra.mxu1 %v21489_v58  ;;  %14628 = vmatprep.subr.bf16.mxu0 %v21494_v61  ;;  %v21525_v58 = vld [vmem:[#allocation2 + $0x1138] ss:$36 sps:$4 sm:$0xff]  }
 0x403   :  { %14669 = vmatprep.subr.bf16.mxu1 %v21497_v62  ;;  %v21533_v61 = vld [vmem:[#allocation2 + $0x10f4] ss:$36 sps:$4 sm:$0xff]  }
 0x405   :  { %14629 = vmatpush1.bf16.msra.mxu0 %v21492_v47  ;;  %v21528_v47 = vld [vmem:[#allocation2 + $0xc70] ss:$36 sps:$4 sm:$0xff]  }
 0x406   :  { %14670 = vmatpush1.bf16.msra.mxu1 %v21495_v4  ;;  %14630 = vmatprep.subr.bf16.mxu0 %v21500_v38  ;;  %v21531_v4 = vld [vmem:[#allocation2 + $0x10f0] ss:$36 sps:$4 sm:$0xff]  }
 0x407   :  { %14671 = vmatprep.subr.bf16.mxu1 %v21503_v3  ;;  %v21536_v38 = vld [vmem:[#allocation2 + $0xc2c] ss:$36 sps:$4 sm:$0xff]  }
 0x408   :  { %v21539_v3 = vld [vmem:[#allocation2 + $0x10ac] ss:$36 sps:$4 sm:$0xff]  }
 0x409   :  { %14631 = vmatpush1.bf16.msra.mxu0 %v21498_v49  ;;  %v21537_v49 = vld [vmem:[#allocation2 + $0x10a8] ss:$36 sps:$4 sm:$0xff]  }
 0x40a   :  { %14672 = vmatpush1.bf16.msra.mxu1 %v21501_v8  ;;  %14632 = vmatprep.subr.bf16.mxu0 %v21506_v9  ;;  %v21542_v8 = vld [vmem:[#allocation2 + $0xbe4] ss:$36 sps:$4 sm:$0xff]  }
 0x40b   :  { %14673 = vmatprep.subr.bf16.mxu1 %v21509_v11  ;;  %v21545_v9 = vld [vmem:[#allocation2 + $0x1064] ss:$36 sps:$4 sm:$0xff]  }
 0x40c   :  { %v21540_v11 = vld [vmem:[#allocation2 + $0xbe0] ss:$36 sps:$4 sm:$0xff]  }
 0x40d   :  { %14633 = vmatpush1.bf16.msra.mxu0 %v21504_v51  ;;  %v21543_v51 = vld [vmem:[#allocation2 + $0x1060] ss:$36 sps:$4 sm:$0xff]  }
 0x40e   :  { %14674 = vmatpush1.bf16.msra.mxu1 %v21507_v16  ;;  %14634 = vmatprep.subr.bf16.mxu0 %v21512_v57  ;;  %v21548_v16 = vld [vmem:[#allocation2 + $0xb9c] ss:$36 sps:$4 sm:$0xff]  }
 0x40f   :  { %14675 = vmatprep.subr.bf16.mxu1 %v21515_v24  ;;  %v21551_v57 = vld [vmem:[#allocation2 + $0x101c] ss:$36 sps:$4 sm:$0xff]  }
 0x410   :  { %v21546_v24 = vld [vmem:[#allocation2 + $0xb98] ss:$36 sps:$4 sm:$0xff]  }
 0x411   :  { %v14365_v55 = vpop.f32.mrf.mxu1  ;;  %14635 = vmatpush2.bf16.msra.mxu0 %v21510_v28  ;;  %v21549_v28 = vld [vmem:[#allocation2 + $0x1018] ss:$36 sps:$4 sm:$0xff]  }
 0x412   :  { %v23524_v7 = vadd.f32 %v14365_v55, %v23516_v14  ;;  %14676 = vmatpush2.bf16.msra.mxu1 %v21513_v29  ;;  %14636 = vmatprep.subr.bf16.mxu0 %v21518_v10  ;;  %v21530_v14 = vld [vmem:[#allocation2 + $0xc74] ss:$36 sps:$4 sm:$0xff]  }
 0x413   :  { %v14367_v53 = vpop.f32.mrf.mxu1  ;;  %14677 = vmatprep.subr.bf16.mxu1 %v21521_v30  ;;  %v21554_v29 = vld [vmem:[#allocation2 + $0xb54] ss:$36 sps:$4 sm:$0xff]  }
 0x414   :  { %v23527_v39 = vadd.f32 %v14367_v53, %v23519_v63  ;;  %v21534_v63 = vld [vmem:[#allocation2 + $0xc28] ss:$36 sps:$4 sm:$0xff]   ;;  %v21557_v10 = vld [vmem:[#allocation2 + $0xfd4] ss:$36 sps:$4 sm:$0xff]  }
 0x415   :  { %v14369_v6 = vpop.f32.mrf.mxu1  ;;  %14637 = vmatpush2.bf16.msra.mxu0 %v21516_v5  ;;  %v21552_v30 = vld [vmem:[#allocation2 + $0xb50] ss:$36 sps:$4 sm:$0xff]   ;;  %v21558_v53 = vld [vmem:[#allocation2 + $0x1408] ss:$36 sps:$4 sm:$0xff]  }
 0x416   :  { %14678 = vmatpush2.bf16.msra.mxu1 %v21519_v37  ;;  %14638 = vmatprep.subr.bf16.mxu0 %v21524_v48  ;;  %v21555_v55 = vld [vmem:[#allocation2 + $0xfd0] ss:$36 sps:$4 sm:$0xff]   ;;  %v21561_v48 = vld [vmem:[#allocation2 + $0x1888] ss:$36 sps:$4 sm:$0xff]  }
 0x417   :  { %14679 = vmatprep.subr.bf16.mxu1 %v21527_v52  ;;  %v14370_v62 = vpop.f32.mrf.mxu1  ;;  %v21560_v5 = vld [vmem:[#allocation2 + $0x140c] ss:$36 sps:$4 sm:$0xff]   ;;  %v21566_v52 = vld [vmem:[#allocation2 + $0x13c4] ss:$36 sps:$4 sm:$0xff]  }
 0x418   :  { %v21563_v37 = vld [vmem:[#allocation2 + $0x188c] ss:$36 sps:$4 sm:$0xff]   ;;  %v21569_v6 = vld [vmem:[#allocation2 + $0x1844] ss:$36 sps:$4 sm:$0xff]  }
 0x419   :  { %14639 = vmatpush2.bf16.msra.mxu0 %v21522_v2  ;;  %v21564_v2 = vld [vmem:[#allocation2 + $0x13c0] ss:$36 sps:$4 sm:$0xff]  }
 0x41a   :  { %14680 = vmatpush2.bf16.msra.mxu1 %v21525_v58  ;;  %14640 = vmatprep.subr.bf16.mxu0 %v21530_v14  ;;  %v21567_v58 = vld [vmem:[#allocation2 + $0x1840] ss:$36 sps:$4 sm:$0xff]  }
 0x41b   :  { %14681 = vmatprep.subr.bf16.mxu1 %v21533_v61 }
 0x41d   :  { %14641 = vmatpush2.bf16.msra.mxu0 %v21528_v47  ;;  %v21572_v47 = vld [vmem:[#allocation2 + $0x137c] ss:$36 sps:$4 sm:$0xff]  }
 0x41e   :  { %14682 = vmatpush2.bf16.msra.mxu1 %v21531_v4  ;;  %14642 = vmatprep.subr.bf16.mxu0 %v21536_v38  ;;  %v21575_v4 = vld [vmem:[#allocation2 + $0x17fc] ss:$36 sps:$4 sm:$0xff]  }
 0x41f   :  { %14683 = vmatprep.subr.bf16.mxu1 %v21539_v3  ;;  %v21570_v3 = vld [vmem:[#allocation2 + $0x1378] ss:$36 sps:$4 sm:$0xff]  }
 0x421   :  { %14643 = vmatpush2.bf16.msra.mxu0 %v21534_v63  ;;  %v21573_v63 = vld [vmem:[#allocation2 + $0x17f8] ss:$36 sps:$4 sm:$0xff]  }
 0x422   :  { %14684 = vmatpush2.bf16.msra.mxu1 %v21537_v49  ;;  %14644 = vmatprep.subr.bf16.mxu0 %v21542_v8  ;;  %v21578_v8 = vld [vmem:[#allocation2 + $0x1334] ss:$36 sps:$4 sm:$0xff]  }
 0x423   :  { %14685 = vmatprep.subr.bf16.mxu1 %v21545_v9  ;;  %v21581_v9 = vld [vmem:[#allocation2 + $0x17b4] ss:$36 sps:$4 sm:$0xff]  }
 0x425   :  { %14645 = vmatpush2.bf16.msra.mxu0 %v21540_v11  ;;  %v21576_v11 = vld [vmem:[#allocation2 + $0x1330] ss:$36 sps:$4 sm:$0xff]  }
 0x426   :  { %14686 = vmatpush2.bf16.msra.mxu1 %v21543_v51  ;;  %14646 = vmatprep.subr.bf16.mxu0 %v21548_v16  ;;  %v21579_v51 = vld [vmem:[#allocation2 + $0x17b0] ss:$36 sps:$4 sm:$0xff]  }
 0x427   :  { %14687 = vmatprep.subr.bf16.mxu1 %v21551_v57  ;;  %v21587_v16 = vld [vmem:[#allocation2 + $0x176c] ss:$36 sps:$4 sm:$0xff]  }
 0x428   :  { %v21582_v57 = vld [vmem:[#allocation2 + $0x12e8] ss:$36 sps:$4 sm:$0xff]  }
 0x429   :  { %14647 = vmatpush2.bf16.msra.mxu0 %v21546_v24  ;;  %v21585_v24 = vld [vmem:[#allocation2 + $0x1768] ss:$36 sps:$4 sm:$0xff]  }
 0x42a   :  { %14688 = vmatpush2.bf16.msra.mxu1 %v21549_v28  ;;  %14648 = vmatprep.subr.bf16.mxu0 %v21554_v29  ;;  %v21590_v28 = vld [vmem:[#allocation2 + $0x12a4] ss:$36 sps:$4 sm:$0xff]  }
 0x42b   :  { %14689 = vmatprep.subr.bf16.mxu1 %v21557_v10  ;;  %v21593_v29 = vld [vmem:[#allocation2 + $0x1724] ss:$36 sps:$4 sm:$0xff]  }
 0x42c   :  { %v21588_v10 = vld [vmem:[#allocation2 + $0x12a0] ss:$36 sps:$4 sm:$0xff]  }
 0x42d   :  { %14649 = vmatpush2.bf16.msra.mxu0 %v21552_v30  ;;  %v21591_v30 = vld [vmem:[#allocation2 + $0x1720] ss:$36 sps:$4 sm:$0xff]  }
 0x42e   :  { %14690 = vmatpush2.bf16.msra.mxu1 %v21555_v55  ;;  %14700 = vmatprep.subr.bf16.mxu0 %v21560_v5  ;;  %v21596_v55 = vld [vmem:[#allocation2 + $0x125c] ss:$36 sps:$4 sm:$0xff]  }
 0x42f   :  { %14741 = vmatprep.subr.bf16.mxu1 %v21563_v37  ;;  %v21599_v5 = vld [vmem:[#allocation2 + $0x16dc] ss:$36 sps:$4 sm:$0xff]  }
 0x430   :  { %v14406_v14 = vpop.f32.mrf.mxu0  ;;  %14651 = vmatmul.mubr.bf16.vlgmr.msra.gmra.mxu0 %v23215_v26  ;;  %v21594_v37 = vld [vmem:[#allocation2 + $0x1258] ss:$36 sps:$4 sm:$0xff]  }
 0x431   :  { %14692 = vmatmul.mubr.bf16.vlgmr.msra.gmra.mxu1 %v23219_v31  ;;  %v23532_v61 = vadd.f32 %v14406_v14, %v23524_v7  ;;  %14701 = vmatpush1.bf16.msra.mxu0 %v21558_v53  ;;  %v21597_v53 = vld [vmem:[#allocation2 + $0x16d8] ss:$36 sps:$4 sm:$0xff]   ;;  %v21611_v14 = vld [vmem:[#allocation2 + $0x1acc] ss:$36 sps:$4 sm:$0xff]  }
 0x432   :  { %14742 = vmatpush1.bf16.msra.mxu1 %v21561_v48  ;;  %v14408_v62 = vpop.f32.mrf.mxu0  ;;  %14702 = vmatprep.subr.bf16.mxu0 %v21566_v52  ;;  %v21602_v48 = vld [vmem:[#allocation2 + $0x1214] ss:$36 sps:$4 sm:$0xff]  }
 0x433   :  { %14743 = vmatprep.subr.bf16.mxu1 %v21569_v6  ;;  %v23535_v38 = vadd.f32 %v14408_v62, %v23527_v39  ;;  %14732 = vmatprep.mubr.bf16.mxu0 %v23235_v41  ;;  %v21584_v39 = vld [vmem:[#allocation2 + $0x12ec] ss:$36 sps:$4 sm:$0xff]   ;;  %v21605_v52 = vld [vmem:[#allocation2 + $0x1694] ss:$36 sps:$4 sm:$0xff]  }
 0x434   :  { %14773 = vmatprep.mubr.bf16.mxu1 %v23240_v43  ;;  %v14410_v49 = vpop.f32.mrf.mxu0  ;;  %v21600_v6 = vld [vmem:[#allocation2 + $0x1210] ss:$36 sps:$4 sm:$0xff]   ;;  %v21606_v62 = vld [vmem:[#allocation2 + $0x1648] ss:$36 sps:$4 sm:$0xff]  }
 0x435   :  { %14703 = vmatpush1.bf16.msra.mxu0 %v21564_v2  ;;  %v21603_v2 = vld [vmem:[#allocation2 + $0x1690] ss:$36 sps:$4 sm:$0xff]  }
 0x436   :  { %14744 = vmatpush1.bf16.msra.mxu1 %v21567_v58  ;;  %v14411_v7 = vpop.f32.mrf.mxu0  ;;  %14704 = vmatprep.subr.bf16.mxu0 %v21572_v47  ;;  %v21608_v58 = vld [vmem:[#allocation2 + $0x164c] ss:$36 sps:$4 sm:$0xff]  }
 0x437   :  { %14745 = vmatprep.subr.bf16.mxu1 %v21575_v4  ;;  %v21609_v47 = vld [vmem:[#allocation2 + $0x1ac8] ss:$36 sps:$4 sm:$0xff]   ;;  %v21612_v7 = vld [vmem:[#allocation2 + $0x1600] ss:$36 sps:$4 sm:$0xff]  }
 0x438   :  { %v21614_v4 = vld [vmem:[#allocation2 + $0x1604] ss:$36 sps:$4 sm:$0xff]  }
 0x439   :  { %14705 = vmatpush1.bf16.msra.mxu0 %v21570_v3  ;;  %v21617_v3 = vld [vmem:[#allocation2 + $0x1a84] ss:$36 sps:$4 sm:$0xff]  }
 0x43a   :  { %14746 = vmatpush1.bf16.msra.mxu1 %v21573_v63  ;;  %14706 = vmatprep.subr.bf16.mxu0 %v21578_v8  ;;  %v21615_v8 = vld [vmem:[#allocation2 + $0x1a80] ss:$36 sps:$4 sm:$0xff]  }
 0x43b   :  { %14747 = vmatprep.subr.bf16.mxu1 %v21581_v9 }
 0x43d   :  { %14707 = vmatpush1.bf16.msra.mxu0 %v21576_v11  ;;  %v21620_v11 = vld [vmem:[#allocation2 + $0x15bc] ss:$36 sps:$4 sm:$0xff]  }
 0x43e   :  { %14748 = vmatpush1.bf16.msra.mxu1 %v21579_v51  ;;  %14708 = vmatprep.subr.bf16.mxu0 %v21584_v39  ;;  %v21623_v51 = vld [vmem:[#allocation2 + $0x1a3c] ss:$36 sps:$4 sm:$0xff]  }
 0x43f   :  { %14749 = vmatprep.subr.bf16.mxu1 %v21587_v16 }
 0x441   :  { %14709 = vmatpush1.bf16.msra.mxu0 %v21582_v57  ;;  %v21618_v57 = vld [vmem:[#allocation2 + $0x15b8] ss:$36 sps:$4 sm:$0xff]  }
 0x442   :  { %14750 = vmatpush1.bf16.msra.mxu1 %v21585_v24  ;;  %14710 = vmatprep.subr.bf16.mxu0 %v21590_v28  ;;  %v21621_v24 = vld [vmem:[#allocation2 + $0x1a38] ss:$36 sps:$4 sm:$0xff]  }
 0x443   :  { %14751 = vmatprep.subr.bf16.mxu1 %v21593_v29  ;;  %v21629_v28 = vld [vmem:[#allocation2 + $0x19f4] ss:$36 sps:$4 sm:$0xff]  }
 0x445   :  { %14711 = vmatpush1.bf16.msra.mxu0 %v21588_v10  ;;  %v21624_v10 = vld [vmem:[#allocation2 + $0x1570] ss:$36 sps:$4 sm:$0xff]  }
 0x446   :  { %14752 = vmatpush1.bf16.msra.mxu1 %v21591_v30  ;;  %14712 = vmatprep.subr.bf16.mxu0 %v21596_v55  ;;  %v21627_v30 = vld [vmem:[#allocation2 + $0x19f0] ss:$36 sps:$4 sm:$0xff]  }
 0x447   :  { %14753 = vmatprep.subr.bf16.mxu1 %v21599_v5  ;;  %v21632_v55 = vld [vmem:[#allocation2 + $0x152c] ss:$36 sps:$4 sm:$0xff]  }
 0x448   :  { %v21635_v5 = vld [vmem:[#allocation2 + $0x19ac] ss:$36 sps:$4 sm:$0xff]  }
 0x449   :  { %14713 = vmatpush1.bf16.msra.mxu0 %v21594_v37  ;;  %v21633_v37 = vld [vmem:[#allocation2 + $0x19a8] ss:$36 sps:$4 sm:$0xff]  }
 0x44a   :  { %14754 = vmatpush1.bf16.msra.mxu1 %v21597_v53  ;;  %14714 = vmatprep.subr.bf16.mxu0 %v21602_v48  ;;  %v21638_v53 = vld [vmem:[#allocation2 + $0x14e4] ss:$36 sps:$4 sm:$0xff]  }
 0x44b   :  { %14755 = vmatprep.subr.bf16.mxu1 %v21605_v52  ;;  %v21641_v48 = vld [vmem:[#allocation2 + $0x1964] ss:$36 sps:$4 sm:$0xff]  }
 0x44c   :  { %v21636_v52 = vld [vmem:[#allocation2 + $0x14e0] ss:$36 sps:$4 sm:$0xff]  }
 0x44d   :  { %14715 = vmatpush1.bf16.msra.mxu0 %v21600_v6  ;;  %v21639_v6 = vld [vmem:[#allocation2 + $0x1960] ss:$36 sps:$4 sm:$0xff]  }
 0x44e   :  { %14756 = vmatpush1.bf16.msra.mxu1 %v21603_v2  ;;  %14716 = vmatprep.subr.bf16.mxu0 %v21608_v58  ;;  %v21644_v2 = vld [vmem:[#allocation2 + $0x149c] ss:$36 sps:$4 sm:$0xff]  }
 0x44f   :  { %14757 = vmatprep.subr.bf16.mxu1 %v21611_v14  ;;  %v21647_v58 = vld [vmem:[#allocation2 + $0x191c] ss:$36 sps:$4 sm:$0xff]  }
 0x450   :  { %v21642_v14 = vld [vmem:[#allocation2 + $0x1498] ss:$36 sps:$4 sm:$0xff]  }
 0x451   :  { %v14447_v63 = vpop.f32.mrf.mxu1  ;;  %14717 = vmatpush2.bf16.msra.mxu0 %v21606_v62  ;;  %v21645_v62 = vld [vmem:[#allocation2 + $0x1918] ss:$36 sps:$4 sm:$0xff]  }
 0x452   :  { %v23540_v49 = vadd.f32 %v14447_v63, %v23532_v61  ;;  %14758 = vmatpush2.bf16.msra.mxu1 %v21609_v47  ;;  %14718 = vmatprep.subr.bf16.mxu0 %v21614_v4  ;;  %v21626_v61 = vld [vmem:[#allocation2 + $0x1574] ss:$36 sps:$4 sm:$0xff]  }
 0x453   :  { %v14449_v9 = vpop.f32.mrf.mxu1  ;;  %14759 = vmatprep.subr.bf16.mxu1 %v21617_v3  ;;  %v21650_v47 = vld [vmem:[#allocation2 + $0x1454] ss:$36 sps:$4 sm:$0xff]  }
 0x454   :  { %v23543_v39 = vadd.f32 %v14449_v9, %v23535_v38  ;;  %v21630_v38 = vld [vmem:[#allocation2 + $0x1528] ss:$36 sps:$4 sm:$0xff]   ;;  %v21653_v4 = vld [vmem:[#allocation2 + $0x18d4] ss:$36 sps:$4 sm:$0xff]  }
 0x455   :  { %v14451_v16 = vpop.f32.mrf.mxu1  ;;  %14719 = vmatpush2.bf16.msra.mxu0 %v21612_v7  ;;  %v21648_v3 = vld [vmem:[#allocation2 + $0x1450] ss:$36 sps:$4 sm:$0xff]   ;;  %v21654_v9 = vld [vmem:[#allocation2 + $0x1d08] ss:$36 sps:$4 sm:$0xff]  }
 0x456   :  { %14760 = vmatpush2.bf16.msra.mxu1 %v21615_v8  ;;  %14720 = vmatprep.subr.bf16.mxu0 %v21620_v11  ;;  %v21651_v63 = vld [vmem:[#allocation2 + $0x18d0] ss:$36 sps:$4 sm:$0xff]   ;;  %v21657_v11 = vld [vmem:[#allocation2 + $0x2188] ss:$36 sps:$4 sm:$0xff]  }
 0x457   :  { %14761 = vmatprep.subr.bf16.mxu1 %v21623_v51  ;;  %v14452_v29 = vpop.f32.mrf.mxu1  ;;  %v21656_v7 = vld [vmem:[#allocation2 + $0x1d0c] ss:$36 sps:$4 sm:$0xff]   ;;  %v21662_v51 = vld [vmem:[#allocation2 + $0x1cc4] ss:$36 sps:$4 sm:$0xff]  }
 0x458   :  { %v21659_v8 = vld [vmem:[#allocation2 + $0x218c] ss:$36 sps:$4 sm:$0xff]   ;;  %v21665_v16 = vld [vmem:[#allocation2 + $0x2144] ss:$36 sps:$4 sm:$0xff]  }
 0x459   :  { %14721 = vmatpush2.bf16.msra.mxu0 %v21618_v57  ;;  %v21660_v57 = vld [vmem:[#allocation2 + $0x1cc0] ss:$36 sps:$4 sm:$0xff]  }
 0x45a   :  { %14762 = vmatpush2.bf16.msra.mxu1 %v21621_v24  ;;  %14722 = vmatprep.subr.bf16.mxu0 %v21626_v61  ;;  %v21663_v24 = vld [vmem:[#allocation2 + $0x2140] ss:$36 sps:$4 sm:$0xff]  }
 0x45b   :  { %14763 = vmatprep.subr.bf16.mxu1 %v21629_v28 }
 0x45d   :  { %14723 = vmatpush2.bf16.msra.mxu0 %v21624_v10 }
 0x45e   :  { %14764 = vmatpush2.bf16.msra.mxu1 %v21627_v30  ;;  %14724 = vmatprep.subr.bf16.mxu0 %v21632_v55  ;;  %v21668_v55 = vld [vmem:[#allocation2 + $0x1c7c] ss:$36 sps:$4 sm:$0xff]  }
 0x45f   :  { %14765 = vmatprep.subr.bf16.mxu1 %v21635_v5  ;;  %v21671_v5 = vld [vmem:[#allocation2 + $0x20fc] ss:$36 sps:$4 sm:$0xff]  }
 0x461   :  { %14725 = vmatpush2.bf16.msra.mxu0 %v21630_v38 }
 0x462   :  { %14766 = vmatpush2.bf16.msra.mxu1 %v21633_v37  ;;  %14726 = vmatprep.subr.bf16.mxu0 %v21638_v53  ;;  %v21666_v53 = vld [vmem:[#allocation2 + $0x1c78] ss:$36 sps:$4 sm:$0xff]  }
 0x463   :  { %14767 = vmatprep.subr.bf16.mxu1 %v21641_v48 }
 0x465   :  { %14727 = vmatpush2.bf16.msra.mxu0 %v21636_v52 }
 0x466   :  { %14768 = vmatpush2.bf16.msra.mxu1 %v21639_v6  ;;  %14728 = vmatprep.subr.bf16.mxu0 %v21644_v2  ;;  %v21669_v6 = vld [vmem:[#allocation2 + $0x20f8] ss:$36 sps:$4 sm:$0xff]  }
 0x467   :  { %14769 = vmatprep.subr.bf16.mxu1 %v21647_v58  ;;  %v21674_v58 = vld [vmem:[#allocation2 + $0x1c34] ss:$36 sps:$4 sm:$0xff]  }
 0x469   :  { %14729 = vmatpush2.bf16.msra.mxu0 %v21642_v14  ;;  %v21677_v14 = vld [vmem:[#allocation2 + $0x20b4] ss:$36 sps:$4 sm:$0xff]  }
 0x46a   :  { %14770 = vmatpush2.bf16.msra.mxu1 %v21645_v62  ;;  %14730 = vmatprep.subr.bf16.mxu0 %v21650_v47  ;;  %v21672_v62 = vld [vmem:[#allocation2 + $0x1c30] ss:$36 sps:$4 sm:$0xff]  }
 0x46b   :  { %14771 = vmatprep.subr.bf16.mxu1 %v21653_v4  ;;  %v21675_v47 = vld [vmem:[#allocation2 + $0x20b0] ss:$36 sps:$4 sm:$0xff]  }
 0x46c   :  { %v21680_v4 = vld [vmem:[#allocation2 + $0x1bec] ss:$36 sps:$4 sm:$0xff]  }
 0x46d   :  { %14731 = vmatpush2.bf16.msra.mxu0 %v21648_v3  ;;  %v21683_v3 = vld [vmem:[#allocation2 + $0x206c] ss:$36 sps:$4 sm:$0xff]  }
 0x46e   :  { %14772 = vmatpush2.bf16.msra.mxu1 %v21651_v63  ;;  %14782 = vmatprep.subr.bf16.mxu0 %v21656_v7  ;;  %v21678_v63 = vld [vmem:[#allocation2 + $0x1be8] ss:$36 sps:$4 sm:$0xff]  }
 0x46f   :  { %14823 = vmatprep.subr.bf16.mxu1 %v21659_v8  ;;  %v21681_v7 = vld [vmem:[#allocation2 + $0x2068] ss:$36 sps:$4 sm:$0xff]  }
 0x470   :  { %v14488_v61 = vpop.f32.mrf.mxu0  ;;  %14733 = vmatmul.mubr.bf16.vlgmr.msra.gmra.mxu0 %v23252_v50  ;;  %v21686_v8 = vld [vmem:[#allocation2 + $0x1ba4] ss:$36 sps:$4 sm:$0xff]  }
 0x471   :  { %14774 = vmatmul.mubr.bf16.vlgmr.msra.gmra.mxu1 %v23259_v56  ;;  %v14529_v28 = vpop.f32.mrf.mxu1  ;;  %v14489_v29 = vadd.f32 %v14488_v61, %v23540_v49  ;;  %14783 = vmatpush1.bf16.msra.mxu0 %v21654_v9  ;;  %v21689_v9 = vld [vmem:[#allocation2 + $0x2024] ss:$36 sps:$4 sm:$0xff]   ;;  %v21693_v61 = vld [vmem:[#allocation2 + $0x1fd8] ss:$36 sps:$4 sm:$0xff]  }
 0x472   :  { %14824 = vmatpush1.bf16.msra.mxu1 %v21657_v11  ;;  %v14490_v10 = vpop.f32.mrf.mxu0  ;;  %14784 = vmatprep.subr.bf16.mxu0 %v21662_v51  ;;  %v21684_v11 = vld [vmem:[#allocation2 + $0x1ba0] ss:$36 sps:$4 sm:$0xff]  }
 0x473   :  { %v14531_v30 = vpop.f32.mrf.mxu1  ;;  %14825 = vmatprep.subr.bf16.mxu1 %v21665_v16  ;;  %v14491_v38 = vadd.f32 %v14490_v10, %v23543_v39  ;;  %v23549_v37 = vadd.f32 %v14529_v28, %v14489_v29  ;;  %14814 = vmatprep.mubr.bf16.mxu0 %v23255_v54  ;;  %v21687_v51 = vld [vmem:[#allocation2 + $0x2020] ss:$36 sps:$4 sm:$0xff]   ;;  %v21698_v28 = vld [vmem:[#allocation2 + $0x1b14] ss:$36 sps:$4 sm:$0xff]  }
 0x474   :  { %14855 = vmatprep.mubr.bf16.mxu1 %v23263_v59  ;;  %v14492_v48 = vpop.f32.mrf.mxu0  ;;  %v21692_v16 = vld [vmem:[#allocation2 + $0x1b5c] ss:$36 sps:$4 sm:$0xff]   ;;  %v21701_v29 = vld [vmem:[#allocation2 + $0x1f94] ss:$36 sps:$4 sm:$0xff]  }
 0x475   :  { %v14533_v52 = vpop.f32.mrf.mxu1  ;;  %v23553_v49 = vadd.f32 %v14531_v30, %v14491_v38  ;;  %14785 = vmatpush1.bf16.msra.mxu0 %v21660_v57  ;;  %v21695_v57 = vld [vmem:[#allocation2 + $0x1fdc] ss:$36 sps:$4 sm:$0xff]   ;;  %v21696_v10 = vld [vmem:[#allocation2 + $0x1b10] ss:$36 sps:$4 sm:$0xff]   ;;  %v21702_v38 = vld [vmem:[#allocation2 + $0x1f48] ss:$36 sps:$4 sm:$0xff]  }
 0x476   :  { %14826 = vmatpush1.bf16.msra.mxu1 %v21663_v24  ;;  %v14493_v2 = vpop.f32.mrf.mxu0  ;;  %14786 = vmatprep.subr.bf16.mxu0 %v21668_v55  ;;  %v21690_v24 = vld [vmem:[#allocation2 + $0x1b58] ss:$36 sps:$4 sm:$0xff]   ;;  %v21699_v30 = vld [vmem:[#allocation2 + $0x1f90] ss:$36 sps:$4 sm:$0xff]   ;;  %v21710_v48 = vld [vmem:[#allocation2 + $0x1f04] ss:$36 sps:$4 sm:$0xff]  }
 0x477   :  { %14827 = vmatprep.subr.bf16.mxu1 %v21671_v5  ;;  %v14534_v39 = vpop.f32.mrf.mxu1  ;;  %v21704_v55 = vld [vmem:[#allocation2 + $0x1f4c] ss:$36 sps:$4 sm:$0xff]   ;;  %v21713_v52 = vld [vmem:[#allocation2 + $0x2384] ss:$36 sps:$4 sm:$0xff]  }
 0x478   :  { %v21707_v5 = vld [vmem:[#allocation2 + $0x23cc] ss:$36 sps:$4 sm:$0xff]   ;;  %v21711_v2 = vld [vmem:[#allocation2 + $0x2380] ss:$36 sps:$4 sm:$0xff]   ;;  %v21714_v39 = vld [vmem:[#allocation2 + $0x1eb8] ss:$36 sps:$4 sm:$0xff]  }
 0x479   :  { %14787 = vmatpush1.bf16.msra.mxu0 %v21666_v53  ;;  %v21705_v53 = vld [vmem:[#allocation2 + $0x23c8] ss:$36 sps:$4 sm:$0xff]  }
 0x47a   :  { %14828 = vmatpush1.bf16.msra.mxu1 %v21669_v6  ;;  %14788 = vmatprep.subr.bf16.mxu0 %v21674_v58  ;;  %v21708_v6 = vld [vmem:[#allocation2 + $0x1f00] ss:$36 sps:$4 sm:$0xff]  }
 0x47b   :  { %14829 = vmatprep.subr.bf16.mxu1 %v21677_v14  ;;  %v21716_v58 = vld [vmem:[#allocation2 + $0x1ebc] ss:$36 sps:$4 sm:$0xff]  }
 0x47c   :  { %v21719_v14 = vld [vmem:[#allocation2 + $0x233c] ss:$36 sps:$4 sm:$0xff]  }
 0x47d   :  { %14789 = vmatpush1.bf16.msra.mxu0 %v21672_v62  ;;  %v21717_v62 = vld [vmem:[#allocation2 + $0x2338] ss:$36 sps:$4 sm:$0xff]  }
 0x47e   :  { %14830 = vmatpush1.bf16.msra.mxu1 %v21675_v47  ;;  %14790 = vmatprep.subr.bf16.mxu0 %v21680_v4  ;;  %v21722_v47 = vld [vmem:[#allocation2 + $0x1e74] ss:$36 sps:$4 sm:$0xff]  }
 0x47f   :  { %14831 = vmatprep.subr.bf16.mxu1 %v21683_v3  ;;  %v21725_v4 = vld [vmem:[#allocation2 + $0x22f4] ss:$36 sps:$4 sm:$0xff]  }
 0x480   :  { %v21720_v3 = vld [vmem:[#allocation2 + $0x1e70] ss:$36 sps:$4 sm:$0xff]  }
 0x481   :  { %14791 = vmatpush1.bf16.msra.mxu0 %v21678_v63  ;;  %v21723_v63 = vld [vmem:[#allocation2 + $0x22f0] ss:$36 sps:$4 sm:$0xff]  }
 0x482   :  { %14832 = vmatpush1.bf16.msra.mxu1 %v21681_v7  ;;  %14792 = vmatprep.subr.bf16.mxu0 %v21686_v8  ;;  %v21728_v7 = vld [vmem:[#allocation2 + $0x1e2c] ss:$36 sps:$4 sm:$0xff]  }
 0x483   :  { %14833 = vmatprep.subr.bf16.mxu1 %v21689_v9  ;;  %v21731_v8 = vld [vmem:[#allocation2 + $0x22ac] ss:$36 sps:$4 sm:$0xff]  }
 0x484   :  { %v21726_v9 = vld [vmem:[#allocation2 + $0x1e28] ss:$36 sps:$4 sm:$0xff]  }
 0x485   :  { %14793 = vmatpush1.bf16.msra.mxu0 %v21684_v11  ;;  %v21729_v11 = vld [vmem:[#allocation2 + $0x22a8] ss:$36 sps:$4 sm:$0xff]  }
 0x486   :  { %14834 = vmatpush1.bf16.msra.mxu1 %v21687_v51  ;;  %14794 = vmatprep.subr.bf16.mxu0 %v21692_v16  ;;  %v21734_v51 = vld [vmem:[#allocation2 + $0x1de4] ss:$36 sps:$4 sm:$0xff]  }
 0x487   :  { %14835 = vmatprep.subr.bf16.mxu1 %v21695_v57  ;;  %v21737_v16 = vld [vmem:[#allocation2 + $0x2264] ss:$36 sps:$4 sm:$0xff]  }
 0x488   :  { %v21732_v57 = vld [vmem:[#allocation2 + $0x1de0] ss:$36 sps:$4 sm:$0xff]  }
 0x489   :  { %14795 = vmatpush1.bf16.msra.mxu0 %v21690_v24  ;;  %v21735_v24 = vld [vmem:[#allocation2 + $0x2260] ss:$36 sps:$4 sm:$0xff]  }
 0x48a   :  { %14836 = vmatpush1.bf16.msra.mxu1 %v21693_v61  ;;  %14796 = vmatprep.subr.bf16.mxu0 %v21698_v28  ;;  %v21740_v61 = vld [vmem:[#allocation2 + $0x1d9c] ss:$36 sps:$4 sm:$0xff]  }
 0x48b   :  { %14837 = vmatprep.subr.bf16.mxu1 %v21701_v29  ;;  %v21743_v28 = vld [vmem:[#allocation2 + $0x221c] ss:$36 sps:$4 sm:$0xff]  }
 0x48c   :  { %v21738_v29 = vld [vmem:[#allocation2 + $0x1d98] ss:$36 sps:$4 sm:$0xff]  }
 0x48d   :  { %14797 = vmatpush1.bf16.msra.mxu0 %v21696_v10  ;;  %v21741_v10 = vld [vmem:[#allocation2 + $0x2218] ss:$36 sps:$4 sm:$0xff]  }
 0x48e   :  { %14838 = vmatpush1.bf16.msra.mxu1 %v21699_v30  ;;  %14798 = vmatprep.subr.bf16.mxu0 %v21704_v55  ;;  %v21746_v30 = vld [vmem:[#allocation2 + $0x1d54] ss:$36 sps:$4 sm:$0xff]  }
 0x48f   :  { %14839 = vmatprep.subr.bf16.mxu1 %v21707_v5  ;;  %v21749_v55 = vld [vmem:[#allocation2 + $0x21d4] ss:$36 sps:$4 sm:$0xff]  }
 0x490   :  { %v21744_v5 = vld [vmem:[#allocation2 + $0x1d50] ss:$36 sps:$4 sm:$0xff]  }
 0x491   :  { %14799 = vmatpush2.bf16.msra.mxu0 %v21702_v38  ;;  %v21747_v38 = vld [vmem:[#allocation2 + $0x21d0] ss:$36 sps:$4 sm:$0xff]  }
 0x492   :  { %14840 = vmatpush2.bf16.msra.mxu1 %v21705_v53  ;;  %14800 = vmatprep.subr.bf16.mxu0 %v21710_v48  ;;  %v2388_v53 = vsub.s32 4, %v23172_v42  ;;  %v21752_v48 = vld [vmem:[#allocation2 + $0x260c] ss:$36 sps:$4 sm:$0xff]  }
 0x493   :  { %14841 = vmatprep.subr.bf16.mxu1 %v21713_v52  ;;  %v21755_v52 = vld [vmem:[#allocation2 + $0x2a8c] ss:$36 sps:$4 sm:$0xff]  }
 0x495   :  { %14801 = vmatpush2.bf16.msra.mxu0 %v21708_v6  ;;  %v2392_v6 = vsub.s32 5, %v23172_v42 }
 0x496   :  { %14842 = vmatpush2.bf16.msra.mxu1 %v21711_v2  ;;  %14802 = vmatprep.subr.bf16.mxu0 %v21716_v58  ;;  %v21750_v2 = vld [vmem:[#allocation2 + $0x2608] ss:$36 sps:$4 sm:$0xff]  }
 0x497   :  { %14843 = vmatprep.subr.bf16.mxu1 %v21719_v14  ;;  %v21753_v58 = vld [vmem:[#allocation2 + $0x2a88] ss:$36 sps:$4 sm:$0xff]   ;;  %v23075_v14 = vld [vmem:[%s24069_s2] sm:$0xff] }
 0x499   :  { %14803 = vmatpush2.bf16.msra.mxu0 %v21714_v39  ;;  %v2389_v39 = vrot.slane %v23075_v14, %v2388_v53  ;;  %v21773_v53 = vld [vmem:[#allocation2 + $0x29b4] ss:$36 sps:$4 sm:$0xff]  }
 0x49a   :  { %14844 = vmatpush2.bf16.msra.mxu1 %v21717_v62  ;;  %14804 = vmatprep.subr.bf16.mxu0 %v21722_v47  ;;  %v21758_v62 = vld [vmem:[#allocation2 + $0x25c4] ss:$36 sps:$4 sm:$0xff]  }
 0x49b   :  { %14845 = vmatprep.subr.bf16.mxu1 %v21725_v4  ;;  %v21761_v47 = vld [vmem:[#allocation2 + $0x2a44] ss:$36 sps:$4 sm:$0xff]   ;;  %v2393_v4 = vrot.slane %v23075_v14, %v2392_v6  ;;  %v21771_v6 = vld [vmem:[#allocation2 + $0x29b0] ss:$36 sps:$4 sm:$0xff]  }
 0x49c   :  { %v21774_v14 = vld [vmem:[#allocation2 + $0x24e8] ss:$36 sps:$4 sm:$0xff]  }
 0x49d   :  { %14805 = vmatpush2.bf16.msra.mxu0 %v21720_v3  ;;  %v21756_v3 = vld [vmem:[#allocation2 + $0x25c0] ss:$36 sps:$4 sm:$0xff]  }
 0x49e   :  { %14846 = vmatpush2.bf16.msra.mxu1 %v21723_v63  ;;  %14806 = vmatprep.subr.bf16.mxu0 %v21728_v7  ;;  %v21759_v63 = vld [vmem:[#allocation2 + $0x2a40] ss:$36 sps:$4 sm:$0xff]  }
 0x49f   :  { %14847 = vmatprep.subr.bf16.mxu1 %v21731_v8 }
 0x4a1   :  { %14807 = vmatpush2.bf16.msra.mxu0 %v21726_v9 }
 0x4a2   :  { %14848 = vmatpush2.bf16.msra.mxu1 %v21729_v11  ;;  %14808 = vmatprep.subr.bf16.mxu0 %v21734_v51 }
 0x4a3   :  { %14849 = vmatprep.subr.bf16.mxu1 %v21737_v16  ;;  %v21764_v16 = vld [vmem:[#allocation2 + $0x257c] ss:$36 sps:$4 sm:$0xff]  }
 0x4a5   :  { %14809 = vmatpush2.bf16.msra.mxu0 %v21732_v57  ;;  %v21767_v57 = vld [vmem:[#allocation2 + $0x29fc] ss:$36 sps:$4 sm:$0xff]  }
 0x4a6   :  { %14850 = vmatpush2.bf16.msra.mxu1 %v21735_v24  ;;  %14810 = vmatprep.subr.bf16.mxu0 %v21740_v61 }
 0x4a7   :  { %14851 = vmatprep.subr.bf16.mxu1 %v21743_v28  ;;  %v21762_v28 = vld [vmem:[#allocation2 + $0x2578] ss:$36 sps:$4 sm:$0xff]  }
 0x4a9   :  { %14811 = vmatpush2.bf16.msra.mxu0 %v21738_v29  ;;  %v21765_v29 = vld [vmem:[#allocation2 + $0x29f8] ss:$36 sps:$4 sm:$0xff]  }
 0x4aa   :  { %14852 = vmatpush2.bf16.msra.mxu1 %v21741_v10  ;;  %14812 = vmatprep.subr.bf16.mxu0 %v21746_v30 }
 0x4ab   :  { %14853 = vmatprep.subr.bf16.mxu1 %v21749_v55 }
 0x4ad   :  { %14813 = vmatpush2.bf16.msra.mxu0 %v21744_v5 }
 0x4ae   :  { %14854 = vmatpush2.bf16.msra.mxu1 %v21747_v38  ;;  %14864 = vmatprep.subr.bf16.mxu0 %v21752_v48  ;;  %v21770_v38 = vld [vmem:[#allocation2 + $0x2534] ss:$36 sps:$4 sm:$0xff]  }
 0x4af   :  { %14905 = vmatprep.subr.bf16.mxu1 %v21755_v52  ;;  %v21768_v52 = vld [vmem:[#allocation2 + $0x2530] ss:$36 sps:$4 sm:$0xff]  }
 0x4b0   :  { %v14570_v7 = vpop.f32.mrf.mxu0  ;;  %14815 = vmatmul.mubr.bf16.vlgmr.msra.gmra.mxu0 %v23285_v15 }
 0x4b1   :  { %14856 = vmatmul.mubr.bf16.vlgmr.msra.gmra.mxu1 %v23294_v27  ;;  %v14611_v8 = vpop.f32.mrf.mxu1  ;;  %v14571_v9 = vadd.f32 %v14570_v7, %v2389_v39  ;;  %14865 = vmatpush1.bf16.msra.mxu0 %v21750_v2  ;;  %v21776_v2 = vld [vmem:[#allocation2 + $0x24ec] ss:$36 sps:$4 sm:$0xff]   ;;  %v21791_v7 = vld [vmem:[#allocation2 + $0x28dc] ss:$36 sps:$4 sm:$0xff]  }
 0x4b2   :  { %14906 = vmatpush1.bf16.msra.mxu1 %v21753_v58  ;;  %v14572_v11 = vpop.f32.mrf.mxu0  ;;  %14866 = vmatprep.subr.bf16.mxu0 %v21758_v62  ;;  %v21779_v58 = vld [vmem:[#allocation2 + $0x296c] ss:$36 sps:$4 sm:$0xff]   ;;  %v21782_v62 = vld [vmem:[#allocation2 + $0x24a4] ss:$36 sps:$4 sm:$0xff]  }
 0x4b3   :  { %v14613_v51 = vpop.f32.mrf.mxu1  ;;  %14907 = vmatprep.subr.bf16.mxu1 %v21761_v47  ;;  %v14573_v24 = vadd.f32 %v14572_v11, %v2393_v4  ;;  %v23562_v61 = vadd.f32 %v14611_v8, %v14571_v9  ;;  %14896 = vmatprep.mubr.bf16.mxu0 %v23290_v22  ;;  %v21777_v39 = vld [vmem:[#allocation2 + $0x2968] ss:$36 sps:$4 sm:$0xff]   ;;  %v21780_v4 = vld [vmem:[#allocation2 + $0x24a0] ss:$36 sps:$4 sm:$0xff]   ;;  %v21786_v8 = vld [vmem:[#allocation2 + $0x2458] ss:$36 sps:$4 sm:$0xff]  }
 0x4b4   :  { %14937 = vmatprep.mubr.bf16.mxu1 %v23298_v32  ;;  %v14574_v10 = vpop.f32.mrf.mxu0  ;;  %v21785_v47 = vld [vmem:[#allocation2 + $0x2924] ss:$36 sps:$4 sm:$0xff]   ;;  %v21789_v9 = vld [vmem:[#allocation2 + $0x28d8] ss:$36 sps:$4 sm:$0xff]  }
 0x4b5   :  { %v14615_v30 = vpop.f32.mrf.mxu1  ;;  %v23566_v55 = vadd.f32 %v14613_v51, %v14573_v24  ;;  %14867 = vmatpush1.bf16.msra.mxu0 %v21756_v3  ;;  %v21783_v3 = vld [vmem:[#allocation2 + $0x2920] ss:$36 sps:$4 sm:$0xff]   ;;  %v21794_v11 = vld [vmem:[#allocation2 + $0x2414] ss:$36 sps:$4 sm:$0xff]   ;;  %v21800_v24 = vld [vmem:[#allocation2 + $0x284c] ss:$36 sps:$4 sm:$0xff]  }
 0x4b6   :  { %14908 = vmatpush1.bf16.msra.mxu1 %v21759_v63  ;;  %v14575_v5 = vpop.f32.mrf.mxu0  ;;  %14868 = vmatprep.subr.bf16.mxu0 %v21764_v16  ;;  %v21788_v63 = vld [vmem:[#allocation2 + $0x245c] ss:$36 sps:$4 sm:$0xff]   ;;  %v21797_v51 = vld [vmem:[#allocation2 + $0x2894] ss:$36 sps:$4 sm:$0xff]   ;;  %v21801_v10 = vld [vmem:[#allocation2 + $0x2cc8] ss:$36 sps:$4 sm:$0xff]  }
 0x4b7   :  { %14909 = vmatprep.subr.bf16.mxu1 %v21767_v57  ;;  %v14616_v48 = vpop.f32.mrf.mxu1  ;;  %v21792_v16 = vld [vmem:[#allocation2 + $0x2410] ss:$36 sps:$4 sm:$0xff]   ;;  %v21806_v30 = vld [vmem:[#allocation2 + $0x2804] ss:$36 sps:$4 sm:$0xff]  }
 0x4b8   :  { %v21795_v57 = vld [vmem:[#allocation2 + $0x2890] ss:$36 sps:$4 sm:$0xff]   ;;  %v21809_v5 = vld [vmem:[#allocation2 + $0x2c84] ss:$36 sps:$4 sm:$0xff]   ;;  %v21812_v48 = vld [vmem:[#allocation2 + $0x27bc] ss:$36 sps:$4 sm:$0xff]  }
 0x4b9   :  { %14869 = vmatpush1.bf16.msra.mxu0 %v21762_v28  ;;  %v21803_v28 = vld [vmem:[#allocation2 + $0x2ccc] ss:$36 sps:$4 sm:$0xff]  }
 0x4ba   :  { %14910 = vmatpush1.bf16.msra.mxu1 %v21765_v29  ;;  %14870 = vmatprep.subr.bf16.mxu0 %v21770_v38  ;;  %v21798_v29 = vld [vmem:[#allocation2 + $0x2848] ss:$36 sps:$4 sm:$0xff]   ;;  %v21804_v38 = vld [vmem:[#allocation2 + $0x2800] ss:$36 sps:$4 sm:$0xff]  }
 0x4bb   :  { %14911 = vmatprep.subr.bf16.mxu1 %v21773_v53  ;;  %v21807_v53 = vld [vmem:[#allocation2 + $0x2c80] ss:$36 sps:$4 sm:$0xff]  }
 0x4bd   :  { %14871 = vmatpush1.bf16.msra.mxu0 %v21768_v52  ;;  %v21815_v52 = vld [vmem:[#allocation2 + $0x2c3c] ss:$36 sps:$4 sm:$0xff]  }
 0x4be   :  { %14912 = vmatpush1.bf16.msra.mxu1 %v21771_v6  ;;  %14872 = vmatprep.subr.bf16.mxu0 %v21776_v2  ;;  %v21810_v6 = vld [vmem:[#allocation2 + $0x27b8] ss:$36 sps:$4 sm:$0xff]  }
 0x4bf   :  { %14913 = vmatprep.subr.bf16.mxu1 %v21779_v58  ;;  %v21813_v2 = vld [vmem:[#allocation2 + $0x2c38] ss:$36 sps:$4 sm:$0xff]  }
 0x4c0   :  { %v21818_v58 = vld [vmem:[#allocation2 + $0x2774] ss:$36 sps:$4 sm:$0xff]  }
 0x4c1   :  { %14873 = vmatpush1.bf16.msra.mxu0 %v21774_v14  ;;  %v21821_v14 = vld [vmem:[#allocation2 + $0x2bf4] ss:$36 sps:$4 sm:$0xff]  }
 0x4c2   :  { %14914 = vmatpush1.bf16.msra.mxu1 %v21777_v39  ;;  %14874 = vmatprep.subr.bf16.mxu0 %v21782_v62  ;;  %v21816_v39 = vld [vmem:[#allocation2 + $0x2770] ss:$36 sps:$4 sm:$0xff]  }
 0x4c3   :  { %14915 = vmatprep.subr.bf16.mxu1 %v21785_v47  ;;  %v21819_v62 = vld [vmem:[#allocation2 + $0x2bf0] ss:$36 sps:$4 sm:$0xff]  }
 0x4c4   :  { %v21824_v47 = vld [vmem:[#allocation2 + $0x272c] ss:$36 sps:$4 sm:$0xff]  }
 0x4c5   :  { %14875 = vmatpush1.bf16.msra.mxu0 %v21780_v4  ;;  %v21827_v4 = vld [vmem:[#allocation2 + $0x2bac] ss:$36 sps:$4 sm:$0xff]  }
 0x4c6   :  { %14916 = vmatpush1.bf16.msra.mxu1 %v21783_v3  ;;  %14876 = vmatprep.subr.bf16.mxu0 %v21788_v63  ;;  %v21822_v3 = vld [vmem:[#allocation2 + $0x2728] ss:$36 sps:$4 sm:$0xff]  }
 0x4c7   :  { %14917 = vmatprep.subr.bf16.mxu1 %v21791_v7  ;;  %v21825_v63 = vld [vmem:[#allocation2 + $0x2ba8] ss:$36 sps:$4 sm:$0xff]  }
 0x4c8   :  { %v21830_v7 = vld [vmem:[#allocation2 + $0x26e4] ss:$36 sps:$4 sm:$0xff]  }
 0x4c9   :  { %14877 = vmatpush1.bf16.msra.mxu0 %v21786_v8  ;;  %v21833_v8 = vld [vmem:[#allocation2 + $0x2b64] ss:$36 sps:$4 sm:$0xff]  }
 0x4ca   :  { %14918 = vmatpush1.bf16.msra.mxu1 %v21789_v9  ;;  %14878 = vmatprep.subr.bf16.mxu0 %v21794_v11  ;;  %v21828_v9 = vld [vmem:[#allocation2 + $0x26e0] ss:$36 sps:$4 sm:$0xff]  }
 0x4cb   :  { %14919 = vmatprep.subr.bf16.mxu1 %v21797_v51  ;;  %v21831_v11 = vld [vmem:[#allocation2 + $0x2b60] ss:$36 sps:$4 sm:$0xff]  }
 0x4cc   :  { %v21836_v51 = vld [vmem:[#allocation2 + $0x269c] ss:$36 sps:$4 sm:$0xff]  }
 0x4cd   :  { %14879 = vmatpush1.bf16.msra.mxu0 %v21792_v16  ;;  %v21839_v16 = vld [vmem:[#allocation2 + $0x2b1c] ss:$36 sps:$4 sm:$0xff]  }
 0x4ce   :  { %14920 = vmatpush1.bf16.msra.mxu1 %v21795_v57  ;;  %14880 = vmatprep.subr.bf16.mxu0 %v21800_v24  ;;  %v21834_v57 = vld [vmem:[#allocation2 + $0x2698] ss:$36 sps:$4 sm:$0xff]  }
 0x4cf   :  { %14921 = vmatprep.subr.bf16.mxu1 %v21803_v28  ;;  %v21837_v24 = vld [vmem:[#allocation2 + $0x2b18] ss:$36 sps:$4 sm:$0xff]  }
 0x4d0   :  { %v21842_v28 = vld [vmem:[#allocation2 + $0x2654] ss:$36 sps:$4 sm:$0xff]  }
 0x4d1   :  { %14881 = vmatpush2.bf16.msra.mxu0 %v21798_v29  ;;  %v21845_v29 = vld [vmem:[#allocation2 + $0x2ad4] ss:$36 sps:$4 sm:$0xff]  }
 0x4d2   :  { %14922 = vmatpush2.bf16.msra.mxu1 %v21801_v10  ;;  %14882 = vmatprep.subr.bf16.mxu0 %v21806_v30  ;;  %v21840_v10 = vld [vmem:[#allocation2 + $0x2650] ss:$36 sps:$4 sm:$0xff]  }
 0x4d3   :  { %14923 = vmatprep.subr.bf16.mxu1 %v21809_v5  ;;  %v21843_v30 = vld [vmem:[#allocation2 + $0x2ad0] ss:$36 sps:$4 sm:$0xff]  }
 0x4d4   :  { %v21848_v5 = vld [vmem:[#allocation2 + $0x2f0c] ss:$36 sps:$4 sm:$0xff]  }
 0x4d5   :  { %14883 = vmatpush2.bf16.msra.mxu0 %v21804_v38  ;;  %v21851_v38 = vld [vmem:[#allocation2 + $0x338c] ss:$36 sps:$4 sm:$0xff]  }
 0x4d6   :  { %14924 = vmatpush2.bf16.msra.mxu1 %v21807_v53  ;;  %14884 = vmatprep.subr.bf16.mxu0 %v21812_v48  ;;  %v21846_v53 = vld [vmem:[#allocation2 + $0x2f08] ss:$36 sps:$4 sm:$0xff]  }
 0x4d7   :  { %14925 = vmatprep.subr.bf16.mxu1 %v21815_v52  ;;  %v21849_v48 = vld [vmem:[#allocation2 + $0x3388] ss:$36 sps:$4 sm:$0xff]  }
 0x4d8   :  { %v21854_v52 = vld [vmem:[#allocation2 + $0x2ec4] ss:$36 sps:$4 sm:$0xff]  }
 0x4d9   :  { %14885 = vmatpush2.bf16.msra.mxu0 %v21810_v6  ;;  %v21857_v6 = vld [vmem:[#allocation2 + $0x3344] ss:$36 sps:$4 sm:$0xff]  }
 0x4da   :  { %14926 = vmatpush2.bf16.msra.mxu1 %v21813_v2  ;;  %14886 = vmatprep.subr.bf16.mxu0 %v21818_v58  ;;  %v21852_v2 = vld [vmem:[#allocation2 + $0x2ec0] ss:$36 sps:$4 sm:$0xff]  }
 0x4db   :  { %14927 = vmatprep.subr.bf16.mxu1 %v21821_v14  ;;  %v21855_v58 = vld [vmem:[#allocation2 + $0x3340] ss:$36 sps:$4 sm:$0xff]  }
 0x4dd   :  { %14887 = vmatpush2.bf16.msra.mxu0 %v21816_v39 }
 0x4de   :  { %14928 = vmatpush2.bf16.msra.mxu1 %v21819_v62  ;;  %14888 = vmatprep.subr.bf16.mxu0 %v21824_v47 }
 0x4df   :  { %14929 = vmatprep.subr.bf16.mxu1 %v21827_v4 }
 0x4e1   :  { %14889 = vmatpush2.bf16.msra.mxu0 %v21822_v3  ;;  %v21860_v3 = vld [vmem:[#allocation2 + $0x2e7c] ss:$36 sps:$4 sm:$0xff]  }
 0x4e2   :  { %14930 = vmatpush2.bf16.msra.mxu1 %v21825_v63  ;;  %14890 = vmatprep.subr.bf16.mxu0 %v21830_v7  ;;  %v21863_v63 = vld [vmem:[#allocation2 + $0x32fc] ss:$36 sps:$4 sm:$0xff]  }
 0x4e3   :  { %14931 = vmatprep.subr.bf16.mxu1 %v21833_v8 }
 0x4e5   :  { %14891 = vmatpush2.bf16.msra.mxu0 %v21828_v9  ;;  %v21858_v9 = vld [vmem:[#allocation2 + $0x2e78] ss:$36 sps:$4 sm:$0xff]  }
 0x4e6   :  { %14932 = vmatpush2.bf16.msra.mxu1 %v21831_v11  ;;  %14892 = vmatprep.subr.bf16.mxu0 %v21836_v51  ;;  %v21861_v11 = vld [vmem:[#allocation2 + $0x32f8] ss:$36 sps:$4 sm:$0xff]  }
 0x4e7   :  { %14933 = vmatprep.subr.bf16.mxu1 %v21839_v16 }
 0x4e9   :  { %14893 = vmatpush2.bf16.msra.mxu0 %v21834_v57 }
 0x4ea   :  { %14934 = vmatpush2.bf16.msra.mxu1 %v21837_v24  ;;  %14894 = vmatprep.subr.bf16.mxu0 %v21842_v28  ;;  %v21866_v24 = vld [vmem:[#allocation2 + $0x2e34] ss:$36 sps:$4 sm:$0xff]  }
 0x4eb   :  { %14935 = vmatprep.subr.bf16.mxu1 %v21845_v29  ;;  %v21869_v28 = vld [vmem:[#allocation2 + $0x32b4] ss:$36 sps:$4 sm:$0xff]  }
 0x4ec   :  { %v21864_v29 = vld [vmem:[#allocation2 + $0x2e30] ss:$36 sps:$4 sm:$0xff]  }
 0x4ed   :  { %14895 = vmatpush2.bf16.msra.mxu0 %v21840_v10  ;;  %v21867_v10 = vld [vmem:[#allocation2 + $0x32b0] ss:$36 sps:$4 sm:$0xff]  }
 0x4ee   :  { %14936 = vmatpush2.bf16.msra.mxu1 %v21843_v30  ;;  %14946 = vmatprep.subr.bf16.mxu0 %v21848_v5  ;;  %v21872_v30 = vld [vmem:[#allocation2 + $0x2dec] ss:$36 sps:$4 sm:$0xff]  }
 0x4ef   :  { %14987 = vmatprep.subr.bf16.mxu1 %v21851_v38  ;;  %v21875_v5 = vld [vmem:[#allocation2 + $0x326c] ss:$36 sps:$4 sm:$0xff]  }
 0x4f0   :  { %v14652_v14 = vpop.f32.mrf.mxu0  ;;  %14897 = vmatmul.mubr.bf16.vlgmr.msra.gmra.mxu0 %v23317_v12  ;;  %v21870_v38 = vld [vmem:[#allocation2 + $0x2de8] ss:$36 sps:$4 sm:$0xff]  }
 0x4f1   :  { %14938 = vmatmul.mubr.bf16.vlgmr.msra.gmra.mxu1 %v23324_v40  ;;  %v14693_v39 = vpop.f32.mrf.mxu1  ;;  %v14653_v62 = vadd.f32 %v14652_v14, %v23562_v61  ;;  %14947 = vmatpush1.bf16.msra.mxu0 %v21846_v53  ;;  %v21873_v53 = vld [vmem:[#allocation2 + $0x3268] ss:$36 sps:$4 sm:$0xff]   ;;  %v21887_v14 = vld [vmem:[#allocation2 + $0x31dc] ss:$36 sps:$4 sm:$0xff]  }
 0x4f2   :  { %14988 = vmatpush1.bf16.msra.mxu1 %v21849_v48  ;;  %v14654_v47 = vpop.f32.mrf.mxu0  ;;  %14948 = vmatprep.subr.bf16.mxu0 %v21854_v52  ;;  %v21878_v48 = vld [vmem:[#allocation2 + $0x2da4] ss:$36 sps:$4 sm:$0xff]  }
 0x4f3   :  { %v14695_v4 = vpop.f32.mrf.mxu1  ;;  %14989 = vmatprep.subr.bf16.mxu1 %v21857_v6  ;;  %v14655_v7 = vadd.f32 %v14654_v47, %v23566_v55  ;;  %v23572_v8 = vadd.f32 %v14693_v39, %v14653_v62  ;;  %14978 = vmatprep.mubr.bf16.mxu0 %v23320_v25  ;;  %v21881_v52 = vld [vmem:[#allocation2 + $0x3224] ss:$36 sps:$4 sm:$0xff]   ;;  %v21882_v39 = vld [vmem:[#allocation2 + $0x2d58] ss:$36 sps:$4 sm:$0xff]  }
 0x4f4   :  { %15019 = vmatprep.mubr.bf16.mxu1 %v23328_v33  ;;  %v14656_v51 = vpop.f32.mrf.mxu0  ;;  %v21876_v6 = vld [vmem:[#allocation2 + $0x2da0] ss:$36 sps:$4 sm:$0xff]   ;;  %v21885_v62 = vld [vmem:[#allocation2 + $0x31d8] ss:$36 sps:$4 sm:$0xff]  }
 0x4f5   :  { %v14697_v61 = vpop.f32.mrf.mxu1  ;;  %v23576_v16 = vadd.f32 %v14695_v4, %v14655_v7  ;;  %14949 = vmatpush1.bf16.msra.mxu0 %v21852_v2  ;;  %v21879_v2 = vld [vmem:[#allocation2 + $0x3220] ss:$36 sps:$4 sm:$0xff]   ;;  %v21890_v47 = vld [vmem:[#allocation2 + $0x2d14] ss:$36 sps:$4 sm:$0xff]   ;;  %v21896_v7 = vld [vmem:[#allocation2 + $0x314c] ss:$36 sps:$4 sm:$0xff]  }
 0x4f6   :  { %14990 = vmatpush1.bf16.msra.mxu1 %v21855_v58  ;;  %v14657_v57 = vpop.f32.mrf.mxu0  ;;  %14950 = vmatprep.subr.bf16.mxu0 %v21860_v3  ;;  %v21884_v58 = vld [vmem:[#allocation2 + $0x2d5c] ss:$36 sps:$4 sm:$0xff]   ;;  %v21893_v4 = vld [vmem:[#allocation2 + $0x3194] ss:$36 sps:$4 sm:$0xff]   ;;  %v21897_v51 = vld [vmem:[#allocation2 + $0x35c8] ss:$36 sps:$4 sm:$0xff]  }
 0x4f7   :  { %14991 = vmatprep.subr.bf16.mxu1 %v21863_v63  ;;  %v14698_v55 = vpop.f32.mrf.mxu1  ;;  %v21888_v3 = vld [vmem:[#allocation2 + $0x2d10] ss:$36 sps:$4 sm:$0xff]   ;;  %v21902_v61 = vld [vmem:[#allocation2 + $0x3104] ss:$36 sps:$4 sm:$0xff]  }
 0x4f8   :  { %v21891_v63 = vld [vmem:[#allocation2 + $0x3190] ss:$36 sps:$4 sm:$0xff]   ;;  %v21905_v57 = vld [vmem:[#allocation2 + $0x3584] ss:$36 sps:$4 sm:$0xff]   ;;  %v21908_v55 = vld [vmem:[#allocation2 + $0x30bc] ss:$36 sps:$4 sm:$0xff]  }
 0x4f9   :  { %14951 = vmatpush1.bf16.msra.mxu0 %v21858_v9  ;;  %v21899_v9 = vld [vmem:[#allocation2 + $0x35cc] ss:$36 sps:$4 sm:$0xff]  }
 0x4fa   :  { %14992 = vmatpush1.bf16.msra.mxu1 %v21861_v11  ;;  %14952 = vmatprep.subr.bf16.mxu0 %v21866_v24  ;;  %v21894_v11 = vld [vmem:[#allocation2 + $0x3148] ss:$36 sps:$4 sm:$0xff]   ;;  %v21900_v24 = vld [vmem:[#allocation2 + $0x3100] ss:$36 sps:$4 sm:$0xff]  }
 0x4fb   :  { %14993 = vmatprep.subr.bf16.mxu1 %v21869_v28  ;;  %v21903_v28 = vld [vmem:[#allocation2 + $0x3580] ss:$36 sps:$4 sm:$0xff]  }
 0x4fd   :  { %14953 = vmatpush1.bf16.msra.mxu0 %v21864_v29  ;;  %v21911_v29 = vld [vmem:[#allocation2 + $0x353c] ss:$36 sps:$4 sm:$0xff]  }
 0x4fe   :  { %14994 = vmatpush1.bf16.msra.mxu1 %v21867_v10  ;;  %14954 = vmatprep.subr.bf16.mxu0 %v21872_v30  ;;  %v21906_v10 = vld [vmem:[#allocation2 + $0x30b8] ss:$36 sps:$4 sm:$0xff]  }
 0x4ff   :  { %14995 = vmatprep.subr.bf16.mxu1 %v21875_v5  ;;  %v21909_v30 = vld [vmem:[#allocation2 + $0x3538] ss:$36 sps:$4 sm:$0xff]  }
 0x500   :  { %v21914_v5 = vld [vmem:[#allocation2 + $0x3074] ss:$36 sps:$4 sm:$0xff]  }
 0x501   :  { %14955 = vmatpush1.bf16.msra.mxu0 %v21870_v38  ;;  %v21917_v38 = vld [vmem:[#allocation2 + $0x34f4] ss:$36 sps:$4 sm:$0xff]  }
 0x502   :  { %14996 = vmatpush1.bf16.msra.mxu1 %v21873_v53  ;;  %14956 = vmatprep.subr.bf16.mxu0 %v21878_v48  ;;  %v21912_v53 = vld [vmem:[#allocation2 + $0x3070] ss:$36 sps:$4 sm:$0xff]  }
 0x503   :  { %14997 = vmatprep.subr.bf16.mxu1 %v21881_v52  ;;  %v21915_v48 = vld [vmem:[#allocation2 + $0x34f0] ss:$36 sps:$4 sm:$0xff]  }
 0x504   :  { %v21920_v52 = vld [vmem:[#allocation2 + $0x302c] ss:$36 sps:$4 sm:$0xff]  }
 0x505   :  { %14957 = vmatpush1.bf16.msra.mxu0 %v21876_v6  ;;  %v21923_v6 = vld [vmem:[#allocation2 + $0x34ac] ss:$36 sps:$4 sm:$0xff]  }
 0x506   :  { %14998 = vmatpush1.bf16.msra.mxu1 %v21879_v2  ;;  %14958 = vmatprep.subr.bf16.mxu0 %v21884_v58  ;;  %v21918_v2 = vld [vmem:[#allocation2 + $0x3028] ss:$36 sps:$4 sm:$0xff]  }
 0x507   :  { %14999 = vmatprep.subr.bf16.mxu1 %v21887_v14  ;;  %v21921_v58 = vld [vmem:[#allocation2 + $0x34a8] ss:$36 sps:$4 sm:$0xff]  }
 0x508   :  { %v21926_v14 = vld [vmem:[#allocation2 + $0x2fe4] ss:$36 sps:$4 sm:$0xff]  }
 0x509   :  { %14959 = vmatpush1.bf16.msra.mxu0 %v21882_v39  ;;  %v21929_v39 = vld [vmem:[#allocation2 + $0x3464] ss:$36 sps:$4 sm:$0xff]  }
 0x50a   :  { %15000 = vmatpush1.bf16.msra.mxu1 %v21885_v62  ;;  %14960 = vmatprep.subr.bf16.mxu0 %v21890_v47  ;;  %v21924_v62 = vld [vmem:[#allocation2 + $0x2fe0] ss:$36 sps:$4 sm:$0xff]  }
 0x50b   :  { %15001 = vmatprep.subr.bf16.mxu1 %v21893_v4  ;;  %v21927_v47 = vld [vmem:[#allocation2 + $0x3460] ss:$36 sps:$4 sm:$0xff]  }
 0x50c   :  { %v21932_v4 = vld [vmem:[#allocation2 + $0x2f9c] ss:$36 sps:$4 sm:$0xff]  }
 0x50d   :  { %14961 = vmatpush1.bf16.msra.mxu0 %v21888_v3  ;;  %v21935_v3 = vld [vmem:[#allocation2 + $0x341c] ss:$36 sps:$4 sm:$0xff]  }
 0x50e   :  { %15002 = vmatpush1.bf16.msra.mxu1 %v21891_v63  ;;  %14962 = vmatprep.subr.bf16.mxu0 %v21896_v7  ;;  %v21930_v63 = vld [vmem:[#allocation2 + $0x2f98] ss:$36 sps:$4 sm:$0xff]  }
 0x50f   :  { %15003 = vmatprep.subr.bf16.mxu1 %v21899_v9  ;;  %v21933_v7 = vld [vmem:[#allocation2 + $0x3418] ss:$36 sps:$4 sm:$0xff]  }
 0x510   :  { %v21938_v9 = vld [vmem:[#allocation2 + $0x2f54] ss:$36 sps:$4 sm:$0xff]  }
 0x511   :  { %14963 = vmatpush2.bf16.msra.mxu0 %v21894_v11  ;;  %v21941_v11 = vld [vmem:[#allocation2 + $0x33d4] ss:$36 sps:$4 sm:$0xff]  }
 0x512   :  { %15004 = vmatpush2.bf16.msra.mxu1 %v21897_v51  ;;  %14964 = vmatprep.subr.bf16.mxu0 %v21902_v61  ;;  %v21936_v51 = vld [vmem:[#allocation2 + $0x2f50] ss:$36 sps:$4 sm:$0xff]  }
 0x513   :  { %15005 = vmatprep.subr.bf16.mxu1 %v21905_v57  ;;  %v21939_v61 = vld [vmem:[#allocation2 + $0x33d0] ss:$36 sps:$4 sm:$0xff]  }
 0x514   :  { %v21944_v57 = vld [vmem:[#allocation2 + $0x380c] ss:$36 sps:$4 sm:$0xff]  }
 0x515   :  { %14965 = vmatpush2.bf16.msra.mxu0 %v21900_v24  ;;  %v21947_v24 = vld [vmem:[#allocation2 + $0x3c8c] ss:$36 sps:$4 sm:$0xff]  }
 0x516   :  { %15006 = vmatpush2.bf16.msra.mxu1 %v21903_v28  ;;  %14966 = vmatprep.subr.bf16.mxu0 %v21908_v55  ;;  %v21942_v28 = vld [vmem:[#allocation2 + $0x3808] ss:$36 sps:$4 sm:$0xff]  }
 0x517   :  { %15007 = vmatprep.subr.bf16.mxu1 %v21911_v29  ;;  %v21945_v55 = vld [vmem:[#allocation2 + $0x3c88] ss:$36 sps:$4 sm:$0xff]  }
 0x518   :  { %v21950_v29 = vld [vmem:[#allocation2 + $0x37c4] ss:$36 sps:$4 sm:$0xff]  }
 0x519   :  { %14967 = vmatpush2.bf16.msra.mxu0 %v21906_v10  ;;  %v21953_v10 = vld [vmem:[#allocation2 + $0x3c44] ss:$36 sps:$4 sm:$0xff]  }
 0x51a   :  { %15008 = vmatpush2.bf16.msra.mxu1 %v21909_v30  ;;  %14968 = vmatprep.subr.bf16.mxu0 %v21914_v5 }
 0x51b   :  { %15009 = vmatprep.subr.bf16.mxu1 %v21917_v38 }
 0x51d   :  { %14969 = vmatpush2.bf16.msra.mxu0 %v21912_v53  ;;  %v21948_v53 = vld [vmem:[#allocation2 + $0x37c0] ss:$36 sps:$4 sm:$0xff]  }
 0x51e   :  { %15010 = vmatpush2.bf16.msra.mxu1 %v21915_v48  ;;  %14970 = vmatprep.subr.bf16.mxu0 %v21920_v52  ;;  %v21951_v48 = vld [vmem:[#allocation2 + $0x3c40] ss:$36 sps:$4 sm:$0xff]  }
 0x51f   :  { %15011 = vmatprep.subr.bf16.mxu1 %v21923_v6 }
 0x521   :  { %14971 = vmatpush2.bf16.msra.mxu0 %v21918_v2  ;;  %v21956_v2 = vld [vmem:[#allocation2 + $0x377c] ss:$36 sps:$4 sm:$0xff]  }
 0x522   :  { %15012 = vmatpush2.bf16.msra.mxu1 %v21921_v58  ;;  %14972 = vmatprep.subr.bf16.mxu0 %v21926_v14  ;;  %v21959_v58 = vld [vmem:[#allocation2 + $0x3bfc] ss:$36 sps:$4 sm:$0xff]  }
 0x523   :  { %15013 = vmatprep.subr.bf16.mxu1 %v21929_v39 }
 0x525   :  { %14973 = vmatpush2.bf16.msra.mxu0 %v21924_v62 }
 0x526   :  { %15014 = vmatpush2.bf16.msra.mxu1 %v21927_v47  ;;  %14974 = vmatprep.subr.bf16.mxu0 %v21932_v4  ;;  %v21954_v4 = vld [vmem:[#allocation2 + $0x3778] ss:$36 sps:$4 sm:$0xff]  }
 0x527   :  { %15015 = vmatprep.subr.bf16.mxu1 %v21935_v3  ;;  %v21957_v3 = vld [vmem:[#allocation2 + $0x3bf8] ss:$36 sps:$4 sm:$0xff]  }
 0x529   :  { %14975 = vmatpush2.bf16.msra.mxu0 %v21930_v63 }
 0x52a   :  { %15016 = vmatpush2.bf16.msra.mxu1 %v21933_v7  ;;  %14976 = vmatprep.subr.bf16.mxu0 %v21938_v9  ;;  %v21962_v7 = vld [vmem:[#allocation2 + $0x3734] ss:$36 sps:$4 sm:$0xff]  }
 0x52b   :  { %15017 = vmatprep.subr.bf16.mxu1 %v21941_v11  ;;  %v21965_v9 = vld [vmem:[#allocation2 + $0x3bb4] ss:$36 sps:$4 sm:$0xff]  }
 0x52c   :  { %v21960_v11 = vld [vmem:[#allocation2 + $0x3730] ss:$36 sps:$4 sm:$0xff]  }
 0x52d   :  { %14977 = vmatpush2.bf16.msra.mxu0 %v21936_v51  ;;  %v21963_v51 = vld [vmem:[#allocation2 + $0x3bb0] ss:$36 sps:$4 sm:$0xff]  }
 0x52e   :  { %15018 = vmatpush2.bf16.msra.mxu1 %v21939_v61  ;;  %15028 = vmatprep.subr.bf16.mxu0 %v21944_v57  ;;  %v21968_v61 = vld [vmem:[#allocation2 + $0x36ec] ss:$36 sps:$4 sm:$0xff]  }
 0x52f   :  { %15069 = vmatprep.subr.bf16.mxu1 %v21947_v24  ;;  %v21971_v57 = vld [vmem:[#allocation2 + $0x3b6c] ss:$36 sps:$4 sm:$0xff]  }
 0x530   :  { %v14734_v30 = vpop.f32.mrf.mxu0  ;;  %14979 = vmatmul.mubr.bf16.vlgmr.msra.gmra.mxu0 %v23353_v20  ;;  %v21966_v24 = vld [vmem:[#allocation2 + $0x36e8] ss:$36 sps:$4 sm:$0xff]  }
 0x531   :  { %15020 = vmatmul.mubr.bf16.vlgmr.msra.gmra.mxu1 %v23360_v36  ;;  %v14775_v5 = vpop.f32.mrf.mxu1  ;;  %v14735_v38 = vadd.f32 %v14734_v30, %v23572_v8  ;;  %15029 = vmatpush1.bf16.msra.mxu0 %v21942_v28  ;;  %v21969_v28 = vld [vmem:[#allocation2 + $0x3b68] ss:$36 sps:$4 sm:$0xff]   ;;  %v21975_v30 = vld [vmem:[#allocation2 + $0x3b20] ss:$36 sps:$4 sm:$0xff]  }
 0x532   :  { %15070 = vmatpush1.bf16.msra.mxu1 %v21945_v55  ;;  %v14736_v52 = vpop.f32.mrf.mxu0  ;;  %15030 = vmatprep.subr.bf16.mxu0 %v21950_v29  ;;  %v21974_v55 = vld [vmem:[#allocation2 + $0x36a4] ss:$36 sps:$4 sm:$0xff]  }
 0x533   :  { %v14777_v6 = vpop.f32.mrf.mxu1  ;;  %15071 = vmatprep.subr.bf16.mxu1 %v21953_v10  ;;  %v14737_v14 = vadd.f32 %v14736_v52, %v23576_v16  ;;  %v23582_v39 = vadd.f32 %v14775_v5, %v14735_v38  ;;  %15060 = vmatprep.mubr.bf16.mxu0 %v23356_v34  ;;  %v21977_v29 = vld [vmem:[#allocation2 + $0x3b24] ss:$36 sps:$4 sm:$0xff]   ;;  %v21980_v5 = vld [vmem:[#allocation2 + $0x365c] ss:$36 sps:$4 sm:$0xff]   ;;  %v21986_v52 = vld [vmem:[#allocation2 + $0x3614] ss:$36 sps:$4 sm:$0xff]  }
 0x534   :  { %15101 = vmatprep.mubr.bf16.mxu1 %v23364_v44  ;;  %v14738_v62 = vpop.f32.mrf.mxu0  ;;  %v21972_v10 = vld [vmem:[#allocation2 + $0x36a0] ss:$36 sps:$4 sm:$0xff]  }
 0x535   :  { %v14779_v8 = vpop.f32.mrf.mxu1  ;;  %v23586_v47 = vadd.f32 %v14777_v6, %v14737_v14  ;;  %15031 = vmatpush1.bf16.msra.mxu0 %v21948_v53  ;;  %v21983_v38 = vld [vmem:[#allocation2 + $0x3adc] ss:$36 sps:$4 sm:$0xff]   ;;  %v21989_v6 = vld [vmem:[#allocation2 + $0x3a94] ss:$36 sps:$4 sm:$0xff]   ;;  %v21992_v14 = vld [vmem:[#allocation2 + $0x3a4c] ss:$36 sps:$4 sm:$0xff]  }
 0x536   :  { %15072 = vmatpush1.bf16.msra.mxu1 %v21951_v48  ;;  %v14739_v63 = vpop.f32.mrf.mxu0  ;;  %15032 = vmatprep.subr.bf16.mxu0 %v21956_v2  ;;  %v21978_v53 = vld [vmem:[#allocation2 + $0x3658] ss:$36 sps:$4 sm:$0xff]   ;;  %v21984_v2 = vld [vmem:[#allocation2 + $0x3610] ss:$36 sps:$4 sm:$0xff]   ;;  %v21990_v8 = vld [vmem:[#allocation2 + $0x3a48] ss:$36 sps:$4 sm:$0xff]  }
 0x537   :  { %15073 = vmatprep.subr.bf16.mxu1 %v21959_v58  ;;  %v14780_v16 = vpop.f32.mrf.mxu1  ;;  %v21981_v48 = vld [vmem:[#allocation2 + $0x3ad8] ss:$36 sps:$4 sm:$0xff]   ;;  %v21987_v58 = vld [vmem:[#allocation2 + $0x3a90] ss:$36 sps:$4 sm:$0xff]   ;;  %v22001_v63 = vld [vmem:[#allocation2 + $0x3e84] ss:$36 sps:$4 sm:$0xff]  }
 0x538   :  { %v21995_v62 = vld [vmem:[#allocation2 + $0x3ecc] ss:$36 sps:$4 sm:$0xff]   ;;  %v22004_v16 = vld [vmem:[#allocation2 + $0x39bc] ss:$36 sps:$4 sm:$0xff]  }
 0x539   :  { %15033 = vmatpush1.bf16.msra.mxu0 %v21954_v4  ;;  %v21993_v4 = vld [vmem:[#allocation2 + $0x3ec8] ss:$36 sps:$4 sm:$0xff]  }
 0x53a   :  { %15074 = vmatpush1.bf16.msra.mxu1 %v21957_v3  ;;  %15034 = vmatprep.subr.bf16.mxu0 %v21962_v7  ;;  %v21998_v3 = vld [vmem:[#allocation2 + $0x3a04] ss:$36 sps:$4 sm:$0xff]  }
 0x53b   :  { %15075 = vmatprep.subr.bf16.mxu1 %v21965_v9  ;;  %v21996_v7 = vld [vmem:[#allocation2 + $0x3a00] ss:$36 sps:$4 sm:$0xff]  }
 0x53c   :  { %v21999_v9 = vld [vmem:[#allocation2 + $0x3e80] ss:$36 sps:$4 sm:$0xff]  }
 0x53d   :  { %15035 = vmatpush1.bf16.msra.mxu0 %v21960_v11  ;;  %v22007_v11 = vld [vmem:[#allocation2 + $0x3e3c] ss:$36 sps:$4 sm:$0xff]  }
 0x53e   :  { %15076 = vmatpush1.bf16.msra.mxu1 %v21963_v51  ;;  %15036 = vmatprep.subr.bf16.mxu0 %v21968_v61  ;;  %v22002_v51 = vld [vmem:[#allocation2 + $0x39b8] ss:$36 sps:$4 sm:$0xff]  }
 0x53f   :  { %15077 = vmatprep.subr.bf16.mxu1 %v21971_v57  ;;  %v22005_v61 = vld [vmem:[#allocation2 + $0x3e38] ss:$36 sps:$4 sm:$0xff]  }
 0x540   :  { %v22010_v57 = vld [vmem:[#allocation2 + $0x3974] ss:$36 sps:$4 sm:$0xff]  }
 0x541   :  { %15037 = vmatpush1.bf16.msra.mxu0 %v21966_v24  ;;  %v22013_v24 = vld [vmem:[#allocation2 + $0x3df4] ss:$36 sps:$4 sm:$0xff]  }
 0x542   :  { %15078 = vmatpush1.bf16.msra.mxu1 %v21969_v28  ;;  %15038 = vmatprep.subr.bf16.mxu0 %v21974_v55  ;;  %v22008_v28 = vld [vmem:[#allocation2 + $0x3970] ss:$36 sps:$4 sm:$0xff]  }
 0x543   :  { %15079 = vmatprep.subr.bf16.mxu1 %v21977_v29  ;;  %v22011_v55 = vld [vmem:[#allocation2 + $0x3df0] ss:$36 sps:$4 sm:$0xff]  }
 0x544   :  { %v22016_v29 = vld [vmem:[#allocation2 + $0x392c] ss:$36 sps:$4 sm:$0xff]  }
 0x545   :  { %15039 = vmatpush1.bf16.msra.mxu0 %v21972_v10  ;;  %v22019_v10 = vld [vmem:[#allocation2 + $0x3dac] ss:$36 sps:$4 sm:$0xff]  }
 0x546   :  { %15080 = vmatpush1.bf16.msra.mxu1 %v21975_v30  ;;  %15040 = vmatprep.subr.bf16.mxu0 %v21980_v5  ;;  %v22014_v30 = vld [vmem:[#allocation2 + $0x3928] ss:$36 sps:$4 sm:$0xff]  }
 0x547   :  { %15081 = vmatprep.subr.bf16.mxu1 %v21983_v38  ;;  %v22017_v5 = vld [vmem:[#allocation2 + $0x3da8] ss:$36 sps:$4 sm:$0xff]  }
 0x548   :  { %v22022_v38 = vld [vmem:[#allocation2 + $0x38e4] ss:$36 sps:$4 sm:$0xff]  }
 0x549   :  { %15041 = vmatpush1.bf16.msra.mxu0 %v21978_v53  ;;  %v22025_v53 = vld [vmem:[#allocation2 + $0x3d64] ss:$36 sps:$4 sm:$0xff]  }
 0x54a   :  { %15082 = vmatpush1.bf16.msra.mxu1 %v21981_v48  ;;  %15042 = vmatprep.subr.bf16.mxu0 %v21986_v52  ;;  %v22020_v48 = vld [vmem:[#allocation2 + $0x38e0] ss:$36 sps:$4 sm:$0xff]  }
 0x54b   :  { %15083 = vmatprep.subr.bf16.mxu1 %v21989_v6  ;;  %v22023_v52 = vld [vmem:[#allocation2 + $0x3d60] ss:$36 sps:$4 sm:$0xff]  }
 0x54c   :  { %v22028_v6 = vld [vmem:[#allocation2 + $0x389c] ss:$36 sps:$4 sm:$0xff]  }
 0x54d   :  { %15043 = vmatpush1.bf16.msra.mxu0 %v21984_v2  ;;  %v22031_v2 = vld [vmem:[#allocation2 + $0x3d1c] ss:$36 sps:$4 sm:$0xff]  }
 0x54e   :  { %15084 = vmatpush1.bf16.msra.mxu1 %v21987_v58  ;;  %15044 = vmatprep.subr.bf16.mxu0 %v21992_v14  ;;  %v22026_v58 = vld [vmem:[#allocation2 + $0x3898] ss:$36 sps:$4 sm:$0xff]  }
 0x54f   :  { %15085 = vmatprep.subr.bf16.mxu1 %v21995_v62  ;;  %v22029_v14 = vld [vmem:[#allocation2 + $0x3d18] ss:$36 sps:$4 sm:$0xff]  }
 0x550   :  { %v22034_v62 = vld [vmem:[#allocation2 + $0x3854] ss:$36 sps:$4 sm:$0xff]  }
 0x551   :  { %15045 = vmatpush2.bf16.msra.mxu0 %v21990_v8  ;;  %v22037_v8 = vld [vmem:[#allocation2 + $0x3cd4] ss:$36 sps:$4 sm:$0xff]  }
 0x552   :  { %15086 = vmatpush2.bf16.msra.mxu1 %v21993_v4  ;;  %15046 = vmatprep.subr.bf16.mxu0 %v21998_v3  ;;  %v22032_v4 = vld [vmem:[#allocation2 + $0x3850] ss:$36 sps:$4 sm:$0xff]  }
 0x553   :  { %15087 = vmatprep.subr.bf16.mxu1 %v22001_v63  ;;  %v22035_v3 = vld [vmem:[#allocation2 + $0x3cd0] ss:$36 sps:$4 sm:$0xff]  }
 0x554   :  { %v22040_v63 = vld [vmem:[#allocation2 + $0x410c] ss:$36 sps:$4 sm:$0xff]  }
 0x555   :  { %15047 = vmatpush2.bf16.msra.mxu0 %v21996_v7  ;;  %v22043_v7 = vld [vmem:[#allocation2 + $0x214] ss:$36 sps:$4 sm:$0xff]  }
 0x556   :  { %15088 = vmatpush2.bf16.msra.mxu1 %v21999_v9  ;;  %15048 = vmatprep.subr.bf16.mxu0 %v22004_v16  ;;  %v22038_v9 = vld [vmem:[#allocation2 + $0x4108] ss:$36 sps:$4 sm:$0xff]   ;;  %v22041_v16 = vld [vmem:[#allocation2 + $0x210] ss:$36 sps:$4 sm:$0xff]  }
 0x557   :  { %15089 = vmatprep.subr.bf16.mxu1 %v22007_v11  ;;  %v22046_v11 = vld [vmem:[#allocation2 + $0x40c4] ss:$36 sps:$4 sm:$0xff]  }
 0x559   :  { %15049 = vmatpush2.bf16.msra.mxu0 %v22002_v51  ;;  %v22049_v51 = vld [vmem:[#allocation2 + $0x1cc] ss:$36 sps:$4 sm:$0xff]  }
 0x55a   :  { %15090 = vmatpush2.bf16.msra.mxu1 %v22005_v61  ;;  %15050 = vmatprep.subr.bf16.mxu0 %v22010_v57 }
 0x55b   :  { %15091 = vmatprep.subr.bf16.mxu1 %v22013_v24 }
 0x55d   :  { %15051 = vmatpush2.bf16.msra.mxu0 %v22008_v28  ;;  %v22044_v28 = vld [vmem:[#allocation2 + $0x40c0] ss:$36 sps:$4 sm:$0xff]  }
 0x55e   :  { %15092 = vmatpush2.bf16.msra.mxu1 %v22011_v55  ;;  %15052 = vmatprep.subr.bf16.mxu0 %v22016_v29  ;;  %v22047_v55 = vld [vmem:[#allocation2 + $0x1c8] ss:$36 sps:$4 sm:$0xff]  }
 0x55f   :  { %15093 = vmatprep.subr.bf16.mxu1 %v22019_v10 }
 0x561   :  { %15053 = vmatpush2.bf16.msra.mxu0 %v22014_v30  ;;  %v22052_v30 = vld [vmem:[#allocation2 + $0x407c] ss:$36 sps:$4 sm:$0xff]  }
 0x562   :  { %15094 = vmatpush2.bf16.msra.mxu1 %v22017_v5  ;;  %15054 = vmatprep.subr.bf16.mxu0 %v22022_v38  ;;  %v22055_v5 = vld [vmem:[#allocation2 + $0x184] ss:$36 sps:$4 sm:$0xff]  }
 0x563   :  { %15095 = vmatprep.subr.bf16.mxu1 %v22025_v53 }
 0x565   :  { %15055 = vmatpush2.bf16.msra.mxu0 %v22020_v48 }
 0x566   :  { %15096 = vmatpush2.bf16.msra.mxu1 %v22023_v52  ;;  %15056 = vmatprep.subr.bf16.mxu0 %v22028_v6  ;;  %v22050_v6 = vld [vmem:[#allocation2 + $0x4078] ss:$36 sps:$4 sm:$0xff]  }
 0x567   :  { %15097 = vmatprep.subr.bf16.mxu1 %v22031_v2  ;;  %v22053_v2 = vld [vmem:[#allocation2 + $0x180] ss:$36 sps:$4 sm:$0xff]  }
 0x569   :  { %15057 = vmatpush2.bf16.msra.mxu0 %v22026_v58 }
 0x56a   :  { %15098 = vmatpush2.bf16.msra.mxu1 %v22029_v14  ;;  %15058 = vmatprep.subr.bf16.mxu0 %v22034_v62  ;;  %v22058_v14 = vld [vmem:[#allocation2 + $0x4034] ss:$36 sps:$4 sm:$0xff]   ;;  %v22061_v62 = vld [vmem:[#allocation2 + $0x13c] ss:$36 sps:$4 sm:$0xff]  }
 0x56b   :  { %15099 = vmatprep.subr.bf16.mxu1 %v22037_v8  ;;  %v22056_v8 = vld [vmem:[#allocation2 + $0x4030] ss:$36 sps:$4 sm:$0xff]  }
 0x56d   :  { %15059 = vmatpush2.bf16.msra.mxu0 %v22032_v4  ;;  %v22059_v4 = vld [vmem:[#allocation2 + $0x138] ss:$36 sps:$4 sm:$0xff]  }
 0x56e   :  { %15100 = vmatpush2.bf16.msra.mxu1 %v22035_v3  ;;  %15110 = vmatprep.subr.bf16.mxu0 %v22040_v63  ;;  %v22064_v3 = vld [vmem:[#allocation2 + $0x3fec] ss:$36 sps:$4 sm:$0xff]   ;;  %v22067_v63 = vld [vmem:[#allocation2 + $0xf4] ss:$36 sps:$4 sm:$0xff]  }
 0x56f   :  { %15151 = vmatprep.subr.bf16.mxu1 %v22043_v7  ;;  %v22062_v7 = vld [vmem:[#allocation2 + $0x3fe8] ss:$36 sps:$4 sm:$0xff]  }
 0x570   :  { %v14816_v61 = vpop.f32.mrf.mxu0  ;;  %15061 = vmatmul.mubr.bf16.vlgmr.msra.gmra.mxu0 %v23378_v45 }
 0x571   :  { %15102 = vmatmul.mubr.bf16.vlgmr.msra.gmra.mxu1 %v23382_v35  ;;  %v14857_v57 = vpop.f32.mrf.mxu1  ;;  %v14817_v24 = vadd.f32 %v14816_v61, %v23582_v39  ;;  %15111 = vmatpush1.bf16.msra.mxu0 %v22038_v9  ;;  %v22065_v9 = vld [vmem:[#allocation2 + $0xf0] ss:$36 sps:$4 sm:$0xff]   ;;  %v22071_v61 = vld [vmem:[#allocation2 + $0xa8] ss:$36 sps:$4 sm:$0xff]  }
 0x572   :  { %15152 = vmatpush1.bf16.msra.mxu1 %v22041_v16  ;;  %v14818_v29 = vpop.f32.mrf.mxu0  ;;  %15112 = vmatprep.subr.bf16.mxu0 %v22046_v11  ;;  %v22070_v16 = vld [vmem:[#allocation2 + $0x3fa4] ss:$36 sps:$4 sm:$0xff]   ;;  %v22073_v11 = vld [vmem:[#allocation2 + $0xac] ss:$36 sps:$4 sm:$0xff]  }
 0x573   :  { %v14859_v10 = vpop.f32.mrf.mxu1  ;;  %15153 = vmatprep.subr.bf16.mxu1 %v22049_v51  ;;  %v14819_v38 = vadd.f32 %v14818_v29, %v23586_v47  ;;  %v23592_v53 = vadd.f32 %v14857_v57, %v14817_v24  ;;  %15142 = vmatprep.mubr.bf16.mxu0 %v23125_v21  ;;  %v22068_v51 = vld [vmem:[#allocation2 + $0x3fa0] ss:$36 sps:$4 sm:$0xff]   ;;  %v22082_v29 = vld [vmem:[#allocation2 + $0x3f14] ss:$36 sps:$4 sm:$0xff]  }
 0x574   :  { %15183 = vmatprep.mubr.bf16.mxu1 %v23182_v60  ;;  %v14820_v48 = vpop.f32.mrf.mxu0  ;;  %v22076_v57 = vld [vmem:[#allocation2 + $0x3f5c] ss:$36 sps:$4 sm:$0xff]   ;;  %v22079_v24 = vld [vmem:[#allocation2 + $0x64] ss:$36 sps:$4 sm:$0xff]  }
 0x575   :  { %v14861_v39 = vpop.f32.mrf.mxu1  ;;  %v23596_v52 = vadd.f32 %v14859_v10, %v14819_v38  ;;  %15113 = vmatpush1.bf16.msra.mxu0 %v22044_v28  ;;  %v22074_v28 = vld [vmem:[#allocation2 + $0x3f58] ss:$36 sps:$4 sm:$0xff]  }
 0x576   :  { %15154 = vmatpush1.bf16.msra.mxu1 %v22047_v55  ;;  %v14821_v58 = vpop.f32.mrf.mxu0  ;;  %15114 = vmatprep.subr.bf16.mxu0 %v22052_v30  ;;  %v22077_v55 = vld [vmem:[#allocation2 + $0x60] ss:$36 sps:$4 sm:$0xff]   ;;  %v22080_v30 = vld [vmem:[#allocation2 + $0x3f10] ss:$36 sps:$4 sm:$0xff]  }
 0x577   :  { %15155 = vmatprep.subr.bf16.mxu1 %v22055_v5  ;;  %v14862_v47 = vpop.f32.mrf.mxu1  ;;  %v22085_v10 = vld [vmem:[#allocation2 + $0x1c] ss:$36 sps:$4 sm:$0xff]   ;;  %v22088_v38 = vld [vmem:[#allocation2 + $0x454] ss:$36 sps:$4 sm:$0xff]   ;;  %v22097_v58 = vld [vmem:[#allocation2 + $0x64c] ss:$36 sps:$4 sm:$0xff]  }
 0x578   :  { %v22083_v5 = vld [vmem:[#allocation2 + $0x18] ss:$36 sps:$4 sm:$0xff]   ;;  %v22086_v39 = vld [vmem:[#allocation2 + $0x450] ss:$36 sps:$4 sm:$0xff]   ;;  %v22100_v47 = vld [vmem:[#allocation2 + $0x3c4] ss:$36 sps:$4 sm:$0xff]  }
 0x579   :  { %15115 = vmatpush1.bf16.msra.mxu0 %v22050_v6  ;;  %v22091_v48 = vld [vmem:[#allocation2 + $0x694] ss:$36 sps:$4 sm:$0xff]  }
 0x57a   :  { %15156 = vmatpush1.bf16.msra.mxu1 %v22053_v2  ;;  %15116 = vmatprep.subr.bf16.mxu0 %v22058_v14  ;;  %v22089_v6 = vld [vmem:[#allocation2 + $0x690] ss:$36 sps:$4 sm:$0xff]   ;;  %v22092_v14 = vld [vmem:[#allocation2 + $0x408] ss:$36 sps:$4 sm:$0xff]  }
 0x57b   :  { %15157 = vmatprep.subr.bf16.mxu1 %v22061_v62  ;;  %v22094_v2 = vld [vmem:[#allocation2 + $0x40c] ss:$36 sps:$4 sm:$0xff]  }
 0x57c   :  { %v22095_v62 = vld [vmem:[#allocation2 + $0x648] ss:$36 sps:$4 sm:$0xff]  }
 0x57d   :  { %15117 = vmatpush1.bf16.msra.mxu0 %v22056_v8  ;;  %v22103_v8 = vld [vmem:[#allocation2 + $0x604] ss:$36 sps:$4 sm:$0xff]  }
 0x57e   :  { %15158 = vmatpush1.bf16.msra.mxu1 %v22059_v4  ;;  %15118 = vmatprep.subr.bf16.mxu0 %v22064_v3  ;;  %v22098_v4 = vld [vmem:[#allocation2 + $0x3c0] ss:$36 sps:$4 sm:$0xff]  }
 0x57f   :  { %15159 = vmatprep.subr.bf16.mxu1 %v22067_v63  ;;  %v22101_v3 = vld [vmem:[#allocation2 + $0x600] ss:$36 sps:$4 sm:$0xff]  }
 0x580   :  { %v22106_v63 = vld [vmem:[#allocation2 + $0x37c] ss:$36 sps:$4 sm:$0xff]  }
 0x581   :  { %15119 = vmatpush1.bf16.msra.mxu0 %v22062_v7  ;;  %v22109_v7 = vld [vmem:[#allocation2 + $0x5bc] ss:$36 sps:$4 sm:$0xff]  }
 0x582   :  { %15160 = vmatpush1.bf16.msra.mxu1 %v22065_v9  ;;  %15120 = vmatprep.subr.bf16.mxu0 %v22070_v16  ;;  %v22104_v9 = vld [vmem:[#allocation2 + $0x378] ss:$36 sps:$4 sm:$0xff]  }
 0x583   :  { %15161 = vmatprep.subr.bf16.mxu1 %v22073_v11  ;;  %v22107_v16 = vld [vmem:[#allocation2 + $0x5b8] ss:$36 sps:$4 sm:$0xff]  }
 0x584   :  { %v22112_v11 = vld [vmem:[#allocation2 + $0x334] ss:$36 sps:$4 sm:$0xff]  }
 0x585   :  { %15121 = vmatpush1.bf16.msra.mxu0 %v22068_v51  ;;  %v22115_v51 = vld [vmem:[#allocation2 + $0x574] ss:$36 sps:$4 sm:$0xff]  }
 0x586   :  { %15162 = vmatpush1.bf16.msra.mxu1 %v22071_v61  ;;  %15122 = vmatprep.subr.bf16.mxu0 %v22076_v57  ;;  %v22110_v61 = vld [vmem:[#allocation2 + $0x330] ss:$36 sps:$4 sm:$0xff]  }
 0x587   :  { %15163 = vmatprep.subr.bf16.mxu1 %v22079_v24  ;;  %v22113_v57 = vld [vmem:[#allocation2 + $0x570] ss:$36 sps:$4 sm:$0xff]  }
 0x588   :  { %v22118_v24 = vld [vmem:[#allocation2 + $0x2ec] ss:$36 sps:$4 sm:$0xff]  }
 0x589   :  { %15123 = vmatpush1.bf16.msra.mxu0 %v22074_v28  ;;  %v22121_v28 = vld [vmem:[#allocation2 + $0x52c] ss:$36 sps:$4 sm:$0xff]  }
 0x58a   :  { %15164 = vmatpush1.bf16.msra.mxu1 %v22077_v55  ;;  %15124 = vmatprep.subr.bf16.mxu0 %v22082_v29  ;;  %v22116_v55 = vld [vmem:[#allocation2 + $0x2e8] ss:$36 sps:$4 sm:$0xff]  }
 0x58b   :  { %15165 = vmatprep.subr.bf16.mxu1 %v22085_v10  ;;  %v22119_v29 = vld [vmem:[#allocation2 + $0x528] ss:$36 sps:$4 sm:$0xff]  }
 0x58c   :  { %v22124_v10 = vld [vmem:[#allocation2 + $0x2a4] ss:$36 sps:$4 sm:$0xff]  }
 0x58d   :  { %15125 = vmatpush1.bf16.msra.mxu0 %v22080_v30  ;;  %v22127_v30 = vld [vmem:[#allocation2 + $0x4e4] ss:$36 sps:$4 sm:$0xff]  }
 0x58e   :  { %15166 = vmatpush1.bf16.msra.mxu1 %v22083_v5  ;;  %15192 = vmatprep.subr.bf16.mxu0 %v22091_v48  ;;  %v22122_v5 = vld [vmem:[#allocation2 + $0x2a0] ss:$36 sps:$4 sm:$0xff]  }
 0x58f   :  { %15167 = vmatprep.subr.bf16.mxu1 %v22088_v38  ;;  %v22125_v38 = vld [vmem:[#allocation2 + $0x4e0] ss:$36 sps:$4 sm:$0xff]  }
 0x590   :  { %15143 = vmatmul.mubr.bf16.vlgmr.msra.gmra.mxu0 %v23398_v18  ;;  %v22130_v48 = vld [vmem:[#allocation2 + $0x25c] ss:$36 sps:$4 sm:$0xff]  }
 0x591   :  { %15193 = vmatpush1.bf16.msra.mxu0 %v22089_v6  ;;  %15224 = vmatprep.mubr.bf16.mxu0 %v23186_v0  ;;  %v22128_v6 = vld [vmem:[#allocation2 + $0x258] ss:$36 sps:$4 sm:$0xff]  }
 0x592   :  { %15168 = vmatpush2.bf16.msra.mxu1 %v22086_v39  ;;  %15194 = vmatprep.subr.bf16.mxu0 %v22097_v58  ;;  %v22133_v39 = vld [vmem:[#allocation2 + $0x49c] ss:$36 sps:$4 sm:$0xff]   ;;  %v22136_v58 = vld [vmem:[#allocation2 + $0x8d4] ss:$36 sps:$4 sm:$0xff]  }
 0x593   :  { %15169 = vmatprep.subr.bf16.mxu1 %v22094_v2  ;;  %v22131_v2 = vld [vmem:[#allocation2 + $0x498] ss:$36 sps:$4 sm:$0xff]  }
 0x595   :  { %15195 = vmatpush1.bf16.msra.mxu0 %v22095_v62  ;;  %v22134_v62 = vld [vmem:[#allocation2 + $0x8d0] ss:$36 sps:$4 sm:$0xff]  }
 0x596   :  { %15170 = vmatpush2.bf16.msra.mxu1 %v22092_v14  ;;  %15196 = vmatprep.subr.bf16.mxu0 %v22103_v8  ;;  %v22139_v14 = vld [vmem:[#allocation2 + $0xb14] ss:$36 sps:$4 sm:$0xff]   ;;  %v22142_v8 = vld [vmem:[#allocation2 + $0x88c] ss:$36 sps:$4 sm:$0xff]  }
 0x597   :  { %15171 = vmatprep.subr.bf16.mxu1 %v22100_v47  ;;  %v22137_v47 = vld [vmem:[#allocation2 + $0xb10] ss:$36 sps:$4 sm:$0xff]  }
 0x599   :  { %15197 = vmatpush1.bf16.msra.mxu0 %v22101_v3 }
 0x59a   :  { %15172 = vmatpush2.bf16.msra.mxu1 %v22098_v4  ;;  %15198 = vmatprep.subr.bf16.mxu0 %v22109_v7  ;;  %v22145_v4 = vld [vmem:[#allocation2 + $0xacc] ss:$36 sps:$4 sm:$0xff]  }
 0x59b   :  { %15173 = vmatprep.subr.bf16.mxu1 %v22106_v63 }
 0x59d   :  { %15199 = vmatpush1.bf16.msra.mxu0 %v22107_v16  ;;  %v22143_v16 = vld [vmem:[#allocation2 + $0xac8] ss:$36 sps:$4 sm:$0xff]  }
 0x59e   :  { %15174 = vmatpush2.bf16.msra.mxu1 %v22104_v9  ;;  %15200 = vmatprep.subr.bf16.mxu0 %v22115_v51  ;;  %v22140_v9 = vld [vmem:[#allocation2 + $0x888] ss:$36 sps:$4 sm:$0xff]  }
 0x59f   :  { %15175 = vmatprep.subr.bf16.mxu1 %v22112_v11 }
 0x5a1   :  { %15201 = vmatpush1.bf16.msra.mxu0 %v22113_v57  ;;  %v22151_v57 = vld [vmem:[#allocation2 + $0xa84] ss:$36 sps:$4 sm:$0xff]  }
 0x5a2   :  { %15176 = vmatpush2.bf16.msra.mxu1 %v22110_v61  ;;  %15202 = vmatprep.subr.bf16.mxu0 %v22121_v28  ;;  %v22148_v61 = vld [vmem:[#allocation2 + $0x844] ss:$36 sps:$4 sm:$0xff]  }
 0x5a3   :  { %15177 = vmatprep.subr.bf16.mxu1 %v22118_v24 }
 0x5a5   :  { %15203 = vmatpush1.bf16.msra.mxu0 %v22119_v29 }
 0x5a6   :  { %15178 = vmatpush2.bf16.msra.mxu1 %v22116_v55  ;;  %15204 = vmatprep.subr.bf16.mxu0 %v22127_v30  ;;  %v22149_v30 = vld [vmem:[#allocation2 + $0xa80] ss:$36 sps:$4 sm:$0xff]  }
 0x5a7   :  { %15179 = vmatprep.subr.bf16.mxu1 %v22124_v10 }
 0x5a9   :  { %15205 = vmatpush1.bf16.msra.mxu0 %v22125_v38  ;;  %v22154_v38 = vld [vmem:[#allocation2 + $0x7fc] ss:$36 sps:$4 sm:$0xff]  }
 0x5aa   :  { %15180 = vmatpush2.bf16.msra.mxu1 %v22122_v5  ;;  %15206 = vmatprep.subr.bf16.mxu0 %v22133_v39 }
 0x5ab   :  { %15181 = vmatprep.subr.bf16.mxu1 %v22130_v48  ;;  %v22157_v48 = vld [vmem:[#allocation2 + $0xa3c] ss:$36 sps:$4 sm:$0xff]  }
 0x5ad   :  { %15207 = vmatpush1.bf16.msra.mxu0 %v22131_v2  ;;  %v22160_v2 = vld [vmem:[#allocation2 + $0x7b4] ss:$36 sps:$4 sm:$0xff]  }
 0x5ae   :  { %15182 = vmatpush2.bf16.msra.mxu1 %v22128_v6  ;;  %15208 = vmatprep.subr.bf16.mxu0 %v22136_v58  ;;  %v22155_v6 = vld [vmem:[#allocation2 + $0xa38] ss:$36 sps:$4 sm:$0xff]  }
 0x5af   :  { %15233 = vmatprep.subr.bf16.mxu1 %v22139_v14  ;;  %v22163_v58 = vld [vmem:[#allocation2 + $0x9f4] ss:$36 sps:$4 sm:$0xff]  }
 0x5b0   :  { %v14898_v3 = vpop.f32.mrf.mxu0  ;;  %v22158_v14 = vld [vmem:[#allocation2 + $0x7b0] ss:$36 sps:$4 sm:$0xff]  }
 0x5b1   :  { %15184 = vmatmul.mubr.bf16.vlgmr.msra.gmra.mxu1 %v23196_v13  ;;  %v14939_v63 = vpop.f32.mrf.mxu1  ;;  %v14899_v7 = vadd.f32 %v14898_v3, %v23592_v53  ;;  %15209 = vmatpush2.bf16.msra.mxu0 %v22134_v62  ;;  %v22146_v53 = vld [vmem:[#allocation2 + $0x840] ss:$36 sps:$4 sm:$0xff]   ;;  %v22161_v62 = vld [vmem:[#allocation2 + $0x9f0] ss:$36 sps:$4 sm:$0xff]   ;;  %v22167_v3 = vld [vmem:[#allocation2 + $0x9a8] ss:$36 sps:$4 sm:$0xff]  }
 0x5b2   :  { %15234 = vmatpush1.bf16.msra.mxu1 %v22137_v47  ;;  %v14900_v11 = vpop.f32.mrf.mxu0  ;;  %15210 = vmatprep.subr.bf16.mxu0 %v22142_v8  ;;  %v22166_v47 = vld [vmem:[#allocation2 + $0x76c] ss:$36 sps:$4 sm:$0xff]  }
 0x5b3   :  { %v14941_v51 = vpop.f32.mrf.mxu1  ;;  %15235 = vmatprep.subr.bf16.mxu1 %v22145_v4  ;;  %v14901_v24 = vadd.f32 %v14900_v11, %v23596_v52  ;;  %v23603_v28 = vadd.f32 %v14939_v63, %v14899_v7  ;;  %15265 = vmatprep.mubr.bf16.mxu1 %v23199_v17  ;;  %v22152_v52 = vld [vmem:[#allocation2 + $0x7f8] ss:$36 sps:$4 sm:$0xff]   ;;  %v22169_v8 = vld [vmem:[#allocation2 + $0x9ac] ss:$36 sps:$4 sm:$0xff]   ;;  %v22172_v63 = vld [vmem:[#allocation2 + $0x724] ss:$36 sps:$4 sm:$0xff]  }
 0x5b4   :  { %v14902_v55 = vpop.f32.mrf.mxu0  ;;  %v22164_v4 = vld [vmem:[#allocation2 + $0x768] ss:$36 sps:$4 sm:$0xff]   ;;  %v22178_v11 = vld [vmem:[#allocation2 + $0x6dc] ss:$36 sps:$4 sm:$0xff]  }
 0x5b5   :  { %v14943_v29 = vpop.f32.mrf.mxu1  ;;  %v23606_v10 = vadd.f32 %v14941_v51, %v14901_v24  ;;  %15211 = vmatpush2.bf16.msra.mxu0 %v22140_v9  ;;  %v22175_v7 = vld [vmem:[#allocation2 + $0x964] ss:$36 sps:$4 sm:$0xff]   ;;  %v22181_v51 = vld [vmem:[#allocation2 + $0x91c] ss:$36 sps:$4 sm:$0xff]   ;;  %v22184_v24 = vld [vmem:[#allocation2 + $0xd54] ss:$36 sps:$4 sm:$0xff]  }
 0x5b6   :  { %15236 = vmatpush1.bf16.msra.mxu1 %v22143_v16  ;;  %v14903_v5 = vpop.f32.mrf.mxu0  ;;  %15212 = vmatprep.subr.bf16.mxu0 %v22148_v61  ;;  %v22170_v9 = vld [vmem:[#allocation2 + $0x720] ss:$36 sps:$4 sm:$0xff]   ;;  %v22176_v61 = vld [vmem:[#allocation2 + $0x6d8] ss:$36 sps:$4 sm:$0xff]   ;;  %v22182_v29 = vld [vmem:[#allocation2 + $0xd50] ss:$36 sps:$4 sm:$0xff]  }
 0x5b7   :  { %15237 = vmatprep.subr.bf16.mxu1 %v22151_v57  ;;  %v14944_v39 = vpop.f32.mrf.mxu1  ;;  %v22173_v16 = vld [vmem:[#allocation2 + $0x960] ss:$36 sps:$4 sm:$0xff]   ;;  %v22179_v57 = vld [vmem:[#allocation2 + $0x918] ss:$36 sps:$4 sm:$0xff]   ;;  %v22193_v5 = vld [vmem:[#allocation2 + $0xf4c] ss:$36 sps:$4 sm:$0xff]  }
 0x5b8   :  { %v22187_v55 = vld [vmem:[#allocation2 + $0xf94] ss:$36 sps:$4 sm:$0xff]   ;;  %v22196_v39 = vld [vmem:[#allocation2 + $0xcc4] ss:$36 sps:$4 sm:$0xff]  }
 0x5b9   :  { %15213 = vmatpush2.bf16.msra.mxu0 %v22146_v53  ;;  %v22185_v53 = vld [vmem:[#allocation2 + $0xf90] ss:$36 sps:$4 sm:$0xff]  }
 0x5ba   :  { %15238 = vmatpush1.bf16.msra.mxu1 %v22149_v30  ;;  %15214 = vmatprep.subr.bf16.mxu0 %v22154_v38  ;;  %v22190_v30 = vld [vmem:[#allocation2 + $0xd0c] ss:$36 sps:$4 sm:$0xff]  }
 0x5bb   :  { %15239 = vmatprep.subr.bf16.mxu1 %v22157_v48  ;;  %v22188_v38 = vld [vmem:[#allocation2 + $0xd08] ss:$36 sps:$4 sm:$0xff]  }
 0x5bc   :  { %v22191_v48 = vld [vmem:[#allocation2 + $0xf48] ss:$36 sps:$4 sm:$0xff]  }
 0x5bd   :  { %15215 = vmatpush2.bf16.msra.mxu0 %v22152_v52  ;;  %v22199_v52 = vld [vmem:[#allocation2 + $0xf04] ss:$36 sps:$4 sm:$0xff]  }
 0x5be   :  { %15240 = vmatpush1.bf16.msra.mxu1 %v22155_v6  ;;  %15216 = vmatprep.subr.bf16.mxu0 %v22160_v2  ;;  %v22194_v6 = vld [vmem:[#allocation2 + $0xcc0] ss:$36 sps:$4 sm:$0xff]  }
 0x5bf   :  { %15241 = vmatprep.subr.bf16.mxu1 %v22163_v58  ;;  %v22197_v2 = vld [vmem:[#allocation2 + $0xf00] ss:$36 sps:$4 sm:$0xff]  }
 0x5c0   :  { %v22202_v58 = vld [vmem:[#allocation2 + $0xc7c] ss:$36 sps:$4 sm:$0xff]  }
 0x5c1   :  { %15217 = vmatpush2.bf16.msra.mxu0 %v22158_v14  ;;  %v22205_v14 = vld [vmem:[#allocation2 + $0xebc] ss:$36 sps:$4 sm:$0xff]  }
 0x5c2   :  { %15242 = vmatpush1.bf16.msra.mxu1 %v22161_v62  ;;  %15218 = vmatprep.subr.bf16.mxu0 %v22166_v47  ;;  %v22200_v62 = vld [vmem:[#allocation2 + $0xc78] ss:$36 sps:$4 sm:$0xff]  }
 0x5c3   :  { %15243 = vmatprep.subr.bf16.mxu1 %v22169_v8  ;;  %v22203_v47 = vld [vmem:[#allocation2 + $0xeb8] ss:$36 sps:$4 sm:$0xff]  }
 0x5c4   :  { %v22208_v8 = vld [vmem:[#allocation2 + $0xc34] ss:$36 sps:$4 sm:$0xff]  }
 0x5c5   :  { %15219 = vmatpush2.bf16.msra.mxu0 %v22164_v4  ;;  %v22211_v4 = vld [vmem:[#allocation2 + $0xe74] ss:$36 sps:$4 sm:$0xff]  }
 0x5c6   :  { %15244 = vmatpush1.bf16.msra.mxu1 %v22167_v3  ;;  %15220 = vmatprep.subr.bf16.mxu0 %v22172_v63  ;;  %v22206_v3 = vld [vmem:[#allocation2 + $0xc30] ss:$36 sps:$4 sm:$0xff]  }
 0x5c7   :  { %15245 = vmatprep.subr.bf16.mxu1 %v22175_v7  ;;  %v22209_v63 = vld [vmem:[#allocation2 + $0xe70] ss:$36 sps:$4 sm:$0xff]  }
 0x5c8   :  { %v22214_v7 = vld [vmem:[#allocation2 + $0xbec] ss:$36 sps:$4 sm:$0xff]  }
 0x5c9   :  { %15221 = vmatpush2.bf16.msra.mxu0 %v22170_v9  ;;  %v22217_v9 = vld [vmem:[#allocation2 + $0xe2c] ss:$36 sps:$4 sm:$0xff]  }
 0x5ca   :  { %15246 = vmatpush1.bf16.msra.mxu1 %v22173_v16  ;;  %15222 = vmatprep.subr.bf16.mxu0 %v22178_v11  ;;  %v22212_v16 = vld [vmem:[#allocation2 + $0xbe8] ss:$36 sps:$4 sm:$0xff]  }
 0x5cb   :  { %15247 = vmatprep.subr.bf16.mxu1 %v22181_v51  ;;  %v22215_v11 = vld [vmem:[#allocation2 + $0xe28] ss:$36 sps:$4 sm:$0xff]  }
 0x5cc   :  { %v22220_v51 = vld [vmem:[#allocation2 + $0xba4] ss:$36 sps:$4 sm:$0xff]  }
 0x5cd   :  { %15223 = vmatpush2.bf16.msra.mxu0 %v22176_v61  ;;  %v22223_v61 = vld [vmem:[#allocation2 + $0xde4] ss:$36 sps:$4 sm:$0xff]  }
 0x5ce   :  { %15248 = vmatpush1.bf16.msra.mxu1 %v22179_v57  ;;  %15274 = vmatprep.subr.bf16.mxu0 %v22187_v55  ;;  %v22218_v57 = vld [vmem:[#allocation2 + $0xba0] ss:$36 sps:$4 sm:$0xff]  }
 0x5cf   :  { %15249 = vmatprep.subr.bf16.mxu1 %v22184_v24  ;;  %v22221_v24 = vld [vmem:[#allocation2 + $0xde0] ss:$36 sps:$4 sm:$0xff]  }
 0x5d0   :  { %15225 = vmatmul.mubr.bf16.vlgmr.msra.gmra.mxu0 %v23203_v19  ;;  %v22226_v55 = vld [vmem:[#allocation2 + $0xb5c] ss:$36 sps:$4 sm:$0xff]  }
 0x5d1   :  { %15275 = vmatpush1.bf16.msra.mxu0 %v22185_v53  ;;  %15306 = vmatprep.mubr.bf16.mxu0 %v23207_v23  ;;  %v22224_v53 = vld [vmem:[#allocation2 + $0xb58] ss:$36 sps:$4 sm:$0xff]  }
 0x5d2   :  { %15250 = vmatpush2.bf16.msra.mxu1 %v22182_v29  ;;  %15276 = vmatprep.subr.bf16.mxu0 %v22193_v5  ;;  %v22229_v29 = vld [vmem:[#allocation2 + $0xd9c] ss:$36 sps:$4 sm:$0xff]   ;;  %v22232_v5 = vld [vmem:[#allocation2 + $0x11d4] ss:$36 sps:$4 sm:$0xff]  }
 0x5d3   :  { %15251 = vmatprep.subr.bf16.mxu1 %v22190_v30  ;;  %v22227_v30 = vld [vmem:[#allocation2 + $0xd98] ss:$36 sps:$4 sm:$0xff]  }
 0x5d5   :  { %15277 = vmatpush1.bf16.msra.mxu0 %v22191_v48  ;;  %v22230_v48 = vld [vmem:[#allocation2 + $0x11d0] ss:$36 sps:$4 sm:$0xff]  }
 0x5d6   :  { %15252 = vmatpush2.bf16.msra.mxu1 %v22188_v38  ;;  %15278 = vmatprep.subr.bf16.mxu0 %v22199_v52  ;;  %v22235_v38 = vld [vmem:[#allocation2 + $0x1414] ss:$36 sps:$4 sm:$0xff]   ;;  %v22238_v52 = vld [vmem:[#allocation2 + $0x118c] ss:$36 sps:$4 sm:$0xff]  }
 0x5d7   :  { %15253 = vmatprep.subr.bf16.mxu1 %v22196_v39  ;;  %v22233_v39 = vld [vmem:[#allocation2 + $0x1410] ss:$36 sps:$4 sm:$0xff]  }
 0x5d9   :  { %15279 = vmatpush1.bf16.msra.mxu0 %v22197_v2 }
 0x5da   :  { %15254 = vmatpush2.bf16.msra.mxu1 %v22194_v6  ;;  %15280 = vmatprep.subr.bf16.mxu0 %v22205_v14  ;;  %v22241_v6 = vld [vmem:[#allocation2 + $0x13cc] ss:$36 sps:$4 sm:$0xff]  }
 0x5db   :  { %15255 = vmatprep.subr.bf16.mxu1 %v22202_v58 }
 0x5dd   :  { %15281 = vmatpush1.bf16.msra.mxu0 %v22203_v47  ;;  %v22239_v47 = vld [vmem:[#allocation2 + $0x13c8] ss:$36 sps:$4 sm:$0xff]  }
 0x5de   :  { %15256 = vmatpush2.bf16.msra.mxu1 %v22200_v62  ;;  %15282 = vmatprep.subr.bf16.mxu0 %v22211_v4  ;;  %v22236_v62 = vld [vmem:[#allocation2 + $0x1188] ss:$36 sps:$4 sm:$0xff]  }
 0x5df   :  { %15257 = vmatprep.subr.bf16.mxu1 %v22208_v8 }
 0x5e1   :  { %15283 = vmatpush1.bf16.msra.mxu0 %v22209_v63  ;;  %v22247_v63 = vld [vmem:[#allocation2 + $0x1384] ss:$36 sps:$4 sm:$0xff]  }
 0x5e2   :  { %15258 = vmatpush2.bf16.msra.mxu1 %v22206_v3  ;;  %15284 = vmatprep.subr.bf16.mxu0 %v22217_v9  ;;  %v22244_v3 = vld [vmem:[#allocation2 + $0x1144] ss:$36 sps:$4 sm:$0xff]  }
 0x5e3   :  { %15259 = vmatprep.subr.bf16.mxu1 %v22214_v7 }
 0x5e5   :  { %15285 = vmatpush1.bf16.msra.mxu0 %v22215_v11 }
 0x5e6   :  { %15260 = vmatpush2.bf16.msra.mxu1 %v22212_v16  ;;  %15286 = vmatprep.subr.bf16.mxu0 %v22223_v61  ;;  %v22245_v61 = vld [vmem:[#allocation2 + $0x1380] ss:$36 sps:$4 sm:$0xff]  }
 0x5e7   :  { %15261 = vmatprep.subr.bf16.mxu1 %v22220_v51 }
 0x5e9   :  { %15287 = vmatpush1.bf16.msra.mxu0 %v22221_v24  ;;  %v22250_v24 = vld [vmem:[#allocation2 + $0x10fc] ss:$36 sps:$4 sm:$0xff]  }
 0x5ea   :  { %15262 = vmatpush2.bf16.msra.mxu1 %v22218_v57  ;;  %15288 = vmatprep.subr.bf16.mxu0 %v22229_v29 }
 0x5eb   :  { %15263 = vmatprep.subr.bf16.mxu1 %v22226_v55  ;;  %v22253_v55 = vld [vmem:[#allocation2 + $0x133c] ss:$36 sps:$4 sm:$0xff]  }
 0x5ed   :  { %15289 = vmatpush1.bf16.msra.mxu0 %v22227_v30  ;;  %v22256_v30 = vld [vmem:[#allocation2 + $0x10b4] ss:$36 sps:$4 sm:$0xff]  }
 0x5ee   :  { %15264 = vmatpush2.bf16.msra.mxu1 %v22224_v53  ;;  %15290 = vmatprep.subr.bf16.mxu0 %v22232_v5  ;;  %v22251_v53 = vld [vmem:[#allocation2 + $0x1338] ss:$36 sps:$4 sm:$0xff]  }
 0x5ef   :  { %15315 = vmatprep.subr.bf16.mxu1 %v22235_v38  ;;  %v22259_v5 = vld [vmem:[#allocation2 + $0x12f4] ss:$36 sps:$4 sm:$0xff]  }
 0x5f0   :  { %v14980_v2 = vpop.f32.mrf.mxu0  ;;  %v22254_v38 = vld [vmem:[#allocation2 + $0x10b0] ss:$36 sps:$4 sm:$0xff]  }
 0x5f1   :  { %15266 = vmatmul.mubr.bf16.vlgmr.msra.gmra.mxu1 %v23215_v26  ;;  %v15021_v58 = vpop.f32.mrf.mxu1  ;;  %v14981_v14 = vadd.f32 %v14980_v2, %v23603_v28  ;;  %15291 = vmatpush2.bf16.msra.mxu0 %v22230_v48  ;;  %v22242_v28 = vld [vmem:[#allocation2 + $0x1140] ss:$36 sps:$4 sm:$0xff]   ;;  %v22257_v48 = vld [vmem:[#allocation2 + $0x12f0] ss:$36 sps:$4 sm:$0xff]   ;;  %v22263_v2 = vld [vmem:[#allocation2 + $0x12a8] ss:$36 sps:$4 sm:$0xff]  }
 0x5f2   :  { %15316 = vmatpush1.bf16.msra.mxu1 %v22233_v39  ;;  %v14982_v8 = vpop.f32.mrf.mxu0  ;;  %15292 = vmatprep.subr.bf16.mxu0 %v22238_v52  ;;  %v22262_v39 = vld [vmem:[#allocation2 + $0x106c] ss:$36 sps:$4 sm:$0xff]  }
 0x5f3   :  { %v15023_v4 = vpop.f32.mrf.mxu1  ;;  %15317 = vmatprep.subr.bf16.mxu1 %v22241_v6  ;;  %v14983_v7 = vadd.f32 %v14982_v8, %v23606_v10  ;;  %v23613_v9 = vadd.f32 %v15021_v58, %v14981_v14  ;;  %15347 = vmatprep.mubr.bf16.mxu1 %v23235_v41  ;;  %v22248_v10 = vld [vmem:[#allocation2 + $0x10f8] ss:$36 sps:$4 sm:$0xff]   ;;  %v22265_v52 = vld [vmem:[#allocation2 + $0x12ac] ss:$36 sps:$4 sm:$0xff]   ;;  %v22268_v58 = vld [vmem:[#allocation2 + $0x1024] ss:$36 sps:$4 sm:$0xff]  }
 0x5f4   :  { %v14984_v16 = vpop.f32.mrf.mxu0  ;;  %v22260_v6 = vld [vmem:[#allocation2 + $0x1068] ss:$36 sps:$4 sm:$0xff]   ;;  %v22274_v8 = vld [vmem:[#allocation2 + $0xfdc] ss:$36 sps:$4 sm:$0xff]  }
 0x5f5   :  { %v15025_v11 = vpop.f32.mrf.mxu1  ;;  %v23616_v51 = vadd.f32 %v15023_v4, %v14983_v7  ;;  %15293 = vmatpush2.bf16.msra.mxu0 %v22236_v62  ;;  %v22271_v14 = vld [vmem:[#allocation2 + $0x1264] ss:$36 sps:$4 sm:$0xff]   ;;  %v22277_v4 = vld [vmem:[#allocation2 + $0x121c] ss:$36 sps:$4 sm:$0xff]   ;;  %v22280_v7 = vld [vmem:[#allocation2 + $0x1654] ss:$36 sps:$4 sm:$0xff]  }
 0x5f6   :  { %15318 = vmatpush1.bf16.msra.mxu1 %v22239_v47  ;;  %v14985_v57 = vpop.f32.mrf.mxu0  ;;  %15294 = vmatprep.subr.bf16.mxu0 %v22244_v3  ;;  %v22266_v62 = vld [vmem:[#allocation2 + $0x1020] ss:$36 sps:$4 sm:$0xff]   ;;  %v22272_v3 = vld [vmem:[#allocation2 + $0xfd8] ss:$36 sps:$4 sm:$0xff]   ;;  %v22278_v11 = vld [vmem:[#allocation2 + $0x1650] ss:$36 sps:$4 sm:$0xff]  }
 0x5f7   :  { %15319 = vmatprep.subr.bf16.mxu1 %v22247_v63  ;;  %v15026_v29 = vpop.f32.mrf.mxu1  ;;  %v22269_v47 = vld [vmem:[#allocation2 + $0x1260] ss:$36 sps:$4 sm:$0xff]   ;;  %v22275_v63 = vld [vmem:[#allocation2 + $0x1218] ss:$36 sps:$4 sm:$0xff]   ;;  %v22289_v57 = vld [vmem:[#allocation2 + $0x184c] ss:$36 sps:$4 sm:$0xff]  }
 0x5f8   :  { %v22283_v16 = vld [vmem:[#allocation2 + $0x1894] ss:$36 sps:$4 sm:$0xff]   ;;  %v22292_v29 = vld [vmem:[#allocation2 + $0x15c4] ss:$36 sps:$4 sm:$0xff]  }
 0x5f9   :  { %15295 = vmatpush2.bf16.msra.mxu0 %v22242_v28  ;;  %v22281_v28 = vld [vmem:[#allocation2 + $0x1890] ss:$36 sps:$4 sm:$0xff]  }
 0x5fa   :  { %15320 = vmatpush1.bf16.msra.mxu1 %v22245_v61  ;;  %15296 = vmatprep.subr.bf16.mxu0 %v22250_v24  ;;  %v22286_v61 = vld [vmem:[#allocation2 + $0x160c] ss:$36 sps:$4 sm:$0xff]  }
 0x5fb   :  { %15321 = vmatprep.subr.bf16.mxu1 %v22253_v55  ;;  %v22284_v24 = vld [vmem:[#allocation2 + $0x1608] ss:$36 sps:$4 sm:$0xff]  }
 0x5fc   :  { %v22287_v55 = vld [vmem:[#allocation2 + $0x1848] ss:$36 sps:$4 sm:$0xff]  }
 0x5fd   :  { %15297 = vmatpush2.bf16.msra.mxu0 %v22248_v10  ;;  %v22295_v10 = vld [vmem:[#allocation2 + $0x1804] ss:$36 sps:$4 sm:$0xff]  }
 0x5fe   :  { %15322 = vmatpush1.bf16.msra.mxu1 %v22251_v53  ;;  %15298 = vmatprep.subr.bf16.mxu0 %v22256_v30  ;;  %v22290_v53 = vld [vmem:[#allocation2 + $0x15c0] ss:$36 sps:$4 sm:$0xff]  }
 0x5ff   :  { %15323 = vmatprep.subr.bf16.mxu1 %v22259_v5  ;;  %v22293_v30 = vld [vmem:[#allocation2 + $0x1800] ss:$36 sps:$4 sm:$0xff]  }
 0x600   :  { %v22298_v5 = vld [vmem:[#allocation2 + $0x157c] ss:$36 sps:$4 sm:$0xff]  }
 0x601   :  { %15299 = vmatpush2.bf16.msra.mxu0 %v22254_v38  ;;  %v22301_v38 = vld [vmem:[#allocation2 + $0x17bc] ss:$36 sps:$4 sm:$0xff]  }
 0x602   :  { %15324 = vmatpush1.bf16.msra.mxu1 %v22257_v48  ;;  %15300 = vmatprep.subr.bf16.mxu0 %v22262_v39  ;;  %v22296_v48 = vld [vmem:[#allocation2 + $0x1578] ss:$36 sps:$4 sm:$0xff]  }
 0x603   :  { %15325 = vmatprep.subr.bf16.mxu1 %v22265_v52  ;;  %v22299_v39 = vld [vmem:[#allocation2 + $0x17b8] ss:$36 sps:$4 sm:$0xff]  }
 0x604   :  { %v22304_v52 = vld [vmem:[#allocation2 + $0x1534] ss:$36 sps:$4 sm:$0xff]  }
 0x605   :  { %15301 = vmatpush2.bf16.msra.mxu0 %v22260_v6  ;;  %v22307_v6 = vld [vmem:[#allocation2 + $0x1774] ss:$36 sps:$4 sm:$0xff]  }
 0x606   :  { %15326 = vmatpush1.bf16.msra.mxu1 %v22263_v2  ;;  %15302 = vmatprep.subr.bf16.mxu0 %v22268_v58  ;;  %v22302_v2 = vld [vmem:[#allocation2 + $0x1530] ss:$36 sps:$4 sm:$0xff]  }
 0x607   :  { %15327 = vmatprep.subr.bf16.mxu1 %v22271_v14  ;;  %v22305_v58 = vld [vmem:[#allocation2 + $0x1770] ss:$36 sps:$4 sm:$0xff]  }
 0x608   :  { %v22310_v14 = vld [vmem:[#allocation2 + $0x14ec] ss:$36 sps:$4 sm:$0xff]  }
 0x609   :  { %15303 = vmatpush2.bf16.msra.mxu0 %v22266_v62  ;;  %v22313_v62 = vld [vmem:[#allocation2 + $0x172c] ss:$36 sps:$4 sm:$0xff]  }
 0x60a   :  { %15328 = vmatpush1.bf16.msra.mxu1 %v22269_v47  ;;  %15304 = vmatprep.subr.bf16.mxu0 %v22274_v8  ;;  %v22308_v47 = vld [vmem:[#allocation2 + $0x14e8] ss:$36 sps:$4 sm:$0xff]  }
 0x60b   :  { %15329 = vmatprep.subr.bf16.mxu1 %v22277_v4  ;;  %v22311_v8 = vld [vmem:[#allocation2 + $0x1728] ss:$36 sps:$4 sm:$0xff]  }
 0x60c   :  { %v22316_v4 = vld [vmem:[#allocation2 + $0x14a4] ss:$36 sps:$4 sm:$0xff]  }
 0x60d   :  { %15305 = vmatpush2.bf16.msra.mxu0 %v22272_v3  ;;  %v22319_v3 = vld [vmem:[#allocation2 + $0x16e4] ss:$36 sps:$4 sm:$0xff]  }
 0x60e   :  { %15330 = vmatpush1.bf16.msra.mxu1 %v22275_v63  ;;  %15356 = vmatprep.subr.bf16.mxu0 %v22283_v16  ;;  %v22314_v63 = vld [vmem:[#allocation2 + $0x14a0] ss:$36 sps:$4 sm:$0xff]  }
 0x60f   :  { %15331 = vmatprep.subr.bf16.mxu1 %v22280_v7  ;;  %v22317_v7 = vld [vmem:[#allocation2 + $0x16e0] ss:$36 sps:$4 sm:$0xff]  }
 0x610   :  { %15307 = vmatmul.mubr.bf16.vlgmr.msra.gmra.mxu0 %v23219_v31  ;;  %v22322_v16 = vld [vmem:[#allocation2 + $0x145c] ss:$36 sps:$4 sm:$0xff]  }
 0x611   :  { %15357 = vmatpush1.bf16.msra.mxu0 %v22281_v28  ;;  %15388 = vmatprep.mubr.bf16.mxu0 %v23240_v43  ;;  %v22320_v28 = vld [vmem:[#allocation2 + $0x1458] ss:$36 sps:$4 sm:$0xff]  }
 0x612   :  { %15332 = vmatpush2.bf16.msra.mxu1 %v22278_v11  ;;  %15358 = vmatprep.subr.bf16.mxu0 %v22289_v57  ;;  %v22325_v11 = vld [vmem:[#allocation2 + $0x169c] ss:$36 sps:$4 sm:$0xff]   ;;  %v22328_v57 = vld [vmem:[#allocation2 + $0x1ad4] ss:$36 sps:$4 sm:$0xff]  }
 0x613   :  { %15333 = vmatprep.subr.bf16.mxu1 %v22286_v61  ;;  %v22323_v61 = vld [vmem:[#allocation2 + $0x1698] ss:$36 sps:$4 sm:$0xff]  }
 0x615   :  { %15359 = vmatpush1.bf16.msra.mxu0 %v22287_v55  ;;  %v22326_v55 = vld [vmem:[#allocation2 + $0x1ad0] ss:$36 sps:$4 sm:$0xff]  }
 0x616   :  { %15334 = vmatpush2.bf16.msra.mxu1 %v22284_v24  ;;  %15360 = vmatprep.subr.bf16.mxu0 %v22295_v10  ;;  %v22331_v24 = vld [vmem:[#allocation2 + $0x1d14] ss:$36 sps:$4 sm:$0xff]   ;;  %v22334_v10 = vld [vmem:[#allocation2 + $0x1a8c] ss:$36 sps:$4 sm:$0xff]  }
 0x617   :  { %15335 = vmatprep.subr.bf16.mxu1 %v22292_v29  ;;  %v22329_v29 = vld [vmem:[#allocation2 + $0x1d10] ss:$36 sps:$4 sm:$0xff]  }
 0x619   :  { %15361 = vmatpush1.bf16.msra.mxu0 %v22293_v30 }
 0x61a   :  { %15336 = vmatpush2.bf16.msra.mxu1 %v22290_v53  ;;  %15362 = vmatprep.subr.bf16.mxu0 %v22301_v38  ;;  %v22337_v53 = vld [vmem:[#allocation2 + $0x1ccc] ss:$36 sps:$4 sm:$0xff]  }
 0x61b   :  { %15337 = vmatprep.subr.bf16.mxu1 %v22298_v5 }
 0x61d   :  { %15363 = vmatpush1.bf16.msra.mxu0 %v22299_v39  ;;  %v22335_v39 = vld [vmem:[#allocation2 + $0x1cc8] ss:$36 sps:$4 sm:$0xff]  }
 0x61e   :  { %15338 = vmatpush2.bf16.msra.mxu1 %v22296_v48  ;;  %15364 = vmatprep.subr.bf16.mxu0 %v22307_v6  ;;  %v22332_v48 = vld [vmem:[#allocation2 + $0x1a88] ss:$36 sps:$4 sm:$0xff]  }
 0x61f   :  { %15339 = vmatprep.subr.bf16.mxu1 %v22304_v52 }
 0x621   :  { %15365 = vmatpush1.bf16.msra.mxu0 %v22305_v58  ;;  %v22343_v58 = vld [vmem:[#allocation2 + $0x1c84] ss:$36 sps:$4 sm:$0xff]  }
 0x622   :  { %15340 = vmatpush2.bf16.msra.mxu1 %v22302_v2  ;;  %15366 = vmatprep.subr.bf16.mxu0 %v22313_v62  ;;  %v22340_v2 = vld [vmem:[#allocation2 + $0x1a44] ss:$36 sps:$4 sm:$0xff]  }
 0x623   :  { %15341 = vmatprep.subr.bf16.mxu1 %v22310_v14 }
 0x625   :  { %15367 = vmatpush1.bf16.msra.mxu0 %v22311_v8 }
 0x626   :  { %15342 = vmatpush2.bf16.msra.mxu1 %v22308_v47  ;;  %15368 = vmatprep.subr.bf16.mxu0 %v22319_v3  ;;  %v22341_v3 = vld [vmem:[#allocation2 + $0x1c80] ss:$36 sps:$4 sm:$0xff]  }
 0x627   :  { %15343 = vmatprep.subr.bf16.mxu1 %v22316_v4 }
 0x629   :  { %15369 = vmatpush1.bf16.msra.mxu0 %v22317_v7  ;;  %v22346_v7 = vld [vmem:[#allocation2 + $0x19fc] ss:$36 sps:$4 sm:$0xff]  }
 0x62a   :  { %15344 = vmatpush2.bf16.msra.mxu1 %v22314_v63  ;;  %15370 = vmatprep.subr.bf16.mxu0 %v22325_v11 }
 0x62b   :  { %15345 = vmatprep.subr.bf16.mxu1 %v22322_v16  ;;  %v22349_v16 = vld [vmem:[#allocation2 + $0x1c3c] ss:$36 sps:$4 sm:$0xff]  }
 0x62d   :  { %15371 = vmatpush1.bf16.msra.mxu0 %v22323_v61  ;;  %v22352_v61 = vld [vmem:[#allocation2 + $0x19b4] ss:$36 sps:$4 sm:$0xff]  }
 0x62e   :  { %15346 = vmatpush2.bf16.msra.mxu1 %v22320_v28  ;;  %15372 = vmatprep.subr.bf16.mxu0 %v22328_v57  ;;  %v22347_v28 = vld [vmem:[#allocation2 + $0x1c38] ss:$36 sps:$4 sm:$0xff]  }
 0x62f   :  { %15397 = vmatprep.subr.bf16.mxu1 %v22331_v24  ;;  %v22355_v57 = vld [vmem:[#allocation2 + $0x1bf4] ss:$36 sps:$4 sm:$0xff]  }
 0x630   :  { %v15062_v30 = vpop.f32.mrf.mxu0  ;;  %v22350_v24 = vld [vmem:[#allocation2 + $0x19b0] ss:$36 sps:$4 sm:$0xff]  }
 0x631   :  { %15348 = vmatmul.mubr.bf16.vlgmr.msra.gmra.mxu1 %v23252_v50  ;;  %v15103_v5 = vpop.f32.mrf.mxu1  ;;  %v15063_v38 = vadd.f32 %v15062_v30, %v23613_v9  ;;  %15373 = vmatpush2.bf16.msra.mxu0 %v22326_v55  ;;  %v22338_v9 = vld [vmem:[#allocation2 + $0x1a40] ss:$36 sps:$4 sm:$0xff]   ;;  %v22353_v55 = vld [vmem:[#allocation2 + $0x1bf0] ss:$36 sps:$4 sm:$0xff]   ;;  %v22359_v30 = vld [vmem:[#allocation2 + $0x1ba8] ss:$36 sps:$4 sm:$0xff]  }
 0x632   :  { %15398 = vmatpush1.bf16.msra.mxu1 %v22329_v29  ;;  %v15064_v52 = vpop.f32.mrf.mxu0  ;;  %15374 = vmatprep.subr.bf16.mxu0 %v22334_v10  ;;  %v22358_v29 = vld [vmem:[#allocation2 + $0x196c] ss:$36 sps:$4 sm:$0xff]  }
 0x633   :  { %v15105_v6 = vpop.f32.mrf.mxu1  ;;  %15399 = vmatprep.subr.bf16.mxu1 %v22337_v53  ;;  %v15065_v14 = vadd.f32 %v15064_v52, %v23616_v51  ;;  %v23623_v62 = vadd.f32 %v15103_v5, %v15063_v38  ;;  %15429 = vmatprep.mubr.bf16.mxu1 %v23255_v54  ;;  %v22344_v51 = vld [vmem:[#allocation2 + $0x19f8] ss:$36 sps:$4 sm:$0xff]   ;;  %v22361_v10 = vld [vmem:[#allocation2 + $0x1bac] ss:$36 sps:$4 sm:$0xff]   ;;  %v22364_v5 = vld [vmem:[#allocation2 + $0x1924] ss:$36 sps:$4 sm:$0xff]  }
 0x634   :  { %v15066_v47 = vpop.f32.mrf.mxu0  ;;  %v22356_v53 = vld [vmem:[#allocation2 + $0x1968] ss:$36 sps:$4 sm:$0xff]   ;;  %v22370_v52 = vld [vmem:[#allocation2 + $0x18dc] ss:$36 sps:$4 sm:$0xff]  }
 0x635   :  { %v15107_v8 = vpop.f32.mrf.mxu1  ;;  %v23626_v4 = vadd.f32 %v15105_v6, %v15065_v14  ;;  %15375 = vmatpush2.bf16.msra.mxu0 %v22332_v48  ;;  %v22367_v38 = vld [vmem:[#allocation2 + $0x1b64] ss:$36 sps:$4 sm:$0xff]   ;;  %v22373_v6 = vld [vmem:[#allocation2 + $0x1b1c] ss:$36 sps:$4 sm:$0xff]   ;;  %v22376_v14 = vld [vmem:[#allocation2 + $0x1f54] ss:$36 sps:$4 sm:$0xff]  }
 0x636   :  { %15400 = vmatpush1.bf16.msra.mxu1 %v22335_v39  ;;  %v15067_v63 = vpop.f32.mrf.mxu0  ;;  %15376 = vmatprep.subr.bf16.mxu0 %v22340_v2  ;;  %v22362_v48 = vld [vmem:[#allocation2 + $0x1920] ss:$36 sps:$4 sm:$0xff]   ;;  %v22368_v2 = vld [vmem:[#allocation2 + $0x18d8] ss:$36 sps:$4 sm:$0xff]   ;;  %v22374_v8 = vld [vmem:[#allocation2 + $0x1f50] ss:$36 sps:$4 sm:$0xff]  }
 0x637   :  { %15401 = vmatprep.subr.bf16.mxu1 %v22343_v58  ;;  %v15108_v11 = vpop.f32.mrf.mxu1  ;;  %v22365_v39 = vld [vmem:[#allocation2 + $0x1b60] ss:$36 sps:$4 sm:$0xff]   ;;  %v22371_v58 = vld [vmem:[#allocation2 + $0x1b18] ss:$36 sps:$4 sm:$0xff]   ;;  %v22385_v63 = vld [vmem:[#allocation2 + $0x214c] ss:$36 sps:$4 sm:$0xff]  }
 0x638   :  { %v22379_v47 = vld [vmem:[#allocation2 + $0x2194] ss:$36 sps:$4 sm:$0xff]   ;;  %v22380_v11 = vld [vmem:[#allocation2 + $0x1f08] ss:$36 sps:$4 sm:$0xff]  }
 0x639   :  { %15377 = vmatpush2.bf16.msra.mxu0 %v22338_v9  ;;  %v22377_v9 = vld [vmem:[#allocation2 + $0x2190] ss:$36 sps:$4 sm:$0xff]  }
 0x63a   :  { %15402 = vmatpush1.bf16.msra.mxu1 %v22341_v3  ;;  %15378 = vmatprep.subr.bf16.mxu0 %v22346_v7  ;;  %v22382_v3 = vld [vmem:[#allocation2 + $0x1f0c] ss:$36 sps:$4 sm:$0xff]  }
 0x63b   :  { %15403 = vmatprep.subr.bf16.mxu1 %v22349_v16 }
 0x63d   :  { %15379 = vmatpush2.bf16.msra.mxu0 %v22344_v51  ;;  %v22383_v51 = vld [vmem:[#allocation2 + $0x2148] ss:$36 sps:$4 sm:$0xff]  }
 0x63e   :  { %15404 = vmatpush1.bf16.msra.mxu1 %v22347_v28  ;;  %15380 = vmatprep.subr.bf16.mxu0 %v22352_v61  ;;  %v22388_v61 = vld [vmem:[#allocation2 + $0x1ec4] ss:$36 sps:$4 sm:$0xff]  }
 0x63f   :  { %15405 = vmatprep.subr.bf16.mxu1 %v22355_v57  ;;  %v22391_v57 = vld [vmem:[#allocation2 + $0x2104] ss:$36 sps:$4 sm:$0xff]  }
 0x641   :  { %15381 = vmatpush2.bf16.msra.mxu0 %v22350_v24 }
 0x642   :  { %15406 = vmatpush1.bf16.msra.mxu1 %v22353_v55  ;;  %15382 = vmatprep.subr.bf16.mxu0 %v22358_v29  ;;  %v22386_v29 = vld [vmem:[#allocation2 + $0x1ec0] ss:$36 sps:$4 sm:$0xff]  }
 0x643   :  { %15407 = vmatprep.subr.bf16.mxu1 %v22361_v10 }
 0x645   :  { %15383 = vmatpush2.bf16.msra.mxu0 %v22356_v53  ;;  %v22394_v53 = vld [vmem:[#allocation2 + $0x1e7c] ss:$36 sps:$4 sm:$0xff]  }
 0x646   :  { %15408 = vmatpush1.bf16.msra.mxu1 %v22359_v30  ;;  %15384 = vmatprep.subr.bf16.mxu0 %v22364_v5  ;;  %v22397_v30 = vld [vmem:[#allocation2 + $0x20bc] ss:$36 sps:$4 sm:$0xff]  }
 0x647   :  { %15409 = vmatprep.subr.bf16.mxu1 %v22367_v38  ;;  %v22392_v5 = vld [vmem:[#allocation2 + $0x1e78] ss:$36 sps:$4 sm:$0xff]  }
 0x648   :  { %v22395_v38 = vld [vmem:[#allocation2 + $0x20b8] ss:$36 sps:$4 sm:$0xff]  }
 0x649   :  { %15385 = vmatpush2.bf16.msra.mxu0 %v22362_v48  ;;  %v22403_v48 = vld [vmem:[#allocation2 + $0x2074] ss:$36 sps:$4 sm:$0xff]  }
 0x64a   :  { %15410 = vmatpush1.bf16.msra.mxu1 %v22365_v39  ;;  %15386 = vmatprep.subr.bf16.mxu0 %v22370_v52  ;;  %v22398_v39 = vld [vmem:[#allocation2 + $0x1e30] ss:$36 sps:$4 sm:$0xff]  }
 0x64b   :  { %15411 = vmatprep.subr.bf16.mxu1 %v22373_v6  ;;  %v22401_v52 = vld [vmem:[#allocation2 + $0x2070] ss:$36 sps:$4 sm:$0xff]  }
 0x64c   :  { %v22406_v6 = vld [vmem:[#allocation2 + $0x1dec] ss:$36 sps:$4 sm:$0xff]  }
 0x64d   :  { %15387 = vmatpush2.bf16.msra.mxu0 %v22368_v2  ;;  %v22409_v2 = vld [vmem:[#allocation2 + $0x202c] ss:$36 sps:$4 sm:$0xff]  }
 0x64e   :  { %15412 = vmatpush1.bf16.msra.mxu1 %v22371_v58  ;;  %15438 = vmatprep.subr.bf16.mxu0 %v22379_v47  ;;  %v22404_v58 = vld [vmem:[#allocation2 + $0x1de8] ss:$36 sps:$4 sm:$0xff]  }
 0x64f   :  { %15413 = vmatprep.subr.bf16.mxu1 %v22376_v14  ;;  %v22407_v14 = vld [vmem:[#allocation2 + $0x2028] ss:$36 sps:$4 sm:$0xff]  }
 0x650   :  { %v15144_v7 = vpop.f32.mrf.mxu0  ;;  %15389 = vmatmul.mubr.bf16.vlgmr.msra.gmra.mxu0 %v23259_v56  ;;  %v22412_v47 = vld [vmem:[#allocation2 + $0x1da4] ss:$36 sps:$4 sm:$0xff]  }
 0x651   :  { %v23630_v16 = vadd.f32 %v15144_v7, %v23623_v62  ;;  %15439 = vmatpush1.bf16.msra.mxu0 %v22377_v9  ;;  %15470 = vmatprep.mubr.bf16.mxu0 %v23263_v59  ;;  %v22389_v62 = vld [vmem:[#allocation2 + $0x2100] ss:$36 sps:$4 sm:$0xff]  }
 0x652   :  { %15414 = vmatpush2.bf16.msra.mxu1 %v22374_v8  ;;  %v15146_v28 = vpop.f32.mrf.mxu0  ;;  %15440 = vmatprep.subr.bf16.mxu0 %v22385_v63  ;;  %v22415_v8 = vld [vmem:[#allocation2 + $0x1fe4] ss:$36 sps:$4 sm:$0xff]   ;;  %v22418_v63 = vld [vmem:[#allocation2 + $0x1d5c] ss:$36 sps:$4 sm:$0xff]  }
 0x653   :  { %15415 = vmatprep.subr.bf16.mxu1 %v22382_v3  ;;  %v23633_v24 = vadd.f32 %v15146_v28, %v23626_v4  ;;  %v22400_v4 = vld [vmem:[#allocation2 + $0x1e34] ss:$36 sps:$4 sm:$0xff]   ;;  %v22410_v9 = vld [vmem:[#allocation2 + $0x1da0] ss:$36 sps:$4 sm:$0xff]  }
 0x654   :  { %v15148_v55 = vpop.f32.mrf.mxu0  ;;  %v22413_v3 = vld [vmem:[#allocation2 + $0x1fe0] ss:$36 sps:$4 sm:$0xff]   ;;  %v22424_v28 = vld [vmem:[#allocation2 + $0x23d4] ss:$36 sps:$4 sm:$0xff]  }
 0x655   :  { %15441 = vmatpush1.bf16.msra.mxu0 %v22383_v51  ;;  %v22421_v7 = vld [vmem:[#allocation2 + $0x1f9c] ss:$36 sps:$4 sm:$0xff]   ;;  %v22425_v55 = vld [vmem:[#allocation2 + $0x2610] ss:$36 sps:$4 sm:$0xff]  }
 0x656   :  { %15416 = vmatpush2.bf16.msra.mxu1 %v22380_v11  ;;  %v15149_v10 = vpop.f32.mrf.mxu0  ;;  %15442 = vmatprep.subr.bf16.mxu0 %v22391_v57  ;;  %v22416_v11 = vld [vmem:[#allocation2 + $0x1d58] ss:$36 sps:$4 sm:$0xff]   ;;  %v22422_v57 = vld [vmem:[#allocation2 + $0x23d0] ss:$36 sps:$4 sm:$0xff]  }
 0x657   :  { %15417 = vmatprep.subr.bf16.mxu1 %v22388_v61  ;;  %v22419_v51 = vld [vmem:[#allocation2 + $0x1f98] ss:$36 sps:$4 sm:$0xff]  }
 0x658   :  { %v22427_v61 = vld [vmem:[#allocation2 + $0x2614] ss:$36 sps:$4 sm:$0xff]  }
 0x659   :  { %15443 = vmatpush1.bf16.msra.mxu0 %v22389_v62  ;;  %v22433_v62 = vld [vmem:[#allocation2 + $0x25cc] ss:$36 sps:$4 sm:$0xff]  }
 0x65a   :  { %15418 = vmatpush2.bf16.msra.mxu1 %v22386_v29  ;;  %15444 = vmatprep.subr.bf16.mxu0 %v22397_v30  ;;  %v22430_v29 = vld [vmem:[#allocation2 + $0x238c] ss:$36 sps:$4 sm:$0xff]  }
 0x65b   :  { %15419 = vmatprep.subr.bf16.mxu1 %v22394_v53  ;;  %v22428_v53 = vld [vmem:[#allocation2 + $0x2388] ss:$36 sps:$4 sm:$0xff]  }
 0x65c   :  { %v22431_v30 = vld [vmem:[#allocation2 + $0x25c8] ss:$36 sps:$4 sm:$0xff]  }
 0x65d   :  { %15445 = vmatpush1.bf16.msra.mxu0 %v22395_v38  ;;  %v22439_v38 = vld [vmem:[#allocation2 + $0x2584] ss:$36 sps:$4 sm:$0xff]  }
 0x65e   :  { %15420 = vmatpush2.bf16.msra.mxu1 %v22392_v5  ;;  %15446 = vmatprep.subr.bf16.mxu0 %v22403_v48  ;;  %v22436_v5 = vld [vmem:[#allocation2 + $0x2344] ss:$36 sps:$4 sm:$0xff]  }
 0x65f   :  { %15421 = vmatprep.subr.bf16.mxu1 %v22400_v4 }
 0x661   :  { %15447 = vmatpush1.bf16.msra.mxu0 %v22401_v52  ;;  %v22437_v52 = vld [vmem:[#allocation2 + $0x2580] ss:$36 sps:$4 sm:$0xff]  }
 0x662   :  { %15422 = vmatpush2.bf16.msra.mxu1 %v22398_v39  ;;  %15448 = vmatprep.subr.bf16.mxu0 %v22409_v2  ;;  %v22434_v39 = vld [vmem:[#allocation2 + $0x2340] ss:$36 sps:$4 sm:$0xff]  }
 0x663   :  { %15423 = vmatprep.subr.bf16.mxu1 %v22406_v6  ;;  %v22442_v6 = vld [vmem:[#allocation2 + $0x22fc] ss:$36 sps:$4 sm:$0xff]  }
 0x664   :  { %v22445_v2 = vld [vmem:[#allocation2 + $0x253c] ss:$36 sps:$4 sm:$0xff]  }
 0x665   :  { %15449 = vmatpush1.bf16.msra.mxu0 %v22407_v14  ;;  %v22440_v14 = vld [vmem:[#allocation2 + $0x22f8] ss:$36 sps:$4 sm:$0xff]  }
 0x666   :  { %15424 = vmatpush2.bf16.msra.mxu1 %v22404_v58  ;;  %15450 = vmatprep.subr.bf16.mxu0 %v22415_v8  ;;  %v22448_v8 = vld [vmem:[#allocation2 + $0x22b4] ss:$36 sps:$4 sm:$0xff]  }
 0x667   :  { %15425 = vmatprep.subr.bf16.mxu1 %v22412_v47  ;;  %v22443_v47 = vld [vmem:[#allocation2 + $0x2538] ss:$36 sps:$4 sm:$0xff]  }
 0x669   :  { %15451 = vmatpush1.bf16.msra.mxu0 %v22413_v3  ;;  %v22446_v3 = vld [vmem:[#allocation2 + $0x22b0] ss:$36 sps:$4 sm:$0xff]  }
 0x66a   :  { %15426 = vmatpush2.bf16.msra.mxu1 %v22410_v9  ;;  %15452 = vmatprep.subr.bf16.mxu0 %v22421_v7  ;;  %v22451_v9 = vld [vmem:[#allocation2 + $0x24f4] ss:$36 sps:$4 sm:$0xff]   ;;  %v22454_v7 = vld [vmem:[#allocation2 + $0x226c] ss:$36 sps:$4 sm:$0xff]  }
 0x66b   :  { %15427 = vmatprep.subr.bf16.mxu1 %v22418_v63  ;;  %v22449_v63 = vld [vmem:[#allocation2 + $0x24f0] ss:$36 sps:$4 sm:$0xff]  }
 0x66d   :  { %15453 = vmatpush1.bf16.msra.mxu0 %v22419_v51  ;;  %v22452_v51 = vld [vmem:[#allocation2 + $0x2268] ss:$36 sps:$4 sm:$0xff]  }
 0x66e   :  { %15428 = vmatpush2.bf16.msra.mxu1 %v22416_v11  ;;  %15454 = vmatprep.subr.bf16.mxu0 %v22424_v28  ;;  %v22457_v11 = vld [vmem:[#allocation2 + $0x24ac] ss:$36 sps:$4 sm:$0xff]  }
 0x66f   :  { %15479 = vmatprep.subr.bf16.mxu1 %v22427_v61  ;;  %v22455_v28 = vld [vmem:[#allocation2 + $0x24a8] ss:$36 sps:$4 sm:$0xff]  }
 0x670   :  { %v22460_v61 = vld [vmem:[#allocation2 + $0x2224] ss:$36 sps:$4 sm:$0xff]  }
 0x671   :  { %15430 = vmatmul.mubr.bf16.vlgmr.msra.gmra.mxu1 %v23285_v15  ;;  %v23637_v10 = vpop.f32.mrf.mxu1  ;;  %15455 = vmatpush2.bf16.msra.mxu0 %v22422_v57  ;;  %v22463_v57 = vld [vmem:[#allocation2 + $0x2464] ss:$36 sps:$4 sm:$0xff]  }
 0x672   :  { %15480 = vmatpush1.bf16.msra.mxu1 %v22425_v55  ;;  %15456 = vmatprep.subr.bf16.mxu0 %v22430_v29  ;;  %v22458_v55 = vld [vmem:[#allocation2 + $0x2220] ss:$36 sps:$4 sm:$0xff]  }
 0x673   :  { %15481 = vmatprep.subr.bf16.mxu1 %v22433_v62  ;;  %v23639_v4 = vpop.f32.mrf.mxu1  ;;  %15511 = vmatprep.mubr.bf16.mxu1 %v23290_v22  ;;  %v22461_v29 = vld [vmem:[#allocation2 + $0x2460] ss:$36 sps:$4 sm:$0xff]  }
 0x674   :  { %v22466_v62 = vld [vmem:[#allocation2 + $0x21dc] ss:$36 sps:$4 sm:$0xff]  }
 0x675   :  { %v15189_v48 = vpop.f32.mrf.mxu1  ;;  %15457 = vmatpush2.bf16.msra.mxu0 %v22428_v53  ;;  %v22469_v53 = vld [vmem:[#allocation2 + $0x241c] ss:$36 sps:$4 sm:$0xff]  }
 0x676   :  { %15482 = vmatpush1.bf16.msra.mxu1 %v22431_v30  ;;  %15458 = vmatprep.subr.bf16.mxu0 %v22436_v5  ;;  %v2396_v30 = vsub.s32 6, %v23172_v42  ;;  %v2400_v5 = vsub.s32 7, %v23172_v42  ;;  %v22467_v48 = vld [vmem:[#allocation2 + $0x2418] ss:$36 sps:$4 sm:$0xff]   ;;  %v22478_v42 = vld [vmem:[#allocation2 + $0x280c] ss:$36 sps:$4 sm:$0xff]  }
 0x677   :  { %15483 = vmatprep.subr.bf16.mxu1 %v22439_v38  ;;  %v15190_v58 = vpop.f32.mrf.mxu1  ;;  %v22464_v38 = vld [vmem:[#allocation2 + $0x21d8] ss:$36 sps:$4 sm:$0xff]  }
 0x679   :  { %15459 = vmatpush2.bf16.msra.mxu0 %v22434_v39  ;;  %v22472_v39 = vld [vmem:[#allocation2 + $0x2854] ss:$36 sps:$4 sm:$0xff]  }
 0x67a   :  { %15484 = vmatpush1.bf16.msra.mxu1 %v22437_v52  ;;  %15460 = vmatprep.subr.bf16.mxu0 %v22442_v6  ;;  %v22475_v52 = vld [vmem:[#allocation2 + $0x2a94] ss:$36 sps:$4 sm:$0xff]   ;;  %v23076_v6 = vld [vmem:[%s24069_s2] sm:$0xff] }
 0x67b   :  { %15485 = vmatprep.subr.bf16.mxu1 %v22445_v2  ;;  %v2397_v2 = vrot.slane %v23076_v6, %v2396_v30  ;;  %v2401_v58 = vrot.slane %v23076_v6, %v2400_v5  ;;  %v22493_v30 = vld [vmem:[#allocation2 + $0x29bc] ss:$36 sps:$4 sm:$0xff]   ;;  %v22497_v6 = vld [vmem:[#allocation2 + $0x2970] ss:$36 sps:$4 sm:$0xff]  }
 0x67c   :  { %v22488_v5 = vld [vmem:[#allocation2 + $0x2778] ss:$36 sps:$4 sm:$0xff]  }
 0x67d   :  { %15461 = vmatpush2.bf16.msra.mxu0 %v22440_v14  ;;  %v22470_v14 = vld [vmem:[#allocation2 + $0x2850] ss:$36 sps:$4 sm:$0xff]  }
 0x67e   :  { %15486 = vmatpush1.bf16.msra.mxu1 %v22443_v47  ;;  %15462 = vmatprep.subr.bf16.mxu0 %v22448_v8  ;;  %v22473_v47 = vld [vmem:[#allocation2 + $0x2a90] ss:$36 sps:$4 sm:$0xff]  }
 0x67f   :  { %15487 = vmatprep.subr.bf16.mxu1 %v22451_v9  ;;  %v22481_v8 = vld [vmem:[#allocation2 + $0x2a4c] ss:$36 sps:$4 sm:$0xff]   ;;  %v15186_v9 = vadd.f32 %v23637_v10, %v2397_v2 }
 0x680   :  { %v22502_v2 = vld [vmem:[#allocation2 + $0x26ec] ss:$36 sps:$4 sm:$0xff]  }
 0x681   :  { %15463 = vmatpush2.bf16.msra.mxu0 %v22446_v3 }
 0x682   :  { %15488 = vmatpush1.bf16.msra.mxu1 %v22449_v63  ;;  %15464 = vmatprep.subr.bf16.mxu0 %v22454_v7  ;;  %v15188_v63 = vadd.f32 %v23639_v4, %v2401_v58  ;;  %v22485_v4 = vld [vmem:[#allocation2 + $0x2a00] ss:$36 sps:$4 sm:$0xff]   ;;  %v22505_v58 = vld [vmem:[#allocation2 + $0x292c] ss:$36 sps:$4 sm:$0xff]  }
 0x683   :  { %15489 = vmatprep.subr.bf16.mxu1 %v22457_v11  ;;  %v22476_v11 = vld [vmem:[#allocation2 + $0x2808] ss:$36 sps:$4 sm:$0xff]  }
 0x685   :  { %15465 = vmatpush2.bf16.msra.mxu0 %v22452_v51  ;;  %v22479_v51 = vld [vmem:[#allocation2 + $0x2a48] ss:$36 sps:$4 sm:$0xff]  }
 0x686   :  { %15490 = vmatpush1.bf16.msra.mxu1 %v22455_v28  ;;  %15466 = vmatprep.subr.bf16.mxu0 %v22460_v61  ;;  %v22484_v61 = vld [vmem:[#allocation2 + $0x27c4] ss:$36 sps:$4 sm:$0xff]  }
 0x687   :  { %15491 = vmatprep.subr.bf16.mxu1 %v22463_v57  ;;  %v22487_v57 = vld [vmem:[#allocation2 + $0x2a04] ss:$36 sps:$4 sm:$0xff]  }
 0x689   :  { %15467 = vmatpush2.bf16.msra.mxu0 %v22458_v55 }
 0x68a   :  { %15492 = vmatpush1.bf16.msra.mxu1 %v22461_v29  ;;  %15468 = vmatprep.subr.bf16.mxu0 %v22466_v62  ;;  %v22482_v29 = vld [vmem:[#allocation2 + $0x27c0] ss:$36 sps:$4 sm:$0xff]  }
 0x68b   :  { %15493 = vmatprep.subr.bf16.mxu1 %v22469_v53  ;;  %v22490_v53 = vld [vmem:[#allocation2 + $0x277c] ss:$36 sps:$4 sm:$0xff]  }
 0x68d   :  { %15469 = vmatpush2.bf16.msra.mxu0 %v22464_v38  ;;  %v22491_v38 = vld [vmem:[#allocation2 + $0x29b8] ss:$36 sps:$4 sm:$0xff]  }
 0x68e   :  { %15494 = vmatpush1.bf16.msra.mxu1 %v22467_v48  ;;  %15520 = vmatprep.subr.bf16.mxu0 %v22475_v52  ;;  %v22496_v48 = vld [vmem:[#allocation2 + $0x2734] ss:$36 sps:$4 sm:$0xff]  }
 0x68f   :  { %15495 = vmatprep.subr.bf16.mxu1 %v22472_v39  ;;  %v22499_v39 = vld [vmem:[#allocation2 + $0x2974] ss:$36 sps:$4 sm:$0xff]  }
 0x690   :  { %v15226_v3 = vpop.f32.mrf.mxu0  ;;  %15471 = vmatmul.mubr.bf16.vlgmr.msra.gmra.mxu0 %v23294_v27  ;;  %v22494_v52 = vld [vmem:[#allocation2 + $0x2730] ss:$36 sps:$4 sm:$0xff]  }
 0x691   :  { %v23650_v7 = vadd.f32 %v15226_v3, %v15186_v9  ;;  %15521 = vmatpush1.bf16.msra.mxu0 %v22473_v47  ;;  %15552 = vmatprep.mubr.bf16.mxu0 %v23298_v32  ;;  %v22503_v47 = vld [vmem:[#allocation2 + $0x2928] ss:$36 sps:$4 sm:$0xff]   ;;  %v22506_v9 = vld [vmem:[#allocation2 + $0x26a0] ss:$36 sps:$4 sm:$0xff]  }
 0x692   :  { %15496 = vmatpush2.bf16.msra.mxu1 %v22470_v14  ;;  %v15228_v28 = vpop.f32.mrf.mxu0  ;;  %15522 = vmatprep.subr.bf16.mxu0 %v22481_v8  ;;  %v22500_v14 = vld [vmem:[#allocation2 + $0x26e8] ss:$36 sps:$4 sm:$0xff]   ;;  %v22509_v3 = vld [vmem:[#allocation2 + $0x28e0] ss:$36 sps:$4 sm:$0xff]  }
 0x693   :  { %15497 = vmatprep.subr.bf16.mxu1 %v22478_v42  ;;  %v23652_v55 = vadd.f32 %v15228_v28, %v15188_v63  ;;  %v22508_v42 = vld [vmem:[#allocation2 + $0x26a4] ss:$36 sps:$4 sm:$0xff]   ;;  %v22514_v63 = vld [vmem:[#allocation2 + $0x265c] ss:$36 sps:$4 sm:$0xff]  }
 0x694   :  { %v15230_v10 = vpop.f32.mrf.mxu0  ;;  %v22511_v8 = vld [vmem:[#allocation2 + $0x28e4] ss:$36 sps:$4 sm:$0xff]   ;;  %v22515_v28 = vld [vmem:[#allocation2 + $0x2898] ss:$36 sps:$4 sm:$0xff]  }
 0x695   :  { %15523 = vmatpush1.bf16.msra.mxu0 %v22479_v51  ;;  %v22512_v51 = vld [vmem:[#allocation2 + $0x2658] ss:$36 sps:$4 sm:$0xff]   ;;  %v22518_v10 = vld [vmem:[#allocation2 + $0x2cd0] ss:$36 sps:$4 sm:$0xff]  }
 0x696   :  { %15498 = vmatpush2.bf16.msra.mxu1 %v22476_v11  ;;  %v15231_v62 = vpop.f32.mrf.mxu0  ;;  %15524 = vmatprep.subr.bf16.mxu0 %v22487_v57  ;;  %v22517_v11 = vld [vmem:[#allocation2 + $0x289c] ss:$36 sps:$4 sm:$0xff]   ;;  %v22523_v57 = vld [vmem:[#allocation2 + $0x2f14] ss:$36 sps:$4 sm:$0xff]  }
 0x697   :  { %15499 = vmatprep.subr.bf16.mxu1 %v22484_v61  ;;  %v22520_v61 = vld [vmem:[#allocation2 + $0x2cd4] ss:$36 sps:$4 sm:$0xff]   ;;  %v22529_v62 = vld [vmem:[#allocation2 + $0x2ecc] ss:$36 sps:$4 sm:$0xff]  }
 0x699   :  { %15525 = vmatpush1.bf16.msra.mxu0 %v22485_v4  ;;  %v22526_v4 = vld [vmem:[#allocation2 + $0x2c8c] ss:$36 sps:$4 sm:$0xff]  }
 0x69a   :  { %15500 = vmatpush2.bf16.msra.mxu1 %v22482_v29  ;;  %15526 = vmatprep.subr.bf16.mxu0 %v22493_v30  ;;  %v22521_v29 = vld [vmem:[#allocation2 + $0x2f10] ss:$36 sps:$4 sm:$0xff]  }
 0x69b   :  { %15501 = vmatprep.subr.bf16.mxu1 %v22490_v53 }
 0x69d   :  { %15527 = vmatpush1.bf16.msra.mxu0 %v22491_v38  ;;  %v22527_v38 = vld [vmem:[#allocation2 + $0x2ec8] ss:$36 sps:$4 sm:$0xff]  }
 0x69e   :  { %15502 = vmatpush2.bf16.msra.mxu1 %v22488_v5  ;;  %15528 = vmatprep.subr.bf16.mxu0 %v22499_v39  ;;  %v22524_v5 = vld [vmem:[#allocation2 + $0x2c88] ss:$36 sps:$4 sm:$0xff]  }
 0x69f   :  { %15503 = vmatprep.subr.bf16.mxu1 %v22496_v48  ;;  %v22532_v39 = vld [vmem:[#allocation2 + $0x2c44] ss:$36 sps:$4 sm:$0xff]  }
 0x6a1   :  { %15529 = vmatpush1.bf16.msra.mxu0 %v22497_v6 }
 0x6a2   :  { %15504 = vmatpush2.bf16.msra.mxu1 %v22494_v52  ;;  %15530 = vmatprep.subr.bf16.mxu0 %v22505_v58  ;;  %v22535_v52 = vld [vmem:[#allocation2 + $0x2e84] ss:$36 sps:$4 sm:$0xff]  }
 0x6a3   :  { %15505 = vmatprep.subr.bf16.mxu1 %v22502_v2  ;;  %v22530_v58 = vld [vmem:[#allocation2 + $0x2c40] ss:$36 sps:$4 sm:$0xff]  }
 0x6a5   :  { %15531 = vmatpush1.bf16.msra.mxu0 %v22503_v47  ;;  %v22541_v47 = vld [vmem:[#allocation2 + $0x2e3c] ss:$36 sps:$4 sm:$0xff]  }
 0x6a6   :  { %15506 = vmatpush2.bf16.msra.mxu1 %v22500_v14  ;;  %15532 = vmatprep.subr.bf16.mxu0 %v22511_v8  ;;  %v22538_v14 = vld [vmem:[#allocation2 + $0x2bfc] ss:$36 sps:$4 sm:$0xff]  }
 0x6a7   :  { %15507 = vmatprep.subr.bf16.mxu1 %v22508_v42  ;;  %v22536_v8 = vld [vmem:[#allocation2 + $0x2bf8] ss:$36 sps:$4 sm:$0xff]  }
 0x6a9   :  { %15533 = vmatpush1.bf16.msra.mxu0 %v22509_v3  ;;  %v22547_v3 = vld [vmem:[#allocation2 + $0x2df4] ss:$36 sps:$4 sm:$0xff]  }
 0x6aa   :  { %15508 = vmatpush2.bf16.msra.mxu1 %v22506_v9  ;;  %15534 = vmatprep.subr.bf16.mxu0 %v22517_v11  ;;  %v22539_v9 = vld [vmem:[#allocation2 + $0x2e38] ss:$36 sps:$4 sm:$0xff]   ;;  %v22545_v11 = vld [vmem:[#allocation2 + $0x2df0] ss:$36 sps:$4 sm:$0xff]  }
 0x6ab   :  { %15509 = vmatprep.subr.bf16.mxu1 %v22514_v63  ;;  %v22542_v63 = vld [vmem:[#allocation2 + $0x2bb0] ss:$36 sps:$4 sm:$0xff]  }
 0x6ad   :  { %15535 = vmatpush1.bf16.msra.mxu0 %v22515_v28  ;;  %v22553_v28 = vld [vmem:[#allocation2 + $0x2dac] ss:$36 sps:$4 sm:$0xff]  }
 0x6ae   :  { %15510 = vmatpush2.bf16.msra.mxu1 %v22512_v51  ;;  %15536 = vmatprep.subr.bf16.mxu0 %v22520_v61  ;;  %v22550_v51 = vld [vmem:[#allocation2 + $0x2b6c] ss:$36 sps:$4 sm:$0xff]  }
 0x6af   :  { %15561 = vmatprep.subr.bf16.mxu1 %v22523_v57  ;;  %v22548_v61 = vld [vmem:[#allocation2 + $0x2b68] ss:$36 sps:$4 sm:$0xff]  }
 0x6b0   :  { %v22551_v57 = vld [vmem:[#allocation2 + $0x2da8] ss:$36 sps:$4 sm:$0xff]  }
 0x6b1   :  { %v15267_v53 = vpop.f32.mrf.mxu1  ;;  %15512 = vmatmul.mubr.bf16.vlgmr.msra.gmra.mxu1 %v23317_v12  ;;  %15537 = vmatpush2.bf16.msra.mxu0 %v22518_v10  ;;  %v22556_v10 = vld [vmem:[#allocation2 + $0x2b24] ss:$36 sps:$4 sm:$0xff]  }
 0x6b2   :  { %v23657_v30 = vadd.f32 %v15267_v53, %v23650_v7  ;;  %15562 = vmatpush1.bf16.msra.mxu1 %v22521_v29  ;;  %15538 = vmatprep.subr.bf16.mxu0 %v22526_v4  ;;  %v22533_v7 = vld [vmem:[#allocation2 + $0x2e80] ss:$36 sps:$4 sm:$0xff]  }
 0x6b3   :  { %v15269_v48 = vpop.f32.mrf.mxu1  ;;  %15563 = vmatprep.subr.bf16.mxu1 %v22529_v62  ;;  %15593 = vmatprep.mubr.bf16.mxu1 %v23320_v25  ;;  %v22559_v29 = vld [vmem:[#allocation2 + $0x2d64] ss:$36 sps:$4 sm:$0xff]   ;;  %v22562_v53 = vld [vmem:[#allocation2 + $0x2adc] ss:$36 sps:$4 sm:$0xff]  }
 0x6b4   :  { %v23660_v6 = vadd.f32 %v15269_v48, %v23652_v55  ;;  %v22544_v55 = vld [vmem:[#allocation2 + $0x2bb4] ss:$36 sps:$4 sm:$0xff]   ;;  %v22554_v4 = vld [vmem:[#allocation2 + $0x2b20] ss:$36 sps:$4 sm:$0xff]  }
 0x6b5   :  { %v15271_v2 = vpop.f32.mrf.mxu1  ;;  %15539 = vmatpush2.bf16.msra.mxu0 %v22524_v5  ;;  %v22557_v62 = vld [vmem:[#allocation2 + $0x2d60] ss:$36 sps:$4 sm:$0xff]   ;;  %v22563_v48 = vld [vmem:[#allocation2 + $0x2d18] ss:$36 sps:$4 sm:$0xff]  }
 0x6b6   :  { %15564 = vmatpush1.bf16.msra.mxu1 %v22527_v38  ;;  %15540 = vmatprep.subr.bf16.mxu0 %v22532_v39  ;;  %v22565_v5 = vld [vmem:[#allocation2 + $0x2d1c] ss:$36 sps:$4 sm:$0xff]   ;;  %v22568_v39 = vld [vmem:[#allocation2 + $0x3154] ss:$36 sps:$4 sm:$0xff]  }
 0x6b7   :  { %15565 = vmatprep.subr.bf16.mxu1 %v22535_v52  ;;  %v15272_v42 = vpop.f32.mrf.mxu1  ;;  %v22560_v38 = vld [vmem:[#allocation2 + $0x2ad8] ss:$36 sps:$4 sm:$0xff]   ;;  %v22566_v2 = vld [vmem:[#allocation2 + $0x3150] ss:$36 sps:$4 sm:$0xff]  }
 0x6b8   :  { %v22571_v52 = vld [vmem:[#allocation2 + $0x3394] ss:$36 sps:$4 sm:$0xff]  }
 0x6b9   :  { %15541 = vmatpush2.bf16.msra.mxu0 %v22530_v58  ;;  %v22569_v58 = vld [vmem:[#allocation2 + $0x3390] ss:$36 sps:$4 sm:$0xff]  }
 0x6ba   :  { %15566 = vmatpush1.bf16.msra.mxu1 %v22533_v7  ;;  %15542 = vmatprep.subr.bf16.mxu0 %v22538_v14  ;;  %v22574_v7 = vld [vmem:[#allocation2 + $0x310c] ss:$36 sps:$4 sm:$0xff]  }
 0x6bb   :  { %15567 = vmatprep.subr.bf16.mxu1 %v22541_v47  ;;  %v22577_v14 = vld [vmem:[#allocation2 + $0x334c] ss:$36 sps:$4 sm:$0xff]  }
 0x6bd   :  { %15543 = vmatpush2.bf16.msra.mxu0 %v22536_v8  ;;  %v22572_v8 = vld [vmem:[#allocation2 + $0x3108] ss:$36 sps:$4 sm:$0xff]  }
 0x6be   :  { %15568 = vmatpush1.bf16.msra.mxu1 %v22539_v9  ;;  %15544 = vmatprep.subr.bf16.mxu0 %v22544_v55  ;;  %v22575_v9 = vld [vmem:[#allocation2 + $0x3348] ss:$36 sps:$4 sm:$0xff]  }
 0x6bf   :  { %15569 = vmatprep.subr.bf16.mxu1 %v22547_v3  ;;  %v22580_v3 = vld [vmem:[#allocation2 + $0x30c4] ss:$36 sps:$4 sm:$0xff]  }
 0x6c1   :  { %15545 = vmatpush2.bf16.msra.mxu0 %v22542_v63  ;;  %v22583_v63 = vld [vmem:[#allocation2 + $0x3304] ss:$36 sps:$4 sm:$0xff]  }
 0x6c2   :  { %15570 = vmatpush1.bf16.msra.mxu1 %v22545_v11  ;;  %15546 = vmatprep.subr.bf16.mxu0 %v22550_v51 }
 0x6c3   :  { %15571 = vmatprep.subr.bf16.mxu1 %v22553_v28  ;;  %v22578_v28 = vld [vmem:[#allocation2 + $0x30c0] ss:$36 sps:$4 sm:$0xff]  }
 0x6c5   :  { %15547 = vmatpush2.bf16.msra.mxu0 %v22548_v61 }
 0x6c6   :  { %15572 = vmatpush1.bf16.msra.mxu1 %v22551_v57  ;;  %15548 = vmatprep.subr.bf16.mxu0 %v22556_v10  ;;  %v22586_v57 = vld [vmem:[#allocation2 + $0x307c] ss:$36 sps:$4 sm:$0xff]  }
 0x6c7   :  { %15573 = vmatprep.subr.bf16.mxu1 %v22559_v29  ;;  %v22589_v10 = vld [vmem:[#allocation2 + $0x32bc] ss:$36 sps:$4 sm:$0xff]  }
 0x6c8   :  { %v22584_v29 = vld [vmem:[#allocation2 + $0x3078] ss:$36 sps:$4 sm:$0xff]  }
 0x6c9   :  { %15549 = vmatpush2.bf16.msra.mxu0 %v22554_v4  ;;  %v22587_v4 = vld [vmem:[#allocation2 + $0x32b8] ss:$36 sps:$4 sm:$0xff]  }
 0x6ca   :  { %15574 = vmatpush1.bf16.msra.mxu1 %v22557_v62  ;;  %15550 = vmatprep.subr.bf16.mxu0 %v22562_v53  ;;  %v22595_v62 = vld [vmem:[#allocation2 + $0x3274] ss:$36 sps:$4 sm:$0xff]  }
 0x6cb   :  { %15575 = vmatprep.subr.bf16.mxu1 %v22565_v5  ;;  %v22590_v53 = vld [vmem:[#allocation2 + $0x3030] ss:$36 sps:$4 sm:$0xff]  }
 0x6cc   :  { %v22593_v5 = vld [vmem:[#allocation2 + $0x3270] ss:$36 sps:$4 sm:$0xff]  }
 0x6cd   :  { %15551 = vmatpush2.bf16.msra.mxu0 %v22560_v38  ;;  %v22598_v38 = vld [vmem:[#allocation2 + $0x2fec] ss:$36 sps:$4 sm:$0xff]  }
 0x6ce   :  { %15576 = vmatpush1.bf16.msra.mxu1 %v22563_v48  ;;  %15602 = vmatprep.subr.bf16.mxu0 %v22571_v52  ;;  %v22601_v48 = vld [vmem:[#allocation2 + $0x322c] ss:$36 sps:$4 sm:$0xff]  }
 0x6cf   :  { %15577 = vmatprep.subr.bf16.mxu1 %v22568_v39  ;;  %v22596_v39 = vld [vmem:[#allocation2 + $0x2fe8] ss:$36 sps:$4 sm:$0xff]  }
 0x6d0   :  { %v15308_v47 = vpop.f32.mrf.mxu0  ;;  %15553 = vmatmul.mubr.bf16.vlgmr.msra.gmra.mxu0 %v23324_v40  ;;  %v22599_v52 = vld [vmem:[#allocation2 + $0x3228] ss:$36 sps:$4 sm:$0xff]  }
 0x6d1   :  { %v23665_v42 = vadd.f32 %v15308_v47, %v23657_v30  ;;  %15603 = vmatpush1.bf16.msra.mxu0 %v22569_v58  ;;  %15634 = vmatprep.mubr.bf16.mxu0 %v23328_v33  ;;  %v22581_v30 = vld [vmem:[#allocation2 + $0x3300] ss:$36 sps:$4 sm:$0xff]  }
 0x6d2   :  { %15578 = vmatpush2.bf16.msra.mxu1 %v22566_v2  ;;  %v15310_v55 = vpop.f32.mrf.mxu0  ;;  %15604 = vmatprep.subr.bf16.mxu0 %v22577_v14  ;;  %v22604_v2 = vld [vmem:[#allocation2 + $0x2fa4] ss:$36 sps:$4 sm:$0xff]   ;;  %v22610_v47 = vld [vmem:[#allocation2 + $0x2f5c] ss:$36 sps:$4 sm:$0xff]  }
 0x6d3   :  { %15579 = vmatprep.subr.bf16.mxu1 %v22574_v7  ;;  %v23668_v11 = vadd.f32 %v15310_v55, %v23660_v6  ;;  %v22592_v6 = vld [vmem:[#allocation2 + $0x3034] ss:$36 sps:$4 sm:$0xff]   ;;  %v22607_v58 = vld [vmem:[#allocation2 + $0x31e4] ss:$36 sps:$4 sm:$0xff]  }
 0x6d4   :  { %v15312_v51 = vpop.f32.mrf.mxu0  ;;  %v22602_v7 = vld [vmem:[#allocation2 + $0x2fa0] ss:$36 sps:$4 sm:$0xff]   ;;  %v22611_v55 = vld [vmem:[#allocation2 + $0x3198] ss:$36 sps:$4 sm:$0xff]  }
 0x6d5   :  { %15605 = vmatpush1.bf16.msra.mxu0 %v22575_v9  ;;  %v22605_v14 = vld [vmem:[#allocation2 + $0x31e0] ss:$36 sps:$4 sm:$0xff]   ;;  %v22608_v9 = vld [vmem:[#allocation2 + $0x2f58] ss:$36 sps:$4 sm:$0xff]   ;;  %v22614_v51 = vld [vmem:[#allocation2 + $0x35d0] ss:$36 sps:$4 sm:$0xff]  }
 0x6d6   :  { %15580 = vmatpush2.bf16.msra.mxu1 %v22572_v8  ;;  %v15313_v61 = vpop.f32.mrf.mxu0  ;;  %15606 = vmatprep.subr.bf16.mxu0 %v22583_v63  ;;  %v22613_v8 = vld [vmem:[#allocation2 + $0x319c] ss:$36 sps:$4 sm:$0xff]   ;;  %v22619_v63 = vld [vmem:[#allocation2 + $0x3814] ss:$36 sps:$4 sm:$0xff]  }
 0x6d7   :  { %15581 = vmatprep.subr.bf16.mxu1 %v22580_v3  ;;  %v22616_v3 = vld [vmem:[#allocation2 + $0x35d4] ss:$36 sps:$4 sm:$0xff]   ;;  %v22625_v61 = vld [vmem:[#allocation2 + $0x37cc] ss:$36 sps:$4 sm:$0xff]  }
 0x6d9   :  { %15607 = vmatpush1.bf16.msra.mxu0 %v22581_v30  ;;  %v22622_v30 = vld [vmem:[#allocation2 + $0x358c] ss:$36 sps:$4 sm:$0xff]  }
 0x6da   :  { %15582 = vmatpush2.bf16.msra.mxu1 %v22578_v28  ;;  %15608 = vmatprep.subr.bf16.mxu0 %v22589_v10  ;;  %v22617_v28 = vld [vmem:[#allocation2 + $0x3810] ss:$36 sps:$4 sm:$0xff]  }
 0x6db   :  { %15583 = vmatprep.subr.bf16.mxu1 %v22586_v57 }
 0x6dd   :  { %15609 = vmatpush1.bf16.msra.mxu0 %v22587_v4  ;;  %v22623_v4 = vld [vmem:[#allocation2 + $0x37c8] ss:$36 sps:$4 sm:$0xff]  }
 0x6de   :  { %15584 = vmatpush2.bf16.msra.mxu1 %v22584_v29  ;;  %15610 = vmatprep.subr.bf16.mxu0 %v22595_v62  ;;  %v22620_v29 = vld [vmem:[#allocation2 + $0x3588] ss:$36 sps:$4 sm:$0xff]  }
 0x6df   :  { %15585 = vmatprep.subr.bf16.mxu1 %v22592_v6  ;;  %v22628_v62 = vld [vmem:[#allocation2 + $0x3544] ss:$36 sps:$4 sm:$0xff]  }
 0x6e1   :  { %15611 = vmatpush1.bf16.msra.mxu0 %v22593_v5 }
 0x6e2   :  { %15586 = vmatpush2.bf16.msra.mxu1 %v22590_v53  ;;  %15612 = vmatprep.subr.bf16.mxu0 %v22601_v48  ;;  %v22631_v53 = vld [vmem:[#allocation2 + $0x3784] ss:$36 sps:$4 sm:$0xff]  }
 0x6e3   :  { %15587 = vmatprep.subr.bf16.mxu1 %v22598_v38  ;;  %v22626_v48 = vld [vmem:[#allocation2 + $0x3540] ss:$36 sps:$4 sm:$0xff]  }
 0x6e5   :  { %15613 = vmatpush1.bf16.msra.mxu0 %v22599_v52  ;;  %v22637_v52 = vld [vmem:[#allocation2 + $0x373c] ss:$36 sps:$4 sm:$0xff]  }
 0x6e6   :  { %15588 = vmatpush2.bf16.msra.mxu1 %v22596_v39  ;;  %15614 = vmatprep.subr.bf16.mxu0 %v22607_v58  ;;  %v22634_v39 = vld [vmem:[#allocation2 + $0x34fc] ss:$36 sps:$4 sm:$0xff]  }
 0x6e7   :  { %15589 = vmatprep.subr.bf16.mxu1 %v22604_v2  ;;  %v22632_v58 = vld [vmem:[#allocation2 + $0x34f8] ss:$36 sps:$4 sm:$0xff]  }
 0x6e9   :  { %15615 = vmatpush1.bf16.msra.mxu0 %v22605_v14  ;;  %v22643_v14 = vld [vmem:[#allocation2 + $0x36f4] ss:$36 sps:$4 sm:$0xff]  }
 0x6ea   :  { %15590 = vmatpush2.bf16.msra.mxu1 %v22602_v7  ;;  %15616 = vmatprep.subr.bf16.mxu0 %v22613_v8  ;;  %v22635_v7 = vld [vmem:[#allocation2 + $0x3738] ss:$36 sps:$4 sm:$0xff]   ;;  %v22641_v8 = vld [vmem:[#allocation2 + $0x36f0] ss:$36 sps:$4 sm:$0xff]  }
 0x6eb   :  { %15591 = vmatprep.subr.bf16.mxu1 %v22610_v47  ;;  %v22638_v47 = vld [vmem:[#allocation2 + $0x34b0] ss:$36 sps:$4 sm:$0xff]  }
 0x6ed   :  { %15617 = vmatpush1.bf16.msra.mxu0 %v22611_v55  ;;  %v22649_v55 = vld [vmem:[#allocation2 + $0x36ac] ss:$36 sps:$4 sm:$0xff]  }
 0x6ee   :  { %15592 = vmatpush2.bf16.msra.mxu1 %v22608_v9  ;;  %15618 = vmatprep.subr.bf16.mxu0 %v22616_v3  ;;  %v22646_v9 = vld [vmem:[#allocation2 + $0x346c] ss:$36 sps:$4 sm:$0xff]  }
 0x6ef   :  { %15643 = vmatprep.subr.bf16.mxu1 %v22619_v63  ;;  %v22644_v3 = vld [vmem:[#allocation2 + $0x3468] ss:$36 sps:$4 sm:$0xff]  }
 0x6f0   :  { %v22647_v63 = vld [vmem:[#allocation2 + $0x36a8] ss:$36 sps:$4 sm:$0xff]  }
 0x6f1   :  { %v15349_v57 = vpop.f32.mrf.mxu1  ;;  %15594 = vmatmul.mubr.bf16.vlgmr.msra.gmra.mxu1 %v23353_v20  ;;  %15619 = vmatpush2.bf16.msra.mxu0 %v22614_v51  ;;  %v22652_v51 = vld [vmem:[#allocation2 + $0x3424] ss:$36 sps:$4 sm:$0xff]  }
 0x6f2   :  { %v23673_v10 = vadd.f32 %v15349_v57, %v23665_v42  ;;  %15644 = vmatpush1.bf16.msra.mxu1 %v22617_v28  ;;  %15620 = vmatprep.subr.bf16.mxu0 %v22622_v30  ;;  %v22629_v42 = vld [vmem:[#allocation2 + $0x3780] ss:$36 sps:$4 sm:$0xff]  }
 0x6f3   :  { %v15351_v6 = vpop.f32.mrf.mxu1  ;;  %15645 = vmatprep.subr.bf16.mxu1 %v22625_v61  ;;  %15675 = vmatprep.mubr.bf16.mxu1 %v23356_v34  ;;  %v22655_v28 = vld [vmem:[#allocation2 + $0x3664] ss:$36 sps:$4 sm:$0xff]   ;;  %v22658_v57 = vld [vmem:[#allocation2 + $0x33dc] ss:$36 sps:$4 sm:$0xff]  }
 0x6f4   :  { %v23676_v5 = vadd.f32 %v15351_v6, %v23668_v11  ;;  %v22640_v11 = vld [vmem:[#allocation2 + $0x34b4] ss:$36 sps:$4 sm:$0xff]   ;;  %v22650_v30 = vld [vmem:[#allocation2 + $0x3420] ss:$36 sps:$4 sm:$0xff]  }
 0x6f5   :  { %v15353_v38 = vpop.f32.mrf.mxu1  ;;  %15621 = vmatpush2.bf16.msra.mxu0 %v22620_v29  ;;  %v22653_v61 = vld [vmem:[#allocation2 + $0x3660] ss:$36 sps:$4 sm:$0xff]   ;;  %v22659_v6 = vld [vmem:[#allocation2 + $0x3618] ss:$36 sps:$4 sm:$0xff]  }
 0x6f6   :  { %15646 = vmatpush1.bf16.msra.mxu1 %v22623_v4  ;;  %15622 = vmatprep.subr.bf16.mxu0 %v22628_v62  ;;  %v22661_v29 = vld [vmem:[#allocation2 + $0x361c] ss:$36 sps:$4 sm:$0xff]   ;;  %v22664_v62 = vld [vmem:[#allocation2 + $0x3a54] ss:$36 sps:$4 sm:$0xff]  }
 0x6f7   :  { %15647 = vmatprep.subr.bf16.mxu1 %v22631_v53  ;;  %v15354_v2 = vpop.f32.mrf.mxu1  ;;  %v22656_v4 = vld [vmem:[#allocation2 + $0x33d8] ss:$36 sps:$4 sm:$0xff]   ;;  %v22662_v38 = vld [vmem:[#allocation2 + $0x3a50] ss:$36 sps:$4 sm:$0xff]  }
 0x6f8   :  { %v22667_v53 = vld [vmem:[#allocation2 + $0x3c94] ss:$36 sps:$4 sm:$0xff]  }
 0x6f9   :  { %15623 = vmatpush2.bf16.msra.mxu0 %v22626_v48  ;;  %v22665_v48 = vld [vmem:[#allocation2 + $0x3c90] ss:$36 sps:$4 sm:$0xff]  }
 0x6fa   :  { %15648 = vmatpush1.bf16.msra.mxu1 %v22629_v42  ;;  %15624 = vmatprep.subr.bf16.mxu0 %v22634_v39  ;;  %v22670_v42 = vld [vmem:[#allocation2 + $0x3a0c] ss:$36 sps:$4 sm:$0xff]  }
 0x6fb   :  { %15649 = vmatprep.subr.bf16.mxu1 %v22637_v52  ;;  %v22673_v39 = vld [vmem:[#allocation2 + $0x3c4c] ss:$36 sps:$4 sm:$0xff]  }
 0x6fd   :  { %15625 = vmatpush2.bf16.msra.mxu0 %v22632_v58  ;;  %v22668_v58 = vld [vmem:[#allocation2 + $0x3a08] ss:$36 sps:$4 sm:$0xff]  }
 0x6fe   :  { %15650 = vmatpush1.bf16.msra.mxu1 %v22635_v7  ;;  %15626 = vmatprep.subr.bf16.mxu0 %v22640_v11  ;;  %v22671_v7 = vld [vmem:[#allocation2 + $0x3c48] ss:$36 sps:$4 sm:$0xff]  }
 0x6ff   :  { %15651 = vmatprep.subr.bf16.mxu1 %v22643_v14  ;;  %v22676_v14 = vld [vmem:[#allocation2 + $0x39c4] ss:$36 sps:$4 sm:$0xff]  }
 0x701   :  { %15627 = vmatpush2.bf16.msra.mxu0 %v22638_v47  ;;  %v22679_v47 = vld [vmem:[#allocation2 + $0x3c04] ss:$36 sps:$4 sm:$0xff]  }
 0x702   :  { %15652 = vmatpush1.bf16.msra.mxu1 %v22641_v8  ;;  %15628 = vmatprep.subr.bf16.mxu0 %v22646_v9 }
 0x703   :  { %15653 = vmatprep.subr.bf16.mxu1 %v22649_v55  ;;  %v22674_v55 = vld [vmem:[#allocation2 + $0x39c0] ss:$36 sps:$4 sm:$0xff]  }
 0x705   :  { %15629 = vmatpush2.bf16.msra.mxu0 %v22644_v3 }
 0x706   :  { %15654 = vmatpush1.bf16.msra.mxu1 %v22647_v63  ;;  %15630 = vmatprep.subr.bf16.mxu0 %v22652_v51  ;;  %v22682_v63 = vld [vmem:[#allocation2 + $0x397c] ss:$36 sps:$4 sm:$0xff]  }
 0x707   :  { %15655 = vmatprep.subr.bf16.mxu1 %v22655_v28  ;;  %v22685_v51 = vld [vmem:[#allocation2 + $0x3bbc] ss:$36 sps:$4 sm:$0xff]  }
 0x708   :  { %v22680_v28 = vld [vmem:[#allocation2 + $0x3978] ss:$36 sps:$4 sm:$0xff]  }
 0x709   :  { %15631 = vmatpush2.bf16.msra.mxu0 %v22650_v30  ;;  %v22683_v30 = vld [vmem:[#allocation2 + $0x3bb8] ss:$36 sps:$4 sm:$0xff]  }
 0x70a   :  { %15656 = vmatpush1.bf16.msra.mxu1 %v22653_v61  ;;  %15632 = vmatprep.subr.bf16.mxu0 %v22658_v57  ;;  %v22691_v61 = vld [vmem:[#allocation2 + $0x3b74] ss:$36 sps:$4 sm:$0xff]  }
 0x70b   :  { %15657 = vmatprep.subr.bf16.mxu1 %v22661_v29  ;;  %v22686_v57 = vld [vmem:[#allocation2 + $0x3930] ss:$36 sps:$4 sm:$0xff]  }
 0x70c   :  { %v22689_v29 = vld [vmem:[#allocation2 + $0x3b70] ss:$36 sps:$4 sm:$0xff]  }
 0x70d   :  { %15633 = vmatpush2.bf16.msra.mxu0 %v22656_v4  ;;  %v22694_v4 = vld [vmem:[#allocation2 + $0x38ec] ss:$36 sps:$4 sm:$0xff]  }
 0x70e   :  { %15658 = vmatpush1.bf16.msra.mxu1 %v22659_v6  ;;  %15684 = vmatprep.subr.bf16.mxu0 %v22667_v53  ;;  %v22697_v6 = vld [vmem:[#allocation2 + $0x3b2c] ss:$36 sps:$4 sm:$0xff]  }
 0x70f   :  { %15659 = vmatprep.subr.bf16.mxu1 %v22664_v62  ;;  %v22692_v62 = vld [vmem:[#allocation2 + $0x38e8] ss:$36 sps:$4 sm:$0xff]  }
 0x710   :  { %v15390_v52 = vpop.f32.mrf.mxu0  ;;  %15635 = vmatmul.mubr.bf16.vlgmr.msra.gmra.mxu0 %v23360_v36  ;;  %v22695_v53 = vld [vmem:[#allocation2 + $0x3b28] ss:$36 sps:$4 sm:$0xff]  }
 0x711   :  { %v23681_v2 = vadd.f32 %v15390_v52, %v23673_v10  ;;  %15685 = vmatpush1.bf16.msra.mxu0 %v22665_v48  ;;  %15716 = vmatprep.mubr.bf16.mxu0 %v23364_v44  ;;  %v22677_v10 = vld [vmem:[#allocation2 + $0x3c00] ss:$36 sps:$4 sm:$0xff]  }
 0x712   :  { %15660 = vmatpush2.bf16.msra.mxu1 %v22662_v38  ;;  %v15392_v11 = vpop.f32.mrf.mxu0  ;;  %15686 = vmatprep.subr.bf16.mxu0 %v22673_v39  ;;  %v22700_v38 = vld [vmem:[#allocation2 + $0x38a4] ss:$36 sps:$4 sm:$0xff]   ;;  %v22706_v52 = vld [vmem:[#allocation2 + $0x385c] ss:$36 sps:$4 sm:$0xff]  }
 0x713   :  { %15661 = vmatprep.subr.bf16.mxu1 %v22670_v42  ;;  %v23684_v8 = vadd.f32 %v15392_v11, %v23676_v5  ;;  %v22688_v5 = vld [vmem:[#allocation2 + $0x3934] ss:$36 sps:$4 sm:$0xff]   ;;  %v22703_v48 = vld [vmem:[#allocation2 + $0x3ae4] ss:$36 sps:$4 sm:$0xff]  }
 0x714   :  { %v15394_v9 = vpop.f32.mrf.mxu0  ;;  %v22698_v42 = vld [vmem:[#allocation2 + $0x38a0] ss:$36 sps:$4 sm:$0xff]   ;;  %v22707_v11 = vld [vmem:[#allocation2 + $0x3a98] ss:$36 sps:$4 sm:$0xff]  }
 0x715   :  { %15687 = vmatpush1.bf16.msra.mxu0 %v22671_v7  ;;  %v22701_v39 = vld [vmem:[#allocation2 + $0x3ae0] ss:$36 sps:$4 sm:$0xff]   ;;  %v22704_v7 = vld [vmem:[#allocation2 + $0x3858] ss:$36 sps:$4 sm:$0xff]   ;;  %v22710_v9 = vld [vmem:[#allocation2 + $0x3ed0] ss:$36 sps:$4 sm:$0xff]  }
 0x716   :  { %15662 = vmatpush2.bf16.msra.mxu1 %v22668_v58  ;;  %v15395_v3 = vpop.f32.mrf.mxu0  ;;  %15688 = vmatprep.subr.bf16.mxu0 %v22679_v47  ;;  %v22709_v58 = vld [vmem:[#allocation2 + $0x3a9c] ss:$36 sps:$4 sm:$0xff]   ;;  %v22715_v47 = vld [vmem:[#allocation2 + $0x4114] ss:$36 sps:$4 sm:$0xff]  }
 0x717   :  { %15663 = vmatprep.subr.bf16.mxu1 %v22676_v14  ;;  %v22712_v14 = vld [vmem:[#allocation2 + $0x3ed4] ss:$36 sps:$4 sm:$0xff]   ;;  %v22721_v3 = vld [vmem:[#allocation2 + $0x40cc] ss:$36 sps:$4 sm:$0xff]  }
 0x719   :  { %15689 = vmatpush1.bf16.msra.mxu0 %v22677_v10  ;;  %v22718_v10 = vld [vmem:[#allocation2 + $0x3e8c] ss:$36 sps:$4 sm:$0xff]  }
 0x71a   :  { %15664 = vmatpush2.bf16.msra.mxu1 %v22674_v55  ;;  %15690 = vmatprep.subr.bf16.mxu0 %v22685_v51  ;;  %v22713_v55 = vld [vmem:[#allocation2 + $0x4110] ss:$36 sps:$4 sm:$0xff]  }
 0x71b   :  { %15665 = vmatprep.subr.bf16.mxu1 %v22682_v63 }
 0x71d   :  { %15691 = vmatpush1.bf16.msra.mxu0 %v22683_v30  ;;  %v22719_v30 = vld [vmem:[#allocation2 + $0x40c8] ss:$36 sps:$4 sm:$0xff]  }
 0x71e   :  { %15666 = vmatpush2.bf16.msra.mxu1 %v22680_v28  ;;  %15692 = vmatprep.subr.bf16.mxu0 %v22691_v61  ;;  %v22716_v28 = vld [vmem:[#allocation2 + $0x3e88] ss:$36 sps:$4 sm:$0xff]  }
 0x71f   :  { %15667 = vmatprep.subr.bf16.mxu1 %v22688_v5  ;;  %v22724_v61 = vld [vmem:[#allocation2 + $0x3e44] ss:$36 sps:$4 sm:$0xff]  }
 0x721   :  { %15693 = vmatpush1.bf16.msra.mxu0 %v22689_v29 }
 0x722   :  { %15668 = vmatpush2.bf16.msra.mxu1 %v22686_v57  ;;  %15694 = vmatprep.subr.bf16.mxu0 %v22697_v6  ;;  %v22727_v57 = vld [vmem:[#allocation2 + $0x4084] ss:$36 sps:$4 sm:$0xff]  }
 0x723   :  { %15669 = vmatprep.subr.bf16.mxu1 %v22694_v4  ;;  %v22722_v6 = vld [vmem:[#allocation2 + $0x3e40] ss:$36 sps:$4 sm:$0xff]  }
 0x725   :  { %15695 = vmatpush1.bf16.msra.mxu0 %v22695_v53  ;;  %v22733_v53 = vld [vmem:[#allocation2 + $0x403c] ss:$36 sps:$4 sm:$0xff]  }
 0x726   :  { %15670 = vmatpush2.bf16.msra.mxu1 %v22692_v62  ;;  %15696 = vmatprep.subr.bf16.mxu0 %v22703_v48  ;;  %v22730_v62 = vld [vmem:[#allocation2 + $0x3dfc] ss:$36 sps:$4 sm:$0xff]  }
 0x727   :  { %15671 = vmatprep.subr.bf16.mxu1 %v22700_v38  ;;  %v22728_v48 = vld [vmem:[#allocation2 + $0x3df8] ss:$36 sps:$4 sm:$0xff]  }
 0x729   :  { %15697 = vmatpush1.bf16.msra.mxu0 %v22701_v39  ;;  %v22739_v39 = vld [vmem:[#allocation2 + $0x3ff4] ss:$36 sps:$4 sm:$0xff]  }
 0x72a   :  { %15672 = vmatpush2.bf16.msra.mxu1 %v22698_v42  ;;  %15698 = vmatprep.subr.bf16.mxu0 %v22709_v58  ;;  %v22731_v42 = vld [vmem:[#allocation2 + $0x4038] ss:$36 sps:$4 sm:$0xff]   ;;  %v22742_v58 = vld [vmem:[#allocation2 + $0x3d6c] ss:$36 sps:$4 sm:$0xff]  }
 0x72b   :  { %15673 = vmatprep.subr.bf16.mxu1 %v22706_v52  ;;  %v22737_v52 = vld [vmem:[#allocation2 + $0x3ff0] ss:$36 sps:$4 sm:$0xff]  }
 0x72d   :  { %15699 = vmatpush1.bf16.msra.mxu0 %v22707_v11  ;;  %v22740_v11 = vld [vmem:[#allocation2 + $0x3d68] ss:$36 sps:$4 sm:$0xff]  }
 0x72e   :  { %15674 = vmatpush2.bf16.msra.mxu1 %v22704_v7  ;;  %15700 = vmatprep.subr.bf16.mxu0 %v22712_v14  ;;  %v22745_v7 = vld [vmem:[#allocation2 + $0x3fac] ss:$36 sps:$4 sm:$0xff]  }
 0x72f   :  { %15725 = vmatprep.subr.bf16.mxu1 %v22715_v47  ;;  %v22743_v14 = vld [vmem:[#allocation2 + $0x3fa8] ss:$36 sps:$4 sm:$0xff]  }
 0x730   :  { %v22748_v47 = vld [vmem:[#allocation2 + $0x3d24] ss:$36 sps:$4 sm:$0xff]  }
 0x731   :  { %v15431_v63 = vpop.f32.mrf.mxu1  ;;  %15676 = vmatmul.mubr.bf16.vlgmr.msra.gmra.mxu1 %v23378_v45  ;;  %15701 = vmatpush2.bf16.msra.mxu0 %v22710_v9  ;;  %v22751_v9 = vld [vmem:[#allocation2 + $0x3f64] ss:$36 sps:$4 sm:$0xff]  }
 0x732   :  { %v23689_v51 = vadd.f32 %v15431_v63, %v23681_v2  ;;  %15726 = vmatpush1.bf16.msra.mxu1 %v22713_v55  ;;  %15702 = vmatprep.subr.bf16.mxu0 %v22718_v10  ;;  %v22725_v2 = vld [vmem:[#allocation2 + $0x4080] ss:$36 sps:$4 sm:$0xff]  }
 0x733   :  { %v15433_v5 = vpop.f32.mrf.mxu1  ;;  %15727 = vmatprep.subr.bf16.mxu1 %v22721_v3  ;;  %15757 = vmatprep.mubr.bf16.mxu1 %v23125_v21  ;;  %v22734_v21 = vld [vmem:[#allocation2 + $0x3db0] ss:$36 sps:$4 sm:$0xff]   ;;  %v22746_v55 = vld [vmem:[#allocation2 + $0x3d20] ss:$36 sps:$4 sm:$0xff]  }
 0x734   :  { %v23692_v29 = vadd.f32 %v15433_v5, %v23684_v8  ;;  %v22736_v8 = vld [vmem:[#allocation2 + $0x3db4] ss:$36 sps:$4 sm:$0xff]   ;;  %v22749_v10 = vld [vmem:[#allocation2 + $0x3f60] ss:$36 sps:$4 sm:$0xff]  }
 0x735   :  { %v15435_v4 = vpop.f32.mrf.mxu1  ;;  %15703 = vmatpush2.bf16.msra.mxu0 %v22716_v28  ;;  %v22754_v3 = vld [vmem:[#allocation2 + $0x3cdc] ss:$36 sps:$4 sm:$0xff]  }
 0x736   :  { %15728 = vmatpush1.bf16.msra.mxu1 %v22719_v30  ;;  %15704 = vmatprep.subr.bf16.mxu0 %v22724_v61  ;;  %v22757_v63 = vld [vmem:[#allocation2 + $0x3f1c] ss:$36 sps:$4 sm:$0xff]  }
 0x737   :  { %15729 = vmatprep.subr.bf16.mxu1 %v22727_v57  ;;  %v15436_v38 = vpop.f32.mrf.mxu1  ;;  %v22752_v28 = vld [vmem:[#allocation2 + $0x3cd8] ss:$36 sps:$4 sm:$0xff]  }
 0x738   :  { %v22755_v30 = vld [vmem:[#allocation2 + $0x3f18] ss:$36 sps:$4 sm:$0xff]   ;;  %v22764_v38 = vld [vmem:[#allocation2 + $0x1d0] ss:$36 sps:$4 sm:$0xff]  }
 0x739   :  { %15705 = vmatpush2.bf16.msra.mxu0 %v22722_v6  ;;  %v22758_v5 = vld [vmem:[#allocation2 + $0x458] ss:$36 sps:$4 sm:$0xff]   ;;  %v22762_v6 = vld [vmem:[#allocation2 + $0x410] ss:$36 sps:$4 sm:$0xff]  }
 0x73a   :  { %15730 = vmatpush1.bf16.msra.mxu1 %v22725_v2  ;;  %15706 = vmatprep.subr.bf16.mxu0 %v22730_v62  ;;  %v22759_v61 = vld [vmem:[#allocation2 + $0x8d8] ss:$36 sps:$4 sm:$0xff]   ;;  %v22763_v2 = vld [vmem:[#allocation2 + $0x890] ss:$36 sps:$4 sm:$0xff]  }
 0x73b   :  { %15731 = vmatprep.subr.bf16.mxu1 %v22733_v53  ;;  %v22760_v57 = vld [vmem:[#allocation2 + $0x218] ss:$36 sps:$4 sm:$0xff]  }
 0x73c   :  { %v22761_v4 = vld [vmem:[#allocation2 + $0x698] ss:$36 sps:$4 sm:$0xff]  }
 0x73d   :  { %15707 = vmatpush2.bf16.msra.mxu0 %v22728_v48  ;;  %v22765_v48 = vld [vmem:[#allocation2 + $0x650] ss:$36 sps:$4 sm:$0xff]  }
 0x73e   :  { %15732 = vmatpush1.bf16.msra.mxu1 %v22731_v42  ;;  %15708 = vmatprep.subr.bf16.mxu0 %v22736_v8  ;;  %v22766_v8 = vld [vmem:[#allocation2 + $0x3c8] ss:$36 sps:$4 sm:$0xff]  }
 0x73f   :  { %15733 = vmatprep.subr.bf16.mxu1 %v22739_v39  ;;  %v22767_v39 = vld [vmem:[#allocation2 + $0x848] ss:$36 sps:$4 sm:$0xff]  }
 0x741   :  { %15709 = vmatpush2.bf16.msra.mxu0 %v22734_v21 }
 0x742   :  { %15734 = vmatpush1.bf16.msra.mxu1 %v22737_v52  ;;  %15710 = vmatprep.subr.bf16.mxu0 %v22742_v58  ;;  %v22769_v58 = vld [vmem:[#allocation2 + $0x608] ss:$36 sps:$4 sm:$0xff]  }
 0x743   :  { %15735 = vmatprep.subr.bf16.mxu1 %v22745_v7 }
 0x745   :  { %15711 = vmatpush2.bf16.msra.mxu0 %v22740_v11  ;;  %v22770_v11 = vld [vmem:[#allocation2 + $0x380] ss:$36 sps:$4 sm:$0xff]  }
 0x746   :  { %15736 = vmatpush1.bf16.msra.mxu1 %v22743_v14  ;;  %15712 = vmatprep.subr.bf16.mxu0 %v22748_v47  ;;  %v22771_v14 = vld [vmem:[#allocation2 + $0x800] ss:$36 sps:$4 sm:$0xff]  }
 0x747   :  { %15737 = vmatprep.subr.bf16.mxu1 %v22751_v9  ;;  %v22772_v47 = vld [vmem:[#allocation2 + $0x140] ss:$36 sps:$4 sm:$0xff]  }
 0x748   :  { %v22773_v9 = vld [vmem:[#allocation2 + $0x5c0] ss:$36 sps:$4 sm:$0xff]  }
 0x749   :  { %15713 = vmatpush2.bf16.msra.mxu0 %v22746_v55  ;;  %v22777_v55 = vld [vmem:[#allocation2 + $0x578] ss:$36 sps:$4 sm:$0xff]  }
 0x74a   :  { %15738 = vmatpush1.bf16.msra.mxu1 %v22749_v10  ;;  %15714 = vmatprep.subr.bf16.mxu0 %v22754_v3  ;;  %v22778_v10 = vld [vmem:[#allocation2 + $0x2f0] ss:$36 sps:$4 sm:$0xff]  }
 0x74b   :  { %15739 = vmatprep.subr.bf16.mxu1 %v22757_v63  ;;  %v22779_v3 = vld [vmem:[#allocation2 + $0x770] ss:$36 sps:$4 sm:$0xff]  }
 0x74c   :  { %v22780_v63 = vld [vmem:[#allocation2 + $0xb0] ss:$36 sps:$4 sm:$0xff]  }
 0x74d   :  { %15715 = vmatpush2.bf16.msra.mxu0 %v22752_v28  ;;  %v22781_v28 = vld [vmem:[#allocation2 + $0x530] ss:$36 sps:$4 sm:$0xff]  }
 0x74e   :  { %15740 = vmatpush1.bf16.msra.mxu1 %v22755_v30  ;;  %19479 = vmatprep.subr.bf16.mxu0 %v22758_v5  ;;  %v22782_v30 = vld [vmem:[#allocation2 + $0x2a8] ss:$36 sps:$4 sm:$0xff]  }
 0x74f   :  { %19501 = vmatprep.subr.bf16.mxu1 %v22759_v61  ;;  %v22783_v5 = vld [vmem:[#allocation2 + $0x728] ss:$36 sps:$4 sm:$0xff]  }
 0x750   :  { %v15472_v62 = vpop.f32.mrf.mxu0  ;;  %15717 = vmatmul.mubr.bf16.vlgmr.msra.gmra.mxu0 %v23382_v35  ;;  %v22784_v61 = vld [vmem:[#allocation2 + $0x68] ss:$36 sps:$4 sm:$0xff]  }
 0x751   :  { %15758 = vmatmul.mubr.bf16.vlgmr.msra.gmra.mxu1 %v23398_v18  ;;  %v23698_v53 = vadd.f32 %v15472_v62, %v23689_v51  ;;  %19480 = vmatpush3.bf16.msra.mxu0 %v22760_v57  ;;  %v22768_v51 = vld [vmem:[#allocation2 + $0x188] ss:$36 sps:$4 sm:$0xff]   ;;  %v22789_v62 = vld [vmem:[#allocation2 + $0x4a0] ss:$36 sps:$4 sm:$0xff]  }
 0x752   :  { %19502 = vmatpush3.bf16.msra.mxu1 %v22761_v4  ;;  %v15474_v42 = vpop.f32.mrf.mxu0  ;;  %19481 = vmatprep.subr.bf16.mxu0 %v22762_v6  ;;  %v22785_v57 = vld [vmem:[#allocation2 + $0x4e8] ss:$36 sps:$4 sm:$0xff]   ;;  %v22786_v4 = vld [vmem:[#allocation2 + $0x260] ss:$36 sps:$4 sm:$0xff]  }
 0x753   :  { %19503 = vmatprep.subr.bf16.mxu1 %v22763_v2  ;;  %v23701_v21 = vadd.f32 %v15474_v42, %v23692_v29  ;;  %15798 = vmatprep.mubr.bf16.mxu0 %v23182_v60  ;;  %v22774_v29 = vld [vmem:[#allocation2 + $0x338] ss:$36 sps:$4 sm:$0xff]   ;;  %v22787_v6 = vld [vmem:[#allocation2 + $0x6e0] ss:$36 sps:$4 sm:$0xff]  }
 0x754   :  { %15838 = vmatprep.mubr.bf16.mxu1 %v23186_v0  ;;  %v15476_v52 = vpop.f32.mrf.mxu0  ;;  %v22775_v60 = vld [vmem:[#allocation2 + $0x7b8] ss:$36 sps:$4 sm:$0xff]   ;;  %v22788_v2 = vld [vmem:[#allocation2 + $0x20] ss:$36 sps:$4 sm:$0xff]  }
 0x755   :  { %19482 = vmatpush3.bf16.msra.mxu0 %v22764_v38  ;;  %v22776_v0 = vld [vmem:[#allocation2 + $0xf8] ss:$36 sps:$4 sm:$0xff]   ;;  %v22795_v52 = vld [vmem:[#allocation2 + $0x1190] ss:$36 sps:$4 sm:$0xff]  }
 0x756   :  { %19504 = vmatpush3.bf16.msra.mxu1 %v22765_v48  ;;  %v15477_v7 = vpop.f32.mrf.mxu0  ;;  %19483 = vmatprep.subr.bf16.mxu0 %v22766_v8  ;;  %v22790_v38 = vld [vmem:[#allocation2 + $0xd58] ss:$36 sps:$4 sm:$0xff]  }
 0x757   :  { %19505 = vmatprep.subr.bf16.mxu1 %v22767_v39  ;;  %v22791_v48 = vld [vmem:[#allocation2 + $0x11d8] ss:$36 sps:$4 sm:$0xff]   ;;  %v22794_v39 = vld [vmem:[#allocation2 + $0xd10] ss:$36 sps:$4 sm:$0xff]  }
 0x758   :  { %v22792_v42 = vld [vmem:[#allocation2 + $0xb18] ss:$36 sps:$4 sm:$0xff]   ;;  %v22796_v7 = vld [vmem:[#allocation2 + $0xad0] ss:$36 sps:$4 sm:$0xff]  }
 0x759   :  { %19484 = vmatpush3.bf16.msra.mxu0 %v22768_v51  ;;  %v22793_v8 = vld [vmem:[#allocation2 + $0xf98] ss:$36 sps:$4 sm:$0xff]  }
 0x75a   :  { %19506 = vmatpush3.bf16.msra.mxu1 %v22769_v58  ;;  %19485 = vmatprep.subr.bf16.mxu0 %v22770_v11  ;;  %v22797_v11 = vld [vmem:[#allocation2 + $0xf50] ss:$36 sps:$4 sm:$0xff]  }
 0x75b   :  { %19507 = vmatprep.subr.bf16.mxu1 %v22771_v14 }
 0x75d   :  { %19486 = vmatpush3.bf16.msra.mxu0 %v22772_v47  ;;  %v22798_v47 = vld [vmem:[#allocation2 + $0xcc8] ss:$36 sps:$4 sm:$0xff]  }
 0x75e   :  { %19508 = vmatpush3.bf16.msra.mxu1 %v22773_v9  ;;  %19487 = vmatprep.subr.bf16.mxu0 %v22774_v29  ;;  %v22799_v9 = vld [vmem:[#allocation2 + $0x1148] ss:$36 sps:$4 sm:$0xff]  }
 0x75f   :  { %19509 = vmatprep.subr.bf16.mxu1 %v22775_v60  ;;  %v22802_v60 = vld [vmem:[#allocation2 + $0xc80] ss:$36 sps:$4 sm:$0xff]  }
 0x761   :  { %19488 = vmatpush3.bf16.msra.mxu0 %v22776_v0  ;;  %v22803_v0 = vld [vmem:[#allocation2 + $0x1100] ss:$36 sps:$4 sm:$0xff]  }
 0x762   :  { %19510 = vmatpush3.bf16.msra.mxu1 %v22777_v55  ;;  %19489 = vmatprep.subr.bf16.mxu0 %v22778_v10  ;;  %v22804_v10 = vld [vmem:[#allocation2 + $0xa40] ss:$36 sps:$4 sm:$0xff]  }
 0x763   :  { %19511 = vmatprep.subr.bf16.mxu1 %v22779_v3  ;;  %v22805_v3 = vld [vmem:[#allocation2 + $0xec0] ss:$36 sps:$4 sm:$0xff]  }
 0x765   :  { %19490 = vmatpush3.bf16.msra.mxu0 %v22780_v63  ;;  %v22809_v63 = vld [vmem:[#allocation2 + $0xe78] ss:$36 sps:$4 sm:$0xff]  }
 0x766   :  { %19512 = vmatpush3.bf16.msra.mxu1 %v22781_v28  ;;  %19491 = vmatprep.subr.bf16.mxu0 %v22782_v30  ;;  %v22810_v28 = vld [vmem:[#allocation2 + $0xbf0] ss:$36 sps:$4 sm:$0xff]  }
 0x767   :  { %19513 = vmatprep.subr.bf16.mxu1 %v22783_v5  ;;  %v22811_v30 = vld [vmem:[#allocation2 + $0x1070] ss:$36 sps:$4 sm:$0xff]  }
 0x768   :  { %v22812_v5 = vld [vmem:[#allocation2 + $0x9b0] ss:$36 sps:$4 sm:$0xff]  }
 0x769   :  { %19492 = vmatpush3.bf16.msra.mxu0 %v22784_v61  ;;  %v22813_v61 = vld [vmem:[#allocation2 + $0xe30] ss:$36 sps:$4 sm:$0xff]  }
 0x76a   :  { %19514 = vmatpush3.bf16.msra.mxu1 %v22785_v57  ;;  %19493 = vmatprep.subr.bf16.mxu0 %v22786_v4  ;;  %v22814_v57 = vld [vmem:[#allocation2 + $0xba8] ss:$36 sps:$4 sm:$0xff]  }
 0x76b   :  { %19515 = vmatprep.subr.bf16.mxu1 %v22787_v6  ;;  %v22815_v4 = vld [vmem:[#allocation2 + $0x1028] ss:$36 sps:$4 sm:$0xff]  }
 0x76c   :  { %v22816_v6 = vld [vmem:[#allocation2 + $0x968] ss:$36 sps:$4 sm:$0xff]  }
 0x76d   :  { %19494 = vmatpush3.bf16.msra.mxu0 %v22788_v2  ;;  %v22817_v2 = vld [vmem:[#allocation2 + $0xde8] ss:$36 sps:$4 sm:$0xff]  }
 0x76e   :  { %19516 = vmatpush3.bf16.msra.mxu1 %v22789_v62  ;;  %19523 = vmatprep.subr.bf16.mxu0 %v22790_v38  ;;  %v22818_v62 = vld [vmem:[#allocation2 + $0xb60] ss:$36 sps:$4 sm:$0xff]  }
 0x76f   :  { %19545 = vmatprep.subr.bf16.mxu1 %v22791_v48  ;;  %v22819_v38 = vld [vmem:[#allocation2 + $0xfe0] ss:$36 sps:$4 sm:$0xff]  }
 0x770   :  { %15799 = vmatmul.mubr.bf16.vlgmr.msra.gmra.mxu0 %v23196_v13  ;;  %v22820_v48 = vld [vmem:[#allocation2 + $0x920] ss:$36 sps:$4 sm:$0xff]  }
 0x771   :  { %v15513_v51 = vpop.f32.mrf.mxu1  ;;  %15839 = vmatmul.mubr.bf16.vlgmr.msra.gmra.mxu1 %v23203_v19  ;;  %19524 = vmatpush3.bf16.msra.mxu0 %v22792_v42  ;;  %v22800_v19 = vld [vmem:[#allocation2 + $0xa88] ss:$36 sps:$4 sm:$0xff]   ;;  %v22821_v42 = vld [vmem:[#allocation2 + $0xda0] ss:$36 sps:$4 sm:$0xff]  }
 0x772   :  { %v23708_v58 = vadd.f32 %v15513_v51, %v23698_v53  ;;  %19546 = vmatpush3.bf16.msra.mxu1 %v22793_v8  ;;  %19525 = vmatprep.subr.bf16.mxu0 %v22794_v39  ;;  %v22801_v53 = vld [vmem:[#allocation2 + $0xf08] ss:$36 sps:$4 sm:$0xff]   ;;  %v22822_v8 = vld [vmem:[#allocation2 + $0x1658] ss:$36 sps:$4 sm:$0xff]  }
 0x773   :  { %v15515_v14 = vpop.f32.mrf.mxu1  ;;  %19547 = vmatprep.subr.bf16.mxu1 %v22795_v52  ;;  %15878 = vmatprep.mubr.bf16.mxu0 %v23199_v17  ;;  %v22807_v17 = vld [vmem:[#allocation2 + $0x10b8] ss:$36 sps:$4 sm:$0xff]  }
 0x774   :  { %v23711_v29 = vadd.f32 %v15515_v14, %v23701_v21  ;;  %15918 = vmatprep.mubr.bf16.mxu1 %v23207_v23  ;;  %v22806_v21 = vld [vmem:[#allocation2 + $0xc38] ss:$36 sps:$4 sm:$0xff]  }
 0x775   :  { %v15517_v13 = vpop.f32.mrf.mxu1  ;;  %19526 = vmatpush3.bf16.msra.mxu0 %v22796_v7  ;;  %v22808_v23 = vld [vmem:[#allocation2 + $0x9f8] ss:$36 sps:$4 sm:$0xff]   ;;  %v22826_v7 = vld [vmem:[#allocation2 + $0x1610] ss:$36 sps:$4 sm:$0xff]  }
 0x776   :  { %19548 = vmatpush3.bf16.msra.mxu1 %v22797_v11  ;;  %19527 = vmatprep.subr.bf16.mxu0 %v22798_v47  ;;  %v22823_v39 = vld [vmem:[#allocation2 + $0x1ad8] ss:$36 sps:$4 sm:$0xff]   ;;  %v22827_v11 = vld [vmem:[#allocation2 + $0x1a90] ss:$36 sps:$4 sm:$0xff]  }
 0x777   :  { %19549 = vmatprep.subr.bf16.mxu1 %v22799_v9  ;;  %v15518_v55 = vpop.f32.mrf.mxu1  ;;  %v22824_v52 = vld [vmem:[#allocation2 + $0x1418] ss:$36 sps:$4 sm:$0xff]   ;;  %v22828_v9 = vld [vmem:[#allocation2 + $0x13d0] ss:$36 sps:$4 sm:$0xff]  }
 0x778   :  { %v22825_v51 = vld [vmem:[#allocation2 + $0x1898] ss:$36 sps:$4 sm:$0xff]   ;;  %v22829_v13 = vld [vmem:[#allocation2 + $0x1850] ss:$36 sps:$4 sm:$0xff]  }
 0x779   :  { %19528 = vmatpush3.bf16.msra.mxu0 %v22800_v19 }
 0x77a   :  { %19550 = vmatpush3.bf16.msra.mxu1 %v22801_v53  ;;  %19529 = vmatprep.subr.bf16.mxu0 %v22802_v60  ;;  %v22830_v53 = vld [vmem:[#allocation2 + $0x15c8] ss:$36 sps:$4 sm:$0xff]  }
 0x77b   :  { %19551 = vmatprep.subr.bf16.mxu1 %v22803_v0  ;;  %v22831_v60 = vld [vmem:[#allocation2 + $0x1a48] ss:$36 sps:$4 sm:$0xff]  }
 0x77d   :  { %19530 = vmatpush3.bf16.msra.mxu0 %v22804_v10  ;;  %v22834_v10 = vld [vmem:[#allocation2 + $0x1580] ss:$36 sps:$4 sm:$0xff]  }
 0x77e   :  { %19552 = vmatpush3.bf16.msra.mxu1 %v22805_v3  ;;  %19531 = vmatprep.subr.bf16.mxu0 %v22806_v21  ;;  %v22835_v3 = vld [vmem:[#allocation2 + $0x1a00] ss:$36 sps:$4 sm:$0xff]  }
 0x77f   :  { %19553 = vmatprep.subr.bf16.mxu1 %v22807_v17  ;;  %v22836_v21 = vld [vmem:[#allocation2 + $0x1340] ss:$36 sps:$4 sm:$0xff]  }
 0x780   :  { %v22837_v17 = vld [vmem:[#allocation2 + $0x17c0] ss:$36 sps:$4 sm:$0xff]  }
 0x781   :  { %19532 = vmatpush3.bf16.msra.mxu0 %v22808_v23  ;;  %v22841_v23 = vld [vmem:[#allocation2 + $0x1778] ss:$36 sps:$4 sm:$0xff]  }
 0x782   :  { %19554 = vmatpush3.bf16.msra.mxu1 %v22809_v63  ;;  %19533 = vmatprep.subr.bf16.mxu0 %v22810_v28  ;;  %v22842_v63 = vld [vmem:[#allocation2 + $0x14f0] ss:$36 sps:$4 sm:$0xff]  }
 0x783   :  { %19555 = vmatprep.subr.bf16.mxu1 %v22811_v30  ;;  %v22843_v28 = vld [vmem:[#allocation2 + $0x1970] ss:$36 sps:$4 sm:$0xff]  }
 0x784   :  { %v22844_v30 = vld [vmem:[#allocation2 + $0x12b0] ss:$36 sps:$4 sm:$0xff]  }
 0x785   :  { %19534 = vmatpush3.bf16.msra.mxu0 %v22812_v5  ;;  %v22845_v5 = vld [vmem:[#allocation2 + $0x1730] ss:$36 sps:$4 sm:$0xff]  }
 0x786   :  { %19556 = vmatpush3.bf16.msra.mxu1 %v22813_v61  ;;  %19535 = vmatprep.subr.bf16.mxu0 %v22814_v57  ;;  %v22846_v61 = vld [vmem:[#allocation2 + $0x14a8] ss:$36 sps:$4 sm:$0xff]  }
 0x787   :  { %19557 = vmatprep.subr.bf16.mxu1 %v22815_v4  ;;  %v22847_v57 = vld [vmem:[#allocation2 + $0x1928] ss:$36 sps:$4 sm:$0xff]  }
 0x788   :  { %v22848_v4 = vld [vmem:[#allocation2 + $0x1268] ss:$36 sps:$4 sm:$0xff]  }
 0x789   :  { %19536 = vmatpush3.bf16.msra.mxu0 %v22816_v6  ;;  %v22849_v6 = vld [vmem:[#allocation2 + $0x16e8] ss:$36 sps:$4 sm:$0xff]  }
 0x78a   :  { %19558 = vmatpush3.bf16.msra.mxu1 %v22817_v2  ;;  %19537 = vmatprep.subr.bf16.mxu0 %v22818_v62  ;;  %v22850_v2 = vld [vmem:[#allocation2 + $0x1460] ss:$36 sps:$4 sm:$0xff]  }
 0x78b   :  { %19559 = vmatprep.subr.bf16.mxu1 %v22819_v38  ;;  %v22851_v62 = vld [vmem:[#allocation2 + $0x18e0] ss:$36 sps:$4 sm:$0xff]  }
 0x78c   :  { %v22852_v38 = vld [vmem:[#allocation2 + $0x1220] ss:$36 sps:$4 sm:$0xff]  }
 0x78d   :  { %19538 = vmatpush3.bf16.msra.mxu0 %v22820_v48  ;;  %v22853_v48 = vld [vmem:[#allocation2 + $0x16a0] ss:$36 sps:$4 sm:$0xff]  }
 0x78e   :  { %19560 = vmatpush3.bf16.msra.mxu1 %v22821_v42  ;;  %19567 = vmatprep.subr.bf16.mxu0 %v22822_v8  ;;  %v22854_v42 = vld [vmem:[#allocation2 + $0x1f58] ss:$36 sps:$4 sm:$0xff]  }
 0x78f   :  { %19589 = vmatprep.subr.bf16.mxu1 %v22823_v39  ;;  %v22855_v8 = vld [vmem:[#allocation2 + $0x23d8] ss:$36 sps:$4 sm:$0xff]  }
 0x790   :  { %v15554_v14 = vpop.f32.mrf.mxu0  ;;  %15879 = vmatmul.mubr.bf16.vlgmr.msra.gmra.mxu0 %v23215_v26  ;;  %v22856_v39 = vld [vmem:[#allocation2 + $0x1d18] ss:$36 sps:$4 sm:$0xff]  }
 0x791   :  { %15919 = vmatmul.mubr.bf16.vlgmr.msra.gmra.mxu1 %v23219_v31  ;;  %v23718_v47 = vadd.f32 %v15554_v14, %v23708_v58  ;;  %19568 = vmatpush3.bf16.msra.mxu0 %v22824_v52  ;;  %v22832_v31 = vld [vmem:[#allocation2 + $0x1388] ss:$36 sps:$4 sm:$0xff]   ;;  %v22857_v52 = vld [vmem:[#allocation2 + $0x2198] ss:$36 sps:$4 sm:$0xff]  }
 0x792   :  { %19590 = vmatpush3.bf16.msra.mxu1 %v22825_v51  ;;  %v15556_v19 = vpop.f32.mrf.mxu0  ;;  %19569 = vmatprep.subr.bf16.mxu0 %v22826_v7  ;;  %v22833_v58 = vld [vmem:[#allocation2 + $0x1808] ss:$36 sps:$4 sm:$0xff]   ;;  %v22858_v51 = vld [vmem:[#allocation2 + $0x1f10] ss:$36 sps:$4 sm:$0xff]  }
 0x793   :  { %19591 = vmatprep.subr.bf16.mxu1 %v22827_v11  ;;  %v23721_v0 = vadd.f32 %v15556_v19, %v23711_v29  ;;  %15958 = vmatprep.mubr.bf16.mxu0 %v23235_v41  ;;  %v22838_v29 = vld [vmem:[#allocation2 + $0x1538] ss:$36 sps:$4 sm:$0xff]   ;;  %v22859_v7 = vld [vmem:[#allocation2 + $0x2390] ss:$36 sps:$4 sm:$0xff]  }
 0x794   :  { %15998 = vmatprep.mubr.bf16.mxu1 %v23240_v43  ;;  %v15558_v26 = vpop.f32.mrf.mxu0  ;;  %v22839_v41 = vld [vmem:[#allocation2 + $0x19b8] ss:$36 sps:$4 sm:$0xff]  }
 0x795   :  { %19570 = vmatpush3.bf16.msra.mxu0 %v22828_v9  ;;  %v22840_v43 = vld [vmem:[#allocation2 + $0x12f8] ss:$36 sps:$4 sm:$0xff]   ;;  %v22860_v9 = vld [vmem:[#allocation2 + $0x1cd0] ss:$36 sps:$4 sm:$0xff]  }
 0x796   :  { %19592 = vmatpush3.bf16.msra.mxu1 %v22829_v13  ;;  %v15559_v55 = vpop.f32.mrf.mxu0  ;;  %19571 = vmatprep.subr.bf16.mxu0 %v22830_v53  ;;  %v22861_v13 = vld [vmem:[#allocation2 + $0x2150] ss:$36 sps:$4 sm:$0xff]   ;;  %v22862_v53 = vld [vmem:[#allocation2 + $0x1ec8] ss:$36 sps:$4 sm:$0xff]  }
 0x797   :  { %19593 = vmatprep.subr.bf16.mxu1 %v22831_v60  ;;  %v22863_v60 = vld [vmem:[#allocation2 + $0x2348] ss:$36 sps:$4 sm:$0xff]  }
 0x799   :  { %19572 = vmatpush3.bf16.msra.mxu0 %v22832_v31  ;;  %v22866_v31 = vld [vmem:[#allocation2 + $0x1e80] ss:$36 sps:$4 sm:$0xff]  }
 0x79a   :  { %19594 = vmatpush3.bf16.msra.mxu1 %v22833_v58  ;;  %19573 = vmatprep.subr.bf16.mxu0 %v22834_v10  ;;  %v22867_v58 = vld [vmem:[#allocation2 + $0x2300] ss:$36 sps:$4 sm:$0xff]  }
 0x79b   :  { %19595 = vmatprep.subr.bf16.mxu1 %v22835_v3  ;;  %v22868_v10 = vld [vmem:[#allocation2 + $0x1c40] ss:$36 sps:$4 sm:$0xff]  }
 0x79c   :  { %v22869_v3 = vld [vmem:[#allocation2 + $0x20c0] ss:$36 sps:$4 sm:$0xff]  }
 0x79d   :  { %19574 = vmatpush3.bf16.msra.mxu0 %v22836_v21  ;;  %v22873_v21 = vld [vmem:[#allocation2 + $0x2078] ss:$36 sps:$4 sm:$0xff]  }
 0x79e   :  { %19596 = vmatpush3.bf16.msra.mxu1 %v22837_v17  ;;  %19575 = vmatprep.subr.bf16.mxu0 %v22838_v29  ;;  %v22874_v17 = vld [vmem:[#allocation2 + $0x1df0] ss:$36 sps:$4 sm:$0xff]  }
 0x79f   :  { %19597 = vmatprep.subr.bf16.mxu1 %v22839_v41  ;;  %v22875_v29 = vld [vmem:[#allocation2 + $0x2270] ss:$36 sps:$4 sm:$0xff]  }
 0x7a0   :  { %v22876_v41 = vld [vmem:[#allocation2 + $0x1bb0] ss:$36 sps:$4 sm:$0xff]  }
 0x7a1   :  { %19576 = vmatpush3.bf16.msra.mxu0 %v22840_v43  ;;  %v22877_v43 = vld [vmem:[#allocation2 + $0x2030] ss:$36 sps:$4 sm:$0xff]  }
 0x7a2   :  { %19598 = vmatpush3.bf16.msra.mxu1 %v22841_v23  ;;  %19577 = vmatprep.subr.bf16.mxu0 %v22842_v63  ;;  %v22878_v23 = vld [vmem:[#allocation2 + $0x1da8] ss:$36 sps:$4 sm:$0xff]  }
 0x7a3   :  { %19599 = vmatprep.subr.bf16.mxu1 %v22843_v28  ;;  %v22879_v63 = vld [vmem:[#allocation2 + $0x2228] ss:$36 sps:$4 sm:$0xff]  }
 0x7a4   :  { %v22880_v28 = vld [vmem:[#allocation2 + $0x1b68] ss:$36 sps:$4 sm:$0xff]  }
 0x7a5   :  { %19578 = vmatpush3.bf16.msra.mxu0 %v22844_v30  ;;  %v22881_v30 = vld [vmem:[#allocation2 + $0x1fe8] ss:$36 sps:$4 sm:$0xff]  }
 0x7a6   :  { %19600 = vmatpush3.bf16.msra.mxu1 %v22845_v5  ;;  %19579 = vmatprep.subr.bf16.mxu0 %v22846_v61  ;;  %v22882_v5 = vld [vmem:[#allocation2 + $0x1d60] ss:$36 sps:$4 sm:$0xff]  }
 0x7a7   :  { %19601 = vmatprep.subr.bf16.mxu1 %v22847_v57  ;;  %v22883_v61 = vld [vmem:[#allocation2 + $0x21e0] ss:$36 sps:$4 sm:$0xff]  }
 0x7a8   :  { %v22884_v57 = vld [vmem:[#allocation2 + $0x1b20] ss:$36 sps:$4 sm:$0xff]  }
 0x7a9   :  { %19580 = vmatpush3.bf16.msra.mxu0 %v22848_v4  ;;  %v22885_v4 = vld [vmem:[#allocation2 + $0x1fa0] ss:$36 sps:$4 sm:$0xff]  }
 0x7aa   :  { %19602 = vmatpush3.bf16.msra.mxu1 %v22849_v6  ;;  %19581 = vmatprep.subr.bf16.mxu0 %v22850_v2  ;;  %v22886_v6 = vld [vmem:[#allocation2 + $0x2858] ss:$36 sps:$4 sm:$0xff]  }
 0x7ab   :  { %19603 = vmatprep.subr.bf16.mxu1 %v22851_v62  ;;  %v22887_v2 = vld [vmem:[#allocation2 + $0x2cd8] ss:$36 sps:$4 sm:$0xff]  }
 0x7ac   :  { %v22888_v62 = vld [vmem:[#allocation2 + $0x2618] ss:$36 sps:$4 sm:$0xff]  }
 0x7ad   :  { %19582 = vmatpush3.bf16.msra.mxu0 %v22852_v38  ;;  %v22889_v38 = vld [vmem:[#allocation2 + $0x2a98] ss:$36 sps:$4 sm:$0xff]  }
 0x7ae   :  { %19604 = vmatpush3.bf16.msra.mxu1 %v22853_v48  ;;  %19611 = vmatprep.subr.bf16.mxu0 %v22854_v42  ;;  %v22890_v48 = vld [vmem:[#allocation2 + $0x2810] ss:$36 sps:$4 sm:$0xff]  }
 0x7af   :  { %19633 = vmatprep.subr.bf16.mxu1 %v22855_v8  ;;  %v22891_v42 = vld [vmem:[#allocation2 + $0x2c90] ss:$36 sps:$4 sm:$0xff]  }
 0x7b0   :  { %15959 = vmatmul.mubr.bf16.vlgmr.msra.gmra.mxu0 %v23252_v50 }
 0x7b1   :  { %v15595_v11 = vpop.f32.mrf.mxu1  ;;  %15999 = vmatmul.mubr.bf16.vlgmr.msra.gmra.mxu1 %v23259_v56  ;;  %19612 = vmatpush3.bf16.msra.mxu0 %v22856_v39  ;;  %v22864_v56 = vld [vmem:[#allocation2 + $0x1c88] ss:$36 sps:$4 sm:$0xff]  }
 0x7b2   :  { %v23728_v14 = vadd.f32 %v15595_v11, %v23718_v47  ;;  %19634 = vmatpush3.bf16.msra.mxu1 %v22857_v52  ;;  %19613 = vmatprep.subr.bf16.mxu0 %v22858_v51  ;;  %v22865_v47 = vld [vmem:[#allocation2 + $0x2108] ss:$36 sps:$4 sm:$0xff]   ;;  %v22892_v52 = vld [vmem:[#allocation2 + $0x25d0] ss:$36 sps:$4 sm:$0xff]  }
 0x7b3   :  { %v15597_v19 = vpop.f32.mrf.mxu1  ;;  %19635 = vmatprep.subr.bf16.mxu1 %v22859_v7  ;;  %16038 = vmatprep.mubr.bf16.mxu0 %v23255_v54  ;;  %v22871_v54 = vld [vmem:[#allocation2 + $0x22b8] ss:$36 sps:$4 sm:$0xff]   ;;  %v22893_v51 = vld [vmem:[#allocation2 + $0x2a50] ss:$36 sps:$4 sm:$0xff]   ;;  %v22894_v11 = vld [vmem:[#allocation2 + $0x27c8] ss:$36 sps:$4 sm:$0xff]  }
 0x7b4   :  { %v23731_v26 = vadd.f32 %v15597_v19, %v23721_v0  ;;  %16078 = vmatprep.mubr.bf16.mxu1 %v23263_v59  ;;  %v22870_v0 = vld [vmem:[#allocation2 + $0x1e38] ss:$36 sps:$4 sm:$0xff]  }
 0x7b5   :  { %v15599_v50 = vpop.f32.mrf.mxu1  ;;  %19614 = vmatpush3.bf16.msra.mxu0 %v22860_v9  ;;  %v22872_v59 = vld [vmem:[#allocation2 + $0x1bf8] ss:$36 sps:$4 sm:$0xff]   ;;  %v22895_v9 = vld [vmem:[#allocation2 + $0x2c48] ss:$36 sps:$4 sm:$0xff]  }
 0x7b6   :  { %19636 = vmatpush3.bf16.msra.mxu1 %v22861_v13  ;;  %19615 = vmatprep.subr.bf16.mxu0 %v22862_v53  ;;  %v22898_v53 = vld [vmem:[#allocation2 + $0x2780] ss:$36 sps:$4 sm:$0xff]  }
 0x7b7   :  { %19637 = vmatprep.subr.bf16.mxu1 %v22863_v60  ;;  %v15600_v55 = vpop.f32.mrf.mxu1  ;;  %v22899_v60 = vld [vmem:[#allocation2 + $0x2c00] ss:$36 sps:$4 sm:$0xff]  }
 0x7b8   :  { %v22900_v50 = vld [vmem:[#allocation2 + $0x2540] ss:$36 sps:$4 sm:$0xff]   ;;  %v22908_v55 = vld [vmem:[#allocation2 + $0x24b0] ss:$36 sps:$4 sm:$0xff]  }
 0x7b9   :  { %19616 = vmatpush3.bf16.msra.mxu0 %v22864_v56  ;;  %v22901_v56 = vld [vmem:[#allocation2 + $0x29c0] ss:$36 sps:$4 sm:$0xff]  }
 0x7ba   :  { %19638 = vmatpush3.bf16.msra.mxu1 %v22865_v47  ;;  %19617 = vmatprep.subr.bf16.mxu0 %v22866_v31  ;;  %v22905_v47 = vld [vmem:[#allocation2 + $0x2978] ss:$36 sps:$4 sm:$0xff]   ;;  %v22906_v31 = vld [vmem:[#allocation2 + $0x26f0] ss:$36 sps:$4 sm:$0xff]  }
 0x7bb   :  { %19639 = vmatprep.subr.bf16.mxu1 %v22867_v58  ;;  %v22907_v58 = vld [vmem:[#allocation2 + $0x2b70] ss:$36 sps:$4 sm:$0xff]  }
 0x7bd   :  { %19618 = vmatpush3.bf16.msra.mxu0 %v22868_v10  ;;  %v22909_v10 = vld [vmem:[#allocation2 + $0x2930] ss:$36 sps:$4 sm:$0xff]  }
 0x7be   :  { %19640 = vmatpush3.bf16.msra.mxu1 %v22869_v3  ;;  %19619 = vmatprep.subr.bf16.mxu0 %v22870_v0  ;;  %v22910_v3 = vld [vmem:[#allocation2 + $0x26a8] ss:$36 sps:$4 sm:$0xff]  }
 0x7bf   :  { %19641 = vmatprep.subr.bf16.mxu1 %v22871_v54  ;;  %v22911_v0 = vld [vmem:[#allocation2 + $0x2b28] ss:$36 sps:$4 sm:$0xff]  }
 0x7c0   :  { %v22912_v54 = vld [vmem:[#allocation2 + $0x2468] ss:$36 sps:$4 sm:$0xff]  }
 0x7c1   :  { %19620 = vmatpush3.bf16.msra.mxu0 %v22872_v59  ;;  %v22913_v59 = vld [vmem:[#allocation2 + $0x28e8] ss:$36 sps:$4 sm:$0xff]  }
 0x7c2   :  { %19642 = vmatpush3.bf16.msra.mxu1 %v22873_v21  ;;  %19621 = vmatprep.subr.bf16.mxu0 %v22874_v17  ;;  %v22914_v21 = vld [vmem:[#allocation2 + $0x2660] ss:$36 sps:$4 sm:$0xff]  }
 0x7c3   :  { %19643 = vmatprep.subr.bf16.mxu1 %v22875_v29  ;;  %v22915_v17 = vld [vmem:[#allocation2 + $0x2ae0] ss:$36 sps:$4 sm:$0xff]  }
 0x7c4   :  { %v22916_v29 = vld [vmem:[#allocation2 + $0x2420] ss:$36 sps:$4 sm:$0xff]  }
 0x7c5   :  { %19622 = vmatpush3.bf16.msra.mxu0 %v22876_v41  ;;  %v22917_v41 = vld [vmem:[#allocation2 + $0x28a0] ss:$36 sps:$4 sm:$0xff]  }
 0x7c6   :  { %19644 = vmatpush3.bf16.msra.mxu1 %v22877_v43  ;;  %19623 = vmatprep.subr.bf16.mxu0 %v22878_v23  ;;  %v22918_v43 = vld [vmem:[#allocation2 + $0x3158] ss:$36 sps:$4 sm:$0xff]  }
 0x7c7   :  { %19645 = vmatprep.subr.bf16.mxu1 %v22879_v63  ;;  %v22919_v23 = vld [vmem:[#allocation2 + $0x35d8] ss:$36 sps:$4 sm:$0xff]  }
 0x7c8   :  { %v22920_v63 = vld [vmem:[#allocation2 + $0x2f18] ss:$36 sps:$4 sm:$0xff]  }
 0x7c9   :  { %19624 = vmatpush3.bf16.msra.mxu0 %v22880_v28  ;;  %v22921_v28 = vld [vmem:[#allocation2 + $0x3398] ss:$36 sps:$4 sm:$0xff]  }
 0x7ca   :  { %19646 = vmatpush3.bf16.msra.mxu1 %v22881_v30  ;;  %19625 = vmatprep.subr.bf16.mxu0 %v22882_v5  ;;  %v22922_v30 = vld [vmem:[#allocation2 + $0x3110] ss:$36 sps:$4 sm:$0xff]  }
 0x7cb   :  { %19647 = vmatprep.subr.bf16.mxu1 %v22883_v61  ;;  %v22923_v5 = vld [vmem:[#allocation2 + $0x3590] ss:$36 sps:$4 sm:$0xff]  }
 0x7cd   :  { %19626 = vmatpush3.bf16.msra.mxu0 %v22884_v57 }
 0x7ce   :  { %19648 = vmatpush3.bf16.msra.mxu1 %v22885_v4  ;;  %19655 = vmatprep.subr.bf16.mxu0 %v22886_v6  ;;  %v22924_v4 = vld [vmem:[#allocation2 + $0x2ed0] ss:$36 sps:$4 sm:$0xff]  }
 0x7cf   :  { %19677 = vmatprep.subr.bf16.mxu1 %v22887_v2  ;;  %v22925_v6 = vld [vmem:[#allocation2 + $0x3350] ss:$36 sps:$4 sm:$0xff]  }
 0x7d0   :  { %v15636_v8 = vpop.f32.mrf.mxu0  ;;  %16039 = vmatmul.mubr.bf16.vlgmr.msra.gmra.mxu0 %v23285_v15 }
 0x7d1   :  { %16079 = vmatmul.mubr.bf16.vlgmr.msra.gmra.mxu1 %v23294_v27  ;;  %v23738_v39 = vadd.f32 %v15636_v8, %v23728_v14  ;;  %19656 = vmatpush3.bf16.msra.mxu0 %v22888_v62  ;;  %v22896_v27 = vld [vmem:[#allocation2 + $0x2588] ss:$36 sps:$4 sm:$0xff]   ;;  %v22930_v8 = vld [vmem:[#allocation2 + $0x3080] ss:$36 sps:$4 sm:$0xff]  }
 0x7d2   :  { %19678 = vmatpush3.bf16.msra.mxu1 %v22889_v38  ;;  %v15638_v7 = vpop.f32.mrf.mxu0  ;;  %19657 = vmatprep.subr.bf16.mxu0 %v22890_v48  ;;  %v22897_v14 = vld [vmem:[#allocation2 + $0x2a08] ss:$36 sps:$4 sm:$0xff]  }
 0x7d3   :  { %19679 = vmatprep.subr.bf16.mxu1 %v22891_v42  ;;  %v23741_v13 = vadd.f32 %v15638_v7, %v23731_v26  ;;  %16118 = vmatprep.mubr.bf16.mxu0 %v23290_v22  ;;  %v22902_v26 = vld [vmem:[#allocation2 + $0x2738] ss:$36 sps:$4 sm:$0xff]   ;;  %v22926_v62 = vld [vmem:[#allocation2 + $0x30c8] ss:$36 sps:$4 sm:$0xff]   ;;  %v22933_v7 = vld [vmem:[#allocation2 + $0x32c0] ss:$36 sps:$4 sm:$0xff]  }
 0x7d4   :  { %16158 = vmatprep.mubr.bf16.mxu1 %v23298_v32  ;;  %v15640_v15 = vpop.f32.mrf.mxu0  ;;  %v22903_v22 = vld [vmem:[#allocation2 + $0x2bb8] ss:$36 sps:$4 sm:$0xff]   ;;  %v22927_v38 = vld [vmem:[#allocation2 + $0x3548] ss:$36 sps:$4 sm:$0xff]  }
 0x7d5   :  { %19658 = vmatpush3.bf16.msra.mxu0 %v22892_v52  ;;  %v22904_v32 = vld [vmem:[#allocation2 + $0x24f8] ss:$36 sps:$4 sm:$0xff]   ;;  %v22929_v42 = vld [vmem:[#allocation2 + $0x3308] ss:$36 sps:$4 sm:$0xff]   ;;  %v22939_v15 = vld [vmem:[#allocation2 + $0x3470] ss:$36 sps:$4 sm:$0xff]  }
 0x7d6   :  { %19680 = vmatpush3.bf16.msra.mxu1 %v22893_v51  ;;  %v15641_v19 = vpop.f32.mrf.mxu0  ;;  %19659 = vmatprep.subr.bf16.mxu0 %v22894_v11  ;;  %v22932_v51 = vld [vmem:[#allocation2 + $0x2e40] ss:$36 sps:$4 sm:$0xff]   ;;  %v22934_v11 = vld [vmem:[#allocation2 + $0x3038] ss:$36 sps:$4 sm:$0xff]  }
 0x7d7   :  { %19681 = vmatprep.subr.bf16.mxu1 %v22895_v9  ;;  %v22937_v9 = vld [vmem:[#allocation2 + $0x3278] ss:$36 sps:$4 sm:$0xff]   ;;  %v22942_v19 = vld [vmem:[#allocation2 + $0x2fa8] ss:$36 sps:$4 sm:$0xff]  }
 0x7d9   :  { %19660 = vmatpush3.bf16.msra.mxu0 %v22896_v27  ;;  %v22940_v27 = vld [vmem:[#allocation2 + $0x2db0] ss:$36 sps:$4 sm:$0xff]  }
 0x7da   :  { %19682 = vmatpush3.bf16.msra.mxu1 %v22897_v14  ;;  %19661 = vmatprep.subr.bf16.mxu0 %v22898_v53  ;;  %v22941_v14 = vld [vmem:[#allocation2 + $0x3230] ss:$36 sps:$4 sm:$0xff]   ;;  %v22943_v53 = vld [vmem:[#allocation2 + $0x3428] ss:$36 sps:$4 sm:$0xff]  }
 0x7db   :  { %19683 = vmatprep.subr.bf16.mxu1 %v22899_v60  ;;  %v22944_v60 = vld [vmem:[#allocation2 + $0x2d68] ss:$36 sps:$4 sm:$0xff]  }
 0x7dd   :  { %19662 = vmatpush3.bf16.msra.mxu0 %v22900_v50  ;;  %v22945_v50 = vld [vmem:[#allocation2 + $0x31e8] ss:$36 sps:$4 sm:$0xff]  }
 0x7de   :  { %19684 = vmatpush3.bf16.msra.mxu1 %v22901_v56  ;;  %19663 = vmatprep.subr.bf16.mxu0 %v22902_v26  ;;  %v22946_v56 = vld [vmem:[#allocation2 + $0x2f60] ss:$36 sps:$4 sm:$0xff]  }
 0x7df   :  { %19685 = vmatprep.subr.bf16.mxu1 %v22903_v22  ;;  %v22947_v26 = vld [vmem:[#allocation2 + $0x33e0] ss:$36 sps:$4 sm:$0xff]  }
 0x7e0   :  { %v22948_v22 = vld [vmem:[#allocation2 + $0x2d20] ss:$36 sps:$4 sm:$0xff]  }
 0x7e1   :  { %19664 = vmatpush3.bf16.msra.mxu0 %v22904_v32  ;;  %v22949_v32 = vld [vmem:[#allocation2 + $0x31a0] ss:$36 sps:$4 sm:$0xff]  }
 0x7e2   :  { %19686 = vmatpush3.bf16.msra.mxu1 %v22905_v47  ;;  %19665 = vmatprep.subr.bf16.mxu0 %v22906_v31  ;;  %v22950_v47 = vld [vmem:[#allocation2 + $0x3a58] ss:$36 sps:$4 sm:$0xff]  }
 0x7e3   :  { %19687 = vmatprep.subr.bf16.mxu1 %v22907_v58  ;;  %v22951_v31 = vld [vmem:[#allocation2 + $0x3ed8] ss:$36 sps:$4 sm:$0xff]  }
 0x7e4   :  { %v22952_v58 = vld [vmem:[#allocation2 + $0x3818] ss:$36 sps:$4 sm:$0xff]  }
 0x7e5   :  { %19666 = vmatpush3.bf16.msra.mxu0 %v22908_v55  ;;  %v22953_v55 = vld [vmem:[#allocation2 + $0x3c98] ss:$36 sps:$4 sm:$0xff]  }
 0x7e6   :  { %19688 = vmatpush3.bf16.msra.mxu1 %v22909_v10  ;;  %19667 = vmatprep.subr.bf16.mxu0 %v22910_v3  ;;  %v22954_v10 = vld [vmem:[#allocation2 + $0x3a10] ss:$36 sps:$4 sm:$0xff]  }
 0x7e7   :  { %19689 = vmatprep.subr.bf16.mxu1 %v22911_v0  ;;  %v22955_v3 = vld [vmem:[#allocation2 + $0x3e90] ss:$36 sps:$4 sm:$0xff]  }
 0x7e9   :  { %19668 = vmatpush3.bf16.msra.mxu0 %v22912_v54 }
 0x7ea   :  { %19690 = vmatpush3.bf16.msra.mxu1 %v22913_v59  ;;  %19669 = vmatprep.subr.bf16.mxu0 %v22914_v21  ;;  %v22956_v21 = vld [vmem:[#allocation2 + $0x37d0] ss:$36 sps:$4 sm:$0xff]  }
 0x7eb   :  { %19691 = vmatprep.subr.bf16.mxu1 %v22915_v17  ;;  %v22957_v17 = vld [vmem:[#allocation2 + $0x3c50] ss:$36 sps:$4 sm:$0xff]  }
 0x7ed   :  { %19670 = vmatpush3.bf16.msra.mxu0 %v22916_v29 }
 0x7ee   :  { %19692 = vmatpush3.bf16.msra.mxu1 %v22917_v41  ;;  %19699 = vmatprep.subr.bf16.mxu0 %v22918_v43  ;;  %v22958_v43 = vld [vmem:[#allocation2 + $0x39c8] ss:$36 sps:$4 sm:$0xff]  }
 0x7ef   :  { %19721 = vmatprep.subr.bf16.mxu1 %v22919_v23  ;;  %v22959_v23 = vld [vmem:[#allocation2 + $0x3e48] ss:$36 sps:$4 sm:$0xff]  }
 0x7f0   :  { %16119 = vmatmul.mubr.bf16.vlgmr.msra.gmra.mxu0 %v23317_v12 }
 0x7f1   :  { %v15677_v61 = vpop.f32.mrf.mxu1  ;;  %16159 = vmatmul.mubr.bf16.vlgmr.msra.gmra.mxu1 %v23324_v40  ;;  %19700 = vmatpush3.bf16.msra.mxu0 %v22920_v63  ;;  %v22928_v40 = vld [vmem:[#allocation2 + $0x2e88] ss:$36 sps:$4 sm:$0xff]  }
 0x7f2   :  { %v23748_v57 = vadd.f32 %v15677_v61, %v23738_v39  ;;  %19722 = vmatpush3.bf16.msra.mxu1 %v22921_v28  ;;  %19701 = vmatprep.subr.bf16.mxu0 %v22922_v30  ;;  %v22931_v39 = vld [vmem:[#allocation2 + $0x3500] ss:$36 sps:$4 sm:$0xff]   ;;  %v22961_v61 = vld [vmem:[#allocation2 + $0x3c08] ss:$36 sps:$4 sm:$0xff]  }
 0x7f3   :  { %v15679_v2 = vpop.f32.mrf.mxu1  ;;  %19723 = vmatprep.subr.bf16.mxu1 %v22923_v5  ;;  %16198 = vmatprep.mubr.bf16.mxu0 %v23320_v25  ;;  %v22935_v25 = vld [vmem:[#allocation2 + $0x34b8] ss:$36 sps:$4 sm:$0xff]   ;;  %v22960_v5 = vld [vmem:[#allocation2 + $0x3788] ss:$36 sps:$4 sm:$0xff]  }
 0x7f4   :  { %v23751_v48 = vadd.f32 %v15679_v2, %v23741_v13  ;;  %16238 = vmatprep.mubr.bf16.mxu1 %v23328_v33  ;;  %v22936_v33 = vld [vmem:[#allocation2 + $0x2df8] ss:$36 sps:$4 sm:$0xff]   ;;  %v22938_v13 = vld [vmem:[#allocation2 + $0x2ff0] ss:$36 sps:$4 sm:$0xff]  }
 0x7f5   :  { %v15681_v12 = vpop.f32.mrf.mxu1  ;;  %19702 = vmatpush3.bf16.msra.mxu0 %v22924_v4  ;;  %v22962_v4 = vld [vmem:[#allocation2 + $0x3980] ss:$36 sps:$4 sm:$0xff]  }
 0x7f6   :  { %19724 = vmatpush3.bf16.msra.mxu1 %v22925_v6  ;;  %19703 = vmatprep.subr.bf16.mxu0 %v22926_v62  ;;  %v22963_v6 = vld [vmem:[#allocation2 + $0x3e00] ss:$36 sps:$4 sm:$0xff]   ;;  %v22969_v12 = vld [vmem:[#allocation2 + $0x3b78] ss:$36 sps:$4 sm:$0xff]  }
 0x7f7   :  { %19725 = vmatprep.subr.bf16.mxu1 %v22927_v38  ;;  %v15682_v52 = vpop.f32.mrf.mxu1  ;;  %v22964_v62 = vld [vmem:[#allocation2 + $0x3740] ss:$36 sps:$4 sm:$0xff]   ;;  %v22967_v38 = vld [vmem:[#allocation2 + $0x3db8] ss:$36 sps:$4 sm:$0xff]  }
 0x7f8   :  { %v22974_v52 = vld [vmem:[#allocation2 + $0x38a8] ss:$36 sps:$4 sm:$0xff]  }
 0x7f9   :  { %19704 = vmatpush3.bf16.msra.mxu0 %v22928_v40  ;;  %v22970_v40 = vld [vmem:[#allocation2 + $0x38f0] ss:$36 sps:$4 sm:$0xff]  }
 0x7fa   :  { %19726 = vmatpush3.bf16.msra.mxu1 %v22929_v42  ;;  %19705 = vmatprep.subr.bf16.mxu0 %v22930_v8  ;;  %v22971_v42 = vld [vmem:[#allocation2 + $0x3d70] ss:$36 sps:$4 sm:$0xff]  }
 0x7fb   :  { %19727 = vmatprep.subr.bf16.mxu1 %v22931_v39  ;;  %v22972_v8 = vld [vmem:[#allocation2 + $0x36b0] ss:$36 sps:$4 sm:$0xff]  }
 0x7fc   :  { %v22973_v39 = vld [vmem:[#allocation2 + $0x3b30] ss:$36 sps:$4 sm:$0xff]  }
 0x7fd   :  { %19706 = vmatpush3.bf16.msra.mxu0 %v22932_v51  ;;  %v22975_v51 = vld [vmem:[#allocation2 + $0x3d28] ss:$36 sps:$4 sm:$0xff]  }
 0x7fe   :  { %19728 = vmatpush3.bf16.msra.mxu1 %v22933_v7  ;;  %19707 = vmatprep.subr.bf16.mxu0 %v22934_v11  ;;  %v22976_v7 = vld [vmem:[#allocation2 + $0x3668] ss:$36 sps:$4 sm:$0xff]  }
 0x7ff   :  { %19729 = vmatprep.subr.bf16.mxu1 %v22935_v25  ;;  %v22977_v11 = vld [vmem:[#allocation2 + $0x3ae8] ss:$36 sps:$4 sm:$0xff]   ;;  %v22978_v25 = vld [vmem:[#allocation2 + $0x3860] ss:$36 sps:$4 sm:$0xff]  }
 0x801   :  { %19708 = vmatpush3.bf16.msra.mxu0 %v22936_v33  ;;  %v22979_v33 = vld [vmem:[#allocation2 + $0x3ce0] ss:$36 sps:$4 sm:$0xff]  }
 0x802   :  { %19730 = vmatpush3.bf16.msra.mxu1 %v22937_v9  ;;  %19709 = vmatprep.subr.bf16.mxu0 %v22938_v13  ;;  %v22980_v9 = vld [vmem:[#allocation2 + $0x3620] ss:$36 sps:$4 sm:$0xff]  }
 0x803   :  { %19731 = vmatprep.subr.bf16.mxu1 %v22939_v15  ;;  %v22981_v13 = vld [vmem:[#allocation2 + $0x3aa0] ss:$36 sps:$4 sm:$0xff]   ;;  %v22982_v15 = vld [vmem:[%s24070_s3 + $0x78] sm:$0xff]  }
 0x805   :  { %19710 = vmatpush3.bf16.msra.mxu0 %v22940_v27  ;;  %v16367_v27 = vmax.f32 %v23435_v1, 0.0 }
 0x806   :  { %19732 = vmatpush3.bf16.msra.mxu1 %v22941_v14  ;;  %19711 = vmatprep.subr.bf16.mxu0 %v22942_v19  ;;  %v22983_v14 = vld [vmem:[#allocation2 + $0x4118] ss:$36 sps:$4 sm:$0xff]  }
 0x807   :  { %19733 = vmatprep.subr.bf16.mxu1 %v22943_v53  ;;  %v22984_v19 = vld [vmem:[%s24070_s3 + $0x38] sm:$0xff]   ;;  %v23126_v53 = vmov 0.0  }
 0x809   :  { %19712 = vmatpush3.bf16.msra.mxu0 %v22944_v60  ;;  %v22985_v60 = vld [vmem:[%s24070_s3 + $0x70] sm:$0xff]  }
 0x80a   :  { %19734 = vmatpush3.bf16.msra.mxu1 %v22945_v50  ;;  %19713 = vmatprep.subr.bf16.mxu0 %v22946_v56  ;;  %v16376_v50 = vpack.c.bf16 %v16367_v27, %v16367_v27  ;;  %v23015_v27 = vld [vmem:[%s24070_s3 + $0x168] sm:$0xff]  }
 0x80b   :  { %19735 = vmatprep.subr.bf16.mxu1 %v22947_v26  ;;  %v22986_v26 = vld [vmem:[#allocation2 + $0x40d0] ss:$36 sps:$4 sm:$0xff]  }
 0x80d   :  { %19714 = vmatpush3.bf16.msra.mxu0 %v22948_v22  ;;  %v22987_v22 = vld [vmem:[%s24070_s3 + $0x30] sm:$0xff]  }
 0x80e   :  { %19736 = vmatpush3.bf16.msra.mxu1 %v22949_v32  ;;  %19743 = vmatprep.subr.bf16.mxu0 %v22950_v47  ;;  %v17308_v32 = vld [vmem:[%s24069_s2 + $0x8] ss:$0 sm:$0xff] }
 0x80f   :  { %19765 = vmatprep.subr.bf16.mxu1 %v22951_v31 }
 0x810   :  { %v15718_v0 = vpop.f32.mrf.mxu0  ;;  %16199 = vmatmul.mubr.bf16.vlgmr.msra.gmra.mxu0 %v23353_v20 }
 0x811   :  { %16239 = vmatmul.mubr.bf16.vlgmr.msra.gmra.mxu1 %v23360_v36  ;;  %v15759_v54 = vpop.f32.mrf.mxu1  ;;  %v15719_v59 = vadd.f32 %v15718_v0, %v23748_v57  ;;  %19744 = vmatpush3.bf16.msra.mxu0 %v22952_v58  ;;  %v22989_v0 = vld [vmem:[#allocation2 + $0x4088] ss:$36 sps:$4 sm:$0xff]  }
 0x812   :  { %19766 = vmatpush3.bf16.msra.mxu1 %v22953_v55  ;;  %v15720_v29 = vpop.f32.mrf.mxu0  ;;  %19745 = vmatprep.subr.bf16.mxu0 %v22954_v10 }
 0x813   :  { %v15761_v41 = vpop.f32.mrf.mxu1  ;;  %19767 = vmatprep.subr.bf16.mxu1 %v22955_v3  ;;  %v15721_v63 = vadd.f32 %v15720_v29, %v23751_v48  ;;  %v23759_v28 = vadd.f32 %v15759_v54, %v15719_v59  ;;  %16278 = vmatprep.mubr.bf16.mxu0 %v23356_v34  ;;  %v22965_v34 = vld [vmem:[#allocation2 + $0x3bc0] ss:$36 sps:$4 sm:$0xff]   ;;  %v22968_v48 = vld [vmem:[#allocation2 + $0x36f8] ss:$36 sps:$4 sm:$0xff]   ;;  %v22990_v54 = vld [vmem:[%s24070_s3 + $0x28] sm:$0xff]  }
 0x814   :  { %16318 = vmatprep.mubr.bf16.mxu1 %v23364_v44  ;;  %v15722_v20 = vpop.f32.mrf.mxu0  ;;  %v22966_v44 = vld [vmem:[#allocation2 + $0x3938] ss:$36 sps:$4 sm:$0xff]  }
 0x815   :  { %v15763_v36 = vpop.f32.mrf.mxu1  ;;  %v23763_v30 = vadd.f32 %v15761_v41, %v15721_v63  ;;  %19746 = vmatpush3.bf16.msra.mxu0 %v22956_v21  ;;  %v22991_v21 = vld [vmem:[%s24070_s3 + $0x60] sm:$0xff]   ;;  %v22995_v63 = vld [vmem:[#allocation2 + $0x3ff8] ss:$36 sps:$4 sm:$0xff]  }
 0x816   :  { %19768 = vmatpush3.bf16.msra.mxu1 %v22957_v17  ;;  %v15723_v57 = vpop.f32.mrf.mxu0  ;;  %19747 = vmatprep.subr.bf16.mxu0 %v22958_v43  ;;  %v22992_v41 = vld [vmem:[#allocation2 + $0x4040] ss:$36 sps:$4 sm:$0xff]   ;;  %v22996_v20 = vld [vmem:[%s24070_s3 + $0x18] sm:$0xff]   ;;  %v22997_v36 = vld [vmem:[%s24070_s3 + $0x50] sm:$0xff]  }
 0x817   :  { %19769 = vmatprep.subr.bf16.mxu1 %v22959_v23  ;;  %v15764_v2 = vpop.f32.mrf.mxu1  ;;  %v22993_v43 = vld [vmem:[%s24070_s3 + $0x20] sm:$0xff]   ;;  %v22994_v23 = vld [vmem:[%s24070_s3 + $0x58] sm:$0xff]   ;;  %v23000_v57 = vld [vmem:[%s24070_s3 + $0x48] sm:$0xff]  }
 0x818   :  { %v23003_v2 = vld [vmem:[%s24070_s3 + $0x40] sm:$0xff]  }
 0x819   :  { %19748 = vmatpush3.bf16.msra.mxu0 %v22960_v5  ;;  %v22998_v5 = vld [vmem:[#allocation2 + $0x3fb0] ss:$36 sps:$4 sm:$0xff]  }
 0x81a   :  { %19770 = vmatpush3.bf16.msra.mxu1 %v22961_v61  ;;  %19749 = vmatprep.subr.bf16.mxu0 %v22962_v4  ;;  %v22999_v61 = vld [vmem:[%s24070_s3 + $0x10] sm:$0xff]   ;;  %v23001_v4 = vld [vmem:[#allocation2 + $0x3f68] ss:$36 sps:$4 sm:$0xff]  }
 0x81b   :  { %19771 = vmatprep.subr.bf16.mxu1 %v22963_v6  ;;  %v23002_v6 = vld [vmem:[%s24070_s3 + $0x8] sm:$0xff]  }
 0x81d   :  { %19750 = vmatpush3.bf16.msra.mxu0 %v22964_v62  ;;  %v23004_v62 = vld [vmem:[#allocation2 + $0x3f20] ss:$36 sps:$4 sm:$0xff]  }
 0x81e   :  { %19772 = vmatpush3.bf16.msra.mxu1 %v22965_v34  ;;  %19751 = vmatprep.subr.bf16.mxu0 %v22966_v44  ;;  %v23005_v34 = vld [vmem:[%s24070_s3] sm:$0xff]   ;;  %v16366_v44 = vmax.f32 %v23432_v46, 0.0  ;;  %v23008_v46 = vld [vmem:[%s24070_s3 + $0xb8] sm:$0xff]  }
 0x81f   :  { %19773 = vmatprep.subr.bf16.mxu1 %v22967_v38  ;;  %v23006_v38 = vld [vmem:[%s24070_s3 + $0xf8] sm:$0xff]  }
 0x821   :  { %19752 = vmatpush3.bf16.msra.mxu0 %v22968_v48  ;;  %v23007_v48 = vld [vmem:[%s24070_s3 + $0x178] sm:$0xff]  }
 0x822   :  { %19774 = vmatpush3.bf16.msra.mxu1 %v22969_v12  ;;  %19753 = vmatprep.subr.bf16.mxu0 %v22970_v40  ;;  %v16369_v12 = vmax.f32 %v23553_v49, 0.0  ;;  %v16371_v40 = vmax.f32 %v23633_v24, 0.0  ;;  %v23010_v49 = vld [vmem:[%s24070_s3 + $0xf0] sm:$0xff]  }
 0x823   :  { %19775 = vmatprep.subr.bf16.mxu1 %v22971_v42  ;;  %v16375_v42 = vpack.c.bf16 %v16366_v44, %v16366_v44  ;;  %v23011_v24 = vld [vmem:[%s24070_s3 + $0x170] sm:$0xff]  }
 0x825   :  { %19754 = vmatpush3.bf16.msra.mxu0 %v22972_v8  ;;  %v23009_v8 = vld [vmem:[%s24070_s3 + $0x138] sm:$0xff]  }
 0x826   :  { %19776 = vmatpush3.bf16.msra.mxu1 %v22973_v39  ;;  %19755 = vmatprep.subr.bf16.mxu0 %v22974_v52  ;;  %v16378_v39 = vpack.c.bf16 %v16369_v12, %v16369_v12  ;;  %v16380_v52 = vpack.c.bf16 %v16371_v40, %v16371_v40 }
 0x827   :  { %19777 = vmatprep.subr.bf16.mxu1 %v22975_v51 }
 0x829   :  { %19756 = vmatpush3.bf16.msra.mxu0 %v22976_v7 }
 0x82a   :  { %19778 = vmatpush3.bf16.msra.mxu1 %v22977_v11  ;;  %19757 = vmatprep.subr.bf16.mxu0 %v22978_v25  ;;  %v23012_v11 = vld [vmem:[%s24070_s3 + $0xb0] sm:$0xff]  }
 0x82b   :  { %19779 = vmatprep.subr.bf16.mxu1 %v22979_v33 }
 0x82d   :  { %19758 = vmatpush3.bf16.msra.mxu0 %v22980_v9  ;;  %v23013_v9 = vld [vmem:[%s24070_s3 + $0x130] sm:$0xff]  }
 0x82e   :  { %19780 = vmatpush3.bf16.msra.mxu1 %v22981_v13  ;;  %19902 = vmatprep.subr.bf16.mxu0 %v23126_v53 }
 0x82f   :  { %19796 = vmatprep.subr.bf16.mxu1 %v22982_v15 }
 0x830   :  { %v19495_v56 = vpop.f32.mrf.mxu0  ;;  %16279 = vmatmul.mubr.bf16.vlgmr.msra.gmra.mxu0 %v23378_v45  ;;  %v22988_v45 = vld [vmem:[%s24070_s3 + $0x68] sm:$0xff]  }
 0x831   :  { %16319 = vmatmul.mubr.bf16.vlgmr.msra.gmra.mxu1 %v23382_v35  ;;  %v19517_v1 = vpop.f32.mrf.mxu1  ;;  %19903 = vmatpush3.bf16.msra.mxu0 %v22983_v14 }
 0x832   :  { %19797 = vmatpush3.bf16.msra.mxu1 %v22984_v19  ;;  %16999 = vmatprep.mubr.bf16.mxu1 %v16376_v50  ;;  %v19496_v47 = vpop.f32.mrf.mxu0  ;;  %v23016_v50 = vld [vmem:[%s24070_s3 + $0xa8] sm:$0xff]  }
 0x833   :  { %v19518_v31 = vpop.f32.mrf.mxu1  ;;  %19904 = vmatprep.subr.bf16.mxu0 %v23126_v53  ;;  %v19497_v35 = vadd.f32 %v19496_v47, %v19495_v56  ;;  %19798 = vmatprep.subr.bf16.mxu1 %v22985_v60  ;;  %v23019_v47 = vld [vmem:[%s24070_s3 + $0x160] sm:$0xff]  }
 0x834   :  { %v19519_v58 = vadd.f32 %v19518_v31, %v19517_v1  ;;  %19918 = vmatprep.mubr.msk.bf16.mxu0 %vm23127_vm0, %v23126_v53  ;;  %v19498_v55 = vpop.f32.mrf.mxu0  ;;  %v23017_v1 = vld [vmem:[%s24070_s3 + $0x128] sm:$0xff]   ;;  %v23020_v31 = vld [vmem:[%s24070_s3 + $0xa0] sm:$0xff]  }
 0x835   :  { %v19520_v10 = vpop.f32.mrf.mxu1  ;;  %v15801_v3 = vadd.f32 %v19497_v35, %v17308_v32  ;;  %19905 = vmatpush3.bf16.msra.mxu0 %v22986_v26  ;;  %v23018_v26 = vld [vmem:[%s24070_s3 + $0xe0] sm:$0xff]   ;;  %v23022_v35 = vld [vmem:[%s24070_s3 + $0xd8] sm:$0xff]  }
 0x836   :  { %19799 = vmatpush3.bf16.msra.mxu1 %v22987_v22  ;;  %v19499_v59 = vpop.f32.mrf.mxu0  ;;  %19906 = vmatprep.subr.bf16.mxu0 %v23126_v53  ;;  %v23024_v55 = vld [vmem:[%s24070_s3 + $0x98] sm:$0xff]  }
 0x837   :  { %19800 = vmatprep.subr.bf16.mxu1 %v22988_v45  ;;  %v19521_v17 = vpop.f32.mrf.mxu1  ;;  %v23797_v29 = vadd.f32 %v19519_v58, %v15801_v3  ;;  %v23021_v45 = vld [vmem:[%s24070_s3 + $0x120] sm:$0xff]   ;;  %v23023_v58 = vld [vmem:[%s24070_s3 + $0x158] sm:$0xff]   ;;  %v23026_v3 = vld [vmem:[%s24070_s3 + $0xd0] sm:$0xff]  }
 0x838   :  { %v23025_v10 = vld [vmem:[%s24070_s3 + $0x118] sm:$0xff]   ;;  %v23029_v59 = vld [vmem:[%s24070_s3 + $0x110] sm:$0xff]   ;;  %v23031_v17 = vld [vmem:[%s24070_s3 + $0x148] sm:$0xff]  }
 0x839   :  { %19907 = vmatpush3.bf16.msra.mxu0 %v22989_v0  ;;  %v23027_v0 = vld [vmem:[%s24070_s3 + $0x150] sm:$0xff]  }
 0x83a   :  { %19801 = vmatpush3.bf16.msra.mxu1 %v22990_v54  ;;  %19908 = vmatprep.subr.bf16.mxu0 %v23126_v53  ;;  %v23028_v54 = vld [vmem:[%s24070_s3 + $0x90] sm:$0xff]  }
 0x83b   :  { %19802 = vmatprep.subr.bf16.mxu1 %v22991_v21  ;;  %v23030_v21 = vld [vmem:[%s24070_s3 + $0xc8] sm:$0xff]  }
 0x83d   :  { %19909 = vmatpush3.bf16.msra.mxu0 %v22992_v41  ;;  %v23033_v41 = vld [vmem:[%s24070_s3 + $0x108] sm:$0xff]  }
 0x83e   :  { %19803 = vmatpush3.bf16.msra.mxu1 %v22993_v43  ;;  %19910 = vmatprep.subr.bf16.mxu0 %v23126_v53  ;;  %v23034_v43 = vld [vmem:[%s24070_s3 + $0xc0] sm:$0xff]  }
 0x83f   :  { %19804 = vmatprep.subr.bf16.mxu1 %v22994_v23  ;;  %v23035_v23 = vld [vmem:[%s24070_s3 + $0x140] sm:$0xff]  }
 0x841   :  { %19911 = vmatpush3.bf16.msra.mxu0 %v22995_v63  ;;  %v23036_v63 = vld [vmem:[%s24070_s3 + $0x80] sm:$0xff]  }
 0x842   :  { %19805 = vmatpush3.bf16.msra.mxu1 %v22996_v20  ;;  %19912 = vmatprep.subr.bf16.mxu0 %v23126_v53  ;;  %v16368_v20 = vmax.f32 %v23549_v37, 0.0  ;;  %v23039_v37 = vld [vmem:[%s24070_s3 + $0x1b8] sm:$0xff]  }
 0x843   :  { %19806 = vmatprep.subr.bf16.mxu1 %v22997_v36  ;;  %v23037_v36 = vld [vmem:[%s24070_s3 + $0x100] sm:$0xff]  }
 0x845   :  { %19913 = vmatpush3.bf16.msra.mxu0 %v22998_v5  ;;  %v23038_v5 = vld [vmem:[%s24070_s3 + $0x1f8] sm:$0xff]  }
 0x846   :  { %19807 = vmatpush3.bf16.msra.mxu1 %v22999_v61  ;;  %19914 = vmatprep.subr.bf16.mxu0 %v23126_v53  ;;  %v16370_v61 = vmax.f32 %v23630_v16, 0.0 }
 0x847   :  { %19808 = vmatprep.subr.bf16.mxu1 %v23000_v57  ;;  %v16373_v57 = vmax.f32 %v23763_v30, 0.0  ;;  %v23041_v30 = vld [vmem:[%s24070_s3 + $0x1b0] sm:$0xff]  }
 0x849   :  { %19915 = vmatpush3.bf16.msra.mxu0 %v23001_v4  ;;  %v16377_v4 = vpack.c.bf16 %v16368_v20, %v16368_v20 }
 0x84a   :  { %19809 = vmatpush3.bf16.msra.mxu1 %v23002_v6  ;;  %19916 = vmatprep.subr.bf16.mxu0 %v23126_v53  ;;  %v23040_v6 = vld [vmem:[%s24070_s3 + $0x1f0] sm:$0xff]  }
 0x84b   :  { %19810 = vmatprep.subr.bf16.mxu1 %v23003_v2  ;;  %v16379_v2 = vpack.c.bf16 %v16370_v61, %v16370_v61 }
 0x84d   :  { %19917 = vmatpush3.bf16.msra.mxu0 %v23004_v62  ;;  %v16382_v62 = vpack.c.bf16 %v16373_v57, %v16373_v57 }
 0x84e   :  { %19811 = vmatpush3.bf16.msra.mxu1 %v23005_v34  ;;  %19818 = vmatprep.subr.bf16.mxu0 %v23006_v38 }
 0x84f   :  { %19840 = vmatprep.subr.bf16.mxu1 %v23007_v48  ;;  %v23042_v48 = vld [vmem:[%s24070_s3 + $0x1e8] sm:$0xff]  }
 0x850   :  { %v19539_v51 = vpop.f32.mrf.mxu0  ;;  %19919 = vmatmul.mubr.bf16.vlgmr.msra.gmra.mxu0 %v23398_v18  ;;  %v23014_v18 = vld [vmem:[%s24070_s3 + $0xe8] sm:$0xff]  }
 0x851   :  { %17000 = vmatmul.mubr.bf16.vlgmr.msra.gmra.mxu1 %v16375_v42  ;;  %v19561_v7 = vpop.f32.mrf.mxu1  ;;  %19819 = vmatpush3.bf16.msra.mxu0 %v23008_v46 }
 0x852   :  { %17039 = vmatprep.mubr.bf16.mxu0 %v16378_v39  ;;  %19841 = vmatpush3.bf16.msra.mxu1 %v23009_v8  ;;  %v19540_v25 = vpop.f32.mrf.mxu0  ;;  %v23043_v39 = vld [vmem:[%s24070_s3 + $0x1a8] sm:$0xff]  }
 0x853   :  { %17079 = vmatprep.mubr.bf16.mxu1 %v16380_v52  ;;  %v19562_v33 = vpop.f32.mrf.mxu1  ;;  %v19541_v13 = vadd.f32 %v19540_v25, %v19539_v51  ;;  %19820 = vmatprep.subr.bf16.mxu0 %v23010_v49  ;;  %v23054_v51 = vld [vmem:[%s24070_s3 + $0x238] sm:$0xff]   ;;  %v23045_v25 = vld [vmem:[%s24070_s3 + $0x1a0] sm:$0xff]  }
 0x854   :  { %v19563_v15 = vadd.f32 %v19562_v33, %v19561_v7  ;;  %19842 = vmatprep.subr.bf16.mxu1 %v23011_v24  ;;  %v19542_v14 = vpop.f32.mrf.mxu0  ;;  %v23044_v24 = vld [vmem:[%s24070_s3 + $0x1e0] sm:$0xff]   ;;  %v23046_v33 = vld [vmem:[%s24070_s3 + $0x1d8] sm:$0xff]  }
 0x855   :  { %v19564_v19 = vpop.f32.mrf.mxu1  ;;  %v15881_v60 = vadd.f32 %v19541_v13, %v23797_v29  ;;  %19821 = vmatpush3.bf16.msra.mxu0 %v23012_v11  ;;  %v23032_v29 = vld [vmem:[%s24070_s3 + $0x88] sm:$0xff]   ;;  %v23055_v11 = vld [vmem:[%s24070_s3 + $0x230] sm:$0xff]  }
 0x856   :  { %19843 = vmatpush3.bf16.msra.mxu1 %v23013_v9  ;;  %v19543_v56 = vpop.f32.mrf.mxu0  ;;  %19822 = vmatprep.subr.bf16.mxu0 %v23014_v18  ;;  %v23056_v9 = vld [vmem:[%s24070_s3 + $0x228] sm:$0xff]   ;;  %v23047_v18 = vld [vmem:[%s24070_s3 + $0x198] sm:$0xff]   ;;  %v23048_v13 = vld [vmem:[%s24070_s3 + $0x1d0] sm:$0xff]  }
 0x857   :  { %v19565_v22 = vpop.f32.mrf.mxu1  ;;  %v23875_v32 = vadd.f32 %v19563_v15, %v15881_v60  ;;  %19844 = vmatprep.subr.bf16.mxu1 %v23015_v27  ;;  %v23057_v15 = vld [vmem:[%s24070_s3 + $0x220] sm:$0xff]   ;;  %v23049_v27 = vld [vmem:[%s24070_s3 + $0x190] sm:$0xff]   ;;  %v23050_v14 = vld [vmem:[%s24070_s3 + $0x1c8] sm:$0xff]  }
 0x858   :  { %v23058_v19 = vld [vmem:[%s24070_s3 + $0x218] sm:$0xff]   ;;  %v23051_v60 = vld [vmem:[%s24070_s3 + $0x188] sm:$0xff]   ;;  %v23059_v56 = vld [vmem:[%s24070_s3 + $0x210] sm:$0xff]  }
 0x859   :  { %19823 = vmatpush3.bf16.msra.mxu0 %v23016_v50  ;;  %v23052_v50 = vld [vmem:[%s24070_s3 + $0x1c0] sm:$0xff]  }
 0x85a   :  { %19845 = vmatpush3.bf16.msra.mxu1 %v23017_v1  ;;  %19824 = vmatprep.subr.bf16.mxu0 %v23018_v26  ;;  %v23053_v1 = vld [vmem:[%s24070_s3 + $0x180] sm:$0xff]   ;;  %v16372_v26 = vmax.f32 %v23759_v28, 0.0 }
 0x85b   :  { %19846 = vmatprep.subr.bf16.mxu1 %v23019_v47 }
 0x85c   :  { %v16381_v22 = vpack.c.bf16 %v16372_v26, %v16372_v26 }
 0x85d   :  { %19825 = vmatpush3.bf16.msra.mxu0 %v23020_v31 }
 0x85e   :  { %19847 = vmatpush3.bf16.msra.mxu1 %v23021_v45  ;;  %19826 = vmatprep.subr.bf16.mxu0 %v23022_v35 }
 0x85f   :  { %19848 = vmatprep.subr.bf16.mxu1 %v23023_v58 }
 0x861   :  { %19827 = vmatpush3.bf16.msra.mxu0 %v23024_v55  ;;  %v23061_v55 = vld [vmem:[%s24070_s3 + $0x200] sm:$0xff]  }
 0x862   :  { %19849 = vmatpush3.bf16.msra.mxu1 %v23025_v10  ;;  %19828 = vmatprep.subr.bf16.mxu0 %v23026_v3 }
 0x863   :  { %19850 = vmatprep.subr.bf16.mxu1 %v23027_v0 }
 0x865   :  { %19829 = vmatpush3.bf16.msra.mxu0 %v23028_v54 }
 0x866   :  { %19851 = vmatpush3.bf16.msra.mxu1 %v23029_v59  ;;  %19830 = vmatprep.subr.bf16.mxu0 %v23030_v21 }
 0x867   :  { %19852 = vmatprep.subr.bf16.mxu1 %v23031_v17 }
 0x869   :  { %19831 = vmatpush3.bf16.msra.mxu0 %v23032_v29 }
 0x86a   :  { %19853 = vmatpush3.bf16.msra.mxu1 %v23033_v41  ;;  %19832 = vmatprep.subr.bf16.mxu0 %v23034_v43 }
 0x86b   :  { %19854 = vmatprep.subr.bf16.mxu1 %v23035_v23 }
 0x86d   :  { %19833 = vmatpush3.bf16.msra.mxu0 %v23036_v63 }
 0x86e   :  { %19855 = vmatpush3.bf16.msra.mxu1 %v23037_v36  ;;  %19862 = vmatprep.subr.bf16.mxu0 %v23038_v5 }
 0x86f   :  { %19922 = vmatprep.subr.bf16.mxu1 %v23126_v53 }
 0x870   :  { %v19583_v16 = vpop.f32.mrf.mxu0  ;;  %17040 = vmatmul.mubr.bf16.vlgmr.msra.gmra.mxu0 %v16377_v4 }
 0x871   :  { %v19605_v34 = vpop.f32.mrf.mxu1  ;;  %17080 = vmatmul.mubr.bf16.vlgmr.msra.gmra.mxu1 %v16379_v2  ;;  %19863 = vmatpush3.bf16.msra.mxu0 %v23039_v37 }
 0x872   :  { %17119 = vmatprep.mubr.bf16.mxu0 %v16382_v62  ;;  %v19584_v44 = vpop.f32.mrf.mxu0  ;;  %19864 = vmatprep.subr.bf16.mxu0 %v23040_v6 }
 0x873   :  { %v19606_v38 = vpop.f32.mrf.mxu1  ;;  %v19585_v12 = vadd.f32 %v19584_v44, %v19583_v16  ;;  %19938 = vmatprep.mubr.msk.bf16.mxu1 %vm23127_vm0, %v23126_v53  ;;  %19923 = vmatpush3.bf16.msra.mxu1 %v23054_v51 }
 0x874   :  { %v19607_v40 = vadd.f32 %v19606_v38, %v19605_v34  ;;  %v19586_v46 = vpop.f32.mrf.mxu0  ;;  %19924 = vmatprep.subr.bf16.mxu1 %v23126_v53  ;;  %v23062_v38 = vld [vmem:[%s24072_s5 + $0x38] sm:$0xff]  }
 0x875   :  { %v19608_v42 = vpop.f32.mrf.mxu1  ;;  %v15961_v8 = vadd.f32 %v19585_v12, %v23875_v32  ;;  %19865 = vmatpush3.bf16.msra.mxu0 %v23041_v30  ;;  %v23060_v32 = vld [vmem:[%s24070_s3 + $0x208] sm:$0xff]   ;;  %v23066_v46 = vld [vmem:[%s24072_s5 + $0x18] sm:$0xff]  }
 0x876   :  { %v19587_v49 = vpop.f32.mrf.mxu0  ;;  %19866 = vmatprep.subr.bf16.mxu0 %v23042_v48  ;;  %v23063_v48 = vld [vmem:[%s24072_s5 + $0x30] sm:$0xff]   ;;  %v23064_v12 = vld [vmem:[%s24072_s5 + $0x28] sm:$0xff]  }
 0x877   :  { %v19609_v52 = vpop.f32.mrf.mxu1  ;;  %v16001_v7 = vadd.f32 %v19607_v40, %v15961_v8  ;;  %19925 = vmatpush3.bf16.msra.mxu1 %v23055_v11  ;;  %v23065_v40 = vld [vmem:[%s24072_s5 + $0x20] sm:$0xff]   ;;  %v23067_v42 = vld [vmem:[%s24072_s5 + $0x10] sm:$0xff]  }
 0x878   :  { %19926 = vmatprep.subr.bf16.mxu1 %v23126_v53 }
 0x879   :  { %19867 = vmatpush3.bf16.msra.mxu0 %v23043_v39 }
 0x87a   :  { %19868 = vmatprep.subr.bf16.mxu0 %v23044_v24 }
 0x87b   :  { %19927 = vmatpush3.bf16.msra.mxu1 %v23056_v9 }
 0x87c   :  { %19928 = vmatprep.subr.bf16.mxu1 %v23126_v53 }
 0x87d   :  { %19869 = vmatpush3.bf16.msra.mxu0 %v23045_v25 }
 0x87e   :  { %19870 = vmatprep.subr.bf16.mxu0 %v23046_v33 }
 0x87f   :  { %19929 = vmatpush3.bf16.msra.mxu1 %v23057_v15 }
 0x880   :  { %19930 = vmatprep.subr.bf16.mxu1 %v23126_v53 }
 0x881   :  { %19871 = vmatpush3.bf16.msra.mxu0 %v23047_v18 }
 0x882   :  { %19872 = vmatprep.subr.bf16.mxu0 %v23048_v13 }
 0x883   :  { %19931 = vmatpush3.bf16.msra.mxu1 %v23058_v19 }
 0x884   :  { %19932 = vmatprep.subr.bf16.mxu1 %v23126_v53 }
 0x885   :  { %19873 = vmatpush3.bf16.msra.mxu0 %v23049_v27 }
 0x886   :  { %19874 = vmatprep.subr.bf16.mxu0 %v23050_v14 }
 0x887   :  { %19933 = vmatpush3.bf16.msra.mxu1 %v23059_v56 }
 0x888   :  { %19934 = vmatprep.subr.bf16.mxu1 %v23126_v53 }
 0x889   :  { %19875 = vmatpush3.bf16.msra.mxu0 %v23051_v60 }
 0x88a   :  { %19876 = vmatprep.subr.bf16.mxu0 %v23052_v50 }
 0x88b   :  { %19935 = vmatpush3.bf16.msra.mxu1 %v23060_v32 }
 0x88c   :  { %19936 = vmatprep.subr.bf16.mxu1 %v23126_v53 }
 0x88d   :  { %19877 = vmatpush3.bf16.msra.mxu0 %v23053_v1 }
 0x88e   :  { %19942 = vmatprep.subr.bf16.mxu0 %v23126_v53 }
 0x88f   :  { %19937 = vmatpush3.bf16.msra.mxu1 %v23061_v55 }
 0x890   :  { %v19627_v47 = vpop.f32.mrf.mxu0  ;;  %17120 = vmatmul.mubr.bf16.vlgmr.msra.gmra.mxu0 %v16381_v22 }
 0x891   :  { %v19649_v31 = vpop.f32.mrf.mxu1  ;;  %19958 = vmatprep.mubr.msk.bf16.mxu0 %vm23127_vm0, %v23126_v53  ;;  %19943 = vmatpush3.bf16.msra.mxu0 %v23062_v38  ;;  %v19470_v38 = vld [vmem:[%s24073_s6] ss:$0 sm:$0xff] }
 0x892   :  { %v19628_v28 = vpop.f32.mrf.mxu0  ;;  %19944 = vmatprep.subr.bf16.mxu0 %v23126_v53 }
 0x893   :  { %v19650_v45 = vpop.f32.mrf.mxu1  ;;  %v19629_v35 = vadd.f32 %v19628_v28, %v19627_v47 }
 0x894   :  { %v19651_v58 = vadd.f32 %v19650_v45, %v19649_v31  ;;  %v19630_v10 = vpop.f32.mrf.mxu0 }
 0x895   :  { %v19652_v3 = vpop.f32.mrf.mxu1  ;;  %v16041_v0 = vadd.f32 %v19629_v35, %v16001_v7  ;;  %19945 = vmatpush3.bf16.msra.mxu0 %v23063_v48  ;;  %v19397_v35 = vld [vmem:[%s24071_s4] ss:$0 sm:$0xff] }
 0x896   :  { %v19631_v54 = vpop.f32.mrf.mxu0  ;;  %19946 = vmatprep.subr.bf16.mxu0 %v23126_v53 }
 0x897   :  { %v19653_v59 = vpop.f32.mrf.mxu1  ;;  %v16081_v21 = vadd.f32 %v19651_v58, %v16041_v0 }
 0x899   :  { %19947 = vmatpush3.bf16.msra.mxu0 %v23064_v12 }
 0x89a   :  { %19948 = vmatprep.subr.bf16.mxu0 %v23126_v53 }
 0x89d   :  { %19949 = vmatpush3.bf16.msra.mxu0 %v23065_v40 }
 0x89e   :  { %19950 = vmatprep.subr.bf16.mxu0 %v23126_v53 }
 0x8a1   :  { %19951 = vmatpush3.bf16.msra.mxu0 %v23066_v46 }
 0x8a2   :  { %19952 = vmatprep.subr.bf16.mxu0 %v23126_v53 }
 0x8a5   :  { %19953 = vmatpush3.bf16.msra.mxu0 %v23067_v42 }
 0x8a6   :  { %19954 = vmatprep.subr.bf16.mxu0 %v23126_v53 }
 0x8b0   :  { %v19671_v17 = vpop.f32.mrf.mxu0 }
 0x8b1   :  { %v19693_v29 = vpop.f32.mrf.mxu1 }
 0x8b2   :  { %v19672_v41 = vpop.f32.mrf.mxu0 }
 0x8b3   :  { %v19694_v43 = vpop.f32.mrf.mxu1  ;;  %v19673_v23 = vadd.f32 %v19672_v41, %v19671_v17 }
 0x8b4   :  { %v19695_v63 = vadd.f32 %v19694_v43, %v19693_v29  ;;  %v19674_v20 = vpop.f32.mrf.mxu0 }
 0x8b5   :  { %v19696_v36 = vpop.f32.mrf.mxu1  ;;  %v16121_v5 = vadd.f32 %v19673_v23, %v16081_v21 }
 0x8b6   :  { %v19675_v61 = vpop.f32.mrf.mxu0 }
 0x8b7   :  { %v19697_v57 = vpop.f32.mrf.mxu1  ;;  %v16161_v37 = vadd.f32 %v19695_v63, %v16121_v5 }
 0x8d0   :  { %v19715_v4 = vpop.f32.mrf.mxu0 }
 0x8d1   :  { %v19737_v6 = vpop.f32.mrf.mxu1 }
 0x8d2   :  { %v19716_v2 = vpop.f32.mrf.mxu0 }
 0x8d3   :  { %v19738_v62 = vpop.f32.mrf.mxu1  ;;  %v19717_v25 = vadd.f32 %v19716_v2, %v19715_v4  ;;  %v23069_v4 = vld [vmem:[%s24072_s5] sm:$0xff]  }
 0x8d4   :  { %v19718_v16 = vpop.f32.mrf.mxu0  ;;  %v19739_v9 = vadd.f32 %v19738_v62, %v19737_v6 }
 0x8d5   :  { %v19740_v34 = vpop.f32.mrf.mxu1  ;;  %v16201_v33 = vadd.f32 %v19717_v25, %v16161_v37  ;;  %v23068_v37 = vld [vmem:[%s24072_s5 + $0x8] sm:$0xff]   ;;  %s23128_s5 = smov [#allocation5]  }
 0x8d6   :  { %v19719_v30 = vpop.f32.mrf.mxu0  ;;  %19955 = vmatpush3.bf16.msra.mxu0 %v23068_v37  ;;  %s17299_s6 = sshll.u32 %s23128_s5, 4  ;;  %s17300_s6 = int_to_ptr.vmem [resolvable:$true] %s17299_s6 }
 0x8d7   :  { %v19741_v44 = vpop.f32.mrf.mxu1  ;;  %v16241_v13 = vadd.f32 %v19739_v9, %v16201_v33  ;;  %19956 = vmatprep.subr.bf16.mxu0 %v23126_v53  ;;  %s23097_s30 = scalar_lea.vmem %s17300_s6, 32  ;;  %p23102_p6 = scmp.lt.s32.totalorder %s17300_s6, %s17300_s6 }
 0x8d8   :  { %p23098_p5 = scmp.ne.s32.totalorder %s17300_s6, %s23097_s30  ;;  %p23103_p7 = scmp.lt.s32.totalorder %s23097_s30, %s23097_s30 }
 0x8da   :  { %19957 = vmatpush3.bf16.msra.mxu0 %v23069_v4  ;;  %p23104_p8 = por %p23103_p7, %p23102_p6 }
 0x8dc   :  { %p23105_p9 = pnand %p23104_p8, %p23098_p5 }
 0x8f0   :  { %v19759_v8 = vpop.f32.mrf.mxu0 }
 0x8f1   :  { %v19781_v39 = vpop.f32.mrf.mxu1 }
 0x8f2   :  { %v19760_v49 = vpop.f32.mrf.mxu0 }
 0x8f3   :  { %v19782_v24 = vpop.f32.mrf.mxu1  ;;  %v19761_v18 = vadd.f32 %v19760_v49, %v19759_v8 }
 0x8f4   :  { %v19762_v52 = vpop.f32.mrf.mxu0  ;;  %v19783_v27 = vadd.f32 %v19782_v24, %v19781_v39 }
 0x8f5   :  { %v19784_v51 = vpop.f32.mrf.mxu1  ;;  %v16281_v15 = vadd.f32 %v19761_v18, %v16241_v13 }
 0x8f6   :  { %v19763_v7 = vpop.f32.mrf.mxu0 }
 0x8f7   :  { %v19785_v11 = vpop.f32.mrf.mxu1  ;;  %v16321_v14 = vadd.f32 %v19783_v27, %v16281_v15 }
 0x910   :  { %v16360_v19 = vpop.f32.mrf.mxu0 }
 0x911   :  { %v19812_v60 = vpop.f32.mrf.mxu1  ;;  %v16361_v50 = vadd.f32 %v16360_v19, %v16321_v14 }
 0x912   :  { %v19920_v56 = vpop.f32.mrf.mxu0 }
 0x913   :  { %v19813_v1 = vpop.f32.mrf.mxu1  ;;  %v16374_v26 = vmax.f32 %v16361_v50, 0.0 }
 0x914   :  { %v19814_v22 = vadd.f32 %v19813_v1, %v19812_v60  ;;  %v16363_v32 = vpop.f32.mrf.mxu0 }
 0x915   :  { %v19815_v47 = vpop.f32.mrf.mxu1  ;;  %v16383_v31 = vpack.c.bf16 %v16374_v26, %v16374_v26 }
 0x916   :  { %v19921_v28 = vpop.f32.mrf.mxu0  ;;  %v17002_v3 = vadd.f32 %v19814_v22, %v19397_v35 }
 0x917   :  { %v19816_v45 = vpop.f32.mrf.mxu1  ;;  %19939 = vmatmul.mubr.bf16.vlgmr.msra.gmra.mxu1 %v16383_v31 }
 0x930   :  { %v19834_v58 = vpop.f32.mrf.mxu0 }
 0x931   :  { %v19856_v55 = vpop.f32.mrf.mxu1 }
 0x932   :  { %v19835_v10 = vpop.f32.mrf.mxu0 }
 0x933   :  { %v19836_v0 = vadd.f32 %v19835_v10, %v19834_v58  ;;  %v19857_v54 = vpop.f32.mrf.mxu1 }
 0x934   :  { %v19858_v59 = vadd.f32 %v19857_v54, %v19856_v55  ;;  %v19837_v21 = vpop.f32.mrf.mxu0 }
 0x935   :  { %v17042_v17 = vadd.f32 %v19836_v0, %v17002_v3  ;;  %v19859_v29 = vpop.f32.mrf.mxu1 }
 0x936   :  { %v19838_v41 = vpop.f32.mrf.mxu0 }
 0x937   :  { %v17082_v43 = vadd.f32 %v19858_v59, %v17042_v17  ;;  %v19860_v23 = vpop.f32.mrf.mxu1 }
 0x950   :  { %v19878_v63 = vpop.f32.mrf.mxu0 }
 0x952   :  { %v19879_v20 = vpop.f32.mrf.mxu0 }
 0x953   :  { %v19880_v36 = vadd.f32 %v19879_v20, %v19878_v63 }
 0x954   :  { %v19881_v5 = vpop.f32.mrf.mxu0 }
 0x955   :  { %v17122_v61 = vadd.f32 %v19880_v36, %v17082_v43 }
 0x956   :  { %v19882_v57 = vpop.f32.mrf.mxu0 }
 0x9d7   :  { %v17161_v6 = vpop.f32.mrf.mxu1 }
 0x9d8   :  { %v17162_v2 = vadd.f32 %v17161_v6, %v17122_v61 }
 0x9d9   :  { %v19940_v62 = vpop.f32.mrf.mxu1 }
 0x9da   :  { %v17167_v16 = vmax.f32 %v17162_v2, 0.0 }
 0x9db   :  { %v17164_v34 = vpop.f32.mrf.mxu1 }
 0x9dc   :  { %v17168_v30 = vpack.c.bf16 %v17167_v16, %v17167_v16 }
 0x9dd   :  { %v19941_v44 = vpop.f32.mrf.mxu1 }
 0x9de   :  { %19959 = vmatmul.mubr.bf16.vlgmr.msra.gmra.mxu0 %v17168_v30 }
 0xa9e   :  { %v17274_v48 = vpop.f32.mrf.mxu0 }
 0xa9f   :  { %v17275_v53 = vadd.f32 %v19470_v38, %v17274_v48 }
 0xaa0   :  { %v19960_v12 = vpop.f32.mrf.mxu0 }
 0xaa1   :  { %v17281_v40 = vsel %vm17280_vm1, %v17275_v53, -inf }
 0xaa2   :  { %17282 = vmax.xlane.f32.xlu0 %v17281_v40  ;;  %v17277_v46 = vpop.f32.mrf.mxu0 }
 0xaa4   :  { %v19961_v42 = vpop.f32.mrf.mxu0 }
 0xb2b   :  { %v17283_v8 = vpop.xlane.xlu0 %17282 }
 0xb2c   :  { %v17284_v39 = vsub.f32 %v17275_v53, %v17283_v8 }
 0xb2e   :  { %v17285_v49 = vmul.f32 1.442695, %v17284_v39 }
 0xb30   :  { %23070 = vpow2.f32 %v17285_v49 }
 0xb3d   :  { %v23071_v24 = vpop.eup %23070 }
 0xb3e   :  { %v17287_v52 = vsel %vm17280_vm1, %v23071_v24, 0.0 }
 0xb3f   :  { %17288 = vadd.xlane.f32.xlu0 %v17287_v52 }
 0xbc8   :  { %v17289_v51 = vpop.xlane.xlu0 %17288 }
 0xbc9   :  { %23072 = vrcp.f32 %v17289_v51 }
 0xbd6   :  { %v23073_v7 = vpop.eup %23072 }
 0xbd7   :  { %v17291_v11 = vmul.f32 %v23073_v7, %v23071_v24 }
 0xbd9   :  { %17292 = vst.msk [vmem:[#allocation5] sm:$0x3] %vm17280_vm1, %v17291_v11 }
 0xbda   :  { %23108 = shalt.err (!%p23105_p9)
}
 0xbdb   :  { %17302 = dma.vmem_to_hbm [thread:$0]  %s17300_s6, 32, %s24074_s7, [#allocation4]  }
 0xbdc   :  { %23119 = dma.done.wait [#allocation4], 32  }
 0xbdd   :  { %23120 = vsyncadd [#allocation4], 4294967264 }
 0xbde   :  { %17306 = vsyncpa [#allocation3], 1 }
 0xbdf   :  { %17307 = vsyncpa [#allocation4], 1 }

</bundles_post_ra>
